<compile_context>
chip_gen: v6e
topology: v6e:2x2x1
jax: 0.10.0
libtpu: 0.0.40
codegen_flags: <defaults>
</compile_context>

<pallas_src>
import jax
import jax.numpy as jnp
from jax.experimental import pallas as pl
from jax.experimental.pallas import tpu as pltpu


HIDDEN = 64
TB_MAX = 4096       # max batch tile on the lane axis
LANE_ALIGN = 256    # keep TB a multiple of 256 (covers v5e/v6e/v7x tiling)

_TWO_PI = 6.283185307179586
_INV_TWO_PI = 0.15915494309189535
_PI = 3.141592653589793


def _fast_sin(u):
    """sin(u): mod-2pi range reduction + odd Taylor-9 polynomial on [0, pi/2].

    ~13 VPU ops/element vs the much larger XLA sin expansion; max abs error
    ~4e-6 for the |u| <~ 10 pre-activations this net produces (and still
    ~1e-4-accurate out to |u| of a few hundred in f32).
    """
    k = jnp.floor(u * _INV_TWO_PI + 0.5)       # nearest integer (floor is native)
    r = u - k * _TWO_PI                        # r in [-pi, pi]
    a = jnp.abs(r)
    t = jnp.minimum(a, _PI - a)                # fold: sin(a) == sin(pi - a); t in [0, pi/2]
    t2 = t * t
    p = t * (1.0 + t2 * (-1.6666667e-01 + t2 * (8.3333333e-03
            + t2 * (-1.9841270e-04 + t2 * 2.7557319e-06))))
    return jnp.where(r < 0.0, -p, p)


def cyclic_mlp_kernel(x_ref, p_ref, w2_ref, w3_ref, b3_ref, o_ref):
    # x_ref: (1, 1, TB) -- TB batch samples on the lane axis (lane-dense I/O).
    x = x_ref[0]                                   # (1, TB)

    w1 = p_ref[:, 0:1]                             # (64, 1)
    b1 = p_ref[:, 1:2]                             # (64, 1)
    b2 = p_ref[:, 2:3]                             # (64, 1)

    # Layer 1: Linear(1, 64) + sin.  K=1 layer as a VPU broadcast mul-add.
    h1 = _fast_sin(w1 * x + b1)                    # (64, TB)

    # Dropout(0.1) is identity in eval mode.

    # Layer 2: Linear(64, 64) + sin.  The real MXU matmul; explicit bf16
    # operands (single-pass MXU), f32 accumulation.
    h2 = jnp.dot(w2_ref[...].astype(jnp.bfloat16), h1.astype(jnp.bfloat16),
                 preferred_element_type=jnp.float32) + b2
    h2 = _fast_sin(h2)                             # (64, TB)

    # Dropout(0.1) is identity in eval mode.

    # Layer 3: Linear(64, 1) as a (1,64)@(64,TB) matmul on the (idle) MXU,
    # freeing VALU/XLU issue slots.
    out = jnp.dot(w3_ref[...], h2, preferred_element_type=jnp.float32) + b3_ref[0]
    o_ref[0] = out                                 # (1, TB)


def _round_up(n, m):
    return (n + m - 1) // m * m


def _choose_tb(n):
    """Largest lane tile <= TB_MAX keeping >= 2 grid steps (v7x has 2 TCs
    sharing the 'parallel' axis); multiple of 256."""
    steps = max(2, pl.cdiv(n, TB_MAX))
    return max(LANE_ALIGN, min(TB_MAX, _round_up(pl.cdiv(n, steps), LANE_ALIGN)))


def cyclic_nn_forward(x, params):
    """x: (N, 1) float32. Returns (N, 1) float32."""
    packed, w2, w3, b3 = params
    N = x.shape[0]
    tb = _choose_tb(N)
    G = pl.cdiv(N, tb)
    Npad = G * tb

    xf = x.reshape(N)
    if Npad != N:
        xf = jnp.pad(xf, (0, Npad - N))
    # Lane-dense presentation: (grid, 1, TB); batch lives on the lane axis.
    x3 = xf.reshape(G, 1, tb)

    full = lambda i: (0, 0)  # params: same (only) block every step -> DMA'd once

    weight_bytes = 4 * (HIDDEN * 3 + HIDDEN * HIDDEN + HIDDEN + 1)
    cost = pl.CostEstimate(
        flops=int(Npad) * (2 * HIDDEN * HIDDEN + 6 * HIDDEN + 2),
        transcendentals=int(Npad) * 2 * HIDDEN,
        bytes_accessed=8 * int(Npad) + weight_bytes,   # weights fetched once, not per step
    )

    out = pl.pallas_call(
        cyclic_mlp_kernel,
        out_shape=jax.ShapeDtypeStruct((G, 1, tb), jnp.float32),
        grid_spec=pltpu.PrefetchScalarGridSpec(
            num_scalar_prefetch=0,
            grid=(G,),
            in_specs=[
                pl.BlockSpec((1, 1, tb), lambda i: (i, 0, 0)),        # x tile
                pl.BlockSpec((HIDDEN, 3), full),                      # [w1 | b1 | b2]
                pl.BlockSpec((HIDDEN, HIDDEN), full),                 # W2 (64,64)
                pl.BlockSpec((1, HIDDEN), full),                      # W3 row (1,64)
                pl.BlockSpec(memory_space=pltpu.MemorySpace.SMEM),    # b3 scalar
            ],
            out_specs=pl.BlockSpec((1, 1, tb), lambda i: (i, 0, 0)),
        ),
        compiler_params=pltpu.CompilerParams(
            dimension_semantics=("parallel",),
            vmem_limit_bytes=32 * 1024 * 1024,
        ),
        cost_estimate=cost,
    )(x3, packed, w2, w3, b3)

    return out.reshape(Npad, 1)[:N]


def init_params(key):
    """Deterministic init mimicking PyTorch nn.Linear default:
    U(-1/sqrt(fan_in), 1/sqrt(fan_in)) for weight and bias.
    Kernel-side layout: packed [w1|b1|b2] as (64,3), W2 as (64,64) [out,in],
    W3 as a (1,64) row, b3 as a scalar for SMEM."""
    ks = jax.random.split(key, 6)

    def lin(kw, kb, fan_in, fan_out):
        bound = 1.0 / jnp.sqrt(jnp.float32(fan_in))
        w = jax.random.uniform(kw, (fan_out, fan_in), jnp.float32, -bound, bound)
        b = jax.random.uniform(kb, (fan_out, 1), jnp.float32, -bound, bound)
        return w, b

    w1, b1 = lin(ks[0], ks[1], 1, HIDDEN)        # (64,1), (64,1)
    w2, b2 = lin(ks[2], ks[3], HIDDEN, HIDDEN)   # (64,64), (64,1)
    w3, b3c = lin(ks[4], ks[5], HIDDEN, 1)       # (1,64), (1,1)

    packed = jnp.concatenate([w1, b1, b2], axis=1)   # (64, 3)
    b3 = b3c.reshape(1)                               # scalar bias -> SMEM
    return (packed, w2, w3, b3)


def reference_forward(x, params):
    """Pure-JAX reference (row-major batch layout, jnp.sin)."""
    packed, w2, w3, b3 = params
    w1 = packed[:, 0:1]     # (64,1)
    b1 = packed[:, 1:2]     # (64,1)
    b2 = packed[:, 2:3]     # (64,1)
    h1 = jnp.sin(x @ w1.T + b1.T)     # (N, 64)
    h2 = jnp.sin(h1 @ w2.T + b2.T)    # (N, 64)
    return h2 @ w3.T + b3             # (N, 1)


if __name__ == "__main__":
    key = jax.random.PRNGKey(0)
    kp, kx = jax.random.split(key)
    params = init_params(kp)

    # Small demo batch; non-multiple of the tile so the padding path and the
    # >=2-step grid (megacore sharding) are both exercised.
    N = 3000
    x = jax.random.normal(kx, (N, 1), jnp.float32)

    out = jax.block_until_ready(cyclic_nn_forward(x, params))
    ref = reference_forward(x, params)

    assert out.shape == (N, 1)
    # Tolerance covers bf16 MXU operands + the fast-sin polynomial (~4e-6).
    assert jnp.allclose(out, ref, atol=2e-2, rtol=2e-2), "mismatch vs pure-JAX reference"

    print("KERNEL_OK")
</pallas_src>

<mosaic_0001>
module attributes {stable_mosaic.version = 11 : i64} {
  func.func @cyclic_mlp_kernel(%arg0: i32, %arg1: memref<1x1x1536xf32, #tpu.memory_space<vmem>>, %arg2: memref<64x3xf32, #tpu.memory_space<vmem>>, %arg3: memref<64x64xf32, #tpu.memory_space<vmem>>, %arg4: memref<1x64xf32, #tpu.memory_space<vmem>>, %arg5: memref<1xf32, #tpu.memory_space<smem>>, %arg6: memref<1x1x1536xf32, #tpu.memory_space<vmem>>) attributes {dimension_semantics = [#tpu.dimension_semantics<parallel>], iteration_bounds = array<i64: 2>, scalar_prefetch = 0 : i64, scratch_operands = 0 : i64, tpu.core_type = #tpu.core_type<tc>, window_params = [{transform_indices = @transform_0, window_bounds = array<i64: 1, 1, 1536>}, {pipeline_mode = #tpu.pipeline_mode<synchronous>, transform_indices = @transform_1, window_bounds = array<i64: 64, 3>}, {pipeline_mode = #tpu.pipeline_mode<synchronous>, transform_indices = @transform_2, window_bounds = array<i64: 64, 64>}, {pipeline_mode = #tpu.pipeline_mode<synchronous>, transform_indices = @transform_3, window_bounds = array<i64: 1, 64>}, {transform_indices = @transform_4, window_bounds = array<i64: 1>}, {transform_indices = @transform_5, window_bounds = array<i64: 1, 1, 1536>}]} {
    %c0 = arith.constant 0 : index
    %c0_0 = arith.constant 0 : index
    %c0_1 = arith.constant 0 : index
    %0 = vector.load %arg1[%c0, %c0_0, %c0_1] : memref<1x1x1536xf32, #tpu.memory_space<vmem>>, vector<1x1x1536xf32>
    %1 = vector.shape_cast %0 : vector<1x1x1536xf32> to vector<1x1536xf32>
    %c0_2 = arith.constant 0 : index
    %c0_3 = arith.constant 0 : index
    %2 = vector.load %arg2[%c0_2, %c0_3] : memref<64x3xf32, #tpu.memory_space<vmem>>, vector<64x1xf32>
    %c0_4 = arith.constant 0 : index
    %c1 = arith.constant 1 : index
    %3 = vector.load %arg2[%c0_4, %c1] : memref<64x3xf32, #tpu.memory_space<vmem>>, vector<64x1xf32>
    %c0_5 = arith.constant 0 : index
    %c2 = arith.constant 2 : index
    %4 = vector.load %arg2[%c0_5, %c2] : memref<64x3xf32, #tpu.memory_space<vmem>>, vector<64x1xf32>
    %5 = vector.broadcast %2 : vector<64x1xf32> to vector<64x1536xf32>
    %6 = vector.broadcast %1 : vector<1x1536xf32> to vector<64x1536xf32>
    %7 = arith.mulf %5, %6 : vector<64x1536xf32>
    %8 = vector.broadcast %3 : vector<64x1xf32> to vector<64x1536xf32>
    %9 = arith.addf %7, %8 : vector<64x1536xf32>
    %cst = arith.constant 0.159154937 : f32
    %10 = vector.broadcast %cst : f32 to vector<64x1536xf32>
    %11 = arith.mulf %9, %10 : vector<64x1536xf32>
    %cst_6 = arith.constant 5.000000e-01 : f32
    %12 = vector.broadcast %cst_6 : f32 to vector<64x1536xf32>
    %13 = arith.addf %11, %12 : vector<64x1536xf32>
    %14 = math.floor %13 : vector<64x1536xf32>
    %cst_7 = arith.constant 6.28318548 : f32
    %15 = vector.broadcast %cst_7 : f32 to vector<64x1536xf32>
    %16 = arith.mulf %14, %15 : vector<64x1536xf32>
    %17 = arith.subf %9, %16 : vector<64x1536xf32>
    %18 = math.absf %17 : vector<64x1536xf32>
    %cst_8 = arith.constant 3.14159274 : f32
    %19 = vector.broadcast %cst_8 : f32 to vector<64x1536xf32>
    %20 = arith.subf %19, %18 : vector<64x1536xf32>
    %21 = arith.minimumf %18, %20 : vector<64x1536xf32>
    %22 = arith.mulf %21, %21 : vector<64x1536xf32>
    %cst_9 = arith.constant 2.75573188E-6 : f32
    %23 = vector.broadcast %cst_9 : f32 to vector<64x1536xf32>
    %24 = arith.mulf %22, %23 : vector<64x1536xf32>
    %cst_10 = arith.constant -1.98412701E-4 : f32
    %25 = vector.broadcast %cst_10 : f32 to vector<64x1536xf32>
    %26 = arith.addf %25, %24 : vector<64x1536xf32>
    %27 = arith.mulf %22, %26 : vector<64x1536xf32>
    %cst_11 = arith.constant 0.00833333284 : f32
    %28 = vector.broadcast %cst_11 : f32 to vector<64x1536xf32>
    %29 = arith.addf %28, %27 : vector<64x1536xf32>
    %30 = arith.mulf %22, %29 : vector<64x1536xf32>
    %cst_12 = arith.constant -0.166666672 : f32
    %31 = vector.broadcast %cst_12 : f32 to vector<64x1536xf32>
    %32 = arith.addf %31, %30 : vector<64x1536xf32>
    %33 = arith.mulf %22, %32 : vector<64x1536xf32>
    %cst_13 = arith.constant 1.000000e+00 : f32
    %34 = vector.broadcast %cst_13 : f32 to vector<64x1536xf32>
    %35 = arith.addf %34, %33 : vector<64x1536xf32>
    %36 = arith.mulf %21, %35 : vector<64x1536xf32>
    %cst_14 = arith.constant 0.000000e+00 : f32
    %37 = vector.broadcast %cst_14 : f32 to vector<64x1536xf32>
    %38 = arith.cmpf olt, %17, %37 : vector<64x1536xf32>
    %cst_15 = arith.constant 0.000000e+00 : f32
    %39 = vector.broadcast %cst_15 : f32 to vector<64x1536xf32>
    %40 = arith.subf %39, %36 : vector<64x1536xf32>
    %41 = arith.select %38, %40, %36 : vector<64x1536xi1>, vector<64x1536xf32>
    %c0_16 = arith.constant 0 : index
    %c0_17 = arith.constant 0 : index
    %42 = vector.load %arg3[%c0_16, %c0_17] : memref<64x64xf32, #tpu.memory_space<vmem>>, vector<64x64xf32>
    %43 = arith.truncf %42 : vector<64x64xf32> to vector<64x64xbf16>
    %44 = arith.truncf %41 : vector<64x1536xf32> to vector<64x1536xbf16>
    %cst_18 = arith.constant dense<0.000000e+00> : vector<64x1536xf32>
    %45 = tpu.matmul %43, %44, %cst_18 {dimension_numbers = #tpu.dot_dimension_numbers<[1], [0], [0], [1], [0, 0, 1, 1], [], []>} : vector<64x64xbf16>, vector<64x1536xbf16>, vector<64x1536xf32> -> vector<64x1536xf32>
    %46 = vector.broadcast %4 : vector<64x1xf32> to vector<64x1536xf32>
    %47 = arith.addf %45, %46 : vector<64x1536xf32>
    %cst_19 = arith.constant 0.159154937 : f32
    %48 = vector.broadcast %cst_19 : f32 to vector<64x1536xf32>
    %49 = arith.mulf %47, %48 : vector<64x1536xf32>
    %cst_20 = arith.constant 5.000000e-01 : f32
    %50 = vector.broadcast %cst_20 : f32 to vector<64x1536xf32>
    %51 = arith.addf %49, %50 : vector<64x1536xf32>
    %52 = math.floor %51 : vector<64x1536xf32>
    %cst_21 = arith.constant 6.28318548 : f32
    %53 = vector.broadcast %cst_21 : f32 to vector<64x1536xf32>
    %54 = arith.mulf %52, %53 : vector<64x1536xf32>
    %55 = arith.subf %47, %54 : vector<64x1536xf32>
    %56 = math.absf %55 : vector<64x1536xf32>
    %cst_22 = arith.constant 3.14159274 : f32
    %57 = vector.broadcast %cst_22 : f32 to vector<64x1536xf32>
    %58 = arith.subf %57, %56 : vector<64x1536xf32>
    %59 = arith.minimumf %56, %58 : vector<64x1536xf32>
    %60 = arith.mulf %59, %59 : vector<64x1536xf32>
    %cst_23 = arith.constant 2.75573188E-6 : f32
    %61 = vector.broadcast %cst_23 : f32 to vector<64x1536xf32>
    %62 = arith.mulf %60, %61 : vector<64x1536xf32>
    %cst_24 = arith.constant -1.98412701E-4 : f32
    %63 = vector.broadcast %cst_24 : f32 to vector<64x1536xf32>
    %64 = arith.addf %63, %62 : vector<64x1536xf32>
    %65 = arith.mulf %60, %64 : vector<64x1536xf32>
    %cst_25 = arith.constant 0.00833333284 : f32
    %66 = vector.broadcast %cst_25 : f32 to vector<64x1536xf32>
    %67 = arith.addf %66, %65 : vector<64x1536xf32>
    %68 = arith.mulf %60, %67 : vector<64x1536xf32>
    %cst_26 = arith.constant -0.166666672 : f32
    %69 = vector.broadcast %cst_26 : f32 to vector<64x1536xf32>
    %70 = arith.addf %69, %68 : vector<64x1536xf32>
    %71 = arith.mulf %60, %70 : vector<64x1536xf32>
    %cst_27 = arith.constant 1.000000e+00 : f32
    %72 = vector.broadcast %cst_27 : f32 to vector<64x1536xf32>
    %73 = arith.addf %72, %71 : vector<64x1536xf32>
    %74 = arith.mulf %59, %73 : vector<64x1536xf32>
    %cst_28 = arith.constant 0.000000e+00 : f32
    %75 = vector.broadcast %cst_28 : f32 to vector<64x1536xf32>
    %76 = arith.cmpf olt, %55, %75 : vector<64x1536xf32>
    %cst_29 = arith.constant 0.000000e+00 : f32
    %77 = vector.broadcast %cst_29 : f32 to vector<64x1536xf32>
    %78 = arith.subf %77, %74 : vector<64x1536xf32>
    %79 = arith.select %76, %78, %74 : vector<64x1536xi1>, vector<64x1536xf32>
    %c0_30 = arith.constant 0 : index
    %c0_31 = arith.constant 0 : index
    %80 = vector.load %arg4[%c0_30, %c0_31] : memref<1x64xf32, #tpu.memory_space<vmem>>, vector<1x64xf32>
    %cst_32 = arith.constant dense<0.000000e+00> : vector<1x1536xf32>
    %81 = tpu.matmul %80, %79, %cst_32 {dimension_numbers = #tpu.dot_dimension_numbers<[1], [0], [0], [1], [0, 0, 1, 1], [], []>} : vector<1x64xf32>, vector<64x1536xf32>, vector<1x1536xf32> -> vector<1x1536xf32>
    %c0_33 = arith.constant 0 : index
    %82 = memref.load %arg5[%c0_33] : memref<1xf32, #tpu.memory_space<smem>>
    %83 = vector.broadcast %82 : f32 to vector<1x1536xf32>
    %84 = arith.addf %81, %83 : vector<1x1536xf32>
    %c0_34 = arith.constant 0 : index
    %c0_35 = arith.constant 0 : index
    %c0_36 = arith.constant 0 : index
    %85 = vector.load %arg6[%c0_34, %c0_35, %c0_36] : memref<1x1x1536xf32, #tpu.memory_space<vmem>>, vector<1x1x1536xf32>
    %86 = vector.shape_cast %85 : vector<1x1x1536xf32> to vector<1x1536xf32>
    %87 = vector.shape_cast %84 : vector<1x1536xf32> to vector<1x1x1536xf32>
    tpu.vector_store %arg6[%c0_34, %c0_35, %c0_36], %87 {strides = array<i32>} : memref<1x1x1536xf32, #tpu.memory_space<vmem>>, vector<1x1x1536xf32>,
    return
  }
  func.func @transform_0(%arg0: i32) -> (i32, i32, i32) {
    %c0_i32 = arith.constant 0 : i32
    %c0_i32_0 = arith.constant 0 : i32
    %c0_i32_1 = arith.constant 0 : i32
    return %arg0, %c0_i32, %c0_i32_0 : i32, i32, i32
  }
  func.func @transform_1(%arg0: i32) -> (i32, i32) {
    %c0_i32 = arith.constant 0 : i32
    %c0_i32_0 = arith.constant 0 : i32
    %c0_i32_1 = arith.constant 0 : i32
    return %c0_i32, %c0_i32_0 : i32, i32
  }
  func.func @transform_2(%arg0: i32) -> (i32, i32) {
    %c0_i32 = arith.constant 0 : i32
    %c0_i32_0 = arith.constant 0 : i32
    %c0_i32_1 = arith.constant 0 : i32
    return %c0_i32, %c0_i32_0 : i32, i32
  }
  func.func @transform_3(%arg0: i32) -> (i32, i32) {
    %c0_i32 = arith.constant 0 : i32
    %c0_i32_0 = arith.constant 0 : i32
    %c0_i32_1 = arith.constant 0 : i32
    return %c0_i32, %c0_i32_0 : i32, i32
  }
  func.func @transform_4(%arg0: i32) -> i32 {
    %c0_i32 = arith.constant 0 : i32
    %c0_i32_0 = arith.constant 0 : i32
    return %c0_i32 : i32
  }
  func.func @transform_5(%arg0: i32) -> (i32, i32, i32) {
    %c0_i32 = arith.constant 0 : i32
    %c0_i32_0 = arith.constant 0 : i32
    %c0_i32_1 = arith.constant 0 : i32
    return %arg0, %c0_i32, %c0_i32_0 : i32, i32, i32
  }
}

</mosaic_0001>

<bundles_post_ra>
// kernel: tpu_custom_call.1
= control target key start
LH: loop header
LB: loop body
LE: loop exit
PB: predicated region body
PF: predicated region fallthrough
CT: control target
= control target key end

     0   :  { %s9964_s0 = inlined_call_operand.hbm [shape: f32[2,1,1536], index: 0, kind: input, shape index: {}]   ;;  %s9965_s1 = inlined_call_operand.vmem [shape: f32[64,3], index: 1, kind: input, shape index: {}]   ;;  %s9966_s2 = inlined_call_operand.vmem [shape: f32[64,64], index: 2, kind: input, shape index: {}]   ;;  %s9967_s3 = inlined_call_operand.vmem [shape: f32[1,64], index: 3, kind: input, shape index: {}]   ;;  %s9968_s4 = inlined_call_operand.<no memory space> [shape: f32[1], index: 4, kind: input, shape index: {}]   ;;  %s9969_s5 = inlined_call_operand.hbm [shape: f32[2,1,1536], index: 5, kind: output, shape index: {}]  }
   0x1   :  { %10 = sst [smem:[#allocation2]] %s9968_s4 }
   0x2   :  { %11 = vsyncpa [#allocation4], 0 }
   0x3   :  { %13 = vsyncpa [#allocation4 + $0x1], 0 }
   0x4   :  { %14 = vsyncpa [#allocation5], 0 }
   0x5   :  { %16 = vsyncpa [#allocation5 + $0x1], 0  ;;  %s6014_s20 = smov 0   ;;  %s6016_s21 = smov 0  }
   0x6   :  { %s6018_s22 = smov 0   ;;  %s6020_s23 = smov 0  }
   0x7 LB: > { %s6035_s4 = sadd.s32 4294967295, %s5972_s23   ;;  %s5764_s24 = sadd.s32 4294967294, %s5972_s23   ;;  %s5972_s23 = sphi %s6020_s23, %s10961_s23   ;;  %s5968_s22 = sphi %s6018_s22, %s10960_s22   ;;  %s5964_s21 = sphi %s6016_s21, %s10959_s21   ;;  %s5960_s20 = sphi %s6014_s20, %s10958_s20  }
   0x8   : > { %s6039_s25 = sadd.s32 1, %s5972_s23   ;;  %s29_s26 = sadd.s32 1, %s5968_s22 }
   0x9   : > { %s26_s27 = ssub.s32 %s5972_s23, %s6039_s25  ;;  %p36_p0 = scmp.ne.s32.totalorder %s5968_s22, %s5964_s21 }
   0xa   : > { %p27_p1 = scmp.eq.s32.totalorder %s26_s27, 0  ;;  %p37_p2 = scmp.eq.s32.totalorder %s5972_s23, 0 }
   0xb   : > { %p42_p3 = scmp.ne.s32.totalorder %s5964_s21, %s5960_s20  ;;  %p43_p4 = scmp.eq.s32.totalorder %s6035_s4, 0 }
   0xc   : > { %s6051_s28 = scalar_select %p27_p1, %s5968_s22, %s29_s26  }
   0xd   : > { %p38_p5 = por %p37_p2, %p36_p0  ;;  %p6053_p6 = por %p43_p4, %p42_p3 }
   0xe   : > { %p150_p7 = scmp.eq.s32.totalorder %s6035_s4, 1  ;;  %p156_p8 = scmp.eq.s32.totalorder %s5764_s24, 1 }
   0xf   : > { %s10338_s29 = scalar_select %p6053_p6, 1, 0 }
  0x10   : > { %p5818_p10 = scmp.lt.s32.totalorder %s5972_s23, 2  ;;  %p6060_p11 = por %p150_p7, %p36_p0 }
  0x11   : > { %p6064_p12 = por %p156_p8, %p42_p3  ;;  %s188_s7 = sand.u32 1, %s5968_s22  }
  0x12   : > { %s10339_s30 = scalar_select %p6060_p11, 1, 0 }
  0x13   : > { %s10340_s6 = scalar_select %p6064_p12, 1, 0 }
  0x14   : > { %s5803_s8 = smul.u32 192, %s5972_s23  ;;  %p6075_p13 = pnand %p5818_p10, %p38_p5 }
  0x15   : > { %s5802_s9 = smul.u32 12, %s188_s7  ;;  %s189_s16 = scalar_lea.sflag [#allocation4], %s188_s7 }
  0x16   : > { %s6073_s12 = scalar_lea.hbm %s9964_s0, %s5803_s8  ;;  %p5882_p3 = pneg %p6075_p13 }
  0x17   : > { %s192_s14 = scalar_lea.vmem [#allocation3], %s5802_s9  ;;  %s5880_s17 = scalar_lea.hbm %s6073_s12, 192 }
  0x18   : > { %s200_s15 = sshll.u32 %s192_s14, 4  ;;  %p5881_p2 = scmp.ne.s32.totalorder %s6073_s12, %s5880_s17  ;;  %s201_s15 = int_to_ptr.vmem [resolvable:$true] %s200_s15 }
  0x19   : > { %s5885_s24 = scalar_lea.hbm %s9964_s0, 384  ;;  %p5886_p5 = scmp.lt.s32.totalorder %s6073_s12, %s9964_s0 }
  0x1a   : > { %p5883_p4 = pnand %p5882_p3, %p5881_p2  ;;  %p5887_p8 = scmp.lt.s32.totalorder %s5885_s24, %s5880_s17 }
  0x1c   : > { %p5884_p7 = pneg %p5883_p4  ;;  %p5888_p10 = por %p5887_p8, %p5886_p5 }
  0x1e   : > { %p5889_p9 = pnand %p5888_p10, %p5884_p7 }
  0x20   : > { %5892 = shalt.err (!%p5889_p9)
}
  0x21   : > { %s5893_s8 = scalar_lea.vmem %s201_s15, 192  ;;  %s5974_s7 = smov [#allocation3]  }
  0x22   : > { %p5894_p0 = scmp.ne.s32.totalorder %s201_s15, %s5893_s8  ;;  %s5898_s9 = sshll.u32 %s5974_s7, 4  ;;  %s5899_s9 = int_to_ptr.vmem [resolvable:$false] %s5898_s9 }
  0x23   : > { %s5900_s10 = scalar_lea.vmem %s5899_s9, 384  ;;  %p5901_p2 = scmp.lt.s32.totalorder %s201_s15, %s5899_s9 }
  0x24   : > { %p5896_p1 = pnand %p5894_p0, %p5882_p3  ;;  %p5902_p4 = scmp.lt.s32.totalorder %s5900_s10, %s5893_s8 }
  0x26   : > { %p5897_p12 = pneg %p5896_p1  ;;  %p5903_p11 = por %p5902_p4, %p5901_p2 }
  0x28   : > { %p5904_p6 = pnand %p5903_p11, %p5897_p12 }
  0x2a   : > { %5907 = shalt.err (!%p5904_p6)
}
  0x2b   : > { %5813 = dma.hbm_to_vmem [thread:$0]  (!%p6075_p13), %s6073_s12, 192, %s201_s15, %s189_s16  }
  0x2c   : > { %p10342_p9 = scmp.lt.s32.totalorder %s5972_s23, 3  ;;  %p10343_p7 = scmp.ge.s32.totalorder %s5972_s23, 1 }
  0x2e   : > { %p206_p5 = pnand %p10343_p7, %p10342_p9 }
  0x30   : > { %209 = sbr.rel (%p206_p5) target bundleno = 1636 (0x664), region = 40 }
  0x35   : > { %s6100_s11 = sand.u32 1, %s5964_s21   ;;  %p10344_p6 = scmp.ne.s32.totalorder %s10338_s29, 0 }
  0x36   : > { %s5804_s14 = smul.u32 12, %s6100_s11  ;;  %s212_s17 = scalar_lea.sflag [#allocation4], %s6100_s11 }
  0x38   : > { %s6106_s18 = scalar_lea.vmem [#allocation3], %s5804_s14 }
  0x39   : > { %5951 = dma.done.wait (%p10344_p6), %s212_s17, 192  }
  0x3a   : > { %5953 = vsyncadd (%p10344_p6), %s212_s17, 4294967104  ;;  %v5975_v0 = vmov 1   ;;  %v9977_v1 = vmov 0   ;;  %v251_v2 = vld [vmem:[%s9965_s1 + $0x30] sm:$0xff]  ;;  %v252_v3 = vld [vmem:[%s9965_s1 + $0x38] sm:$0xff]  ;;  %v9972_v10 = vlaneseq  ;;  %s5155_s26 = sld [smem:[#allocation2]] }
  0x3b   : > { %5858 = vset.pattern.permute.xlu1 %v5975_v0  ;;  %5857 = vset.pattern.permute.xlu0 %v9977_v1  ;;  %v249_v4 = vld [vmem:[%s9965_s1 + $0x20] sm:$0xff]  ;;  %v250_v5 = vld [vmem:[%s9965_s1 + $0x28] sm:$0xff]  ;;  %v248_v6 = vld [vmem:[%s9965_s1 + $0x18] sm:$0xff]  ;;  %s241_s27 = scalar_lea.vmem [#allocation6], %s5804_s14  ;;  %s5805_s8 = smul.u32 192, %s6035_s4 }
  0x3c   : > { %2732 = vmatprep.mubr.bf16.mxu0 %v9977_v1  ;;  %2805 = vmatprep.mubr.bf16.mxu1 %v9977_v1  ;;  %v247_v7 = vld [vmem:[%s9965_s1 + $0x10] sm:$0xff]  ;;  %v245_v8 = vld [vmem:[%s9965_s1] sm:$0xff]  ;;  %v246_v9 = vld [vmem:[%s9965_s1 + $0x8] sm:$0xff]  ;;  %v6144_v11 = vshrl.u32 %v9972_v10, 7  ;;  %s5694_s7 = sshll.u32 %s241_s27, 4  ;;  %s5680_s17 = scalar_lea.sflag [#allocation5], %s6100_s11  ;;  %s5695_s7 = int_to_ptr.vmem [resolvable:$true] %s5694_s7 }
  0x3d   : > { %476 = vperm.xlu1 %5858, %v251_v2   ;;  %285 = vperm.xlu0 %5857, %v251_v2   ;;  %v243_v16 = vld [vmem:[%s6106_s18] sm:$0xff]  ;;  %s5692_s10 = scalar_lea.hbm %s9969_s5, %s5805_s8  ;;  %s5908_s12 = scalar_lea.vmem %s5695_s7, 192 }
  0x3e   : > { %10345 = vst [vmem:[#allocation9_spill] sm:$0xff] %v6144_v11  ;;  %v9974_v12 = vsub.s32 1, %v6144_v11  ;;  %v9973_v13 = vsub.s32 3, %v6144_v11  ;;  %v9976_v14 = vsub.s32 0, %v6144_v11  ;;  %v9975_v15 = vsub.s32 2, %v6144_v11  ;;  %p5909_p11 = scmp.ne.s32.totalorder %s5695_s7, %s5908_s12  ;;  %p10955_p12 = scmp.ne.s32.totalorder %s10339_s30, 0 }
  0x3f   : > { %s5980_s13 = smov [#allocation6]  }
  0x40   : > { %v6153_v17 = vrot.slane %v243_v16, %v9974_v12  ;;  %v6157_v18 = vrot.slane %v243_v16, %v9973_v13  ;;  %v6161_v19 = vrot.slane %v243_v16, %v9976_v14  ;;  %v6165_v20 = vrot.slane %v243_v16, %v9975_v15  ;;  %p5910_p13 = pnand %p5909_p11, %p10955_p12  ;;  %s5912_s15 = sshll.u32 %s5980_s13, 4  ;;  %s5913_s15 = int_to_ptr.vmem [resolvable:$false] %s5912_s15 }
  0x41   : > { %480 = vperm.xlu1 %5858, %v252_v3   ;;  %5860 = vset.pattern.permute.xlu0 %v5975_v0  ;;  %s5914_s4 = scalar_lea.vmem %s5913_s15, 384  ;;  %p5915_p1 = scmp.lt.s32.totalorder %s5695_s7, %s5913_s15 }
  0x42   : > { %468 = vperm.xlu0 %5860, %v249_v4   ;;  %p5911_p0 = pneg %p5910_p13  ;;  %p5916_p3 = scmp.lt.s32.totalorder %s5914_s4, %s5908_s12 }
  0x44   : > { %p5917_p8 = por %p5916_p3, %p5915_p1 }
  0x45   : > { %5859 = vset.pattern.permute.xlu1 %v9977_v1 }
  0x46   : > { %280 = vperm.xlu1 %5859, %v250_v5   ;;  %5861 = vset.pattern.permute.xlu0 %v9977_v1  ;;  %p5918_p10 = pnand %p5917_p8, %p5911_p0 }
  0x47   : > { %290 = vperm.xlu0 %5861, %v252_v3  }
  0x4a   : > { %5862 = vset.pattern.permute.xlu1 %v5975_v0 }
  0x4b   : > { %472 = vperm.xlu1 %5862, %v250_v5   ;;  %275 = vperm.xlu0 %5861, %v249_v4  }
  0x4f   : > { %5863 = vset.pattern.permute.xlu1 %v9977_v1  ;;  %270 = vperm.xlu0 %5861, %v248_v6  }
  0x50   : > { %265 = vperm.xlu1 %5863, %v247_v7  }
  0x53   : > { %255 = vperm.xlu0 %5861, %v245_v8  }
  0x54   : > { %5864 = vset.pattern.permute.xlu1 %v5975_v0 }
  0x55   : > { %460 = vperm.xlu1 %5864, %v247_v7  }
  0x57   : > { %5866 = vset.pattern.permute.xlu0 %v5975_v0 }
  0x58   : > { %452 = vperm.xlu0 %5866, %v245_v8  }
  0x59   : > { %464 = vperm.xlu1 %5864, %v248_v6  }
  0x5d   : > { %5865 = vset.pattern.permute.xlu1 %v9977_v1 }
  0x5e   : > { %260 = vperm.xlu1 %5865, %v246_v9  }
  0x62   : > { %5867 = vset.pattern.permute.xlu1 %v5975_v0 }
  0x63   : > { %456 = vperm.xlu1 %5867, %v246_v9  }
  0xb8   : > { %v6167_v21 = vpop.permute.xlu0 %285  ;;  %v6177_v26 = vpop.permute.xlu1 %476 }
  0xb9   : > { %v428_v22 = vmul.f32 %v6153_v17, %v6167_v21  ;;  %v430_v23 = vmul.f32 %v6157_v18, %v6167_v21  ;;  %v427_v24 = vmul.f32 %v6161_v19, %v6167_v21  ;;  %v429_v25 = vmul.f32 %v6165_v20, %v6167_v21 }
  0xbb   : > { %v556_v27 = vadd.f32 %v6177_v26, %v428_v22  ;;  %v558_v28 = vadd.f32 %v6177_v26, %v430_v23  ;;  %v555_v29 = vadd.f32 %v6177_v26, %v427_v24  ;;  %v557_v30 = vadd.f32 %v6177_v26, %v429_v25 }
  0xbc   : > { %v6185_v39 = vpop.permute.xlu1 %480 }
  0xbd   : > { %v6183_v31 = vpop.permute.xlu0 %468  ;;  %v652_v32 = vmul.f32 0.15915494, %v556_v27  ;;  %v654_v33 = vmul.f32 0.15915494, %v558_v28  ;;  %v651_v34 = vmul.f32 0.15915494, %v555_v29 }
  0xbe   : > { %v653_v35 = vmul.f32 0.15915494, %v557_v30 }
  0xbf   : > { %v748_v36 = vadd.f32 0.5, %v652_v32  ;;  %v750_v37 = vadd.f32 0.5, %v654_v33  ;;  %v747_v38 = vadd.f32 0.5, %v651_v34 }
  0xc0   : > { %v749_v40 = vadd.f32 0.5, %v653_v35 }
  0xc1   : > { %v844_v41 = vfloor.f32 %v748_v36  ;;  %v846_v42 = vfloor.f32 %v750_v37  ;;  %v843_v43 = vfloor.f32 %v747_v38  ;;  %v6203_v58 = vpop.permute.xlu1 %280 }
  0xc2   : > { %v6187_v44 = vpop.permute.xlu0 %290  ;;  %v845_v45 = vfloor.f32 %v749_v40  ;;  %v6216_v8 = vmul.f32 %v6153_v17, %v6203_v58 }
  0xc3   : > { %v440_v46 = vmul.f32 %v6153_v17, %v6187_v44  ;;  %v940_v47 = vmul.f32 6.2831855, %v844_v41  ;;  %v442_v48 = vmul.f32 %v6157_v18, %v6187_v44  ;;  %v942_v49 = vmul.f32 6.2831855, %v846_v42 }
  0xc4   : > { %v439_v50 = vmul.f32 %v6161_v19, %v6187_v44  ;;  %v939_v51 = vmul.f32 6.2831855, %v843_v43  ;;  %v441_v52 = vmul.f32 %v6165_v20, %v6187_v44  ;;  %v941_v53 = vmul.f32 6.2831855, %v845_v45 }
  0xc5   : > { %v568_v54 = vadd.f32 %v6185_v39, %v440_v46  ;;  %v6198_v55 = vsub.f32 %v556_v27, %v940_v47  ;;  %v570_v56 = vadd.f32 %v6185_v39, %v442_v48  ;;  %v6201_v57 = vsub.f32 %v558_v28, %v942_v49 }
  0xc6   : > { %v567_v59 = vadd.f32 %v6185_v39, %v439_v50  ;;  %v6206_v60 = vsub.f32 %v555_v29, %v939_v51  ;;  %v569_v61 = vadd.f32 %v6185_v39, %v441_v52  ;;  %v6210_v0 = vsub.f32 %v557_v30, %v941_v53  ;;  %v6229_v43 = vpop.permute.xlu0 %275 }
  0xc7   : > { %v664_v62 = vmul.f32 0.15915494, %v568_v54  ;;  %v1132_v63 = vand.u32 2147483647, %v6198_v55  ;;  %v666_v2 = vmul.f32 0.15915494, %v570_v56 }
  0xc8   : > { %v1134_v3 = vand.u32 2147483647, %v6201_v57  ;;  %v663_v4 = vmul.f32 0.15915494, %v567_v59  ;;  %v1131_v7 = vand.u32 2147483647, %v6206_v60 }
  0xc9   : > { %v760_v5 = vadd.f32 0.5, %v664_v62  ;;  %v1228_v6 = vsub.f32 3.1415927, %v1132_v63  ;;  %v762_v9 = vadd.f32 0.5, %v666_v2  ;;  %v665_v23 = vmul.f32 0.15915494, %v569_v61 }
  0xca   : > { %v1230_v16 = vsub.f32 3.1415927, %v1134_v3  ;;  %v759_v22 = vadd.f32 0.5, %v663_v4  ;;  %v1227_v27 = vsub.f32 3.1415927, %v1131_v7  ;;  %vm2380_vm0 = vcmp.lt.f32.partialorder %v6198_v55, 0.0 }
  0xcb   : > { %v856_v24 = vfloor.f32 %v760_v5  ;;  %v6218_v25 = vmin.f32 %v1132_v63, %v1228_v6  ;;  %v1133_v28 = vand.u32 2147483647, %v6210_v0  ;;  %v858_v29 = vfloor.f32 %v762_v9 }
  0xcc   : > { %v6221_v30 = vmin.f32 %v1134_v3, %v1230_v16  ;;  %v855_v32 = vfloor.f32 %v759_v22  ;;  %v761_v33 = vadd.f32 0.5, %v665_v23  ;;  %v6225_v36 = vmin.f32 %v1131_v7, %v1227_v27 }
  0xcd   : > { %v952_v34 = vmul.f32 6.2831855, %v856_v24  ;;  %v1420_v35 = vmul.f32 %v6218_v25, %v6218_v25  ;;  %v1229_v37 = vsub.f32 3.1415927, %v1133_v28  ;;  %v954_v38 = vmul.f32 6.2831855, %v858_v29 }
  0xce   : > { %v1422_v40 = vmul.f32 %v6221_v30, %v6221_v30  ;;  %v951_v41 = vmul.f32 6.2831855, %v855_v32  ;;  %v857_v42 = vfloor.f32 %v761_v33  ;;  %v6235_v47 = vmul.f32 %v6225_v36, %v6225_v36 }
  0xcf   : > { %v6231_v45 = vsub.f32 %v568_v54, %v952_v34  ;;  %v1516_v46 = vmul.f32 2.7557319e-06, %v1420_v35  ;;  %v6237_v48 = vmin.f32 %v1133_v28, %v1229_v37  ;;  %v6239_v49 = vsub.f32 %v570_v56, %v954_v38 }
  0xd0   : > { %v1518_v50 = vmul.f32 2.7557319e-06, %v1422_v40  ;;  %v6241_v51 = vsub.f32 %v567_v59, %v951_v41  ;;  %v953_v52 = vmul.f32 6.2831855, %v857_v42  ;;  %v6250_v63 = vmul.f32 %v6157_v18, %v6203_v58 }
  0xd1   : > { %v1144_v53 = vand.u32 2147483647, %v6231_v45  ;;  %v1612_v62 = vadd.f32 -0.0001984127, %v1516_v46  ;;  %v6246_v54 = vmul.f32 %v6237_v48, %v6237_v48  ;;  %v1146_v2 = vand.u32 2147483647, %v6239_v49 }
  0xd2   : > { %v1614_v3 = vadd.f32 -0.0001984127, %v1518_v50  ;;  %v6255_v56 = vmul.f32 %v6153_v17, %v6229_v43  ;;  %v6259_v59 = vmul.f32 %v6161_v19, %v6203_v58  ;;  %v1143_v6 = vand.u32 2147483647, %v6241_v51 }
  0xd3   : > { %v1240_v4 = vsub.f32 3.1415927, %v1144_v53  ;;  %v1708_v5 = vmul.f32 %v1612_v62, %v1420_v35  ;;  %v1515_v7 = vmul.f32 2.7557319e-06, %v6235_v47  ;;  %v1242_v9 = vsub.f32 3.1415927, %v1146_v2 }
  0xd4   : > { %v1710_v16 = vmul.f32 %v1614_v3, %v1422_v40  ;;  %v6263_v22 = vsub.f32 %v569_v61, %v953_v52  ;;  %v1517_v23 = vmul.f32 2.7557319e-06, %v6246_v54  ;;  %v1239_v28 = vsub.f32 3.1415927, %v1143_v6 }
  0xd5   : > { %v6266_v24 = vmin.f32 %v1144_v53, %v1240_v4  ;;  %v1804_v27 = vadd.f32 0.008333333, %v1708_v5  ;;  %v1611_v29 = vadd.f32 -0.0001984127, %v1515_v7  ;;  %v6268_v32 = vmin.f32 %v1146_v2, %v1242_v9 }
  0xd6   : > { %v1806_v33 = vadd.f32 0.008333333, %v1710_v16  ;;  %v1145_v34 = vand.u32 2147483647, %v6263_v22  ;;  %v1613_v37 = vadd.f32 -0.0001984127, %v1517_v23  ;;  %v6273_v42 = vmin.f32 %v1143_v6, %v1239_v28 }
  0xd7   : > { %v1432_v38 = vmul.f32 %v6266_v24, %v6266_v24  ;;  %v1900_v41 = vmul.f32 %v1804_v27, %v1420_v35  ;;  %v1707_v61 = vmul.f32 %v1611_v29, %v6235_v47  ;;  %v1434_v46 = vmul.f32 %v6268_v32, %v6268_v32 }
  0xd8   : > { %v1902_v50 = vmul.f32 %v1806_v33, %v1422_v40  ;;  %v1241_v52 = vsub.f32 3.1415927, %v1145_v34  ;;  %v1709_v53 = vmul.f32 %v1613_v37, %v6246_v54  ;;  %v1431_v3 = vmul.f32 %v6273_v42, %v6273_v42 }
  0xd9   : > { %v1528_v62 = vmul.f32 2.7557319e-06, %v1432_v38  ;;  %v1996_v2 = vadd.f32 -0.16666667, %v1900_v41  ;;  %v1803_v4 = vadd.f32 0.008333333, %v1707_v61 }
  0xda   : > { %v1530_v5 = vmul.f32 2.7557319e-06, %v1434_v46  ;;  %v1998_v7 = vadd.f32 -0.16666667, %v1902_v50  ;;  %v6281_v9 = vmin.f32 %v1145_v34, %v1241_v52  ;;  %v1805_v6 = vadd.f32 0.008333333, %v1709_v53 }
  0xdb   : > { %v1624_v16 = vadd.f32 -0.0001984127, %v1528_v62  ;;  %v2092_v23 = vmul.f32 %v1996_v2, %v1420_v35  ;;  %v1527_v27 = vmul.f32 2.7557319e-06, %v1431_v3  ;;  %v1899_v28 = vmul.f32 %v1803_v4, %v6235_v47 }
  0xdc   : > { %v1626_v29 = vadd.f32 -0.0001984127, %v1530_v5  ;;  %v2094_v33 = vmul.f32 %v1998_v7, %v1422_v40  ;;  %vm2382_vm1 = vcmp.lt.f32.partialorder %v6201_v57, 0.0  ;;  %v1433_v37 = vmul.f32 %v6281_v9, %v6281_v9 }
  0xdd   : > { %v1901_v41 = vmul.f32 %v1805_v6, %v6246_v54  ;;  %v1720_v61 = vmul.f32 %v1624_v16, %v1432_v38  ;;  %v2188_v34 = vadd.f32 1.0, %v2092_v23  ;;  %v1623_v50 = vadd.f32 -0.0001984127, %v1527_v27 }
  0xde   : > { %v1995_v52 = vadd.f32 -0.16666667, %v1899_v28  ;;  %v1722_v53 = vmul.f32 %v1626_v29, %v1434_v46  ;;  %v2190_v35 = vadd.f32 1.0, %v2094_v33  ;;  %v1529_v62 = vmul.f32 2.7557319e-06, %v1433_v37 }
  0xdf   : > { %v1997_v2 = vadd.f32 -0.16666667, %v1901_v41  ;;  %v1816_v10 = vadd.f32 0.008333333, %v1720_v61  ;;  %v2284_v4 = vmul.f32 %v2188_v34, %v6218_v25  ;;  %v1719_v5 = vmul.f32 %v1623_v50, %v1431_v3  ;;  %v6299_v34 = vpop.permute.xlu1 %472 }
  0xe0   : > { %v2091_v40 = vmul.f32 %v1995_v52, %v6235_v47  ;;  %v1818_v7 = vadd.f32 0.008333333, %v1722_v53  ;;  %v2286_v13 = vmul.f32 %v2190_v35, %v6221_v30  ;;  %v1625_v12 = vadd.f32 -0.0001984127, %v1529_v62 }
  0xe1   : > { %v2093_v6 = vmul.f32 %v1997_v2, %v6246_v54  ;;  %v1912_v16 = vmul.f32 %v1816_v10, %v1432_v38  ;;  %v2476_v23 = vsub.f32 0.0, %v2284_v4  ;;  %v1815_v27 = vadd.f32 0.008333333, %v1719_v5 }
  0xe2   : > { %v2187_v28 = vadd.f32 1.0, %v2091_v40  ;;  %v1914_v29 = vmul.f32 %v1818_v7, %v1434_v46  ;;  %v2478_v33 = vsub.f32 0.0, %v2286_v13  ;;  %v1721_v15 = vmul.f32 %v1625_v12, %v1433_v37 }
  0xe3   : > { %v2189_v41 = vadd.f32 1.0, %v2093_v6  ;;  %v2008_v61 = vadd.f32 -0.16666667, %v1912_v16  ;;  %v1911_v14 = vmul.f32 %v1815_v27, %v1431_v3  ;;  %vm2379_vm2 = vcmp.lt.f32.partialorder %v6206_v60, 0.0 }
  0xe4   : > { %v2283_v25 = vmul.f32 %v2187_v28, %v6225_v36  ;;  %vm2392_vm3 = vcmp.lt.f32.partialorder %v6231_v45, 0.0  ;;  %v2572_v30 = vsel %vm2380_vm0, %v2476_v23, %v2284_v4  ;;  %v2010_v47 = vadd.f32 -0.16666667, %v1914_v29 }
  0xe5   : > { %v1817_v10 = vadd.f32 0.008333333, %v1721_v15  ;;  %v2285_v54 = vmul.f32 %v2189_v41, %v6237_v48  ;;  %v2104_v50 = vmul.f32 %v2008_v61, %v1432_v38  ;;  %vm2394_vm4 = vcmp.lt.f32.partialorder %v6239_v49, 0.0 }
  0xe6   : > { %v2574_v12 = vsel %vm2382_vm1, %v2478_v33, %v2286_v13  ;;  %v2007_v36 = vadd.f32 -0.16666667, %v1911_v14  ;;  %v2475_v52 = vsub.f32 0.0, %v2283_v25  ;;  %v2106_v53 = vmul.f32 %v2010_v47, %v1434_v46 }
  0xe7   : > { %vm2391_vm5 = vcmp.lt.f32.partialorder %v6241_v51, 0.0  ;;  %v1913_v35 = vmul.f32 %v1817_v10, %v1433_v37  ;;  %vm2381_vm6 = vcmp.lt.f32.partialorder %v6210_v0, 0.0  ;;  %v2477_v55 = vsub.f32 0.0, %v2285_v54 }
  0xe8   : > { %v2200_v15 = vadd.f32 1.0, %v2104_v50  ;;  %v2103_v62 = vmul.f32 %v2007_v36, %v1431_v3  ;;  %v2571_v48 = vsel %vm2379_vm2, %v2475_v52, %v2283_v25  ;;  %v532_v38 = vadd.f32 %v6183_v31, %v6255_v56 }
  0xe9   : > { %v2202_v2 = vadd.f32 1.0, %v2106_v53  ;;  %v2009_v57 = vadd.f32 -0.16666667, %v1913_v35  ;;  %v2573_v13 = vsel %vm2381_vm6, %v2477_v55, %v2285_v54  ;;  %v544_v14 = vadd.f32 %v6299_v34, %v6216_v8 }
  0xea   : > { %v2296_v46 = vmul.f32 %v2200_v15, %v6266_v24  ;;  %v2199_v4 = vadd.f32 1.0, %v2103_v62  ;;  %vm2393_vm7 = vcmp.lt.f32.partialorder %v6263_v22, 0.0  ;;  %v628_v0 = vmul.f32 0.15915494, %v532_v38 }
  0xeb   : > { %v406_v3 = vmul.f32 %v6157_v18, %v6229_v43  ;;  %v2298_v60 = vmul.f32 %v2202_v2, %v6268_v32  ;;  %v2105_v5 = vmul.f32 %v2009_v57, %v1433_v37  ;;  %v640_v40 = vmul.f32 0.15915494, %v544_v14 }
  0xec   : > { %v546_v56 = vadd.f32 %v6299_v34, %v6250_v63  ;;  %v2488_v7 = vsub.f32 0.0, %v2296_v46  ;;  %v2295_v6 = vmul.f32 %v2199_v4, %v6273_v42  ;;  %v724_v8 = vadd.f32 0.5, %v628_v0 }
  0xed   : > { %v534_v24 = vadd.f32 %v6183_v31, %v406_v3  ;;  %v2490_v16 = vsub.f32 0.0, %v2298_v60  ;;  %v2201_v23 = vadd.f32 1.0, %v2105_v5  ;;  %v736_v27 = vadd.f32 0.5, %v640_v40 }
  0xee   : > { %v642_v28 = vmul.f32 0.15915494, %v546_v56  ;;  %v2584_v29 = vsel %vm2392_vm3, %v2488_v7, %v2296_v46  ;;  %v2487_v33 = vsub.f32 0.0, %v2295_v6  ;;  %v820_v32 = vfloor.f32 %v724_v8 }
  0xef   : > { %v630_v37 = vmul.f32 0.15915494, %v534_v24  ;;  %v2644_v41 = vpack.c.bf16 %v2584_v29, %v2572_v30  ;;  %v2586_v63 = vsel %vm2394_vm4, %v2490_v16, %v2298_v60  ;;  %v2297_v61 = vmul.f32 %v2201_v23, %v6281_v9 }
  0xf0   : > { %v832_v42 = vfloor.f32 %v736_v27  ;;  %v2646_v25 = vpack.c.bf16 %v2586_v63, %v2574_v12  ;;  %v2583_v47 = vsel %vm2391_vm5, %v2487_v33, %v2295_v6  ;;  %v916_v10 = vmul.f32 6.2831855, %v820_v32 }
  0xf1   : > { %v726_v54 = vadd.f32 0.5, %v630_v37  ;;  %2708 = vmatprep.subr.bf16.mxu0 %v2644_v41  ;;  %v2643_v50 = vpack.c.bf16 %v2583_v47, %v2571_v48  ;;  %v2489_v45 = vsub.f32 0.0, %v2297_v61  ;;  %v738_v52 = vadd.f32 0.5, %v642_v28 }
  0xf2   : > { %v928_v36 = vmul.f32 6.2831855, %v832_v42  ;;  %2781 = vmatprep.subr.bf16.mxu1 %v2646_v25  ;;  %v6328_v53 = vsub.f32 %v532_v38, %v916_v10  ;;  %v403_v49 = vmul.f32 %v6161_v19, %v6229_v43  ;;  %v543_v9 = vadd.f32 %v6299_v34, %v6259_v59 }
  0xf3   : > { %v822_v30 = vfloor.f32 %v726_v54  ;;  %2709 = vmatpush1.bf16.msra.mxu0 %v2643_v50  ;;  %v2585_v51 = vsel %vm2393_vm7, %v2489_v45, %v2297_v61  ;;  %v834_v35 = vfloor.f32 %v738_v52  ;;  %v405_v55 = vmul.f32 %v6165_v20, %v6229_v43 }
  0xf4   : > { %v6336_v12 = vsub.f32 %v544_v14, %v928_v36  ;;  %v2645_v15 = vpack.c.bf16 %v2585_v51, %v2573_v13  ;;  %v1108_v62 = vand.u32 2147483647, %v6328_v53  ;;  %v531_v57 = vadd.f32 %v6183_v31, %v403_v49 }
  0xf5   : > { %v918_v48 = vmul.f32 6.2831855, %v822_v30  ;;  %v930_v2 = vmul.f32 6.2831855, %v834_v35  ;;  %v639_v22 = vmul.f32 0.15915494, %v543_v9  ;;  %v533_v3 = vadd.f32 %v6183_v31, %v405_v55 }
  0xf6   : > { %v1120_v38 = vand.u32 2147483647, %v6336_v12  ;;  %2782 = vmatpush1.bf16.msra.mxu1 %v2645_v15  ;;  %v1204_v59 = vsub.f32 3.1415927, %v1108_v62  ;;  %v627_v0 = vmul.f32 0.15915494, %v531_v57  ;;  %v417_v40 = vmul.f32 %v6165_v20, %v6203_v58 }
  0xf7   : > { %v6343_v46 = vsub.f32 %v534_v24, %v918_v48  ;;  %v6345_v4 = vsub.f32 %v546_v56, %v930_v2  ;;  %v735_v5 = vadd.f32 0.5, %v639_v22  ;;  %v629_v33 = vmul.f32 0.15915494, %v533_v3 }
  0xf8   : > { %v1216_v14 = vsub.f32 3.1415927, %v1120_v38  ;;  %v6348_v13 = vmin.f32 %v1108_v62, %v1204_v59  ;;  %v723_v8 = vadd.f32 0.5, %v627_v0  ;;  %v545_v23 = vadd.f32 %v6299_v34, %v417_v40 }
  0xf9   : > { %v1110_v60 = vand.u32 2147483647, %v6343_v46  ;;  %v1122_v6 = vand.u32 2147483647, %v6345_v4  ;;  %v831_v16 = vfloor.f32 %v735_v5  ;;  %v725_v47 = vadd.f32 0.5, %v629_v33 }
  0xfa   : > { %v6353_v7 = vmin.f32 %v1120_v38, %v1216_v14  ;;  %v1396_v56 = vmul.f32 %v6348_v13, %v6348_v13  ;;  %v819_v29 = vfloor.f32 %v723_v8  ;;  %v641_v63 = vmul.f32 0.15915494, %v545_v23 }
  0xfb   : > { %v1206_v24 = vsub.f32 3.1415927, %v1110_v60  ;;  %v1218_v28 = vsub.f32 3.1415927, %v1122_v6  ;;  %v927_v41 = vmul.f32 6.2831855, %v831_v16  ;;  %v821_v55 = vfloor.f32 %v725_v47 }
  0xfc   : > { %v1408_v27 = vmul.f32 %v6353_v7, %v6353_v7  ;;  %v1492_v32 = vmul.f32 2.7557319e-06, %v1396_v56  ;;  %v915_v25 = vmul.f32 6.2831855, %v819_v29  ;;  %v737_v45 = vadd.f32 0.5, %v641_v63 }
  0xfd   : > { %v6361_v37 = vmin.f32 %v1110_v60, %v1206_v24  ;;  %v6363_v42 = vmin.f32 %v1122_v6, %v1218_v28  ;;  %v6367_v50 = vsub.f32 %v543_v9, %v927_v41  ;;  %v917_v40 = vmul.f32 6.2831855, %v821_v55  ;;  %v6379_v28 = vpop.permute.xlu1 %265 }
  0xfe   : > { %v1504_v61 = vmul.f32 2.7557319e-06, %v1408_v27  ;;  %v1588_v10 = vadd.f32 -0.0001984127, %v1492_v32  ;;  %v6371_v30 = vsub.f32 %v531_v57, %v915_v25  ;;  %v833_v59 = vfloor.f32 %v737_v45 }
  0xff   : > { %v1398_v54 = vmul.f32 %v6361_v37, %v6361_v37  ;;  %v1410_v52 = vmul.f32 %v6363_v42, %v6363_v42  ;;  %v1119_v35 = vand.u32 2147483647, %v6367_v50  ;;  %v6385_v41 = vsub.f32 %v533_v3, %v917_v40 }
 0x100   : > { %v1600_v36 = vadd.f32 -0.0001984127, %v1504_v61  ;;  %v1684_v49 = vmul.f32 %v1588_v10, %v1396_v56  ;;  %v1107_v48 = vand.u32 2147483647, %v6371_v30  ;;  %v929_v16 = vmul.f32 6.2831855, %v833_v59 }
 0x101   : > { %v1494_v51 = vmul.f32 2.7557319e-06, %v1398_v54  ;;  %v1506_v62 = vmul.f32 2.7557319e-06, %v1410_v52  ;;  %v1215_v9 = vsub.f32 3.1415927, %v1119_v35 }
 0x102   : > { %v1696_v15 = vmul.f32 %v1600_v36, %v1408_v27  ;;  %v1780_v38 = vadd.f32 0.008333333, %v1684_v49  ;;  %v1203_v0 = vsub.f32 3.1415927, %v1107_v48  ;;  %vm2356_vm8 = vcmp.lt.f32.partialorder %v6328_v53, 0.0 }
 0x103   : > { %v1590_v2 = vadd.f32 -0.0001984127, %v1494_v51  ;;  %v1602_v14 = vadd.f32 -0.0001984127, %v1506_v62  ;;  %v6375_v57 = vmin.f32 %v1119_v35, %v1215_v9  ;;  %v6392_v47 = vsub.f32 %v545_v23, %v929_v16  ;;  %v6402_v9 = vpop.permute.xlu1 %460 }
 0x104   : > { %v1792_v22 = vadd.f32 0.008333333, %v1696_v15  ;;  %v1876_v60 = vmul.f32 %v1780_v38, %v1396_v56  ;;  %v6377_v24 = vmin.f32 %v1107_v48, %v1203_v0  ;;  %v1109_v49 = vand.u32 2147483647, %v6385_v41 }
 0x105   : > { %v1686_v5 = vmul.f32 %v1590_v2, %v1398_v54  ;;  %v1698_v8 = vmul.f32 %v1602_v14, %v1410_v52  ;;  %v6383_v32 = vmul.f32 %v6375_v57, %v6375_v57  ;;  %v1121_v55 = vand.u32 2147483647, %v6392_v47 }
 0x106   : > { %v1888_v6 = vmul.f32 %v1792_v22, %v1408_v27  ;;  %v1972_v29 = vadd.f32 -0.16666667, %v1876_v60  ;;  %v6390_v25 = vmul.f32 %v6377_v24, %v6377_v24  ;;  %vm2368_vm9 = vcmp.lt.f32.partialorder %v6336_v12, 0.0 }
 0x107   : > { %v1782_v33 = vadd.f32 0.008333333, %v1686_v5  ;;  %v1794_v61 = vadd.f32 0.008333333, %v1698_v8  ;;  %v1503_v36 = vmul.f32 2.7557319e-06, %v6383_v32  ;;  %v380_v2 = vmul.f32 %v6153_v17, %v6379_v28  ;;  %v6427_v53 = vpop.permute.xlu1 %464 }
 0x108   : > { %v1984_v63 = vadd.f32 -0.16666667, %v1888_v6  ;;  %v2068_v10 = vmul.f32 %v1972_v29, %v1396_v56  ;;  %v1491_v3 = vmul.f32 2.7557319e-06, %v6390_v25  ;;  %vm2358_vm10 = vcmp.lt.f32.partialorder %v6343_v46, 0.0  ;;  %10346 = vst [vmem:[#allocation10_spill] sm:$0xff] %v6427_v53 }
 0x109   : > { %v1878_v45 = vmul.f32 %v1782_v33, %v1398_v54  ;;  %v1890_v35 = vmul.f32 %v1794_v61, %v1410_v52  ;;  %v1599_v48 = vadd.f32 -0.0001984127, %v1503_v36  ;;  %vm2370_vm11 = vcmp.lt.f32.partialorder %v6345_v4, 0.0 }
 0x10a   : > { %v2080_v51 = vmul.f32 %v1984_v63, %v1408_v27  ;;  %v2164_v15 = vadd.f32 1.0, %v2068_v10  ;;  %v1587_v56 = vadd.f32 -0.0001984127, %v1491_v3  ;;  %v1205_v14 = vsub.f32 3.1415927, %v1109_v49 }
 0x10b   : > { %v1974_v62 = vadd.f32 -0.16666667, %v1878_v45  ;;  %v1986_v23 = vadd.f32 -0.16666667, %v1890_v35  ;;  %v1695_v22 = vmul.f32 %v1599_v48, %v6383_v32  ;;  %v1217_v40 = vsub.f32 3.1415927, %v1121_v55  ;;  %v6425_v35 = vpop.permute.xlu0 %270 }
 0x10c   : > { %v2176_v38 = vadd.f32 1.0, %v2080_v51  ;;  %v2260_v27 = vmul.f32 %v2164_v15, %v6348_v13  ;;  %v1683_v5 = vmul.f32 %v1587_v56, %v6390_v25  ;;  %v6409_v29 = vmin.f32 %v1109_v49, %v1205_v14 }
 0x10d   : > { %v2070_v59 = vmul.f32 %v1974_v62, %v1398_v54  ;;  %v2082_v60 = vmul.f32 %v1986_v23, %v1410_v52  ;;  %v1791_v16 = vadd.f32 0.008333333, %v1695_v22  ;;  %v6411_v54 = vmin.f32 %v1121_v55, %v1217_v40 }
 0x10e   : > { %v2272_v0 = vmul.f32 %v2176_v38, %v6353_v7  ;;  %v2452_v6 = vsub.f32 0.0, %v2260_v27  ;;  %v1779_v13 = vadd.f32 0.008333333, %v1683_v5  ;;  %v1397_v52 = vmul.f32 %v6409_v29, %v6409_v29 }
 0x10f   : > { %v2166_v8 = vadd.f32 1.0, %v2070_v59  ;;  %v2178_v63 = vadd.f32 1.0, %v2082_v60  ;;  %v1887_v7 = vmul.f32 %v1791_v16, %v6383_v32  ;;  %v1409_v51 = vmul.f32 %v6411_v54, %v6411_v54 }
 0x110   : > { %v2464_v33 = vsub.f32 0.0, %v2272_v0  ;;  %v2548_v61 = vsel %vm2356_vm8, %v2452_v6, %v2260_v27  ;;  %v1875_v49 = vmul.f32 %v1779_v13, %v6390_v25  ;;  %v1493_v15 = vmul.f32 2.7557319e-06, %v1397_v52 }
 0x111   : > { %v2262_v10 = vmul.f32 %v2166_v8, %v6361_v37  ;;  %v2274_v36 = vmul.f32 %v2178_v63, %v6363_v42  ;;  %v1983_v55 = vadd.f32 -0.16666667, %v1887_v7  ;;  %vm2367_vm12 = vcmp.lt.f32.partialorder %v6367_v50, 0.0 }
 0x112   : > { %v2560_v45 = vsel %vm2368_vm9, %v2464_v33, %v2272_v0  ;;  %v1971_v48 = vadd.f32 -0.16666667, %v1875_v49  ;;  %v1505_v12 = vmul.f32 2.7557319e-06, %v1409_v51  ;;  %v392_v42 = vmul.f32 %v6153_v17, %v6425_v35 }
 0x113   : > { %v2632_v37 = vpack.c.bf16 %v2560_v45, %v2548_v61  ;;  %v2454_v3 = vsub.f32 0.0, %v2262_v10  ;;  %v2466_v62 = vsub.f32 0.0, %v2274_v36  ;;  %v2079_v23 = vmul.f32 %v1983_v55, %v6383_v32 }
 0x114   : > { %vm2355_vm13 = vcmp.lt.f32.partialorder %v6371_v30, 0.0  ;;  %v1589_v56 = vadd.f32 -0.0001984127, %v1493_v15  ;;  %v508_v27 = vadd.f32 %v6402_v9, %v380_v2  ;;  %v2067_v22 = vmul.f32 %v1971_v48, %v6390_v25 }
 0x115   : > { %2710 = vmatprep.subr.bf16.mxu0 %v2632_v37  ;;  %v2550_v38 = vsel %vm2358_vm10, %v2454_v3, %v2262_v10  ;;  %v2562_v59 = vsel %vm2370_vm11, %v2466_v62, %v2274_v36  ;;  %v1601_v14 = vadd.f32 -0.0001984127, %v1505_v12  ;;  %v520_v0 = vadd.f32 %v6427_v53, %v392_v42 }
 0x116   : > { %v2634_v60 = vpack.c.bf16 %v2562_v59, %v2550_v38  ;;  %v2175_v5 = vadd.f32 1.0, %v2079_v23  ;;  %v1685_v40 = vmul.f32 %v1589_v56, %v1397_v52  ;;  %v604_v46 = vmul.f32 0.15915494, %v508_v27 }
 0x117   : > { %v2163_v6 = vadd.f32 1.0, %v2067_v22  ;;  %v1697_v8 = vmul.f32 %v1601_v14, %v1409_v51  ;;  %v616_v32 = vmul.f32 0.15915494, %v520_v0  ;;  %v382_v16 = vmul.f32 %v6157_v18, %v6379_v28 }
 0x118   : > { %2783 = vmatprep.subr.bf16.mxu1 %v2634_v60  ;;  %v2271_v2 = vmul.f32 %v2175_v5, %v6375_v57  ;;  %v1781_v4 = vadd.f32 0.008333333, %v1685_v40  ;;  %v700_v33 = vadd.f32 0.5, %v604_v46  ;;  %v394_v25 = vmul.f32 %v6157_v18, %v6425_v35 }
 0x119   : > { %v2259_v63 = vmul.f32 %v2163_v6, %v6377_v24  ;;  %v1793_v13 = vadd.f32 0.008333333, %v1697_v8  ;;  %v712_v61 = vadd.f32 0.5, %v616_v32  ;;  %v510_v10 = vadd.f32 %v6402_v9, %v382_v16 }
 0x11a   : > { %v2463_v7 = vsub.f32 0.0, %v2271_v2  ;;  %v1877_v45 = vmul.f32 %v1781_v4, %v1397_v52  ;;  %v796_v36 = vfloor.f32 %v700_v33  ;;  %v522_v49 = vadd.f32 %v6427_v53, %v394_v25 }
 0x11b   : > { %v2451_v37 = vsub.f32 0.0, %v2259_v63  ;;  %v1889_v3 = vmul.f32 %v1793_v13, %v1409_v51  ;;  %v808_v55 = vfloor.f32 %v712_v61  ;;  %v606_v57 = vmul.f32 0.15915494, %v510_v10 }
 0x11c   : > { %v2559_v15 = vsel %vm2367_vm12, %v2463_v7, %v2271_v2  ;;  %v1973_v62 = vadd.f32 -0.16666667, %v1877_v45  ;;  %v892_v48 = vmul.f32 6.2831855, %v796_v36  ;;  %v618_v12 = vmul.f32 0.15915494, %v522_v49 }
 0x11d   : > { %v2547_v24 = vsel %vm2355_vm13, %v2451_v37, %v2259_v63  ;;  %v1985_v42 = vadd.f32 -0.16666667, %v1889_v3  ;;  %v904_v38 = vmul.f32 6.2831855, %v808_v55  ;;  %v702_v23 = vadd.f32 0.5, %v606_v57 }
 0x11e   : > { %v2631_v56 = vpack.c.bf16 %v2559_v15, %v2547_v24  ;;  %v2069_v59 = vmul.f32 %v1973_v62, %v1397_v52  ;;  %v6453_v22 = vsub.f32 %v508_v27, %v892_v48  ;;  %v714_v14 = vadd.f32 0.5, %v618_v12 }
 0x11f   : > { %v2081_v60 = vmul.f32 %v1985_v42, %v1409_v51  ;;  %v6455_v5 = vsub.f32 %v520_v0, %v904_v38  ;;  %v798_v40 = vfloor.f32 %v702_v23  ;;  %v379_v16 = vmul.f32 %v6161_v19, %v6379_v28 }
 0x120   : > { %2711 = vmatpush1.bf16.msra.mxu0 %v2631_v56  ;;  %v2165_v50 = vadd.f32 1.0, %v2069_v59  ;;  %v1084_v46 = vand.u32 2147483647, %v6453_v22  ;;  %v810_v6 = vfloor.f32 %v714_v14  ;;  %v391_v51 = vmul.f32 %v6161_v19, %v6425_v35 }
 0x121   : > { %v2177_v8 = vadd.f32 1.0, %v2081_v60  ;;  %v1096_v30 = vand.u32 2147483647, %v6455_v5  ;;  %v894_v32 = vmul.f32 6.2831855, %v798_v40  ;;  %v507_v25 = vadd.f32 %v6402_v9, %v379_v16 }
 0x122   : > { %v2261_v52 = vmul.f32 %v2165_v50, %v6409_v29  ;;  %v1180_v27 = vsub.f32 3.1415927, %v1084_v46  ;;  %v906_v2 = vmul.f32 6.2831855, %v810_v6  ;;  %v519_v7 = vadd.f32 %v6427_v53, %v391_v51 }
 0x123   : > { %v2273_v0 = vmul.f32 %v2177_v8, %v6411_v54  ;;  %v1192_v4 = vsub.f32 3.1415927, %v1096_v30  ;;  %v6465_v33 = vsub.f32 %v510_v10, %v894_v32  ;;  %vm2357_vm14 = vcmp.lt.f32.partialorder %v6385_v41, 0.0 }
 0x124   : > { %v2453_v63 = vsub.f32 0.0, %v2261_v52  ;;  %v6468_v13 = vmin.f32 %v1084_v46, %v1180_v27  ;;  %v6470_v61 = vsub.f32 %v522_v49, %v906_v2  ;;  %vm2369_vm15 = vcmp.lt.f32.partialorder %v6392_v47, 0.0 }
 0x125   : > { %v2465_v29 = vsub.f32 0.0, %v2273_v0  ;;  %v6474_v45 = vmin.f32 %v1096_v30, %v1192_v4  ;;  %v1086_v36 = vand.u32 2147483647, %v6465_v33  ;;  %v603_v57 = vmul.f32 0.15915494, %v507_v25 }
 0x126   : > { %v2549_v54 = vsel %vm2357_vm14, %v2453_v63, %v2261_v52  ;;  %v1372_v10 = vmul.f32 %v6468_v13, %v6468_v13  ;;  %v1098_v37 = vand.u32 2147483647, %v6470_v61  ;;  %v615_v48 = vmul.f32 0.15915494, %v519_v7 }
 0x127   : > { %v2561_v3 = vsel %vm2369_vm15, %v2465_v29, %v2273_v0  ;;  %v1384_v49 = vmul.f32 %v6474_v45, %v6474_v45  ;;  %v1182_v55 = vsub.f32 3.1415927, %v1086_v36  ;;  %v699_v47 = vadd.f32 0.5, %v603_v57 }
 0x128   : > { %v2633_v41 = vpack.c.bf16 %v2561_v3, %v2549_v54  ;;  %v1468_v15 = vmul.f32 2.7557319e-06, %v1372_v10  ;;  %v1194_v62 = vsub.f32 3.1415927, %v1098_v37  ;;  %v381_v42 = vmul.f32 %v6165_v20, %v6379_v28 }
 0x129   : > { %v1480_v12 = vmul.f32 2.7557319e-06, %v1384_v49  ;;  %v6483_v24 = vmin.f32 %v1086_v36, %v1182_v55  ;;  %v711_v56 = vadd.f32 0.5, %v615_v48  ;;  %v393_v59 = vmul.f32 %v6165_v20, %v6425_v35 }
 0x12a   : > { %2784 = vmatpush1.bf16.msra.mxu1 %v2633_v41  ;;  %v1564_v38 = vadd.f32 -0.0001984127, %v1468_v15  ;;  %v6487_v23 = vmin.f32 %v1098_v37, %v1194_v62  ;;  %v795_v40 = vfloor.f32 %v699_v47  ;;  %v509_v50 = vadd.f32 %v6402_v9, %v381_v42 }
 0x12b   : > { %v1576_v14 = vadd.f32 -0.0001984127, %v1480_v12  ;;  %v1374_v60 = vmul.f32 %v6483_v24, %v6483_v24  ;;  %v807_v8 = vfloor.f32 %v711_v56  ;;  %v521_v30 = vadd.f32 %v6427_v53, %v393_v59 }
 0x12c   : > { %v1660_v46 = vmul.f32 %v1564_v38, %v1372_v10  ;;  %v1386_v6 = vmul.f32 %v6487_v23, %v6487_v23  ;;  %v891_v52 = vmul.f32 6.2831855, %v795_v40  ;;  %v605_v27 = vmul.f32 0.15915494, %v509_v50 }
 0x12d   : > { %v1672_v32 = vmul.f32 %v1576_v14, %v1384_v49  ;;  %v1470_v16 = vmul.f32 2.7557319e-06, %v1374_v60  ;;  %v903_v0 = vmul.f32 6.2831855, %v807_v8  ;;  %v617_v36 = vmul.f32 0.15915494, %v521_v30 }
 0x12e   : > { %v1756_v2 = vadd.f32 0.008333333, %v1660_v46  ;;  %v1482_v51 = vmul.f32 2.7557319e-06, %v1386_v6  ;;  %v6497_v29 = vsub.f32 %v507_v25, %v891_v52  ;;  %v701_v55 = vadd.f32 0.5, %v605_v27 }
 0x12f   : > { %v1768_v4 = vadd.f32 0.008333333, %v1672_v32  ;;  %v1566_v63 = vadd.f32 -0.0001984127, %v1470_v16  ;;  %v6499_v3 = vsub.f32 %v519_v7, %v903_v0  ;;  %vm2332_vm0 = vcmp.lt.f32.partialorder %v6453_v22, 0.0 }
 0x130   : > { %v1852_v54 = vmul.f32 %v1756_v2, %v1372_v10  ;;  %v1578_v37 = vadd.f32 -0.0001984127, %v1482_v51  ;;  %v1083_v15 = vand.u32 2147483647, %v6497_v29  ;;  %v797_v38 = vfloor.f32 %v701_v55 }
 0x131   : > { %v1864_v57 = vmul.f32 %v1768_v4, %v1384_v49  ;;  %v1662_v41 = vmul.f32 %v1566_v63, %v1374_v60  ;;  %v1095_v12 = vand.u32 2147483647, %v6499_v3  ;;  %vm2344_vm1 = vcmp.lt.f32.partialorder %v6455_v5, 0.0 }
 0x132   : > { %v1948_v62 = vadd.f32 -0.16666667, %v1852_v54  ;;  %v1674_v48 = vmul.f32 %v1578_v37, %v1386_v6  ;;  %v1179_v25 = vsub.f32 3.1415927, %v1083_v15  ;;  %v713_v14 = vadd.f32 0.5, %v617_v36  ;;  %v6517_v37 = vpop.permute.xlu0 %255 }
 0x133   : > { %v1960_v47 = vadd.f32 -0.16666667, %v1864_v57  ;;  %v1758_v42 = vadd.f32 0.008333333, %v1662_v41  ;;  %v1191_v59 = vsub.f32 3.1415927, %v1095_v12 }
 0x134   : > { %v2044_v56 = vmul.f32 %v1948_v62, %v1372_v10  ;;  %v1770_v7 = vadd.f32 0.008333333, %v1674_v48  ;;  %v6505_v8 = vmin.f32 %v1083_v15, %v1179_v25  ;;  %v893_v32 = vmul.f32 6.2831855, %v797_v38  ;;  %v6521_v62 = vpop.permute.xlu1 %260 }
 0x135   : > { %v2056_v40 = vmul.f32 %v1960_v47, %v1384_v49  ;;  %v1854_v46 = vmul.f32 %v1758_v42, %v1374_v60  ;;  %v6507_v27 = vmin.f32 %v1095_v12, %v1191_v59  ;;  %v809_v2 = vfloor.f32 %v713_v14 }
 0x136   : > { %v2140_v16 = vadd.f32 1.0, %v2044_v56  ;;  %v1866_v52 = vmul.f32 %v1770_v7, %v1386_v6  ;;  %v1371_v10 = vmul.f32 %v6505_v8, %v6505_v8  ;;  %v6511_v4 = vsub.f32 %v509_v50, %v893_v32 }
 0x137   : > { %v2152_v51 = vadd.f32 1.0, %v2056_v40  ;;  %v1950_v0 = vadd.f32 -0.16666667, %v1854_v46  ;;  %vm2334_vm2 = vcmp.lt.f32.partialorder %v6465_v33, 0.0  ;;  %v1383_v49 = vmul.f32 %v6507_v27, %v6507_v27 }
 0x138   : > { %v2236_v63 = vmul.f32 %v2140_v16, %v6468_v13  ;;  %v1962_v36 = vadd.f32 -0.16666667, %v1866_v52  ;;  %v905_v54 = vmul.f32 6.2831855, %v809_v2  ;;  %v1467_v41 = vmul.f32 2.7557319e-06, %v1371_v10  ;;  %v6534_v52 = vpop.permute.xlu0 %452 }
 0x139   : > { %v2248_v55 = vmul.f32 %v2152_v51, %v6474_v45  ;;  %v2046_v57 = vmul.f32 %v1950_v0, %v1374_v60  ;;  %v1085_v15 = vand.u32 2147483647, %v6511_v4  ;;  %v1479_v13 = vmul.f32 2.7557319e-06, %v1383_v49  ;;  %v6539_v51 = vpop.permute.xlu1 %456 }
 0x13a   : > { %v2428_v50 = vsub.f32 0.0, %v2236_v63  ;;  %v2058_v48 = vmul.f32 %v1962_v36, %v1386_v6  ;;  %v6523_v12 = vsub.f32 %v521_v30, %v905_v54  ;;  %v1563_v25 = vadd.f32 -0.0001984127, %v1467_v41 }
 0x13b   : > { %v2440_v47 = vsub.f32 0.0, %v2248_v55  ;;  %v2142_v42 = vadd.f32 1.0, %v2046_v57  ;;  %v1181_v38 = vsub.f32 3.1415927, %v1085_v15  ;;  %v1575_v45 = vadd.f32 -0.0001984127, %v1479_v13 }
 0x13c   : > { %v2524_v56 = vsel %vm2332_vm0, %v2428_v50, %v2236_v63  ;;  %v2154_v7 = vadd.f32 1.0, %v2058_v48  ;;  %v1097_v60 = vand.u32 2147483647, %v6523_v12  ;;  %v1659_v6 = vmul.f32 %v1563_v25, %v1371_v10 }
 0x13d   : > { %v2536_v59 = vsel %vm2344_vm1, %v2440_v47, %v2248_v55  ;;  %v2238_v14 = vmul.f32 %v2142_v42, %v6483_v24  ;;  %v6531_v40 = vmin.f32 %v1085_v15, %v1181_v38  ;;  %v1671_v32 = vmul.f32 %v1575_v45, %v1383_v49 }
 0x13e   : > { %v2620_v30 = vpack.c.bf16 %v2536_v59, %v2524_v56  ;;  %v2250_v46 = vmul.f32 %v2154_v7, %v6487_v23  ;;  %v1193_v16 = vsub.f32 3.1415927, %v1097_v60  ;;  %vm2346_vm3 = vcmp.lt.f32.partialorder %v6470_v61, 0.0 }
 0x13f   : > { %v2430_v22 = vsub.f32 0.0, %v2238_v14  ;;  %v1755_v2 = vadd.f32 0.008333333, %v1659_v6  ;;  %v1373_v5 = vmul.f32 %v6531_v40, %v6531_v40  ;;  %v1767_v0 = vadd.f32 0.008333333, %v1671_v32 }
 0x140   : > { %2712 = vmatprep.subr.bf16.mxu0 %v2620_v30  ;;  %v2442_v24 = vsub.f32 0.0, %v2250_v46  ;;  %v6541_v63 = vmin.f32 %v1097_v60, %v1193_v16  ;;  %v356_v23 = vmul.f32 %v6153_v17, %v6517_v37  ;;  %v368_v55 = vmul.f32 %v6153_v17, %v6521_v62 }
 0x141   : > { %v2526_v36 = vsel %vm2334_vm2, %v2430_v22, %v2238_v14  ;;  %v1851_v54 = vmul.f32 %v1755_v2, %v1371_v10  ;;  %v1469_v61 = vmul.f32 2.7557319e-06, %v1373_v5  ;;  %v1863_v41 = vmul.f32 %v1767_v0, %v1383_v49 }
 0x142   : > { %v2538_v57 = vsel %vm2346_vm3, %v2442_v24, %v2250_v46  ;;  %v1385_v15 = vmul.f32 %v6541_v63, %v6541_v63  ;;  %v484_v50 = vadd.f32 %v6534_v52, %v356_v23  ;;  %v496_v42 = vadd.f32 %v6539_v51, %v368_v55 }
 0x143   : > { %v2622_v48 = vpack.c.bf16 %v2538_v57, %v2526_v36  ;;  %v1947_v13 = vadd.f32 -0.16666667, %v1851_v54  ;;  %v1565_v47 = vadd.f32 -0.0001984127, %v1469_v61  ;;  %v1959_v25 = vadd.f32 -0.16666667, %v1863_v41 }
 0x144   : > { %v1481_v33 = vmul.f32 2.7557319e-06, %v1385_v15  ;;  %v580_v38 = vmul.f32 0.15915494, %v484_v50  ;;  %v358_v56 = vmul.f32 %v6157_v18, %v6517_v37  ;;  %vm2331_vm4 = vcmp.lt.f32.partialorder %v6497_v29, 0.0 }
 0x145   : > { %2785 = vmatprep.subr.bf16.mxu1 %v2622_v48  ;;  %v2043_v17 = vmul.f32 %v1947_v13, %v1371_v10  ;;  %v1661_v7 = vmul.f32 %v1565_v47, %v1373_v5  ;;  %v592_v45 = vmul.f32 0.15915494, %v496_v42  ;;  %v370_v60 = vmul.f32 %v6157_v18, %v6521_v62 }
 0x146   : > { %v2055_v59 = vmul.f32 %v1959_v25, %v1383_v49  ;;  %v1577_v14 = vadd.f32 -0.0001984127, %v1481_v33  ;;  %v676_v6 = vadd.f32 0.5, %v580_v38  ;;  %v486_v30 = vadd.f32 %v6534_v52, %v358_v56 }
 0x147   : > { %v2139_v46 = vadd.f32 1.0, %v2043_v17  ;;  %v1757_v32 = vadd.f32 0.008333333, %v1661_v7  ;;  %v688_v16 = vadd.f32 0.5, %v592_v45  ;;  %v498_v22 = vadd.f32 %v6539_v51, %v370_v60 }
 0x148   : > { %v2151_v2 = vadd.f32 1.0, %v2055_v59  ;;  %v1673_v24 = vmul.f32 %v1577_v14, %v1385_v15  ;;  %v772_v10 = vfloor.f32 %v676_v6  ;;  %v582_v0 = vmul.f32 0.15915494, %v486_v30 }
 0x149   : > { %v2235_v23 = vmul.f32 %v2139_v46, %v6505_v8  ;;  %v1853_v36 = vmul.f32 %v1757_v32, %v1373_v5  ;;  %v784_v54 = vfloor.f32 %v688_v16  ;;  %v594_v61 = vmul.f32 0.15915494, %v498_v22 }
 0x14a   : > { %v2247_v18 = vmul.f32 %v2151_v2, %v6507_v27  ;;  %v1769_v49 = vadd.f32 0.008333333, %v1673_v24  ;;  %v868_v55 = vmul.f32 6.2831855, %v772_v10  ;;  %v678_v57 = vadd.f32 0.5, %v582_v0 }
 0x14b   : > { %v2427_v41 = vsub.f32 0.0, %v2235_v23  ;;  %v1949_v48 = vadd.f32 -0.16666667, %v1853_v36  ;;  %v880_v13 = vmul.f32 6.2831855, %v784_v54  ;;  %v690_v47 = vadd.f32 0.5, %v594_v61 }
 0x14c   : > { %v2439_v25 = vsub.f32 0.0, %v2247_v18  ;;  %v1865_v33 = vmul.f32 %v1769_v49, %v1385_v15  ;;  %v6562_v38 = vsub.f32 %v484_v50, %v868_v55  ;;  %v774_v56 = vfloor.f32 %v678_v57 }
 0x14d   : > { %vm2343_vm5 = vcmp.lt.f32.partialorder %v6499_v3, 0.0  ;;  %v2045_v8 = vmul.f32 %v1949_v48, %v1373_v5  ;;  %v6565_v17 = vsub.f32 %v496_v42, %v880_v13  ;;  %v786_v7 = vfloor.f32 %v690_v47 }
 0x14e   : > { %v2523_v27 = vsel %vm2331_vm4, %v2427_v41, %v2235_v23  ;;  %v2535_v45 = vsel %vm2343_vm5, %v2439_v25, %v2247_v18  ;;  %v1961_v60 = vadd.f32 -0.16666667, %v1865_v33  ;;  %v1060_v59 = vand.u32 2147483647, %v6562_v38 }
 0x14f   : > { %v2619_v14 = vpack.c.bf16 %v2535_v45, %v2523_v27  ;;  %v2141_v6 = vadd.f32 1.0, %v2045_v8  ;;  %vm2333_vm6 = vcmp.lt.f32.partialorder %v6511_v4, 0.0  ;;  %v1072_v50 = vand.u32 2147483647, %v6565_v17 }
 0x150   : > { %v2057_v46 = vmul.f32 %v1961_v60, %v1385_v15  ;;  %v1156_v32 = vsub.f32 3.1415927, %v1060_v59  ;;  %v870_v3 = vmul.f32 6.2831855, %v774_v56  ;;  %v882_v5 = vmul.f32 6.2831855, %v786_v7 }
 0x151   : > { %2713 = vmatpush1.bf16.msra.mxu0 %v2619_v14  ;;  %v2237_v42 = vmul.f32 %v2141_v6, %v6531_v40  ;;  %v1168_v16 = vsub.f32 3.1415927, %v1072_v50  ;;  %v355_v29 = vmul.f32 %v6161_v19, %v6517_v37  ;;  %v367_v2 = vmul.f32 %v6161_v19, %v6521_v62 }
 0x152   : > { %v2153_v24 = vadd.f32 1.0, %v2057_v46  ;;  %v6577_v10 = vmin.f32 %v1060_v59, %v1156_v32  ;;  %v6579_v0 = vsub.f32 %v486_v30, %v870_v3  ;;  %v6581_v23 = vsub.f32 %v498_v22, %v882_v5 }
 0x153   : > { %v2429_v15 = vsub.f32 0.0, %v2237_v42  ;;  %v6583_v36 = vmin.f32 %v1072_v50, %v1168_v16  ;;  %v483_v54 = vadd.f32 %v6534_v52, %v355_v29  ;;  %v495_v40 = vadd.f32 %v6539_v51, %v367_v2 }
 0x154   : > { %v2249_v61 = vmul.f32 %v2153_v24, %v6541_v63  ;;  %v1348_v18 = vmul.f32 %v6577_v10, %v6577_v10  ;;  %v1062_v19 = vand.u32 2147483647, %v6579_v0  ;;  %v1074_v49 = vand.u32 2147483647, %v6581_v23 }
 0x155   : > { %vm2345_vm7 = vcmp.lt.f32.partialorder %v6523_v12, 0.0  ;;  %v2525_v30 = vsel %vm2333_vm6, %v2429_v15, %v2237_v42  ;;  %v1360_v22 = vmul.f32 %v6583_v36, %v6583_v36  ;;  %v317_v55 = vsub.s32 5, %v6144_v11 }
 0x156   : > { %v2441_v57 = vsub.f32 0.0, %v2249_v61  ;;  %v1444_v41 = vmul.f32 2.7557319e-06, %v1348_v18  ;;  %v1158_v63 = vsub.f32 3.1415927, %v1062_v19  ;;  %v357_v48 = vmul.f32 %v6165_v20, %v6517_v37 }
 0x157   : > { %v1456_v13 = vmul.f32 2.7557319e-06, %v1360_v22  ;;  %v1170_v47 = vsub.f32 3.1415927, %v1074_v49  ;;  %v579_v25 = vmul.f32 0.15915494, %v483_v54  ;;  %v369_v12 = vmul.f32 %v6165_v20, %v6521_v62 }
 0x158   : > { %v2537_v33 = vsel %vm2345_vm7, %v2441_v57, %v2249_v61  ;;  %v1540_v4 = vadd.f32 -0.0001984127, %v1444_v41  ;;  %v6602_v56 = vmin.f32 %v1062_v19, %v1158_v63  ;;  %v591_v8 = vmul.f32 0.15915494, %v495_v40 }
 0x159   : > { %v2621_v7 = vpack.c.bf16 %v2537_v33, %v2525_v30  ;;  %v1552_v27 = vadd.f32 -0.0001984127, %v1456_v13  ;;  %v6604_v45 = vmin.f32 %v1074_v49, %v1170_v47  ;;  %v675_v60 = vadd.f32 0.5, %v579_v25 }
 0x15a   : > { %v1636_v59 = vmul.f32 %v1540_v4, %v1348_v18  ;;  %v1350_v14 = vmul.f32 %v6602_v56, %v6602_v56  ;;  %v687_v6 = vadd.f32 0.5, %v591_v8  ;;  %v485_v50 = vadd.f32 %v6534_v52, %v357_v48 }
 0x15b   : > { %2786 = vmatpush1.bf16.msra.mxu1 %v2621_v7  ;;  %v1648_v46 = vmul.f32 %v1552_v27, %v1360_v22  ;;  %v1362_v20 = vmul.f32 %v6604_v45, %v6604_v45  ;;  %v771_v32 = vfloor.f32 %v675_v60  ;;  %v497_v3 = vadd.f32 %v6539_v51, %v369_v12 }
 0x15c   : > { %v1732_v5 = vadd.f32 0.008333333, %v1636_v59  ;;  %v1446_v42 = vmul.f32 2.7557319e-06, %v1350_v14  ;;  %v783_v16 = vfloor.f32 %v687_v6  ;;  %v581_v29 = vmul.f32 0.15915494, %v485_v50 }
 0x15d   : > { %v1744_v2 = vadd.f32 0.008333333, %v1648_v46  ;;  %v1458_v24 = vmul.f32 2.7557319e-06, %v1362_v20  ;;  %v867_v15 = vmul.f32 6.2831855, %v771_v32 }
 0x15e   : > { %v1828_v61 = vmul.f32 %v1732_v5, %v1348_v18  ;;  %v1542_v19 = vadd.f32 -0.0001984127, %v1446_v42  ;;  %v879_v49 = vmul.f32 6.2831855, %v783_v16  ;;  %v593_v30 = vmul.f32 0.15915494, %v497_v3 }
 0x15f   : > { %v1840_v57 = vmul.f32 %v1744_v2, %v1360_v22  ;;  %v1554_v41 = vadd.f32 -0.0001984127, %v1458_v24  ;;  %v6612_v63 = vsub.f32 %v483_v54, %v867_v15  ;;  %v677_v48 = vadd.f32 0.5, %v581_v29  ;;  %v6621_v54 = vld [vmem:[%s6106_s18] sm:$0xff] }
 0x160   : > { %v1924_v13 = vadd.f32 -0.16666667, %v1828_v61  ;;  %v1638_v47 = vmul.f32 %v1542_v19, %v1350_v14  ;;  %v6614_v25 = vsub.f32 %v495_v40, %v879_v49  ;;  %v689_v12 = vadd.f32 0.5, %v593_v30 }
 0x161   : > { %v1936_v33 = vadd.f32 -0.16666667, %v1840_v57  ;;  %vm2308_vm8 = vcmp.lt.f32.partialorder %v6562_v38, 0.0  ;;  %v1650_v4 = vmul.f32 %v1554_v41, %v1362_v20  ;;  %v1059_v8 = vand.u32 2147483647, %v6612_v63 }
 0x162   : > { %v2020_v7 = vmul.f32 %v1924_v13, %v1348_v18  ;;  %vm2320_vm9 = vcmp.lt.f32.partialorder %v6565_v17, 0.0  ;;  %v1734_v27 = vadd.f32 0.008333333, %v1638_v47  ;;  %v1071_v60 = vand.u32 2147483647, %v6614_v25 }
 0x163   : > { %v6624_v59 = vrot.slane %v6621_v54, %v317_v55  ;;  %v2032_v40 = vmul.f32 %v1936_v33, %v1360_v22  ;;  %v1746_v6 = vadd.f32 0.008333333, %v1650_v4  ;;  %v1155_v46 = vsub.f32 3.1415927, %v1059_v8 }
 0x164   : > { %v773_v32 = vfloor.f32 %v677_v48  ;;  %v2116_v5 = vadd.f32 1.0, %v2020_v7  ;;  %v1830_v42 = vmul.f32 %v1734_v27, %v1350_v14  ;;  %v1167_v16 = vsub.f32 3.1415927, %v1071_v60 }
 0x165   : > { %v785_v29 = vfloor.f32 %v689_v12  ;;  %v2128_v2 = vadd.f32 1.0, %v2032_v40  ;;  %v1842_v18 = vmul.f32 %v1746_v6, %v1362_v20  ;;  %v6626_v24 = vmin.f32 %v1059_v8, %v1155_v46 }
 0x166   : > { %v869_v15 = vmul.f32 6.2831855, %v773_v32  ;;  %v2212_v61 = vmul.f32 %v2116_v5, %v6577_v10  ;;  %v1926_v19 = vadd.f32 -0.16666667, %v1830_v42  ;;  %v6629_v49 = vmin.f32 %v1071_v60, %v1167_v16 }
 0x167   : > { %v881_v55 = vmul.f32 6.2831855, %v785_v29  ;;  %v2224_v22 = vmul.f32 %v2128_v2, %v6583_v36  ;;  %v1938_v30 = vadd.f32 -0.16666667, %v1842_v18  ;;  %v1347_v57 = vmul.f32 %v6626_v24, %v6626_v24 }
 0x168   : > { %v6634_v41 = vsub.f32 %v485_v50, %v869_v15  ;;  %v2404_v48 = vsub.f32 0.0, %v2212_v61  ;;  %v2022_v13 = vmul.f32 %v1926_v19, %v1350_v14  ;;  %v1359_v47 = vmul.f32 %v6629_v49, %v6629_v49 }
 0x169   : > { %v6638_v12 = vsub.f32 %v497_v3, %v881_v55  ;;  %v2416_v10 = vsub.f32 0.0, %v2224_v22  ;;  %v2034_v33 = vmul.f32 %v1938_v30, %v1362_v20  ;;  %v1443_v4 = vmul.f32 2.7557319e-06, %v1347_v57 }
 0x16a   : > { %v1061_v8 = vand.u32 2147483647, %v6634_v41  ;;  %v2500_v36 = vsel %vm2308_vm8, %v2404_v48, %v2212_v61  ;;  %v2118_v7 = vadd.f32 1.0, %v2022_v13  ;;  %v1455_v27 = vmul.f32 2.7557319e-06, %v1359_v47 }
 0x16b   : > { %v1073_v50 = vand.u32 2147483647, %v6638_v12  ;;  %v2512_v14 = vsel %vm2320_vm9, %v2416_v10, %v2224_v22  ;;  %v2130_v60 = vadd.f32 1.0, %v2034_v33  ;;  %v1539_v40 = vadd.f32 -0.0001984127, %v1443_v4 }
 0x16c   : > { %v1157_v6 = vsub.f32 3.1415927, %v1061_v8  ;;  %v2608_v3 = vpack.c.bf16 %v2512_v14, %v2500_v36  ;;  %v2214_v46 = vmul.f32 %v2118_v7, %v6602_v56  ;;  %v1551_v20 = vadd.f32 -0.0001984127, %v1455_v27 }
 0x16d   : > { %v1169_v32 = vsub.f32 3.1415927, %v1073_v50  ;;  %v2226_v5 = vmul.f32 %v2130_v60, %v6604_v45  ;;  %vm2310_vm10 = vcmp.lt.f32.partialorder %v6579_v0, 0.0  ;;  %v1635_v38 = vmul.f32 %v1539_v40, %v1347_v57 }
 0x16e   : > { %v6649_v42 = vmin.f32 %v1061_v8, %v1157_v6  ;;  %2714 = vmatprep.subr.bf16.mxu0 %v2608_v3  ;;  %vm2322_vm11 = vcmp.lt.f32.partialorder %v6581_v23, 0.0  ;;  %v2406_v17 = vsub.f32 0.0, %v2214_v46  ;;  %v1647_v16 = vmul.f32 %v1551_v20, %v1359_v47 }
 0x16f   : > { %v6652_v29 = vmin.f32 %v1073_v50, %v1169_v32  ;;  %v2418_v2 = vsub.f32 0.0, %v2226_v5  ;;  %v1731_v18 = vadd.f32 0.008333333, %v1635_v38  ;;  %v432_v45 = vmul.f32 %v6624_v59, %v6167_v21 }
 0x170   : > { %v1349_v56 = vmul.f32 %v6649_v42, %v6649_v42  ;;  %v2502_v15 = vsel %vm2310_vm10, %v2406_v17, %v2214_v46  ;;  %v1743_v0 = vadd.f32 0.008333333, %v1647_v16  ;;  %v444_v23 = vmul.f32 %v6624_v59, %v6187_v44 }
 0x171   : > { %v1361_v61 = vmul.f32 %v6652_v29, %v6652_v29  ;;  %v2514_v19 = vsel %vm2322_vm11, %v2418_v2, %v2226_v5  ;;  %v1827_v55 = vmul.f32 %v1731_v18, %v1347_v57  ;;  %v560_v30 = vadd.f32 %v6177_v26, %v432_v45 }
 0x172   : > { %v1445_v22 = vmul.f32 2.7557319e-06, %v1349_v56  ;;  %v2610_v48 = vpack.c.bf16 %v2514_v19, %v2502_v15  ;;  %v1839_v13 = vmul.f32 %v1743_v0, %v1359_v47  ;;  %v572_v33 = vadd.f32 %v6185_v39, %v444_v23 }
 0x173   : > { %v1457_v10 = vmul.f32 2.7557319e-06, %v1361_v61  ;;  %v1923_v4 = vadd.f32 -0.16666667, %v1827_v55  ;;  %v656_v36 = vmul.f32 0.15915494, %v560_v30 }
 0x174   : > { %v1541_v8 = vadd.f32 -0.0001984127, %v1445_v22  ;;  %2787 = vmatprep.subr.bf16.mxu1 %v2610_v48  ;;  %v1935_v7 = vadd.f32 -0.16666667, %v1839_v13  ;;  %v668_v50 = vmul.f32 0.15915494, %v572_v33 }
 0x175   : > { %v1553_v27 = vadd.f32 -0.0001984127, %v1457_v10  ;;  %v2019_v14 = vmul.f32 %v1923_v4, %v1347_v57  ;;  %vm2307_vm12 = vcmp.lt.f32.partialorder %v6612_v63, 0.0  ;;  %v752_v40 = vadd.f32 0.5, %v656_v36  ;;  %v2595_v48 = vld [vmem:[%s9966_s2] sm:$0xff] }
 0x176   : > { %v1637_v60 = vmul.f32 %v1541_v8, %v1349_v56  ;;  %v325_v6 = vsub.s32 7, %v6144_v11  ;;  %v2031_v3 = vmul.f32 %v1935_v7, %v1359_v47  ;;  %vm2319_vm13 = vcmp.lt.f32.partialorder %v6614_v25, 0.0 }
 0x177   : > { %v1649_v46 = vmul.f32 %v1553_v27, %v1361_v61  ;;  %v764_v20 = vadd.f32 0.5, %v668_v50  ;;  %v2115_v32 = vadd.f32 1.0, %v2019_v14  ;;  %v848_v38 = vfloor.f32 %v752_v40 }
 0x178   : > { %v1733_v5 = vadd.f32 0.008333333, %v1637_v60  ;;  %v6668_v17 = vrot.slane %v6621_v54, %v325_v6  ;;  %v2127_v16 = vadd.f32 1.0, %v2031_v3  ;;  %v313_v18 = vsub.s32 4, %v6144_v11 }
 0x179   : > { %v1745_v2 = vadd.f32 0.008333333, %v1649_v46  ;;  %v860_v57 = vfloor.f32 %v764_v20  ;;  %v2211_v45 = vmul.f32 %v2115_v32, %v6626_v24  ;;  %v944_v0 = vmul.f32 6.2831855, %v848_v38  ;;  %v2596_v24 = vld [vmem:[%s9966_s2 + $0x8] sm:$0xff] }
 0x17a   : > { %v1829_v15 = vmul.f32 %v1733_v5, %v1349_v56  ;;  %v434_v47 = vmul.f32 %v6668_v17, %v6167_v21  ;;  %v2223_v23 = vmul.f32 %v2127_v16, %v6629_v49  ;;  %v446_v22 = vmul.f32 %v6668_v17, %v6187_v44 }
 0x17b   : > { %v1841_v19 = vmul.f32 %v1745_v2, %v1361_v61  ;;  %v956_v55 = vmul.f32 6.2831855, %v860_v57  ;;  %v2403_v13 = vsub.f32 0.0, %v2211_v45  ;;  %v6683_v4 = vsub.f32 %v560_v30, %v944_v0 }
 0x17c   : > { %v1925_v10 = vadd.f32 -0.16666667, %v1829_v15  ;;  %v562_v8 = vadd.f32 %v6177_v26, %v434_v47  ;;  %v2415_v49 = vsub.f32 0.0, %v2223_v23  ;;  %vm2309_vm14 = vcmp.lt.f32.partialorder %v6634_v41, 0.0 }
 0x17d   : > { %v1937_v36 = vadd.f32 -0.16666667, %v1841_v19  ;;  %v6687_v7 = vsub.f32 %v572_v33, %v956_v55  ;;  %v574_v27 = vadd.f32 %v6185_v39, %v446_v22  ;;  %vm2321_vm15 = vcmp.lt.f32.partialorder %v6638_v12, 0.0 }
 0x17e   : > { %v2021_v50 = vmul.f32 %v1925_v10, %v1349_v56  ;;  %v1136_v14 = vand.u32 2147483647, %v6683_v4  ;;  %v6692_v60 = vpack.c.bf16 %v2596_v24, %v2595_v48  ;;  %vm2687_vm0 = vcmask 523264  }
 0x17f   : > { %v2499_v30 = vsel %vm2307_vm12, %v2403_v13, %v2211_v45  ;;  %v2511_v40 = vsel %vm2319_vm13, %v2415_v49, %v2223_v23  ;;  %v2033_v6 = vmul.f32 %v1937_v36, %v1361_v61  ;;  %v1148_v33 = vand.u32 2147483647, %v6687_v7 }
 0x180   : > { %v2607_v3 = vpack.c.bf16 %v2511_v40, %v2499_v30  ;;  %v2117_v46 = vadd.f32 1.0, %v2021_v50  ;;  %v1232_v20 = vsub.f32 3.1415927, %v1136_v14  ;;  %v658_v56 = vmul.f32 0.15915494, %v562_v8 }
 0x181   : > { %v2129_v32 = vadd.f32 1.0, %v2033_v6  ;;  %v1244_v5 = vsub.f32 3.1415927, %v1148_v33  ;;  %v670_v38 = vmul.f32 0.15915494, %v574_v27  ;;  %v6700_v16 = vrot.slane %v6621_v54, %v313_v18 }
 0x182   : > { %2715 = vmatpush1.bf16.msra.mxu0 %v2607_v3  ;;  %v2213_v63 = vmul.f32 %v2117_v46, %v6649_v42  ;;  %v6703_v2 = vmin.f32 %v1136_v14, %v1232_v20  ;;  %v754_v25 = vadd.f32 0.5, %v658_v56  ;;  %v321_v61 = vsub.s32 6, %v6144_v11 }
 0x183   : > { %v2225_v57 = vmul.f32 %v2129_v32, %v6652_v29  ;;  %v6707_v45 = vmin.f32 %v1148_v33, %v1244_v5  ;;  %v766_v15 = vadd.f32 0.5, %v670_v38  ;;  %v431_v0 = vmul.f32 %v6700_v16, %v6167_v21 }
 0x184   : > { %v2405_v47 = vsub.f32 0.0, %v2213_v63  ;;  %v1424_v18 = vmul.f32 %v6703_v2, %v6703_v2  ;;  %v850_v23 = vfloor.f32 %v754_v25  ;;  %v443_v42 = vmul.f32 %v6700_v16, %v6187_v44 }
 0x185   : > { %v2417_v19 = vsub.f32 0.0, %v2225_v57  ;;  %v1436_v55 = vmul.f32 %v6707_v45, %v6707_v45  ;;  %v862_v22 = vfloor.f32 %v766_v15  ;;  %5769 = vmatmul.mubr.msk.bf16.vlgmr.msra.gmra.mxu0 %vm2687_vm0, %v6692_v60  ;;  %v559_v29 = vadd.f32 %v6177_v26, %v431_v0 }
 0x186   : > { %v2501_v48 = vsel %vm2309_vm14, %v2405_v47, %v2213_v63  ;;  %v1520_v24 = vmul.f32 2.7557319e-06, %v1424_v18  ;;  %v946_v13 = vmul.f32 6.2831855, %v850_v23  ;;  %v571_v10 = vadd.f32 %v6185_v39, %v443_v42  ;;  %2742 = vmatprep.mubr.bf16.mxu0 %v9977_v1 }
 0x187   : > { %v2513_v49 = vsel %vm2321_vm15, %v2417_v19, %v2225_v57  ;;  %v1532_v36 = vmul.f32 2.7557319e-06, %v1436_v55  ;;  %v958_v50 = vmul.f32 6.2831855, %v862_v22  ;;  %v655_v14 = vmul.f32 0.15915494, %v559_v29 }
 0x188   : > { %v2609_v30 = vpack.c.bf16 %v2513_v49, %v2501_v48  ;;  %v1616_v40 = vadd.f32 -0.0001984127, %v1520_v24  ;;  %v6726_v6 = vsub.f32 %v562_v8, %v946_v13  ;;  %v667_v33 = vmul.f32 0.15915494, %v571_v10 }
 0x189   : > { %v1628_v3 = vadd.f32 -0.0001984127, %v1532_v36  ;;  %v6728_v41 = vsub.f32 %v574_v27, %v958_v50  ;;  %v751_v46 = vadd.f32 0.5, %v655_v14  ;;  %v6731_v20 = vrot.slane %v6621_v54, %v321_v61 }
 0x18a   : > { %2788 = vmatpush1.bf16.msra.mxu1 %v2609_v30  ;;  %v1712_v56 = vmul.f32 %v1616_v40, %v1424_v18  ;;  %v1138_v12 = vand.u32 2147483647, %v6726_v6  ;;  %v763_v32 = vadd.f32 0.5, %v667_v33  ;;  %vm2384_vm1 = vcmp.lt.f32.partialorder %v6683_v4, 0.0 }
 0x18b   : > { %v1724_v5 = vmul.f32 %v1628_v3, %v1436_v55  ;;  %v1150_v38 = vand.u32 2147483647, %v6728_v41  ;;  %v847_v63 = vfloor.f32 %v751_v46  ;;  %v433_v27 = vmul.f32 %v6731_v20, %v6167_v21 }
 0x18c   : > { %v1808_v25 = vadd.f32 0.008333333, %v1712_v56  ;;  %v1234_v8 = vsub.f32 3.1415927, %v1138_v12  ;;  %v859_v57 = vfloor.f32 %v763_v32  ;;  %v445_v61 = vmul.f32 %v6731_v20, %v6187_v44 }
 0x18d   : > { %v1820_v15 = vadd.f32 0.008333333, %v1724_v5  ;;  %v1246_v0 = vsub.f32 3.1415927, %v1150_v38  ;;  %5773 = vmatmul.mubr.msk.bf16.vlgmr.msra.gmra.mxu1 %vm2687_vm0, %v6692_v60  ;;  %v943_v54 = vmul.f32 6.2831855, %v847_v63  ;;  %v561_v19 = vadd.f32 %v6177_v26, %v433_v27 }
 0x18e   : > { %v1904_v47 = vmul.f32 %v1808_v25, %v1424_v18  ;;  %v6741_v23 = vmin.f32 %v1138_v12, %v1234_v8  ;;  %v955_v42 = vmul.f32 6.2831855, %v859_v57  ;;  %2815 = vmatprep.mubr.bf16.mxu1 %v9977_v1  ;;  %v573_v13 = vadd.f32 %v6185_v39, %v445_v61 }
 0x18f   : > { %v1916_v22 = vmul.f32 %v1820_v15, %v1436_v55  ;;  %v6745_v48 = vmin.f32 %v1150_v38, %v1246_v0  ;;  %v6747_v24 = vsub.f32 %v559_v29, %v943_v54  ;;  %v657_v14 = vmul.f32 0.15915494, %v561_v19 }
 0x190   : > { %v2000_v49 = vadd.f32 -0.16666667, %v1904_v47  ;;  %v1426_v36 = vmul.f32 %v6741_v23, %v6741_v23  ;;  %v6752_v50 = vsub.f32 %v571_v10, %v955_v42  ;;  %v408_v3 = vmul.f32 %v6624_v59, %v6229_v43 }
 0x191   : > { %v2012_v30 = vadd.f32 -0.16666667, %v1916_v22  ;;  %v1438_v40 = vmul.f32 %v6745_v48, %v6745_v48  ;;  %v1135_v33 = vand.u32 2147483647, %v6747_v24  ;;  %v669_v5 = vmul.f32 0.15915494, %v573_v13 }
 0x192   : > { %v2096_v29 = vmul.f32 %v2000_v49, %v1424_v18  ;;  %v1522_v46 = vmul.f32 2.7557319e-06, %v1426_v36  ;;  %v1147_v56 = vand.u32 2147483647, %v6752_v50  ;;  %v753_v8 = vadd.f32 0.5, %v657_v14 }
 0x193   : > { %v2108_v12 = vmul.f32 %v2012_v30, %v1436_v55  ;;  %v1534_v32 = vmul.f32 2.7557319e-06, %v1438_v40  ;;  %v1231_v10 = vsub.f32 3.1415927, %v1135_v33  ;;  %v765_v0 = vadd.f32 0.5, %v669_v5 }
 0x194   : > { %v2192_v38 = vadd.f32 1.0, %v2096_v29  ;;  %v1618_v63 = vadd.f32 -0.0001984127, %v1522_v46  ;;  %v1243_v25 = vsub.f32 3.1415927, %v1147_v56  ;;  %v849_v47 = vfloor.f32 %v753_v8 }
 0x195   : > { %v2204_v57 = vadd.f32 1.0, %v2108_v12  ;;  %v1630_v27 = vadd.f32 -0.0001984127, %v1534_v32  ;;  %v6761_v15 = vmin.f32 %v1135_v33, %v1231_v10  ;;  %v861_v49 = vfloor.f32 %v765_v0 }
 0x196   : > { %v2288_v18 = vmul.f32 %v2192_v38, %v6703_v2  ;;  %v1714_v54 = vmul.f32 %v1618_v63, %v1426_v36  ;;  %v6764_v61 = vmin.f32 %v1147_v56, %v1243_v25  ;;  %v945_v29 = vmul.f32 6.2831855, %v849_v47 }
 0x197   : > { %v2300_v55 = vmul.f32 %v2204_v57, %v6707_v45  ;;  %v1726_v42 = vmul.f32 %v1630_v27, %v1438_v40  ;;  %v1423_v22 = vmul.f32 %v6761_v15, %v6761_v15  ;;  %vm2396_vm2 = vcmp.lt.f32.partialorder %v6687_v7, 0.0 }
 0x198   : > { %v2480_v30 = vsub.f32 0.0, %v2288_v18  ;;  %v1810_v14 = vadd.f32 0.008333333, %v1714_v54  ;;  %v1435_v33 = vmul.f32 %v6764_v61, %v6764_v61  ;;  %v957_v10 = vmul.f32 6.2831855, %v861_v49 }
 0x199   : > { %v2492_v2 = vsub.f32 0.0, %v2300_v55  ;;  %v1822_v46 = vadd.f32 0.008333333, %v1726_v42  ;;  %v1519_v56 = vmul.f32 2.7557319e-06, %v1423_v22  ;;  %v6774_v25 = vsub.f32 %v561_v19, %v945_v29 }
 0x19a   : > { %v2576_v12 = vsel %vm2384_vm1, %v2480_v30, %v2288_v18  ;;  %v1906_v45 = vmul.f32 %v1810_v14, %v1426_v36  ;;  %v1531_v32 = vmul.f32 2.7557319e-06, %v1435_v33  ;;  %v6776_v0 = vsub.f32 %v573_v13, %v957_v10 }
 0x19b   : > { %v2588_v5 = vsel %vm2396_vm2, %v2492_v2, %v2300_v55  ;;  %v1918_v38 = vmul.f32 %v1822_v46, %v1438_v40  ;;  %v1615_v63 = vadd.f32 -0.0001984127, %v1519_v56  ;;  %vm2386_vm3 = vcmp.lt.f32.partialorder %v6726_v6, 0.0 }
 0x19c   : > { %v2648_v8 = vpack.c.bf16 %v2588_v5, %v2576_v12  ;;  %v2002_v57 = vadd.f32 -0.16666667, %v1906_v45  ;;  %v1627_v27 = vadd.f32 -0.0001984127, %v1531_v32  ;;  %v1137_v4 = vand.u32 2147483647, %v6774_v25 }
 0x19d   : > { %v2014_v7 = vadd.f32 -0.16666667, %v1918_v38  ;;  %v1711_v54 = vmul.f32 %v1615_v63, %v1423_v22  ;;  %vm2398_vm4 = vcmp.lt.f32.partialorder %v6728_v41, 0.0  ;;  %v1149_v55 = vand.u32 2147483647, %v6776_v0 }
 0x19e   : > { %2854 = vmatprep.subr.bf16.mxu0 %v2648_v8  ;;  %v2098_v18 = vmul.f32 %v2002_v57, %v1426_v36  ;;  %v1723_v47 = vmul.f32 %v1627_v27, %v1435_v33  ;;  %v420_v19 = vmul.f32 %v6624_v59, %v6203_v58  ;;  %v1233_v13 = vsub.f32 3.1415927, %v1137_v4 }
 0x19f   : > { %v2110_v42 = vmul.f32 %v2014_v7, %v1438_v40  ;;  %v1807_v49 = vadd.f32 0.008333333, %v1711_v54  ;;  %v536_v30 = vadd.f32 %v6183_v31, %v408_v3  ;;  %v1245_v2 = vsub.f32 3.1415927, %v1149_v55 }
 0x1a0   : > { %v2194_v14 = vadd.f32 1.0, %v2098_v18  ;;  %v1819_v29 = vadd.f32 0.008333333, %v1723_v47  ;;  %v548_v46 = vadd.f32 %v6299_v34, %v420_v19  ;;  %v6786_v12 = vmin.f32 %v1137_v4, %v1233_v13 }
 0x1a1   : > { %v2206_v56 = vadd.f32 1.0, %v2110_v42  ;;  %v1903_v36 = vmul.f32 %v1807_v49, %v1423_v22  ;;  %v632_v45 = vmul.f32 0.15915494, %v536_v30  ;;  %v6789_v5 = vmin.f32 %v1149_v55, %v1245_v2 }
 0x1a2   : > { %v2290_v32 = vmul.f32 %v2194_v14, %v6741_v23  ;;  %v1915_v10 = vmul.f32 %v1819_v29, %v1435_v33  ;;  %v644_v40 = vmul.f32 0.15915494, %v548_v46  ;;  %v1425_v3 = vmul.f32 %v6786_v12, %v6786_v12 }
 0x1a3   : > { %v2302_v38 = vmul.f32 %v2206_v56, %v6745_v48  ;;  %v1999_v63 = vadd.f32 -0.16666667, %v1903_v36  ;;  %v728_v8 = vadd.f32 0.5, %v632_v45  ;;  %v1437_v7 = vmul.f32 %v6789_v5, %v6789_v5 }
 0x1a4   : > { %v2482_v57 = vsub.f32 0.0, %v2290_v32  ;;  %v2011_v27 = vadd.f32 -0.16666667, %v1915_v10  ;;  %v740_v54 = vadd.f32 0.5, %v644_v40  ;;  %v1521_v23 = vmul.f32 2.7557319e-06, %v1425_v3 }
 0x1a5   : > { %v2494_v4 = vsub.f32 0.0, %v2302_v38  ;;  %v2095_v18 = vmul.f32 %v1999_v63, %v1423_v22  ;;  %v824_v47 = vfloor.f32 %v728_v8  ;;  %v1533_v48 = vmul.f32 2.7557319e-06, %v1437_v7 }
 0x1a6   : > { %v2578_v55 = vsel %vm2386_vm3, %v2482_v57, %v2290_v32  ;;  %v2107_v19 = vmul.f32 %v2011_v27, %v1435_v33  ;;  %v836_v42 = vfloor.f32 %v740_v54  ;;  %v1617_v14 = vadd.f32 -0.0001984127, %v1521_v23 }
 0x1a7   : > { %v2590_v49 = vsel %vm2398_vm4, %v2494_v4, %v2302_v38  ;;  %v2191_v13 = vadd.f32 1.0, %v2095_v18  ;;  %v920_v29 = vmul.f32 6.2831855, %v824_v47  ;;  %v1629_v36 = vadd.f32 -0.0001984127, %v1533_v48 }
 0x1a8   : > { %v2650_v2 = vpack.c.bf16 %v2590_v49, %v2578_v55  ;;  %v2203_v56 = vadd.f32 1.0, %v2107_v19  ;;  %v932_v45 = vmul.f32 6.2831855, %v836_v42  ;;  %v1713_v10 = vmul.f32 %v1617_v14, %v1425_v3 }
 0x1a9   : > { %v2287_v22 = vmul.f32 %v2191_v13, %v6761_v15  ;;  %v6801_v40 = vsub.f32 %v536_v30, %v920_v29  ;;  %v410_v6 = vmul.f32 %v6668_v17, %v6229_v43  ;;  %vm2383_vm5 = vcmp.lt.f32.partialorder %v6747_v24, 0.0 }
 0x1aa   : > { %2927 = vmatprep.subr.bf16.mxu1 %v2650_v2  ;;  %v2299_v33 = vmul.f32 %v2203_v56, %v6764_v61  ;;  %v1725_v41 = vmul.f32 %v1629_v36, %v1437_v7  ;;  %v6807_v32 = vsub.f32 %v548_v46, %v932_v45  ;;  %vm2395_vm6 = vcmp.lt.f32.partialorder %v6752_v50, 0.0 }
 0x1ab   : > { %v2479_v38 = vsub.f32 0.0, %v2287_v22  ;;  %v1809_v63 = vadd.f32 0.008333333, %v1713_v10  ;;  %v1112_v15 = vand.u32 2147483647, %v6801_v40  ;;  %v422_v27 = vmul.f32 %v6668_v17, %v6203_v58 }
 0x1ac   : > { %v2491_v8 = vsub.f32 0.0, %v2299_v33  ;;  %v1821_v30 = vadd.f32 0.008333333, %v1725_v41  ;;  %v1124_v57 = vand.u32 2147483647, %v6807_v32  ;;  %v538_v24 = vadd.f32 %v6183_v31, %v410_v6 }
 0x1ad   : > { %v2575_v54 = vsel %vm2383_vm5, %v2479_v38, %v2287_v22  ;;  %v1905_v61 = vmul.f32 %v1809_v63, %v1425_v3  ;;  %v1208_v4 = vsub.f32 3.1415927, %v1112_v15  ;;  %v550_v50 = vadd.f32 %v6299_v34, %v422_v27 }
 0x1ae   : > { %v2587_v46 = vsel %vm2395_vm6, %v2491_v8, %v2299_v33  ;;  %v1917_v18 = vmul.f32 %v1821_v30, %v1437_v7  ;;  %v1220_v23 = vsub.f32 3.1415927, %v1124_v57  ;;  %v634_v48 = vmul.f32 0.15915494, %v538_v24 }
 0x1af   : > { %v2647_v47 = vpack.c.bf16 %v2587_v46, %v2575_v54  ;;  %v2001_v55 = vadd.f32 -0.16666667, %v1905_v61  ;;  %v6816_v19 = vmin.f32 %v1112_v15, %v1208_v4  ;;  %v646_v13 = vmul.f32 0.15915494, %v550_v50 }
 0x1b0   : > { %v2013_v42 = vadd.f32 -0.16666667, %v1917_v18  ;;  %v6818_v49 = vmin.f32 %v1124_v57, %v1220_v23  ;;  %v407_v14 = vmul.f32 %v6700_v16, %v6229_v43  ;;  %v730_v56 = vadd.f32 0.5, %v634_v48 }
 0x1b1   : > { %2855 = vmatpush1.bf16.msra.mxu0 %v2647_v47  ;;  %v2097_v29 = vmul.f32 %v2001_v55, %v1425_v3  ;;  %v1400_v2 = vmul.f32 %v6816_v19, %v6816_v19  ;;  %v419_v36 = vmul.f32 %v6700_v16, %v6203_v58  ;;  %v742_v10 = vadd.f32 0.5, %v646_v13 }
 0x1b2   : > { %v2109_v45 = vmul.f32 %v2013_v42, %v1437_v7  ;;  %v1412_v22 = vmul.f32 %v6818_v49, %v6818_v49  ;;  %v535_v6 = vadd.f32 %v6183_v31, %v407_v14  ;;  %v826_v38 = vfloor.f32 %v730_v56  ;;  %v6840_v56 = vld [vmem:[%s6106_s18 + $0x8] sm:$0xf] }
 0x1b3   : > { %v2193_v33 = vadd.f32 1.0, %v2097_v29  ;;  %v1496_v41 = vmul.f32 2.7557319e-06, %v1400_v2  ;;  %v547_v63 = vadd.f32 %v6299_v34, %v419_v36  ;;  %v838_v8 = vfloor.f32 %v742_v10 }
 0x1b4   : > { %v2205_v3 = vadd.f32 1.0, %v2109_v45  ;;  %v1508_v15 = vmul.f32 2.7557319e-06, %v1412_v22  ;;  %v631_v30 = vmul.f32 0.15915494, %v535_v6  ;;  %vm2385_vm7 = vcmp.lt.f32.partialorder %v6774_v25, 0.0 }
 0x1b5   : > { %v2289_v57 = vmul.f32 %v2193_v33, %v6786_v12  ;;  %v1592_v27 = vadd.f32 -0.0001984127, %v1496_v41  ;;  %v922_v54 = vmul.f32 6.2831855, %v826_v38  ;;  %v643_v7 = vmul.f32 0.15915494, %v547_v63 }
 0x1b6   : > { %v2301_v61 = vmul.f32 %v2205_v3, %v6789_v5  ;;  %v1604_v4 = vadd.f32 -0.0001984127, %v1508_v15  ;;  %v934_v46 = vmul.f32 6.2831855, %v838_v8  ;;  %v727_v18 = vadd.f32 0.5, %v631_v30 }
 0x1b7   : > { %v2481_v23 = vsub.f32 0.0, %v2289_v57  ;;  %v1688_v47 = vmul.f32 %v1592_v27, %v1400_v2  ;;  %v6832_v55 = vsub.f32 %v538_v24, %v922_v54  ;;  %v739_v48 = vadd.f32 0.5, %v643_v7 }
 0x1b8   : > { %v2493_v42 = vsub.f32 0.0, %v2301_v61  ;;  %v1700_v13 = vmul.f32 %v1604_v4, %v1412_v22  ;;  %v6834_v14 = vsub.f32 %v550_v50, %v934_v46  ;;  %v823_v29 = vfloor.f32 %v727_v18 }
 0x1b9   : > { %vm2397_vm8 = vcmp.lt.f32.partialorder %v6776_v0, 0.0  ;;  %v1784_v12 = vadd.f32 0.008333333, %v1688_v47  ;;  %v1114_v5 = vand.u32 2147483647, %v6832_v55  ;;  %v2577_v36 = vsel %vm2385_vm7, %v2481_v23, %v2289_v57 }
 0x1ba   : > { %v2589_v45 = vsel %vm2397_vm8, %v2493_v42, %v2301_v61  ;;  %v1796_v10 = vadd.f32 0.008333333, %v1700_v13  ;;  %v1126_v24 = vand.u32 2147483647, %v6834_v14  ;;  %v835_v50 = vfloor.f32 %v739_v48 }
 0x1bb   : > { %v2649_v33 = vpack.c.bf16 %v2589_v45, %v2577_v36  ;;  %v1880_v41 = vmul.f32 %v1784_v12, %v1400_v2  ;;  %v1210_v38 = vsub.f32 3.1415927, %v1114_v5  ;;  %v919_v8 = vmul.f32 6.2831855, %v823_v29 }
 0x1bc   : > { %v1892_v3 = vmul.f32 %v1796_v10, %v1412_v22  ;;  %v1222_v15 = vsub.f32 3.1415927, %v1126_v24  ;;  %v409_v25 = vmul.f32 %v6731_v20, %v6229_v43  ;;  %v10347_v0 = vsub.s32 0, %v6144_v11 }
 0x1bd   : > { %2928 = vmatpush1.bf16.msra.mxu1 %v2649_v33  ;;  %v1976_v57 = vadd.f32 -0.16666667, %v1880_v41  ;;  %v6850_v27 = vmin.f32 %v1114_v5, %v1210_v38  ;;  %v931_v54 = vmul.f32 6.2831855, %v835_v50  ;;  %v6854_v4 = vsub.f32 %v535_v6, %v919_v8 }
 0x1be   : > { %v6848_v30 = vrot.slane %v6840_v56, %v10347_v0  ;;  %v1988_v7 = vadd.f32 -0.16666667, %v1892_v3  ;;  %v6852_v61 = vmin.f32 %v1126_v24, %v1222_v15  ;;  %v421_v46 = vmul.f32 %v6731_v20, %v6203_v58 }
 0x1bf   : > { %v2072_v18 = vmul.f32 %v1976_v57, %v1400_v2  ;;  %v1402_v23 = vmul.f32 %v6850_v27, %v6850_v27  ;;  %v6860_v47 = vsub.f32 %v547_v63, %v931_v54  ;;  %v537_v48 = vadd.f32 %v6183_v31, %v409_v25 }
 0x1c0   : > { %v2084_v42 = vmul.f32 %v1988_v7, %v1412_v22  ;;  %v1414_v13 = vmul.f32 %v6852_v61, %v6852_v61  ;;  %v1111_v29 = vand.u32 2147483647, %v6854_v4  ;;  %v549_v6 = vadd.f32 %v6299_v34, %v421_v46 }
 0x1c1   : > { %v2168_v12 = vadd.f32 1.0, %v2072_v18  ;;  %vm2360_vm9 = vcmp.lt.f32.partialorder %v6801_v40, 0.0  ;;  %v1498_v5 = vmul.f32 2.7557319e-06, %v1402_v23  ;;  %v1123_v2 = vand.u32 2147483647, %v6860_v47 }
 0x1c2   : > { %v2180_v36 = vadd.f32 1.0, %v2084_v42  ;;  %vm2372_vm10 = vcmp.lt.f32.partialorder %v6807_v32, 0.0  ;;  %v1510_v63 = vmul.f32 2.7557319e-06, %v1414_v13  ;;  %v1207_v45 = vsub.f32 3.1415927, %v1111_v29 }
 0x1c3   : > { %v2264_v22 = vmul.f32 %v2168_v12, %v6816_v19  ;;  %v1594_v10 = vadd.f32 -0.0001984127, %v1498_v5  ;;  %v1219_v24 = vsub.f32 3.1415927, %v1123_v2  ;;  %v633_v33 = vmul.f32 0.15915494, %v537_v48 }
 0x1c4   : > { %v2276_v41 = vmul.f32 %v2180_v36, %v6818_v49  ;;  %v1606_v38 = vadd.f32 -0.0001984127, %v1510_v63  ;;  %v6872_v50 = vmin.f32 %v1111_v29, %v1207_v45  ;;  %v645_v3 = vmul.f32 0.15915494, %v549_v6 }
 0x1c5   : > { %v2456_v15 = vsub.f32 0.0, %v2264_v22  ;;  %v1690_v8 = vmul.f32 %v1594_v10, %v1402_v23  ;;  %v6874_v25 = vmin.f32 %v1123_v2, %v1219_v24  ;;  %v729_v0 = vadd.f32 0.5, %v633_v33 }
 0x1c6   : > { %v2468_v57 = vsub.f32 0.0, %v2276_v41  ;;  %v1702_v54 = vmul.f32 %v1606_v38, %v1414_v13  ;;  %v1399_v7 = vmul.f32 %v6872_v50, %v6872_v50  ;;  %v741_v19 = vadd.f32 0.5, %v645_v3 }
 0x1c7   : > { %v2552_v46 = vsel %vm2360_vm9, %v2456_v15, %v2264_v22  ;;  %v1786_v18 = vadd.f32 0.008333333, %v1690_v8  ;;  %v1411_v49 = vmul.f32 %v6874_v25, %v6874_v25  ;;  %v825_v42 = vfloor.f32 %v729_v0 }
 0x1c8   : > { %v2564_v29 = vsel %vm2372_vm10, %v2468_v57, %v2276_v41  ;;  %v1798_v12 = vadd.f32 0.008333333, %v1702_v54  ;;  %v1495_v5 = vmul.f32 2.7557319e-06, %v1399_v7  ;;  %v837_v2 = vfloor.f32 %v741_v19 }
 0x1c9   : > { %v2636_v36 = vpack.c.bf16 %v2564_v29, %v2552_v46  ;;  %v1882_v63 = vmul.f32 %v1786_v18, %v1402_v23  ;;  %v1507_v45 = vmul.f32 2.7557319e-06, %v1411_v49  ;;  %v921_v10 = vmul.f32 6.2831855, %v825_v42 }
 0x1ca   : > { %v1894_v24 = vmul.f32 %v1798_v12, %v1414_v13  ;;  %v1591_v33 = vadd.f32 -0.0001984127, %v1495_v5  ;;  %v933_v38 = vmul.f32 6.2831855, %v837_v2  ;;  %v384_v40 = vmul.f32 %v6624_v59, %v6379_v28 }
 0x1cb   : > { %2856 = vmatprep.subr.bf16.mxu0 %v2636_v36  ;;  %v1978_v22 = vadd.f32 -0.16666667, %v1882_v63  ;;  %v1603_v3 = vadd.f32 -0.0001984127, %v1507_v45  ;;  %v6886_v15 = vsub.f32 %v537_v48, %v921_v10  ;;  %v396_v32 = vmul.f32 %v6624_v59, %v6425_v35 }
 0x1cc   : > { %v1990_v41 = vadd.f32 -0.16666667, %v1894_v24  ;;  %vm2362_vm11 = vcmp.lt.f32.partialorder %v6832_v55, 0.0  ;;  %v1687_v8 = vmul.f32 %v1591_v33, %v1399_v7  ;;  %v6891_v0 = vsub.f32 %v549_v6, %v933_v38 }
 0x1cd   : > { %v512_v57 = vadd.f32 %v6402_v9, %v384_v40  ;;  %v2074_v54 = vmul.f32 %v1978_v22, %v1402_v23  ;;  %v1699_v19 = vmul.f32 %v1603_v3, %v1411_v49  ;;  %v1113_v46 = vand.u32 2147483647, %v6886_v15 }
 0x1ce   : > { %v524_v18 = vadd.f32 %v6427_v53, %v396_v32  ;;  %v2086_v42 = vmul.f32 %v1990_v41, %v1414_v13  ;;  %vm2374_vm12 = vcmp.lt.f32.partialorder %v6834_v14, 0.0  ;;  %v1783_v48 = vadd.f32 0.008333333, %v1687_v8 }
 0x1cf   : > { %v1125_v29 = vand.u32 2147483647, %v6891_v0  ;;  %v2170_v12 = vadd.f32 1.0, %v2074_v54  ;;  %v1795_v5 = vadd.f32 0.008333333, %v1699_v19  ;;  %v386_v6 = vmul.f32 %v6668_v17, %v6379_v28 }
 0x1d0   : > { %v1209_v2 = vsub.f32 3.1415927, %v1113_v46  ;;  %v2182_v36 = vadd.f32 1.0, %v2086_v42  ;;  %v1879_v63 = vmul.f32 %v1783_v48, %v1399_v7  ;;  %v608_v45 = vmul.f32 0.15915494, %v512_v57 }
 0x1d1   : > { %v1221_v23 = vsub.f32 3.1415927, %v1125_v29  ;;  %v2266_v10 = vmul.f32 %v2170_v12, %v6850_v27  ;;  %v1891_v24 = vmul.f32 %v1795_v5, %v1411_v49  ;;  %v620_v13 = vmul.f32 0.15915494, %v524_v18 }
 0x1d2   : > { %v6901_v33 = vmin.f32 %v1113_v46, %v1209_v2  ;;  %v2278_v38 = vmul.f32 %v2182_v36, %v6852_v61  ;;  %v1975_v40 = vadd.f32 -0.16666667, %v1879_v63  ;;  %v704_v3 = vadd.f32 0.5, %v608_v45 }
 0x1d3   : > { %v6904_v22 = vmin.f32 %v1125_v29, %v1221_v23  ;;  %v2458_v32 = vsub.f32 0.0, %v2266_v10  ;;  %v1987_v41 = vadd.f32 -0.16666667, %v1891_v24  ;;  %v716_v54 = vadd.f32 0.5, %v620_v13 }
 0x1d4   : > { %v1401_v8 = vmul.f32 %v6901_v33, %v6901_v33  ;;  %v2470_v19 = vsub.f32 0.0, %v2278_v38  ;;  %v2071_v42 = vmul.f32 %v1975_v40, %v1399_v7  ;;  %v800_v46 = vfloor.f32 %v704_v3 }
 0x1d5   : > { %v1413_v27 = vmul.f32 %v6904_v22, %v6904_v22  ;;  %v2554_v48 = vsel %vm2362_vm11, %v2458_v32, %v2266_v10  ;;  %v2083_v61 = vmul.f32 %v1987_v41, %v1411_v49  ;;  %v812_v29 = vfloor.f32 %v716_v54 }
 0x1d6   : > { %v1497_v12 = vmul.f32 2.7557319e-06, %v1401_v8  ;;  %v2566_v5 = vsel %vm2374_vm12, %v2470_v19, %v2278_v38  ;;  %v2167_v2 = vadd.f32 1.0, %v2071_v42  ;;  %v896_v63 = vmul.f32 6.2831855, %v800_v46  ;;  %v2597_v46 = vld [vmem:[%s9966_s2 + $0x10] sm:$0xff] }
 0x1d7   : > { %v1509_v36 = vmul.f32 2.7557319e-06, %v1413_v27  ;;  %v2638_v23 = vpack.c.bf16 %v2566_v5, %v2554_v48  ;;  %v2179_v45 = vadd.f32 1.0, %v2083_v61  ;;  %v908_v7 = vmul.f32 6.2831855, %v812_v29  ;;  %v2598_v48 = vld [vmem:[%s9966_s2 + $0x18] sm:$0xff] }
 0x1d8   : > { %v1593_v24 = vadd.f32 -0.0001984127, %v1497_v12  ;;  %v2263_v13 = vmul.f32 %v2167_v2, %v6872_v50  ;;  %vm2359_vm13 = vcmp.lt.f32.partialorder %v6854_v4, 0.0  ;;  %v6916_v55 = vsub.f32 %v512_v57, %v896_v63 }
 0x1d9   : > { %v1605_v40 = vadd.f32 -0.0001984127, %v1509_v36  ;;  %2929 = vmatprep.subr.bf16.mxu1 %v2638_v23  ;;  %v2275_v49 = vmul.f32 %v2179_v45, %v6874_v25  ;;  %v6919_v14 = vsub.f32 %v524_v18, %v908_v7  ;;  %v514_v38 = vadd.f32 %v6402_v9, %v386_v6 }
 0x1da   : > { %v1689_v10 = vmul.f32 %v1593_v24, %v1401_v8  ;;  %v2455_v3 = vsub.f32 0.0, %v2263_v13  ;;  %v1088_v41 = vand.u32 2147483647, %v6916_v55  ;;  %v398_v50 = vmul.f32 %v6668_v17, %v6425_v35 }
 0x1db   : > { %v1701_v32 = vmul.f32 %v1605_v40, %v1413_v27  ;;  %vm2371_vm14 = vcmp.lt.f32.partialorder %v6860_v47, 0.0  ;;  %v2467_v54 = vsub.f32 0.0, %v2275_v49  ;;  %v1100_v19 = vand.u32 2147483647, %v6919_v14 }
 0x1dc   : > { %v1785_v57 = vadd.f32 0.008333333, %v1689_v10  ;;  %v2551_v25 = vsel %vm2359_vm13, %v2455_v3, %v2263_v13  ;;  %v1184_v42 = vsub.f32 3.1415927, %v1088_v41  ;;  %v526_v6 = vadd.f32 %v6427_v53, %v398_v50 }
 0x1dd   : > { %v1797_v18 = vadd.f32 0.008333333, %v1701_v32  ;;  %v2563_v47 = vsel %vm2371_vm14, %v2467_v54, %v2275_v49  ;;  %v1196_v12 = vsub.f32 3.1415927, %v1100_v19  ;;  %v610_v29 = vmul.f32 0.15915494, %v514_v38 }
 0x1de   : > { %v1881_v61 = vmul.f32 %v1785_v57, %v1401_v8  ;;  %v2635_v5 = vpack.c.bf16 %v2563_v47, %v2551_v25  ;;  %v6936_v4 = vmin.f32 %v1088_v41, %v1184_v42  ;;  %v622_v36 = vmul.f32 0.15915494, %v526_v6 }
 0x1df   : > { %v1893_v2 = vmul.f32 %v1797_v18, %v1413_v27  ;;  %v6938_v23 = vmin.f32 %v1100_v19, %v1196_v12  ;;  %v706_v45 = vadd.f32 0.5, %v610_v29  ;;  %v6940_v24 = vpack.c.bf16 %v2598_v48, %v2597_v46 }
 0x1e0   : > { %v1977_v63 = vadd.f32 -0.16666667, %v1881_v61  ;;  %2857 = vmatpush1.bf16.msra.mxu0 %v2635_v5  ;;  %v1376_v13 = vmul.f32 %v6936_v4, %v6936_v4  ;;  %v718_v40 = vadd.f32 0.5, %v622_v36  ;;  %v383_v49 = vmul.f32 %v6700_v16, %v6379_v28 }
 0x1e1   : > { %v1989_v7 = vadd.f32 -0.16666667, %v1893_v2  ;;  %v1388_v3 = vmul.f32 %v6938_v23, %v6938_v23  ;;  %v802_v32 = vfloor.f32 %v706_v45  ;;  %5770 = vmatmul.mubr.msk.bf16.gmra.mxu0 %vm2687_vm0, %v6940_v24  ;;  %5774 = vmatmul.mubr.msk.bf16.gmra.mxu1 %vm2687_vm0, %v6940_v24  ;;  %v395_v41 = vmul.f32 %v6700_v16, %v6425_v35 }
 0x1e2   : > { %v2073_v10 = vmul.f32 %v1977_v63, %v1401_v8  ;;  %v1472_v54 = vmul.f32 2.7557319e-06, %v1376_v13  ;;  %v814_v57 = vfloor.f32 %v718_v40  ;;  %v511_v19 = vadd.f32 %v6402_v9, %v383_v49  ;;  %2752 = vmatprep.mubr.bf16.mxu0 %v9977_v1  ;;  %2825 = vmatprep.mubr.bf16.mxu1 %v9977_v1 }
 0x1e3   : > { %v2085_v50 = vmul.f32 %v1989_v7, %v1413_v27  ;;  %v1484_v25 = vmul.f32 2.7557319e-06, %v1388_v3  ;;  %v898_v18 = vmul.f32 6.2831855, %v802_v32  ;;  %v523_v42 = vadd.f32 %v6427_v53, %v395_v41 }
 0x1e4   : > { %v2169_v8 = vadd.f32 1.0, %v2073_v10  ;;  %vm2361_vm15 = vcmp.lt.f32.partialorder %v6886_v15, 0.0  ;;  %v1568_v48 = vadd.f32 -0.0001984127, %v1472_v54  ;;  %v910_v47 = vmul.f32 6.2831855, %v814_v57 }
 0x1e5   : > { %v2181_v46 = vadd.f32 1.0, %v2085_v50  ;;  %v1580_v61 = vadd.f32 -0.0001984127, %v1484_v25  ;;  %v6960_v12 = vsub.f32 %v514_v38, %v898_v18  ;;  %v607_v29 = vmul.f32 0.15915494, %v511_v19 }
 0x1e6   : > { %v2265_v27 = vmul.f32 %v2169_v8, %v6901_v33  ;;  %v1664_v2 = vmul.f32 %v1568_v48, %v1376_v13  ;;  %v6963_v36 = vsub.f32 %v526_v6, %v910_v47  ;;  %v619_v63 = vmul.f32 0.15915494, %v523_v42 }
 0x1e7   : > { %v2277_v5 = vmul.f32 %v2181_v46, %v6904_v22  ;;  %vm2373_vm1 = vcmp.lt.f32.partialorder %v6891_v0, 0.0  ;;  %v1676_v7 = vmul.f32 %v1580_v61, %v1388_v3  ;;  %v1090_v40 = vand.u32 2147483647, %v6960_v12 }
 0x1e8   : > { %v2457_v45 = vsub.f32 0.0, %v2265_v27  ;;  %v1760_v10 = vadd.f32 0.008333333, %v1664_v2  ;;  %v1102_v33 = vand.u32 2147483647, %v6963_v36  ;;  %v385_v38 = vmul.f32 %v6731_v20, %v6379_v28 }
 0x1e9   : > { %v2469_v49 = vsub.f32 0.0, %v2277_v5  ;;  %v1772_v32 = vadd.f32 0.008333333, %v1676_v7  ;;  %v1186_v6 = vsub.f32 3.1415927, %v1090_v40  ;;  %v703_v41 = vadd.f32 0.5, %v607_v29 }
 0x1ea   : > { %v2553_v22 = vsel %vm2361_vm15, %v2457_v45, %v2265_v27  ;;  %v1856_v54 = vmul.f32 %v1760_v10, %v1376_v13  ;;  %v1198_v0 = vsub.f32 3.1415927, %v1102_v33  ;;  %v715_v57 = vadd.f32 0.5, %v619_v63 }
 0x1eb   : > { %v2565_v50 = vsel %vm2373_vm1, %v2469_v49, %v2277_v5  ;;  %v1868_v25 = vmul.f32 %v1772_v32, %v1388_v3  ;;  %v6972_v18 = vmin.f32 %v1090_v40, %v1186_v6  ;;  %v799_v46 = vfloor.f32 %v703_v41 }
 0x1ec   : > { %v2637_v8 = vpack.c.bf16 %v2565_v50, %v2553_v22  ;;  %v1952_v48 = vadd.f32 -0.16666667, %v1856_v54  ;;  %v6974_v47 = vmin.f32 %v1102_v33, %v1198_v0  ;;  %v811_v61 = vfloor.f32 %v715_v57 }
 0x1ed   : > { %v397_v15 = vmul.f32 %v6731_v20, %v6425_v35  ;;  %v1964_v27 = vadd.f32 -0.16666667, %v1868_v25  ;;  %v1378_v29 = vmul.f32 %v6972_v18, %v6972_v18  ;;  %v895_v5 = vmul.f32 6.2831855, %v799_v46 }
 0x1ee   : > { %2930 = vmatpush1.bf16.msra.mxu1 %v2637_v8  ;;  %v513_v2 = vadd.f32 %v6402_v9, %v385_v38  ;;  %v2048_v63 = vmul.f32 %v1952_v48, %v1376_v13  ;;  %v1390_v45 = vmul.f32 %v6974_v47, %v6974_v47  ;;  %v907_v7 = vmul.f32 6.2831855, %v811_v61 }
 0x1ef   : > { %v525_v40 = vadd.f32 %v6427_v53, %v397_v15  ;;  %v2060_v49 = vmul.f32 %v1964_v27, %v1388_v3  ;;  %v1474_v10 = vmul.f32 2.7557319e-06, %v1378_v29  ;;  %v6984_v33 = vsub.f32 %v511_v19, %v895_v5 }
 0x1f0   : > { %v609_v22 = vmul.f32 0.15915494, %v513_v2  ;;  %v2144_v32 = vadd.f32 1.0, %v2048_v63  ;;  %v1486_v6 = vmul.f32 2.7557319e-06, %v1390_v45  ;;  %v6986_v41 = vsub.f32 %v523_v42, %v907_v7 }
 0x1f1   : > { %v621_v50 = vmul.f32 0.15915494, %v525_v40  ;;  %v2156_v54 = vadd.f32 1.0, %v2060_v49  ;;  %vm2336_vm2 = vcmp.lt.f32.partialorder %v6916_v55, 0.0  ;;  %v1570_v13 = vadd.f32 -0.0001984127, %v1474_v10 }
 0x1f2   : > { %v1087_v38 = vand.u32 2147483647, %v6984_v33  ;;  %v2240_v0 = vmul.f32 %v2144_v32, %v6936_v4  ;;  %vm2348_vm3 = vcmp.lt.f32.partialorder %v6919_v14, 0.0  ;;  %v1582_v3 = vadd.f32 -0.0001984127, %v1486_v6 }
 0x1f3   : > { %v1099_v19 = vand.u32 2147483647, %v6986_v41  ;;  %v2252_v57 = vmul.f32 %v2156_v54, %v6938_v23  ;;  %v1666_v8 = vmul.f32 %v1570_v13, %v1378_v29  ;;  %v705_v42 = vadd.f32 0.5, %v609_v22 }
 0x1f4   : > { %v1183_v25 = vsub.f32 3.1415927, %v1087_v38  ;;  %v2432_v46 = vsub.f32 0.0, %v2240_v0  ;;  %v1678_v48 = vmul.f32 %v1582_v3, %v1390_v45  ;;  %v717_v15 = vadd.f32 0.5, %v621_v50 }
 0x1f5   : > { %v1195_v61 = vsub.f32 3.1415927, %v1099_v19  ;;  %v2444_v27 = vsub.f32 0.0, %v2252_v57  ;;  %v1762_v5 = vadd.f32 0.008333333, %v1666_v8  ;;  %v801_v7 = vfloor.f32 %v705_v42 }
 0x1f6   : > { %v6994_v63 = vmin.f32 %v1087_v38, %v1183_v25  ;;  %v2528_v4 = vsel %vm2336_vm2, %v2432_v46, %v2240_v0  ;;  %v1774_v49 = vadd.f32 0.008333333, %v1678_v48  ;;  %v813_v32 = vfloor.f32 %v717_v15 }
 0x1f7   : > { %v6998_v10 = vmin.f32 %v1099_v19, %v1195_v61  ;;  %v2540_v23 = vsel %vm2348_vm3, %v2444_v27, %v2252_v57  ;;  %v1858_v22 = vmul.f32 %v1762_v5, %v1378_v29  ;;  %v897_v50 = vmul.f32 6.2831855, %v801_v7 }
 0x1f8   : > { %v1375_v6 = vmul.f32 %v6994_v63, %v6994_v63  ;;  %v2624_v54 = vpack.c.bf16 %v2540_v23, %v2528_v4  ;;  %v1870_v13 = vmul.f32 %v1774_v49, %v1390_v45  ;;  %v909_v3 = vmul.f32 6.2831855, %v813_v32 }
 0x1f9   : > { %v1387_v38 = vmul.f32 %v6998_v10, %v6998_v10  ;;  %v10348_v55 = vsub.s32 2, %v6144_v11  ;;  %v1954_v19 = vadd.f32 -0.16666667, %v1858_v22  ;;  %v7011_v14 = vsub.f32 %v513_v2, %v897_v50 }
 0x1fa   : > { %v1471_v8 = vmul.f32 2.7557319e-06, %v1375_v6  ;;  %2858 = vmatprep.subr.bf16.mxu0 %v2624_v54  ;;  %v1966_v57 = vadd.f32 -0.16666667, %v1870_v13  ;;  %vm2338_vm4 = vcmp.lt.f32.partialorder %v6960_v12, 0.0  ;;  %v7014_v42 = vsub.f32 %v525_v40, %v909_v3 }
 0x1fb   : > { %v7009_v0 = vrot.slane %v6840_v56, %v10348_v55  ;;  %v1483_v25 = vmul.f32 2.7557319e-06, %v1387_v38  ;;  %v2050_v46 = vmul.f32 %v1954_v19, %v1378_v29  ;;  %vm2350_vm5 = vcmp.lt.f32.partialorder %v6963_v36, 0.0 }
 0x1fc   : > { %v1567_v48 = vadd.f32 -0.0001984127, %v1471_v8  ;;  %v1089_v61 = vand.u32 2147483647, %v7011_v14  ;;  %v360_v15 = vmul.f32 %v6624_v59, %v6517_v37  ;;  %v2062_v27 = vmul.f32 %v1966_v57, %v1390_v45 }
 0x1fd   : > { %v1579_v5 = vadd.f32 -0.0001984127, %v1483_v25  ;;  %v1101_v2 = vand.u32 2147483647, %v7014_v42  ;;  %v372_v7 = vmul.f32 %v6624_v59, %v6521_v62  ;;  %v2146_v4 = vadd.f32 1.0, %v2050_v46 }
 0x1fe   : > { %v1663_v49 = vmul.f32 %v1567_v48, %v1375_v6  ;;  %v1185_v40 = vsub.f32 3.1415927, %v1089_v61  ;;  %v488_v29 = vadd.f32 %v6534_v52, %v360_v15  ;;  %v2158_v32 = vadd.f32 1.0, %v2062_v27 }
 0x1ff   : > { %v1675_v23 = vmul.f32 %v1579_v5, %v1387_v38  ;;  %v1197_v22 = vsub.f32 3.1415927, %v1101_v2  ;;  %v500_v50 = vadd.f32 %v6539_v51, %v372_v7  ;;  %v2242_v54 = vmul.f32 %v2146_v4, %v6972_v18 }
 0x200   : > { %v1759_v13 = vadd.f32 0.008333333, %v1663_v49  ;;  %v7026_v45 = vmin.f32 %v1089_v61, %v1185_v40  ;;  %v584_v3 = vmul.f32 0.15915494, %v488_v29  ;;  %v2254_v55 = vmul.f32 %v2158_v32, %v6974_v47 }
 0x201   : > { %v1771_v19 = vadd.f32 0.008333333, %v1675_v23  ;;  %v7029_v59 = vmin.f32 %v1101_v2, %v1197_v22  ;;  %v596_v8 = vmul.f32 0.15915494, %v500_v50  ;;  %v2434_v57 = vsub.f32 0.0, %v2242_v54 }
 0x202   : > { %v1855_v25 = vmul.f32 %v1759_v13, %v1375_v6  ;;  %v1377_v46 = vmul.f32 %v7026_v45, %v7026_v45  ;;  %v680_v48 = vadd.f32 0.5, %v584_v3  ;;  %v2446_v15 = vsub.f32 0.0, %v2254_v55 }
 0x203   : > { %v1867_v27 = vmul.f32 %v1771_v19, %v1387_v38  ;;  %v1389_v18 = vmul.f32 %v7029_v59, %v7029_v59  ;;  %v692_v61 = vadd.f32 0.5, %v596_v8  ;;  %v2530_v5 = vsel %vm2338_vm4, %v2434_v57, %v2242_v54 }
 0x204   : > { %v1951_v47 = vadd.f32 -0.16666667, %v1855_v25  ;;  %v1473_v7 = vmul.f32 2.7557319e-06, %v1377_v46  ;;  %v776_v2 = vfloor.f32 %v680_v48  ;;  %v2542_v4 = vsel %vm2350_vm5, %v2446_v15, %v2254_v55 }
 0x205   : > { %v1963_v49 = vadd.f32 -0.16666667, %v1867_v27  ;;  %v1485_v40 = vmul.f32 2.7557319e-06, %v1389_v18  ;;  %v788_v32 = vfloor.f32 %v692_v61  ;;  %v2626_v23 = vpack.c.bf16 %v2542_v4, %v2530_v5 }
 0x206   : > { %v2047_v22 = vmul.f32 %v1951_v47, %v1375_v6  ;;  %v1569_v13 = vadd.f32 -0.0001984127, %v1473_v7  ;;  %v872_v3 = vmul.f32 6.2831855, %v776_v2  ;;  %v362_v12 = vmul.f32 %v6668_v17, %v6517_v37 }
 0x207   : > { %v2059_v19 = vmul.f32 %v1963_v49, %v1387_v38  ;;  %v1581_v1 = vadd.f32 -0.0001984127, %v1485_v40  ;;  %v884_v53 = vmul.f32 6.2831855, %v788_v32  ;;  %2931 = vmatprep.subr.bf16.mxu1 %v2626_v23  ;;  %vm2335_vm6 = vcmp.lt.f32.partialorder %v6984_v33, 0.0 }
 0x208   : > { %v2143_v54 = vadd.f32 1.0, %v2047_v22  ;;  %v1665_v8 = vmul.f32 %v1569_v13, %v1377_v46  ;;  %v7042_v36 = vsub.f32 %v488_v29, %v872_v3  ;;  %v490_v6 = vadd.f32 %v6534_v52, %v362_v12 }
 0x209   : > { %v2155_v55 = vadd.f32 1.0, %v2059_v19  ;;  %v1677_v57 = vmul.f32 %v1581_v1, %v1389_v18  ;;  %v7044_v25 = vsub.f32 %v500_v50, %v884_v53  ;;  %v374_v27 = vmul.f32 %v6668_v17, %v6521_v62 }
 0x20a   : > { %v2239_v38 = vmul.f32 %v2143_v54, %v6994_v63  ;;  %v1761_v48 = vadd.f32 0.008333333, %v1665_v8  ;;  %v1064_v15 = vand.u32 2147483647, %v7042_v36  ;;  %vm2347_vm7 = vcmp.lt.f32.partialorder %v6986_v41, 0.0 }
 0x20b   : > { %v2251_v61 = vmul.f32 %v2155_v55, %v6998_v10  ;;  %v1773_v29 = vadd.f32 0.008333333, %v1677_v57  ;;  %v1076_v5 = vand.u32 2147483647, %v7044_v25  ;;  %v502_v47 = vadd.f32 %v6539_v51, %v374_v27 }
 0x20c   : > { %v2431_v1 = vsub.f32 0.0, %v2239_v38  ;;  %v1857_v53 = vmul.f32 %v1761_v48, %v1377_v46  ;;  %v1160_v50 = vsub.f32 3.1415927, %v1064_v15  ;;  %v586_v4 = vmul.f32 0.15915494, %v490_v6 }
 0x20d   : > { %v2443_v7 = vsub.f32 0.0, %v2251_v61  ;;  %v1869_v63 = vmul.f32 %v1773_v29, %v1389_v18  ;;  %v1172_v2 = vsub.f32 3.1415927, %v1076_v5  ;;  %v598_v10 = vmul.f32 0.15915494, %v502_v47 }
 0x20e   : > { %v2527_v49 = vsel %vm2335_vm6, %v2431_v1, %v2239_v38  ;;  %v1953_v17 = vadd.f32 -0.16666667, %v1857_v53  ;;  %v7057_v40 = vmin.f32 %v1064_v15, %v1160_v50  ;;  %v682_v22 = vadd.f32 0.5, %v586_v4 }
 0x20f   : > { %v2539_v41 = vsel %vm2347_vm7, %v2443_v7, %v2251_v61  ;;  %v1965_v32 = vadd.f32 -0.16666667, %v1869_v63  ;;  %v7059_v23 = vmin.f32 %v1076_v5, %v1172_v2  ;;  %v694_v12 = vadd.f32 0.5, %v598_v10 }
 0x210   : > { %v2623_v13 = vpack.c.bf16 %v2539_v41, %v2527_v49  ;;  %v2049_v3 = vmul.f32 %v1953_v17, %v1377_v46  ;;  %v1352_v19 = vmul.f32 %v7057_v40, %v7057_v40  ;;  %v778_v8 = vfloor.f32 %v682_v22 }
 0x211   : > { %v2061_v54 = vmul.f32 %v1965_v32, %v1389_v18  ;;  %v1364_v33 = vmul.f32 %v7059_v23, %v7059_v23  ;;  %v359_v55 = vmul.f32 %v6700_v16, %v6517_v37  ;;  %v790_v48 = vfloor.f32 %v694_v12 }
 0x212   : > { %2859 = vmatpush1.bf16.msra.mxu0 %v2623_v13  ;;  %v2145_v57 = vadd.f32 1.0, %v2049_v3  ;;  %v1448_v38 = vmul.f32 2.7557319e-06, %v1352_v19  ;;  %v371_v15 = vmul.f32 %v6700_v16, %v6521_v62  ;;  %v874_v61 = vmul.f32 6.2831855, %v778_v8 }
 0x213   : > { %v2157_v46 = vadd.f32 1.0, %v2061_v54  ;;  %v1460_v27 = vmul.f32 2.7557319e-06, %v1364_v33  ;;  %v487_v29 = vadd.f32 %v6534_v52, %v359_v55  ;;  %v886_v1 = vmul.f32 6.2831855, %v790_v48 }
 0x214   : > { %v2241_v18 = vmul.f32 %v2145_v57, %v7026_v45  ;;  %v1544_v5 = vadd.f32 -0.0001984127, %v1448_v38  ;;  %v499_v53 = vadd.f32 %v6539_v51, %v371_v15  ;;  %v7073_v63 = vsub.f32 %v490_v6, %v874_v61 }
 0x215   : > { %v2253_v50 = vmul.f32 %v2157_v46, %v7029_v59  ;;  %v1556_v7 = vadd.f32 -0.0001984127, %v1460_v27  ;;  %v583_v2 = vmul.f32 0.15915494, %v487_v29  ;;  %v7075_v16 = vsub.f32 %v502_v47, %v886_v1 }
 0x216   : > { %v2433_v4 = vsub.f32 0.0, %v2241_v18  ;;  %v1640_v49 = vmul.f32 %v1544_v5, %v1352_v19  ;;  %v595_v17 = vmul.f32 0.15915494, %v499_v53  ;;  %vm2337_vm8 = vcmp.lt.f32.partialorder %v7011_v14, 0.0 }
 0x217   : > { %v2445_v10 = vsub.f32 0.0, %v2253_v50  ;;  %v1652_v41 = vmul.f32 %v1556_v7, %v1364_v33  ;;  %v1066_v45 = vand.u32 2147483647, %v7073_v63  ;;  %vm2349_vm9 = vcmp.lt.f32.partialorder %v7014_v42, 0.0 }
 0x218   : > { %v2529_v32 = vsel %vm2337_vm8, %v2433_v4, %v2241_v18  ;;  %v1736_v22 = vadd.f32 0.008333333, %v1640_v49  ;;  %v1078_v59 = vand.u32 2147483647, %v7075_v16  ;;  %v679_v12 = vadd.f32 0.5, %v583_v2 }
 0x219   : > { %v2541_v6 = vsel %vm2349_vm9, %v2445_v10, %v2253_v50  ;;  %v1748_v13 = vadd.f32 0.008333333, %v1652_v41  ;;  %v1162_v3 = vsub.f32 3.1415927, %v1066_v45  ;;  %v691_v55 = vadd.f32 0.5, %v595_v17 }
 0x21a   : > { %v2625_v54 = vpack.c.bf16 %v2541_v6, %v2529_v32  ;;  %v1832_v47 = vmul.f32 %v1736_v22, %v1352_v19  ;;  %v1174_v8 = vsub.f32 3.1415927, %v1078_v59  ;;  %v775_v38 = vfloor.f32 %v679_v12 }
 0x21b   : > { %v1844_v57 = vmul.f32 %v1748_v13, %v1364_v33  ;;  %v7081_v14 = vmin.f32 %v1066_v45, %v1162_v3  ;;  %v361_v48 = vmul.f32 %v6731_v20, %v6517_v37  ;;  %v787_v46 = vfloor.f32 %v691_v55 }
 0x21c   : > { %2932 = vmatpush1.bf16.msra.mxu1 %v2625_v54  ;;  %v1928_v42 = vadd.f32 -0.16666667, %v1832_v47  ;;  %v7085_v15 = vmin.f32 %v1078_v59, %v1174_v8  ;;  %v373_v27 = vmul.f32 %v6731_v20, %v6521_v62  ;;  %v871_v5 = vmul.f32 6.2831855, %v775_v38 }
 0x21d   : > { %v1940_v61 = vadd.f32 -0.16666667, %v1844_v57  ;;  %v1354_v18 = vmul.f32 %v7081_v14, %v7081_v14  ;;  %v489_v1 = vadd.f32 %v6534_v52, %v361_v48  ;;  %v883_v2 = vmul.f32 6.2831855, %v787_v46 }
 0x21e   : > { %v2024_v50 = vmul.f32 %v1928_v42, %v1352_v19  ;;  %v1366_v7 = vmul.f32 %v7085_v15, %v7085_v15  ;;  %v501_v4 = vadd.f32 %v6539_v51, %v373_v27  ;;  %v7095_v10 = vsub.f32 %v487_v29, %v871_v5 }
 0x21f   : > { %v2036_v49 = vmul.f32 %v1940_v61, %v1364_v33  ;;  %v1450_v17 = vmul.f32 2.7557319e-06, %v1354_v18  ;;  %v585_v41 = vmul.f32 0.15915494, %v489_v1  ;;  %v7097_v32 = vsub.f32 %v499_v53, %v883_v2 }
 0x220   : > { %v2120_v20 = vadd.f32 1.0, %v2024_v50  ;;  %v1462_v45 = vmul.f32 2.7557319e-06, %v1366_v7  ;;  %v597_v22 = vmul.f32 0.15915494, %v501_v4  ;;  %vm2312_vm10 = vcmp.lt.f32.partialorder %v7042_v36, 0.0 }
 0x221   : > { %v2132_v59 = vadd.f32 1.0, %v2036_v49  ;;  %v1546_v19 = vadd.f32 -0.0001984127, %v1450_v17  ;;  %v1063_v6 = vand.u32 2147483647, %v7095_v10  ;;  %vm2324_vm11 = vcmp.lt.f32.partialorder %v7044_v25, 0.0 }
 0x222   : > { %v2216_v13 = vmul.f32 %v2120_v20, %v7057_v40  ;;  %v1558_v33 = vadd.f32 -0.0001984127, %v1462_v45  ;;  %v1075_v29 = vand.u32 2147483647, %v7097_v32  ;;  %v681_v53 = vadd.f32 0.5, %v585_v41 }
 0x223   : > { %v2228_v3 = vmul.f32 %v2132_v59, %v7059_v23  ;;  %v1642_v12 = vmul.f32 %v1546_v19, %v1354_v18  ;;  %v1159_v54 = vsub.f32 3.1415927, %v1063_v6  ;;  %v693_v57 = vadd.f32 0.5, %v597_v22 }
 0x224   : > { %v2408_v47 = vsub.f32 0.0, %v2216_v13  ;;  %v1654_v8 = vmul.f32 %v1558_v33, %v1366_v7  ;;  %v1171_v55 = vsub.f32 3.1415927, %v1075_v29  ;;  %v777_v46 = vfloor.f32 %v681_v53 }
 0x225   : > { %v2420_v38 = vsub.f32 0.0, %v2228_v3  ;;  %v1738_v48 = vadd.f32 0.008333333, %v1642_v12  ;;  %v7105_v42 = vmin.f32 %v1063_v6, %v1159_v54  ;;  %v789_v5 = vfloor.f32 %v693_v57 }
 0x226   : > { %v2504_v40 = vsel %vm2312_vm10, %v2408_v47, %v2216_v13  ;;  %v1750_v27 = vadd.f32 0.008333333, %v1654_v8  ;;  %v7109_v61 = vmin.f32 %v1075_v29, %v1171_v55  ;;  %v873_v49 = vmul.f32 6.2831855, %v777_v46 }
 0x227   : > { %v2516_v23 = vsel %vm2324_vm11, %v2420_v38, %v2228_v3  ;;  %v1834_v50 = vmul.f32 %v1738_v48, %v1354_v18  ;;  %v1351_v2 = vmul.f32 %v7105_v42, %v7105_v42  ;;  %v885_v45 = vmul.f32 6.2831855, %v789_v5 }
 0x228   : > { %v2612_v17 = vpack.c.bf16 %v2516_v23, %v2504_v40  ;;  %v1846_v41 = vmul.f32 %v1750_v27, %v1366_v7  ;;  %v1363_v20 = vmul.f32 %v7109_v61, %v7109_v61  ;;  %v7117_v59 = vsub.f32 %v489_v1, %v873_v49 }
 0x229   : > { %v1930_v36 = vadd.f32 -0.16666667, %v1834_v50  ;;  %v1447_v22 = vmul.f32 2.7557319e-06, %v1351_v2  ;;  %v10349_v19 = vsub.s32 1, %v6144_v11  ;;  %vm2314_vm12 = vcmp.lt.f32.partialorder %v7073_v63, 0.0 }
 0x22a   : > { %2860 = vmatprep.subr.bf16.mxu0 %v2612_v17  ;;  %v1942_v6 = vadd.f32 -0.16666667, %v1846_v41  ;;  %v1459_v13 = vmul.f32 2.7557319e-06, %v1363_v20  ;;  %v7125_v33 = vsub.f32 %v501_v4, %v885_v45  ;;  %vm2326_vm13 = vcmp.lt.f32.partialorder %v7075_v16, 0.0 }
 0x22b   : > { %v7122_v25 = vrot.slane %v6840_v56, %v10349_v19  ;;  %v2026_v29 = vmul.f32 %v1930_v36, %v1354_v18  ;;  %v1543_v3 = vadd.f32 -0.0001984127, %v1447_v22  ;;  %v1065_v12 = vand.u32 2147483647, %v7117_v59 }
 0x22c   : > { %v2038_v1 = vmul.f32 %v1942_v6, %v1366_v7  ;;  %v1555_v54 = vadd.f32 -0.0001984127, %v1459_v13  ;;  %v1077_v53 = vand.u32 2147483647, %v7125_v33  ;;  %v10350_v47 = vsub.s32 3, %v6144_v11 }
 0x22d   : > { %v2122_v55 = vadd.f32 1.0, %v2026_v29  ;;  %v1639_v57 = vmul.f32 %v1543_v3, %v1351_v2  ;;  %v1161_v38 = vsub.f32 3.1415927, %v1065_v12  ;;  %v436_v18 = vmul.f32 %v7122_v25, %v6167_v21 }
 0x22e   : > { %v7133_v8 = vrot.slane %v6840_v56, %v10350_v47  ;;  %v2134_v4 = vadd.f32 1.0, %v2038_v1  ;;  %v1651_v48 = vmul.f32 %v1555_v54, %v1363_v20  ;;  %v1173_v46 = vsub.f32 3.1415927, %v1077_v53 }
 0x22f   : > { %v448_v7 = vmul.f32 %v7122_v25, %v6187_v44  ;;  %v2218_v40 = vmul.f32 %v2122_v55, %v7081_v14  ;;  %v1735_v27 = vadd.f32 0.008333333, %v1639_v57  ;;  %v7140_v5 = vmin.f32 %v1065_v12, %v1161_v38 }
 0x230   : > { %v564_v56 = vadd.f32 %v6177_v26, %v436_v18  ;;  %v2230_v23 = vmul.f32 %v2134_v4, %v7085_v15  ;;  %v1747_v50 = vadd.f32 0.008333333, %v1651_v48  ;;  %v7144_v49 = vmin.f32 %v1077_v53, %v1173_v46 }
 0x231   : > { %v576_v17 = vadd.f32 %v6185_v39, %v448_v7  ;;  %v2410_v41 = vsub.f32 0.0, %v2218_v40  ;;  %v1831_v45 = vmul.f32 %v1735_v27, %v1351_v2  ;;  %v1353_v36 = vmul.f32 %v7140_v5, %v7140_v5 }
 0x232   : > { %v660_v22 = vmul.f32 0.15915494, %v564_v56  ;;  %v2422_v19 = vsub.f32 0.0, %v2230_v23  ;;  %v1843_v14 = vmul.f32 %v1747_v50, %v1363_v20  ;;  %v1365_v6 = vmul.f32 %v7144_v49, %v7144_v49 }
 0x233   : > { %v672_v13 = vmul.f32 0.15915494, %v576_v17  ;;  %v2506_v15 = vsel %vm2314_vm12, %v2410_v41, %v2218_v40  ;;  %v1927_v29 = vadd.f32 -0.16666667, %v1831_v45  ;;  %v1449_v3 = vmul.f32 2.7557319e-06, %v1353_v36 }
 0x234   : > { %v756_v12 = vadd.f32 0.5, %v660_v22  ;;  %v2518_v1 = vsel %vm2326_vm13, %v2422_v19, %v2230_v23  ;;  %v1939_v54 = vadd.f32 -0.16666667, %v1843_v14  ;;  %v1461_v53 = vmul.f32 2.7557319e-06, %v1365_v6 }
 0x235   : > { %v768_v47 = vadd.f32 0.5, %v672_v13  ;;  %v2614_v55 = vpack.c.bf16 %v2518_v1, %v2506_v15  ;;  %v2023_v57 = vmul.f32 %v1927_v29, %v1351_v2  ;;  %v1545_v38 = vadd.f32 -0.0001984127, %v1449_v3 }
 0x236   : > { %v852_v18 = vfloor.f32 %v756_v12  ;;  %v2035_v4 = vmul.f32 %v1939_v54, %v1363_v20  ;;  %v1557_v48 = vadd.f32 -0.0001984127, %v1461_v53  ;;  %v438_v63 = vmul.f32 %v7133_v8, %v6167_v21 }
 0x237   : > { %v864_v46 = vfloor.f32 %v768_v47  ;;  %2933 = vmatprep.subr.bf16.mxu1 %v2614_v55  ;;  %v2119_v7 = vadd.f32 1.0, %v2023_v57  ;;  %v1641_v40 = vmul.f32 %v1545_v38, %v1353_v36  ;;  %v450_v16 = vmul.f32 %v7133_v8, %v6187_v44 }
 0x238   : > { %v948_v27 = vmul.f32 6.2831855, %v852_v18  ;;  %v2131_v23 = vadd.f32 1.0, %v2035_v4  ;;  %v1653_v50 = vmul.f32 %v1557_v48, %v1365_v6  ;;  %v566_v2 = vadd.f32 %v6177_v26, %v438_v63 }
 0x239   : > { %v960_v41 = vmul.f32 6.2831855, %v864_v46  ;;  %v2215_v45 = vmul.f32 %v2119_v7, %v7105_v42  ;;  %v1737_v20 = vadd.f32 0.008333333, %v1641_v40  ;;  %v578_v19 = vadd.f32 %v6185_v39, %v450_v16 }
 0x23a   : > { %v7161_v22 = vsub.f32 %v564_v56, %v948_v27  ;;  %v2227_v14 = vmul.f32 %v2131_v23, %v7109_v61  ;;  %v1749_v13 = vadd.f32 0.008333333, %v1653_v50  ;;  %v662_v29 = vmul.f32 0.15915494, %v566_v2  ;;  %v2599_v61 = vld [vmem:[%s9966_s2 + $0x20] sm:$0xff] }
 0x23b   : > { %v7165_v15 = vsub.f32 %v576_v17, %v960_v41  ;;  %vm2311_vm14 = vcmp.lt.f32.partialorder %v7095_v10, 0.0  ;;  %v2407_v3 = vsub.f32 0.0, %v2215_v45  ;;  %v1833_v12 = vmul.f32 %v1737_v20, %v1353_v36  ;;  %v2600_v17 = vld [vmem:[%s9966_s2 + $0x28] sm:$0xff] }
 0x23c   : > { %v1140_v1 = vand.u32 2147483647, %v7161_v22  ;;  %vm2323_vm15 = vcmp.lt.f32.partialorder %v7097_v32, 0.0  ;;  %v2419_v42 = vsub.f32 0.0, %v2227_v14  ;;  %v1845_v54 = vmul.f32 %v1749_v13, %v1365_v6 }
 0x23d   : > { %v1152_v56 = vand.u32 2147483647, %v7165_v15  ;;  %v2503_v53 = vsel %vm2311_vm14, %v2407_v3, %v2215_v45  ;;  %v1929_v10 = vadd.f32 -0.16666667, %v1833_v12  ;;  %v674_v55 = vmul.f32 0.15915494, %v578_v19 }
 0x23e   : > { %v1236_v47 = vsub.f32 3.1415927, %v1140_v1  ;;  %v2515_v57 = vsel %vm2323_vm15, %v2419_v42, %v2227_v14  ;;  %v1941_v38 = vadd.f32 -0.16666667, %v1845_v54  ;;  %v758_v32 = vadd.f32 0.5, %v662_v29  ;;  %v2601_v12 = vld [vmem:[%s9966_s2 + $0x30] sm:$0xff] }
 0x23f   : > { %v1248_v18 = vsub.f32 3.1415927, %v1152_v56  ;;  %v2611_v4 = vpack.c.bf16 %v2515_v57, %v2503_v53  ;;  %v2025_v48 = vmul.f32 %v1929_v10, %v1353_v36  ;;  %v770_v63 = vadd.f32 0.5, %v674_v55 }
 0x240   : > { %v7177_v46 = vmin.f32 %v1140_v1, %v1236_v47  ;;  %v2037_v7 = vmul.f32 %v1941_v38, %v1365_v6  ;;  %v854_v27 = vfloor.f32 %v758_v32  ;;  %v7181_v16 = vpack.c.bf16 %v2600_v17, %v2599_v61  ;;  %v2602_v1 = vld [vmem:[%s9966_s2 + $0x38] sm:$0xff] }
 0x241   : > { %v7179_v40 = vmin.f32 %v1152_v56, %v1248_v18  ;;  %2861 = vmatpush1.bf16.msra.mxu0 %v2611_v4  ;;  %v2121_v23 = vadd.f32 1.0, %v2025_v48  ;;  %vm2313_vm1 = vcmp.lt.f32.partialorder %v7117_v59, 0.0  ;;  %v866_v41 = vfloor.f32 %v770_v63 }
 0x242   : > { %v7186_v50 = vmul.f32 %v7177_v46, %v7177_v46  ;;  %v2133_v45 = vadd.f32 1.0, %v2037_v7  ;;  %v950_v6 = vmul.f32 6.2831855, %v854_v27  ;;  %5771 = vmatmul.mubr.msk.bf16.gmra.mxu0 %vm2687_vm0, %v7181_v16  ;;  %5775 = vmatmul.mubr.msk.bf16.gmra.mxu1 %vm2687_vm0, %v7181_v16  ;;  %v435_v20 = vmul.f32 %v6848_v30, %v6167_v21 }
 0x243   : > { %v7190_v36 = vmul.f32 %v7179_v40, %v7179_v40  ;;  %v2217_v14 = vmul.f32 %v2121_v23, %v7140_v5  ;;  %v962_v29 = vmul.f32 6.2831855, %v866_v41  ;;  %v10351_v3 = vmov 0  }
 0x244   : > { %v1524_v13 = vmul.f32 2.7557319e-06, %v7186_v50  ;;  %2762 = vmatprep.mubr.bf16.mxu0 %v10351_v3  ;;  %2835 = vmatprep.mubr.bf16.mxu1 %v10351_v3  ;;  %v447_v42 = vmul.f32 %v6848_v30, %v6187_v44  ;;  %v2229_v5 = vmul.f32 %v2133_v45, %v7144_v49  ;;  %v7212_v56 = vsub.f32 %v566_v2, %v950_v6 }
 0x245   : > { %v1536_v54 = vmul.f32 2.7557319e-06, %v7190_v36  ;;  %v563_v61 = vadd.f32 %v6177_v26, %v435_v20  ;;  %v2409_v17 = vsub.f32 0.0, %v2217_v14  ;;  %v7215_v10 = vsub.f32 %v578_v19, %v962_v29 }
 0x246   : > { %v1620_v53 = vadd.f32 -0.0001984127, %v1524_v13  ;;  %v575_v47 = vadd.f32 %v6185_v39, %v447_v42  ;;  %v2421_v55 = vsub.f32 0.0, %v2229_v5  ;;  %v1142_v38 = vand.u32 2147483647, %v7212_v56 }
 0x247   : > { %v1632_v57 = vadd.f32 -0.0001984127, %v1536_v54  ;;  %v7219_v18 = vpack.c.bf16 %v2602_v1, %v2601_v12  ;;  %vm2325_vm2 = vcmp.lt.f32.partialorder %v7125_v33, 0.0  ;;  %v2505_v49 = vsel %vm2313_vm1, %v2409_v17, %v2217_v14 }
 0x248   : > { %v1716_v2 = vmul.f32 %v1620_v53, %v7186_v50  ;;  %v1154_v32 = vand.u32 2147483647, %v7215_v10  ;;  %v2517_v4 = vsel %vm2325_vm2, %v2421_v55, %v2229_v5  ;;  %v1238_v48 = vsub.f32 3.1415927, %v1142_v38 }
 0x249   : > { %v1728_v19 = vmul.f32 %v1632_v57, %v7190_v36  ;;  %v659_v63 = vmul.f32 0.15915494, %v563_v61  ;;  %v2613_v7 = vpack.c.bf16 %v2517_v4, %v2505_v49  ;;  %v671_v41 = vmul.f32 0.15915494, %v575_v47 }
 0x24a   : > { %v1812_v27 = vadd.f32 0.008333333, %v1716_v2  ;;  %v1250_v23 = vsub.f32 3.1415927, %v1154_v32  ;;  %v7227_v6 = vmin.f32 %v1142_v38, %v1238_v48  ;;  %5772 = vmatmul.mubr.msk.bf16.gmra.mxu0 %vm2687_vm0, %v7219_v18  ;;  %5776 = vmatmul.mubr.msk.bf16.gmra.mxu1 %vm2687_vm0, %v7219_v18  ;;  %v437_v33 = vmul.f32 %v7009_v0, %v6167_v21 }
 0x24b   : > { %v1824_v45 = vadd.f32 0.008333333, %v1728_v19  ;;  %v755_v59 = vadd.f32 0.5, %v659_v63  ;;  %2934 = vmatpush1.bf16.msra.mxu1 %v2613_v7  ;;  %2878 = vmatprep.mubr.bf16.mxu0 %v10351_v3  ;;  %v767_v13 = vadd.f32 0.5, %v671_v41  ;;  %v449_v29 = vmul.f32 %v7009_v0, %v6187_v44 }
 0x24c   : > { %v1908_v20 = vmul.f32 %v1812_v27, %v7186_v50  ;;  %v7236_v14 = vmin.f32 %v1154_v32, %v1250_v23  ;;  %v1430_v1 = vmul.f32 %v7227_v6, %v7227_v6  ;;  %2951 = vmatprep.mubr.bf16.mxu1 %v10351_v3  ;;  %v565_v21 = vadd.f32 %v6177_v26, %v437_v33 }
 0x24d   : > { %v1920_v12 = vmul.f32 %v1824_v45, %v7190_v36  ;;  %v851_v42 = vfloor.f32 %v755_v59  ;;  %v863_v17 = vfloor.f32 %v767_v13  ;;  %v577_v53 = vadd.f32 %v6185_v39, %v449_v29 }
 0x24e   : > { %v2004_v5 = vadd.f32 -0.16666667, %v1908_v20  ;;  %v1442_v54 = vmul.f32 %v7236_v14, %v7236_v14  ;;  %vm2388_vm3 = vcmp.lt.f32.partialorder %v7161_v22, 0.0  ;;  %v1526_v44 = vmul.f32 2.7557319e-06, %v1430_v1 }
 0x24f   : > { %v2016_v55 = vadd.f32 -0.16666667, %v1920_v12  ;;  %v947_v57 = vmul.f32 6.2831855, %v851_v42  ;;  %v959_v2 = vmul.f32 6.2831855, %v863_v17 }
 0x250   : > { %v2100_v38 = vmul.f32 %v2004_v5, %v7186_v50  ;;  %v1538_v49 = vmul.f32 2.7557319e-06, %v1442_v54  ;;  %v661_v32 = vmul.f32 0.15915494, %v565_v21  ;;  %v1622_v26 = vadd.f32 -0.0001984127, %v1526_v44 }
 0x251   : > { %v2112_v4 = vmul.f32 %v2016_v55, %v7190_v36  ;;  %v7252_v19 = vsub.f32 %v563_v61, %v947_v57  ;;  %v673_v48 = vmul.f32 0.15915494, %v577_v53  ;;  %v7254_v27 = vsub.f32 %v575_v47, %v959_v2 }
 0x252   : > { %v2196_v63 = vadd.f32 1.0, %v2100_v38  ;;  %v1634_v7 = vadd.f32 -0.0001984127, %v1538_v49  ;;  %v757_v39 = vadd.f32 0.5, %v661_v32  ;;  %vm2400_vm4 = vcmp.lt.f32.partialorder %v7165_v15, 0.0  ;;  %5777 = vmatmul.mubr.msk.bf16.vlgmr.msra.gmra.mxu0 %vm2687_vm0, %v6692_v60  ;;  %5781 = vmatmul.mubr.msk.bf16.vlgmr.msra.gmra.mxu1 %vm2687_vm0, %v6692_v60 }
 0x253   : > { %v2208_v23 = vadd.f32 1.0, %v2112_v4  ;;  %v1718_v41 = vmul.f32 %v1622_v26, %v1430_v1  ;;  %v1139_v50 = vand.u32 2147483647, %v7252_v19  ;;  %v1151_v45 = vand.u32 2147483647, %v7254_v27  ;;  %2888 = vmatprep.mubr.bf16.mxu0 %v10351_v3  ;;  %2961 = vmatprep.mubr.bf16.mxu1 %v10351_v3 }
 0x254   : > { %v2292_v36 = vmul.f32 %v2196_v63, %v7177_v46  ;;  %v1730_v61 = vmul.f32 %v1634_v7, %v1442_v54  ;;  %v412_v47 = vmul.f32 %v7122_v25, %v6229_v43  ;;  %v769_v13 = vadd.f32 0.5, %v673_v48 }
 0x255   : > { %v2304_v59 = vmul.f32 %v2208_v23, %v7179_v40  ;;  %v1814_v33 = vadd.f32 0.008333333, %v1718_v41  ;;  %v1235_v20 = vsub.f32 3.1415927, %v1139_v50  ;;  %v1247_v42 = vsub.f32 3.1415927, %v1151_v45 }
 0x256   : > { %v2484_v29 = vsub.f32 0.0, %v2292_v36  ;;  %v1826_v12 = vadd.f32 0.008333333, %v1730_v61  ;;  %v853_v5 = vfloor.f32 %v757_v39  ;;  %v865_v44 = vfloor.f32 %v769_v13 }
 0x257   : > { %v2496_v46 = vsub.f32 0.0, %v2304_v59  ;;  %v1910_v17 = vmul.f32 %v1814_v33, %v1430_v1  ;;  %v7269_v55 = vmin.f32 %v1139_v50, %v1235_v20  ;;  %v7273_v49 = vmin.f32 %v1151_v45, %v1247_v42 }
 0x258   : > { %v2580_v57 = vsel %vm2388_vm3, %v2484_v29, %v2292_v36  ;;  %v1922_v38 = vmul.f32 %v1826_v12, %v1442_v54  ;;  %v949_v2 = vmul.f32 6.2831855, %v853_v5  ;;  %v961_v26 = vmul.f32 6.2831855, %v865_v44 }
 0x259   : > { %v2592_v40 = vsel %vm2400_vm4, %v2496_v46, %v2304_v59  ;;  %v2006_v32 = vadd.f32 -0.16666667, %v1910_v17  ;;  %v7279_v4 = vmul.f32 %v7269_v55, %v7269_v55  ;;  %v7283_v7 = vmul.f32 %v7273_v49, %v7273_v49 }
 0x25a   : > { %v2652_v48 = vpack.c.bf16 %v2592_v40, %v2580_v57  ;;  %v2018_v63 = vadd.f32 -0.16666667, %v1922_v38  ;;  %v7285_v22 = vsub.f32 %v565_v21, %v949_v2  ;;  %vm2390_vm5 = vcmp.lt.f32.partialorder %v7212_v56, 0.0  ;;  %5778 = vmatmul.mubr.msk.bf16.gmra.mxu0 %vm2687_vm0, %v6940_v24  ;;  %5782 = vmatmul.mubr.msk.bf16.gmra.mxu1 %vm2687_vm0, %v6940_v24 }
 0x25b   : > { %v2102_v39 = vmul.f32 %v2006_v32, %v1430_v1  ;;  %v1523_v15 = vmul.f32 2.7557319e-06, %v7279_v4  ;;  %v7289_v23 = vsub.f32 %v577_v53, %v961_v26  ;;  %vm2402_vm6 = vcmp.lt.f32.partialorder %v7215_v10, 0.0  ;;  %2898 = vmatprep.mubr.bf16.mxu0 %v10351_v3  ;;  %2971 = vmatprep.mubr.bf16.mxu1 %v10351_v3 }
 0x25c   : > { %3000 = vmatprep.subr.bf16.mxu0 %v2652_v48  ;;  %v2114_v41 = vmul.f32 %v2018_v63, %v1442_v54  ;;  %v1535_v21 = vmul.f32 2.7557319e-06, %v7283_v7  ;;  %v1141_v1 = vand.u32 2147483647, %v7285_v22  ;;  %v424_v61 = vmul.f32 %v7122_v25, %v6203_v58 }
 0x25d   : > { %v2198_v50 = vadd.f32 1.0, %v2102_v39  ;;  %v1619_v36 = vadd.f32 -0.0001984127, %v1523_v15  ;;  %v1153_v53 = vand.u32 2147483647, %v7289_v23  ;;  %v540_v33 = vadd.f32 %v6183_v31, %v412_v47 }
 0x25e   : > { %v2210_v45 = vadd.f32 1.0, %v2114_v41  ;;  %v1631_v59 = vadd.f32 -0.0001984127, %v1535_v21  ;;  %v1237_v54 = vsub.f32 3.1415927, %v1141_v1  ;;  %v552_v12 = vadd.f32 %v6299_v34, %v424_v61 }
 0x25f   : > { %v2294_v20 = vmul.f32 %v2198_v50, %v7227_v6  ;;  %v1715_v13 = vmul.f32 %v1619_v36, %v7279_v4  ;;  %v1249_v29 = vsub.f32 3.1415927, %v1153_v53  ;;  %v636_v17 = vmul.f32 0.15915494, %v540_v33 }
 0x260   : > { %v2306_v42 = vmul.f32 %v2210_v45, %v7236_v14  ;;  %v1727_v5 = vmul.f32 %v1631_v59, %v7283_v7  ;;  %v7309_v46 = vmin.f32 %v1141_v1, %v1237_v54  ;;  %v648_v2 = vmul.f32 0.15915494, %v552_v12 }
 0x261   : > { %v2486_v44 = vsub.f32 0.0, %v2294_v20  ;;  %v1811_v57 = vadd.f32 0.008333333, %v1715_v13  ;;  %v7311_v38 = vmin.f32 %v1153_v53, %v1249_v29  ;;  %v732_v32 = vadd.f32 0.5, %v636_v17 }
 0x262   : > { %v2498_v47 = vsub.f32 0.0, %v2306_v42  ;;  %v1823_v40 = vadd.f32 0.008333333, %v1727_v5  ;;  %v7315_v6 = vmul.f32 %v7309_v46, %v7309_v46  ;;  %v744_v63 = vadd.f32 0.5, %v648_v2  ;;  %5779 = vmatmul.mubr.msk.bf16.gmra.mxu0 %vm2687_vm0, %v7181_v16  ;;  %5783 = vmatmul.mubr.msk.bf16.gmra.mxu1 %vm2687_vm0, %v7181_v16 }
 0x263   : > { %v2582_v14 = vsel %vm2390_vm5, %v2486_v44, %v2294_v20  ;;  %v1907_v26 = vmul.f32 %v1811_v57, %v7279_v4  ;;  %v7322_v48 = vmul.f32 %v7311_v38, %v7311_v38  ;;  %v828_v41 = vfloor.f32 %v732_v32  ;;  %2908 = vmatprep.mubr.bf16.mxu0 %v10351_v3  ;;  %2981 = vmatprep.mubr.bf16.mxu1 %v10351_v3 }
 0x264   : > { %v2594_v39 = vsel %vm2402_vm6, %v2498_v47, %v2306_v42  ;;  %v1919_v15 = vmul.f32 %v1823_v40, %v7283_v7  ;;  %v1525_v56 = vmul.f32 2.7557319e-06, %v7315_v6  ;;  %v840_v36 = vfloor.f32 %v744_v63 }
 0x265   : > { %v2654_v21 = vpack.c.bf16 %v2594_v39, %v2582_v14  ;;  %v2003_v1 = vadd.f32 -0.16666667, %v1907_v26  ;;  %v1537_v50 = vmul.f32 2.7557319e-06, %v7322_v48  ;;  %v924_v45 = vmul.f32 6.2831855, %v828_v41 }
 0x266   : > { %v2015_v53 = vadd.f32 -0.16666667, %v1919_v15  ;;  %v1621_v61 = vadd.f32 -0.0001984127, %v1525_v56  ;;  %v414_v10 = vmul.f32 %v7133_v8, %v6229_v43  ;;  %v936_v20 = vmul.f32 6.2831855, %v840_v36 }
 0x267   : > { %3073 = vmatprep.subr.bf16.mxu1 %v2654_v21  ;;  %v2099_v59 = vmul.f32 %v2003_v1, %v7279_v4  ;;  %v1633_v54 = vadd.f32 -0.0001984127, %v1537_v50  ;;  %v426_v13 = vmul.f32 %v7133_v8, %v6203_v58  ;;  %v7342_v5 = vsub.f32 %v540_v33, %v924_v45 }
 0x268   : > { %v2111_v29 = vmul.f32 %v2015_v53, %v7283_v7  ;;  %v1717_v42 = vmul.f32 %v1621_v61, %v7315_v6  ;;  %v542_v17 = vadd.f32 %v6183_v31, %v414_v10  ;;  %v7346_v2 = vsub.f32 %v552_v12, %v936_v20 }
 0x269   : > { %v2195_v44 = vadd.f32 1.0, %v2099_v59  ;;  %v1729_v57 = vmul.f32 %v1633_v54, %v7322_v48  ;;  %v554_v4 = vadd.f32 %v6299_v34, %v426_v13  ;;  %vm2387_vm7 = vcmp.lt.f32.partialorder %v7252_v19, 0.0 }
 0x26a   : > { %v2207_v47 = vadd.f32 1.0, %v2111_v29  ;;  %v1813_v40 = vadd.f32 0.008333333, %v1717_v42  ;;  %v1116_v32 = vand.u32 2147483647, %v7342_v5  ;;  %vm2399_vm8 = vcmp.lt.f32.partialorder %v7254_v27, 0.0  ;;  %5780 = vmatmul.mubr.msk.bf16.gmra.mxu0 %vm2687_vm0, %v7219_v18  ;;  %5784 = vmatmul.mubr.msk.bf16.gmra.mxu1 %vm2687_vm0, %v7219_v18 }
 0x26b   : > { %v2291_v7 = vmul.f32 %v2195_v44, %v7269_v55  ;;  %v1825_v33 = vadd.f32 0.008333333, %v1729_v57  ;;  %v1128_v14 = vand.u32 2147483647, %v7346_v2  ;;  %v638_v39 = vmul.f32 0.15915494, %v542_v17  ;;  %3024 = vmatprep.mubr.bf16.mxu0 %v10351_v3  ;;  %3097 = vmatprep.mubr.bf16.mxu1 %v10351_v3 }
 0x26c   : > { %v2303_v12 = vmul.f32 %v2207_v47, %v7273_v49  ;;  %v1909_v26 = vmul.f32 %v1813_v40, %v7315_v6  ;;  %v1212_v63 = vsub.f32 3.1415927, %v1116_v32  ;;  %v650_v41 = vmul.f32 0.15915494, %v554_v4 }
 0x26d   : > { %v2483_v55 = vsub.f32 0.0, %v2291_v7  ;;  %v1921_v15 = vmul.f32 %v1825_v33, %v7322_v48  ;;  %v1224_v56 = vsub.f32 3.1415927, %v1128_v14  ;;  %v734_v36 = vadd.f32 0.5, %v638_v39 }
 0x26e   : > { %v2495_v21 = vsub.f32 0.0, %v2303_v12  ;;  %v2005_v1 = vadd.f32 -0.16666667, %v1909_v26  ;;  %v7363_v50 = vmin.f32 %v1116_v32, %v1212_v63  ;;  %v746_v45 = vadd.f32 0.5, %v650_v41 }
 0x26f   : > { %v2579_v49 = vsel %vm2387_vm7, %v2483_v55, %v2291_v7  ;;  %v2017_v53 = vadd.f32 -0.16666667, %v1921_v15  ;;  %v7367_v61 = vmin.f32 %v1128_v14, %v1224_v56  ;;  %v830_v20 = vfloor.f32 %v734_v36 }
 0x270   : > { %v2591_v10 = vsel %vm2399_vm8, %v2495_v21, %v2303_v12  ;;  %v2101_v59 = vmul.f32 %v2005_v1, %v7315_v6  ;;  %v1404_v54 = vmul.f32 %v7363_v50, %v7363_v50  ;;  %v842_v42 = vfloor.f32 %v746_v45 }
 0x271   : > { %v2651_v13 = vpack.c.bf16 %v2591_v10, %v2579_v49  ;;  %v2113_v29 = vmul.f32 %v2017_v53, %v7322_v48  ;;  %v1416_v19 = vmul.f32 %v7367_v61, %v7367_v61  ;;  %v926_v47 = vmul.f32 6.2831855, %v830_v20 }
 0x272   : > { %v2197_v44 = vadd.f32 1.0, %v2101_v59  ;;  %v1500_v57 = vmul.f32 2.7557319e-06, %v1404_v54  ;;  %v411_v27 = vmul.f32 %v6848_v30, %v6229_v43  ;;  %v938_v32 = vmul.f32 6.2831855, %v842_v42 }
 0x273   : > { %3001 = vmatpush1.bf16.msra.mxu0 %v2651_v13  ;;  %v2209_v40 = vadd.f32 1.0, %v2113_v29  ;;  %v1512_v6 = vmul.f32 2.7557319e-06, %v1416_v19  ;;  %v423_v7 = vmul.f32 %v6848_v30, %v6203_v58  ;;  %v7382_v14 = vsub.f32 %v542_v17, %v926_v47 }
 0x274   : > { %v2293_v33 = vmul.f32 %v2197_v44, %v7309_v46  ;;  %v1596_v48 = vadd.f32 -0.0001984127, %v1500_v57  ;;  %v539_v12 = vadd.f32 %v6183_v31, %v411_v27  ;;  %v7386_v39 = vsub.f32 %v554_v4, %v938_v32 }
 0x275   : > { %v2305_v26 = vmul.f32 %v2209_v40, %v7311_v38  ;;  %v1608_v63 = vadd.f32 -0.0001984127, %v1512_v6  ;;  %v551_v55 = vadd.f32 %v6299_v34, %v423_v7  ;;  %vm2389_vm9 = vcmp.lt.f32.partialorder %v7285_v22, 0.0 }
 0x276   : > { %v2485_v15 = vsub.f32 0.0, %v2293_v33  ;;  %v1692_v56 = vmul.f32 %v1596_v48, %v1404_v54  ;;  %v1118_v41 = vand.u32 2147483647, %v7382_v14  ;;  %vm2401_vm10 = vcmp.lt.f32.partialorder %v7289_v23, 0.0 }
 0x277   : > { %v2497_v46 = vsub.f32 0.0, %v2305_v26  ;;  %v1704_v17 = vmul.f32 %v1608_v63, %v1416_v19  ;;  %v1130_v21 = vand.u32 2147483647, %v7386_v39  ;;  %v635_v49 = vmul.f32 0.15915494, %v539_v12 }
 0x278   : > { %v2581_v1 = vsel %vm2389_vm9, %v2485_v15, %v2293_v33  ;;  %v1788_v36 = vadd.f32 0.008333333, %v1692_v56  ;;  %v1214_v38 = vsub.f32 3.1415927, %v1118_v41  ;;  %v647_v10 = vmul.f32 0.15915494, %v551_v55 }
 0x279   : > { %v2593_v4 = vsel %vm2401_vm10, %v2497_v46, %v2305_v26  ;;  %v1800_v53 = vadd.f32 0.008333333, %v1704_v17  ;;  %v1226_v45 = vsub.f32 3.1415927, %v1130_v21  ;;  %v731_v13 = vadd.f32 0.5, %v635_v49 }
 0x27a   : > { %v2653_v59 = vpack.c.bf16 %v2593_v4, %v2581_v1  ;;  %v1884_v22 = vmul.f32 %v1788_v36, %v1404_v54  ;;  %v7393_v20 = vmin.f32 %v1118_v41, %v1214_v38  ;;  %v743_v23 = vadd.f32 0.5, %v647_v10 }
 0x27b   : > { %v1896_v29 = vmul.f32 %v1800_v53, %v1416_v19  ;;  %v7395_v42 = vmin.f32 %v1130_v21, %v1226_v45  ;;  %v413_v44 = vmul.f32 %v7009_v0, %v6229_v43  ;;  %v827_v27 = vfloor.f32 %v731_v13 }
 0x27c   : > { %3074 = vmatpush1.bf16.msra.mxu1 %v2653_v59  ;;  %v1980_v57 = vadd.f32 -0.16666667, %v1884_v22  ;;  %v1406_v47 = vmul.f32 %v7393_v20, %v7393_v20  ;;  %v425_v40 = vmul.f32 %v7009_v0, %v6203_v58  ;;  %v839_v7 = vfloor.f32 %v743_v23 }
 0x27d   : > { %v1992_v6 = vadd.f32 -0.16666667, %v1896_v29  ;;  %v1418_v32 = vmul.f32 %v7395_v42, %v7395_v42  ;;  %v541_v33 = vadd.f32 %v6183_v31, %v413_v44  ;;  %v923_v63 = vmul.f32 6.2831855, %v827_v27 }
 0x27e   : > { %v2076_v48 = vmul.f32 %v1980_v57, %v1404_v54  ;;  %v1502_v26 = vmul.f32 2.7557319e-06, %v1406_v47  ;;  %v553_v43 = vadd.f32 %v6299_v34, %v425_v40  ;;  %v935_v41 = vmul.f32 6.2831855, %v839_v7 }
 0x27f   : > { %v2088_v15 = vmul.f32 %v1992_v6, %v1416_v19  ;;  %v1514_v56 = vmul.f32 2.7557319e-06, %v1418_v32  ;;  %v637_v46 = vmul.f32 0.15915494, %v541_v33  ;;  %v7407_v1 = vsub.f32 %v539_v12, %v923_v63 }
 0x280   : > { %v2172_v17 = vadd.f32 1.0, %v2076_v48  ;;  %v1598_v21 = vadd.f32 -0.0001984127, %v1502_v26  ;;  %v649_v58 = vmul.f32 0.15915494, %v553_v43  ;;  %v7409_v49 = vsub.f32 %v551_v55, %v935_v41 }
 0x281   : > { %v2184_v36 = vadd.f32 1.0, %v2088_v15  ;;  %v1610_v38 = vadd.f32 -0.0001984127, %v1514_v56  ;;  %v733_v4 = vadd.f32 0.5, %v637_v46  ;;  %vm2364_vm11 = vcmp.lt.f32.partialorder %v7342_v5, 0.0 }
 0x282   : > { %v2268_v31 = vmul.f32 %v2172_v17, %v7363_v50  ;;  %v1694_v54 = vmul.f32 %v1598_v21, %v1406_v47  ;;  %v1115_v34 = vand.u32 2147483647, %v7407_v1  ;;  %vm2376_vm12 = vcmp.lt.f32.partialorder %v7346_v2, 0.0 }
 0x283   : > { %v2280_v19 = vmul.f32 %v2184_v36, %v7367_v61  ;;  %v1706_v53 = vmul.f32 %v1610_v38, %v1418_v32  ;;  %v1127_v12 = vand.u32 2147483647, %v7409_v49  ;;  %v745_v55 = vadd.f32 0.5, %v649_v58 }
 0x284   : > { %v2460_v45 = vsub.f32 0.0, %v2268_v31  ;;  %v1790_v10 = vadd.f32 0.008333333, %v1694_v54  ;;  %v1211_v59 = vsub.f32 3.1415927, %v1115_v34  ;;  %v829_v50 = vfloor.f32 %v733_v4 }
 0x285   : > { %v2472_v22 = vsub.f32 0.0, %v2280_v19  ;;  %v1802_v13 = vadd.f32 0.008333333, %v1706_v53  ;;  %v1223_v29 = vsub.f32 3.1415927, %v1127_v12  ;;  %v841_v57 = vfloor.f32 %v745_v55 }
 0x286   : > { %v2556_v23 = vsel %vm2364_vm11, %v2460_v45, %v2268_v31  ;;  %v1886_v5 = vmul.f32 %v1790_v10, %v1406_v47  ;;  %v7417_v44 = vmin.f32 %v1115_v34, %v1211_v59  ;;  %v925_v2 = vmul.f32 6.2831855, %v829_v50  ;;  %v10352_v45 = vld [vmem:[#allocation10_spill] sm:$0xff] }
 0x287   : > { %v2568_v27 = vsel %vm2376_vm12, %v2472_v22, %v2280_v19  ;;  %v1898_v61 = vmul.f32 %v1802_v13, %v1418_v32  ;;  %v7419_v40 = vmin.f32 %v1127_v12, %v1223_v29  ;;  %v937_v26 = vmul.f32 6.2831855, %v841_v57 }
 0x288   : > { %v2640_v6 = vpack.c.bf16 %v2568_v27, %v2556_v23  ;;  %v1982_v7 = vadd.f32 -0.16666667, %v1886_v5  ;;  %v1403_v48 = vmul.f32 %v7417_v44, %v7417_v44  ;;  %vm2366_vm13 = vcmp.lt.f32.partialorder %v7382_v14, 0.0 }
 0x289   : > { %v1994_v63 = vadd.f32 -0.16666667, %v1898_v61  ;;  %v1415_v15 = vmul.f32 %v7419_v40, %v7419_v40  ;;  %v7426_v56 = vsub.f32 %v541_v33, %v925_v2  ;;  %vm2378_vm14 = vcmp.lt.f32.partialorder %v7386_v39, 0.0 }
 0x28a   : > { %3002 = vmatprep.subr.bf16.mxu0 %v2640_v6  ;;  %v2078_v41 = vmul.f32 %v1982_v7, %v1406_v47  ;;  %v1499_v46 = vmul.f32 2.7557319e-06, %v1403_v48  ;;  %v7429_v17 = vsub.f32 %v553_v43, %v937_v26  ;;  %v388_v38 = vmul.f32 %v7122_v25, %v6379_v28 }
 0x28b   : > { %v2090_v21 = vmul.f32 %v1994_v63, %v1418_v32  ;;  %v1511_v58 = vmul.f32 2.7557319e-06, %v1415_v15  ;;  %v1117_v36 = vand.u32 2147483647, %v7426_v56  ;;  %v400_v33 = vmul.f32 %v7122_v25, %v6425_v35 }
 0x28c   : > { %v2174_v4 = vadd.f32 1.0, %v2078_v41  ;;  %v1595_v31 = vadd.f32 -0.0001984127, %v1499_v46  ;;  %v1129_v54 = vand.u32 2147483647, %v7429_v17  ;;  %v516_v43 = vadd.f32 %v6402_v9, %v388_v38 }
 0x28d   : > { %v2186_v47 = vadd.f32 1.0, %v2090_v21  ;;  %v1607_v34 = vadd.f32 -0.0001984127, %v1511_v58  ;;  %v1213_v19 = vsub.f32 3.1415927, %v1117_v36  ;;  %v528_v10 = vadd.f32 %v10352_v45, %v400_v33 }
 0x28e   : > { %v2270_v32 = vmul.f32 %v2174_v4, %v7393_v20  ;;  %v1691_v53 = vmul.f32 %v1595_v31, %v1403_v48  ;;  %v1225_v12 = vsub.f32 3.1415927, %v1129_v54  ;;  %v612_v13 = vmul.f32 0.15915494, %v516_v43 }
 0x28f   : > { %v2282_v59 = vmul.f32 %v2186_v47, %v7395_v42  ;;  %v1703_v55 = vmul.f32 %v1607_v34, %v1415_v15  ;;  %v7441_v22 = vmin.f32 %v1117_v36, %v1213_v19  ;;  %v624_v5 = vmul.f32 0.15915494, %v528_v10 }
 0x290   : > { %v2462_v29 = vsub.f32 0.0, %v2270_v32  ;;  %v1787_v50 = vadd.f32 0.008333333, %v1691_v53  ;;  %v7443_v23 = vmin.f32 %v1129_v54, %v1225_v12  ;;  %v708_v61 = vadd.f32 0.5, %v612_v13 }
 0x291   : > { %v2474_v57 = vsub.f32 0.0, %v2282_v59  ;;  %v1799_v27 = vadd.f32 0.008333333, %v1703_v55  ;;  %v1405_v20 = vmul.f32 %v7441_v22, %v7441_v22  ;;  %v720_v7 = vadd.f32 0.5, %v624_v5 }
 0x292   : > { %v2558_v2 = vsel %vm2366_vm13, %v2462_v29, %v2270_v32  ;;  %v1883_v6 = vmul.f32 %v1787_v50, %v1403_v48  ;;  %v1417_v42 = vmul.f32 %v7443_v23, %v7443_v23  ;;  %v804_v46 = vfloor.f32 %v708_v61 }
 0x293   : > { %v2570_v26 = vsel %vm2378_vm14, %v2474_v57, %v2282_v59  ;;  %v1895_v63 = vmul.f32 %v1799_v27, %v1415_v15  ;;  %v1501_v41 = vmul.f32 2.7557319e-06, %v1405_v20  ;;  %v816_v38 = vfloor.f32 %v720_v7 }
 0x294   : > { %v2642_v21 = vpack.c.bf16 %v2570_v26, %v2558_v2  ;;  %v1979_v58 = vadd.f32 -0.16666667, %v1883_v6  ;;  %v1513_v36 = vmul.f32 2.7557319e-06, %v1417_v42  ;;  %v900_v54 = vmul.f32 6.2831855, %v804_v46 }
 0x295   : > { %v1991_v4 = vadd.f32 -0.16666667, %v1895_v63  ;;  %v1597_v31 = vadd.f32 -0.0001984127, %v1501_v41  ;;  %v390_v14 = vmul.f32 %v7133_v8, %v6379_v28  ;;  %v912_v34 = vmul.f32 6.2831855, %v816_v38 }
 0x296   : > { %3075 = vmatprep.subr.bf16.mxu1 %v2642_v21  ;;  %v2075_v33 = vmul.f32 %v1979_v58, %v1403_v48  ;;  %v1609_v47 = vadd.f32 -0.0001984127, %v1513_v36  ;;  %v402_v39 = vmul.f32 %v7133_v8, %v6425_v35  ;;  %v7457_v53 = vsub.f32 %v516_v43, %v900_v54 }
 0x297   : > { %v2087_v19 = vmul.f32 %v1991_v4, %v1415_v15  ;;  %v1693_v32 = vmul.f32 %v1597_v31, %v1405_v20  ;;  %v518_v12 = vadd.f32 %v6402_v9, %v390_v14  ;;  %v7460_v13 = vsub.f32 %v528_v10, %v912_v34 }
 0x298   : > { %v2171_v59 = vadd.f32 1.0, %v2075_v33  ;;  %v1705_v55 = vmul.f32 %v1609_v47, %v1417_v42  ;;  %v530_v29 = vadd.f32 %v10352_v45, %v402_v39  ;;  %vm2363_vm15 = vcmp.lt.f32.partialorder %v7407_v1, 0.0 }
 0x299   : > { %v2183_v50 = vadd.f32 1.0, %v2087_v19  ;;  %v1789_v48 = vadd.f32 0.008333333, %v1693_v32  ;;  %v1092_v5 = vand.u32 2147483647, %v7457_v53  ;;  %vm2375_vm1 = vcmp.lt.f32.partialorder %v7409_v49, 0.0 }
 0x29a   : > { %v2267_v57 = vmul.f32 %v2171_v59, %v7417_v44  ;;  %v1801_v15 = vadd.f32 0.008333333, %v1705_v55  ;;  %v1104_v43 = vand.u32 2147483647, %v7460_v13  ;;  %v614_v2 = vmul.f32 0.15915494, %v518_v12 }
 0x29b   : > { %v2279_v27 = vmul.f32 %v2183_v50, %v7419_v40  ;;  %v1885_v61 = vmul.f32 %v1789_v48, %v1405_v20  ;;  %v1188_v10 = vsub.f32 3.1415927, %v1092_v5  ;;  %v626_v63 = vmul.f32 0.15915494, %v530_v29 }
 0x29c   : > { %v2459_v6 = vsub.f32 0.0, %v2267_v57  ;;  %v1897_v7 = vmul.f32 %v1801_v15, %v1417_v42  ;;  %v1200_v26 = vsub.f32 3.1415927, %v1104_v43  ;;  %v710_v58 = vadd.f32 0.5, %v614_v2 }
 0x29d   : > { %v2471_v41 = vsub.f32 0.0, %v2279_v27  ;;  %v1981_v46 = vadd.f32 -0.16666667, %v1885_v61  ;;  %v7469_v21 = vmin.f32 %v1092_v5, %v1188_v10  ;;  %v722_v4 = vadd.f32 0.5, %v626_v63 }
 0x29e   : > { %v2555_v44 = vsel %vm2363_vm15, %v2459_v6, %v2267_v57  ;;  %v1993_v36 = vadd.f32 -0.16666667, %v1897_v7  ;;  %v7473_v38 = vmin.f32 %v1104_v43, %v1200_v26  ;;  %v806_v14 = vfloor.f32 %v710_v58 }
 0x29f   : > { %v2567_v40 = vsel %vm2375_vm1, %v2471_v41, %v2279_v27  ;;  %v2077_v31 = vmul.f32 %v1981_v46, %v1405_v20  ;;  %v1380_v54 = vmul.f32 %v7469_v21, %v7469_v21  ;;  %v818_v39 = vfloor.f32 %v722_v4 }
 0x2a0   : > { %v2639_v33 = vpack.c.bf16 %v2567_v40, %v2555_v44  ;;  %v2089_v47 = vmul.f32 %v1993_v36, %v1417_v42  ;;  %v1392_v34 = vmul.f32 %v7473_v38, %v7473_v38  ;;  %v902_v32 = vmul.f32 6.2831855, %v806_v14 }
 0x2a1   : > { %v2173_v1 = vadd.f32 1.0, %v2077_v31  ;;  %v1476_v19 = vmul.f32 2.7557319e-06, %v1380_v54  ;;  %v387_v59 = vmul.f32 %v6848_v30, %v6379_v28  ;;  %v914_v20 = vmul.f32 6.2831855, %v818_v39 }
 0x2a2   : > { %3003 = vmatpush1.bf16.msra.mxu0 %v2639_v33  ;;  %v2185_v49 = vadd.f32 1.0, %v2089_v47  ;;  %v1488_v55 = vmul.f32 2.7557319e-06, %v1392_v34  ;;  %v399_v50 = vmul.f32 %v6848_v30, %v6425_v35  ;;  %v7486_v5 = vsub.f32 %v518_v12, %v902_v32 }
 0x2a3   : > { %v2269_v48 = vmul.f32 %v2173_v1, %v7441_v22  ;;  %v1572_v42 = vadd.f32 -0.0001984127, %v1476_v19  ;;  %v515_v57 = vadd.f32 %v6402_v9, %v387_v59  ;;  %v7490_v27 = vsub.f32 %v530_v29, %v914_v20 }
 0x2a4   : > { %v2281_v15 = vmul.f32 %v2185_v49, %v7443_v23  ;;  %v1584_v43 = vadd.f32 -0.0001984127, %v1488_v55  ;;  %v527_v61 = vadd.f32 %v10352_v45, %v399_v50  ;;  %vm2365_vm2 = vcmp.lt.f32.partialorder %v7426_v56, 0.0 }
 0x2a5   : > { %v2461_v10 = vsub.f32 0.0, %v2269_v48  ;;  %v1668_v2 = vmul.f32 %v1572_v42, %v1380_v54  ;;  %v1094_v6 = vand.u32 2147483647, %v7486_v5  ;;  %vm2377_vm3 = vcmp.lt.f32.partialorder %v7429_v17, 0.0 }
 0x2a6   : > { %v2473_v22 = vsub.f32 0.0, %v2281_v15  ;;  %v1680_v12 = vmul.f32 %v1584_v43, %v1392_v34  ;;  %v1106_v7 = vand.u32 2147483647, %v7490_v27  ;;  %v611_v41 = vmul.f32 0.15915494, %v515_v57 }
 0x2a7   : > { %v2557_v26 = vsel %vm2365_vm2, %v2461_v10, %v2269_v48  ;;  %v1764_v63 = vadd.f32 0.008333333, %v1668_v2  ;;  %v1190_v23 = vsub.f32 3.1415927, %v1094_v6  ;;  %v623_v44 = vmul.f32 0.15915494, %v527_v61 }
 0x2a8   : > { %v2569_v29 = vsel %vm2377_vm3, %v2473_v22, %v2281_v15  ;;  %v1776_v46 = vadd.f32 0.008333333, %v1680_v12  ;;  %v1202_v58 = vsub.f32 3.1415927, %v1106_v7  ;;  %v707_v40 = vadd.f32 0.5, %v611_v41 }
 0x2a9   : > { %v2641_v36 = vpack.c.bf16 %v2569_v29, %v2557_v26  ;;  %v1860_v56 = vmul.f32 %v1764_v63, %v1380_v54  ;;  %v7497_v4 = vmin.f32 %v1094_v6, %v1190_v23  ;;  %v719_v17 = vadd.f32 0.5, %v623_v44 }
 0x2aa   : > { %v1872_v31 = vmul.f32 %v1776_v46, %v1392_v34  ;;  %v7499_v14 = vmin.f32 %v1106_v7, %v1202_v58  ;;  %v389_v33 = vmul.f32 %v7009_v0, %v6379_v28  ;;  %v803_v1 = vfloor.f32 %v707_v40 }
 0x2ab   : > { %3076 = vmatpush1.bf16.msra.mxu1 %v2641_v36  ;;  %v1956_v47 = vadd.f32 -0.16666667, %v1860_v56  ;;  %v1382_v39 = vmul.f32 %v7497_v4, %v7497_v4  ;;  %v401_v19 = vmul.f32 %v7009_v0, %v6425_v35  ;;  %v815_v49 = vfloor.f32 %v719_v17 }
 0x2ac   : > { %v1968_v32 = vadd.f32 -0.16666667, %v1872_v31  ;;  %v1394_v59 = vmul.f32 %v7499_v14, %v7499_v14  ;;  %v517_v55 = vadd.f32 %v6402_v9, %v389_v33  ;;  %v899_v48 = vmul.f32 6.2831855, %v803_v1 }
 0x2ad   : > { %v2052_v20 = vmul.f32 %v1956_v47, %v1380_v54  ;;  %v1478_v50 = vmul.f32 2.7557319e-06, %v1382_v39  ;;  %v529_v28 = vadd.f32 %v10352_v45, %v401_v19  ;;  %v911_v43 = vmul.f32 6.2831855, %v815_v49 }
 0x2ae   : > { %v2064_v42 = vmul.f32 %v1968_v32, %v1392_v34  ;;  %v1490_v15 = vmul.f32 2.7557319e-06, %v1394_v59  ;;  %v613_v10 = vmul.f32 0.15915494, %v517_v55  ;;  %v7511_v22 = vsub.f32 %v515_v57, %v899_v48 }
 0x2af   : > { %v2148_v2 = vadd.f32 1.0, %v2052_v20  ;;  %v1574_v6 = vadd.f32 -0.0001984127, %v1478_v50  ;;  %v625_v35 = vmul.f32 0.15915494, %v529_v28  ;;  %v7513_v26 = vsub.f32 %v527_v61, %v911_v43 }
 0x2b0   : > { %v2160_v12 = vadd.f32 1.0, %v2064_v42  ;;  %v1586_v7 = vadd.f32 -0.0001984127, %v1490_v15  ;;  %v709_v63 = vadd.f32 0.5, %v613_v10  ;;  %vm2340_vm4 = vcmp.lt.f32.partialorder %v7457_v53, 0.0 }
 0x2b1   : > { %v2244_v9 = vmul.f32 %v2148_v2, %v7469_v21  ;;  %v1670_v54 = vmul.f32 %v1574_v6, %v1382_v39  ;;  %v1091_v45 = vand.u32 2147483647, %v7511_v22  ;;  %vm2352_vm5 = vcmp.lt.f32.partialorder %v7460_v13, 0.0 }
 0x2b2   : > { %v2256_v34 = vmul.f32 %v2160_v12, %v7473_v38  ;;  %v1682_v23 = vmul.f32 %v1586_v7, %v1394_v59  ;;  %v1103_v57 = vand.u32 2147483647, %v7513_v26  ;;  %v721_v61 = vadd.f32 0.5, %v625_v35 }
 0x2b3   : > { %v2436_v41 = vsub.f32 0.0, %v2244_v9  ;;  %v1766_v29 = vadd.f32 0.008333333, %v1670_v54  ;;  %v1187_v46 = vsub.f32 3.1415927, %v1091_v45  ;;  %v805_v21 = vfloor.f32 %v709_v63 }
 0x2b4   : > { %v2448_v58 = vsub.f32 0.0, %v2256_v34  ;;  %v1778_v44 = vadd.f32 0.008333333, %v1682_v23  ;;  %v1199_v36 = vsub.f32 3.1415927, %v1103_v57  ;;  %v817_v31 = vfloor.f32 %v721_v61 }
 0x2b5   : > { %v2532_v56 = vsel %vm2340_vm4, %v2436_v41, %v2244_v9  ;;  %v1862_v53 = vmul.f32 %v1766_v29, %v1382_v39  ;;  %v7521_v40 = vmin.f32 %v1091_v45, %v1187_v46  ;;  %v901_v13 = vmul.f32 6.2831855, %v805_v21 }
 0x2b6   : > { %v2544_v17 = vsel %vm2352_vm5, %v2448_v58, %v2256_v34  ;;  %v1874_v38 = vmul.f32 %v1778_v44, %v1394_v59  ;;  %v7523_v33 = vmin.f32 %v1103_v57, %v1199_v36  ;;  %v913_v32 = vmul.f32 6.2831855, %v817_v31 }
 0x2b7   : > { %v2628_v47 = vpack.c.bf16 %v2544_v17, %v2532_v56  ;;  %v1958_v1 = vadd.f32 -0.16666667, %v1862_v53  ;;  %v1379_v19 = vmul.f32 %v7521_v40, %v7521_v40  ;;  %vm2342_vm6 = vcmp.lt.f32.partialorder %v7486_v5, 0.0 }
 0x2b8   : > { %v1970_v49 = vadd.f32 -0.16666667, %v1874_v38  ;;  %v1391_v20 = vmul.f32 %v7523_v33, %v7523_v33  ;;  %v7530_v50 = vsub.f32 %v517_v55, %v901_v13  ;;  %vm2354_vm7 = vcmp.lt.f32.partialorder %v7490_v27, 0.0 }
 0x2b9   : > { %3004 = vmatprep.subr.bf16.mxu0 %v2628_v47  ;;  %v2054_v48 = vmul.f32 %v1958_v1, %v1382_v39  ;;  %v1475_v42 = vmul.f32 2.7557319e-06, %v1379_v19  ;;  %v7533_v15 = vsub.f32 %v529_v28, %v913_v32  ;;  %v364_v6 = vmul.f32 %v7122_v25, %v6517_v37 }
 0x2ba   : > { %v2066_v43 = vmul.f32 %v1970_v49, %v1394_v59  ;;  %v1487_v10 = vmul.f32 2.7557319e-06, %v1391_v20  ;;  %v1093_v2 = vand.u32 2147483647, %v7530_v50  ;;  %v376_v55 = vmul.f32 %v7122_v25, %v6521_v62 }
 0x2bb   : > { %v2150_v35 = vadd.f32 1.0, %v2054_v48  ;;  %v1571_v12 = vadd.f32 -0.0001984127, %v1475_v42  ;;  %v1105_v7 = vand.u32 2147483647, %v7533_v15  ;;  %v492_v28 = vadd.f32 %v6534_v52, %v364_v6 }
 0x2bc   : > { %v2162_v39 = vadd.f32 1.0, %v2066_v43  ;;  %v1583_v63 = vadd.f32 -0.0001984127, %v1487_v10  ;;  %v1189_v9 = vsub.f32 3.1415927, %v1093_v2  ;;  %v504_v34 = vadd.f32 %v6539_v51, %v376_v55 }
 0x2bd   : > { %v2246_v59 = vmul.f32 %v2150_v35, %v7497_v4  ;;  %v1667_v54 = vmul.f32 %v1571_v12, %v1379_v19  ;;  %v1201_v45 = vsub.f32 3.1415927, %v1105_v7  ;;  %v588_v29 = vmul.f32 0.15915494, %v492_v28 }
 0x2be   : > { %v2258_v23 = vmul.f32 %v2162_v39, %v7499_v14  ;;  %v1679_v57 = vmul.f32 %v1583_v63, %v1391_v20  ;;  %v7545_v41 = vmin.f32 %v1093_v2, %v1189_v9  ;;  %v600_v58 = vmul.f32 0.15915494, %v504_v34 }
 0x2bf   : > { %v2438_v46 = vsub.f32 0.0, %v2246_v59  ;;  %v1763_v61 = vadd.f32 0.008333333, %v1667_v54  ;;  %v7547_v25 = vmin.f32 %v1105_v7, %v1201_v45  ;;  %v684_v21 = vadd.f32 0.5, %v588_v29 }
 0x2c0   : > { %v2450_v44 = vsub.f32 0.0, %v2258_v23  ;;  %v1775_v36 = vadd.f32 0.008333333, %v1679_v57  ;;  %v1381_v4 = vmul.f32 %v7545_v41, %v7545_v41  ;;  %v696_v31 = vadd.f32 0.5, %v600_v58 }
 0x2c1   : > { %v2534_v56 = vsel %vm2342_vm6, %v2438_v46, %v2246_v59  ;;  %v1859_v53 = vmul.f32 %v1763_v61, %v1379_v19  ;;  %v1393_v14 = vmul.f32 %v7547_v25, %v7547_v25  ;;  %v780_v47 = vfloor.f32 %v684_v21 }
 0x2c2   : > { %v2546_v17 = vsel %vm2354_vm7, %v2450_v44, %v2258_v23  ;;  %v1871_v38 = vmul.f32 %v1775_v36, %v1391_v20  ;;  %v1477_v13 = vmul.f32 2.7557319e-06, %v1381_v4  ;;  %v792_v48 = vfloor.f32 %v696_v31 }
 0x2c3   : > { %v2630_v1 = vpack.c.bf16 %v2546_v17, %v2534_v56  ;;  %v1955_v32 = vadd.f32 -0.16666667, %v1859_v53  ;;  %v1489_v49 = vmul.f32 2.7557319e-06, %v1393_v14  ;;  %v876_v10 = vmul.f32 6.2831855, %v780_v47 }
 0x2c4   : > { %v1967_v42 = vadd.f32 -0.16666667, %v1871_v38  ;;  %v1573_v43 = vadd.f32 -0.0001984127, %v1477_v13  ;;  %v366_v5 = vmul.f32 %v7133_v8, %v6517_v37  ;;  %v888_v35 = vmul.f32 6.2831855, %v792_v48 }
 0x2c5   : > { %3077 = vmatprep.subr.bf16.mxu1 %v2630_v1  ;;  %v2051_v2 = vmul.f32 %v1955_v32, %v1379_v19  ;;  %v1585_v6 = vadd.f32 -0.0001984127, %v1489_v49  ;;  %v378_v27 = vmul.f32 %v7133_v8, %v6521_v62  ;;  %v7561_v55 = vsub.f32 %v492_v28, %v876_v10 }
 0x2c6   : > { %v2063_v12 = vmul.f32 %v1967_v42, %v1391_v20  ;;  %v1669_v7 = vmul.f32 %v1573_v43, %v1381_v4  ;;  %v494_v39 = vadd.f32 %v6534_v52, %v366_v5  ;;  %v7564_v59 = vsub.f32 %v504_v34, %v888_v35 }
 0x2c7   : > { %v2147_v63 = vadd.f32 1.0, %v2051_v2  ;;  %v1681_v9 = vmul.f32 %v1585_v6, %v1393_v14  ;;  %v506_v54 = vadd.f32 %v6539_v51, %v378_v27  ;;  %vm2339_vm8 = vcmp.lt.f32.partialorder %v7511_v22, 0.0 }
 0x2c8   : > { %v2159_v45 = vadd.f32 1.0, %v2063_v12  ;;  %v1765_v19 = vadd.f32 0.008333333, %v1669_v7  ;;  %v1068_v23 = vand.u32 2147483647, %v7561_v55  ;;  %vm2351_vm9 = vcmp.lt.f32.partialorder %v7513_v26, 0.0 }
 0x2c9   : > { %v2243_v8 = vmul.f32 %v2147_v63, %v7521_v40  ;;  %v1777_v20 = vadd.f32 0.008333333, %v1681_v9  ;;  %v1080_v28 = vand.u32 2147483647, %v7564_v59  ;;  %v590_v46 = vmul.f32 0.15915494, %v494_v39 }
 0x2ca   : > { %v2255_v57 = vmul.f32 %v2159_v45, %v7523_v33  ;;  %v1861_v29 = vmul.f32 %v1765_v19, %v1381_v4  ;;  %v1164_v34 = vsub.f32 3.1415927, %v1068_v23  ;;  %v602_v36 = vmul.f32 0.15915494, %v506_v54 }
 0x2cb   : > { %v2435_v61 = vsub.f32 0.0, %v2243_v8  ;;  %v1873_v58 = vmul.f32 %v1777_v20, %v1393_v14  ;;  %v1176_v44 = vsub.f32 3.1415927, %v1080_v28  ;;  %v686_v31 = vadd.f32 0.5, %v590_v46 }
 0x2cc   : > { %v2447_v21 = vsub.f32 0.0, %v2255_v57  ;;  %v1957_v56 = vadd.f32 -0.16666667, %v1861_v29  ;;  %v7573_v53 = vmin.f32 %v1068_v23, %v1164_v34  ;;  %v698_v13 = vadd.f32 0.5, %v602_v36 }
 0x2cd   : > { %v2531_v40 = vsel %vm2339_vm8, %v2435_v61, %v2243_v8  ;;  %v1969_v17 = vadd.f32 -0.16666667, %v1873_v58  ;;  %v7577_v38 = vmin.f32 %v1080_v28, %v1176_v44  ;;  %v782_v32 = vfloor.f32 %v686_v31 }
 0x2ce   : > { %v2543_v33 = vsel %vm2351_vm9, %v2447_v21, %v2255_v57  ;;  %v2053_v47 = vmul.f32 %v1957_v56, %v1381_v4  ;;  %v1356_v1 = vmul.f32 %v7573_v53, %v7573_v53  ;;  %v794_v43 = vfloor.f32 %v698_v13 }
 0x2cf   : > { %v2627_v49 = vpack.c.bf16 %v2543_v33, %v2531_v40  ;;  %v2065_v48 = vmul.f32 %v1969_v17, %v1393_v14  ;;  %v1368_v42 = vmul.f32 %v7577_v38, %v7577_v38  ;;  %v878_v5 = vmul.f32 6.2831855, %v782_v32 }
 0x2d0   : > { %v2149_v22 = vadd.f32 1.0, %v2053_v47  ;;  %v1452_v10 = vmul.f32 2.7557319e-06, %v1356_v1  ;;  %v363_v2 = vmul.f32 %v6848_v30, %v6517_v37  ;;  %v890_v4 = vmul.f32 6.2831855, %v794_v43 }
 0x2d1   : > { %3005 = vmatpush1.bf16.msra.mxu0 %v2627_v49  ;;  %v2161_v26 = vadd.f32 1.0, %v2065_v48  ;;  %v1464_v6 = vmul.f32 2.7557319e-06, %v1368_v42  ;;  %v375_v35 = vmul.f32 %v6848_v30, %v6521_v62  ;;  %v7590_v12 = vsub.f32 %v494_v39, %v878_v5 }
 0x2d2   : > { %v2245_v27 = vmul.f32 %v2149_v22, %v7545_v41  ;;  %v1548_v14 = vadd.f32 -0.0001984127, %v1452_v10  ;;  %v491_v7 = vadd.f32 %v6534_v52, %v363_v2  ;;  %v7594_v45 = vsub.f32 %v506_v54, %v890_v4 }
 0x2d3   : > { %v2257_v63 = vmul.f32 %v2161_v26, %v7547_v25  ;;  %v1560_v9 = vadd.f32 -0.0001984127, %v1464_v6  ;;  %v503_v19 = vadd.f32 %v6539_v51, %v375_v35  ;;  %vm2341_vm10 = vcmp.lt.f32.partialorder %v7530_v50, 0.0 }
 0x2d4   : > { %v2437_v23 = vsub.f32 0.0, %v2245_v27  ;;  %v1644_v8 = vmul.f32 %v1548_v14, %v1356_v1  ;;  %v1070_v30 = vand.u32 2147483647, %v7590_v12  ;;  %vm2353_vm11 = vcmp.lt.f32.partialorder %v7533_v15, 0.0 }
 0x2d5   : > { %v2449_v41 = vsub.f32 0.0, %v2257_v63  ;;  %v1656_v39 = vmul.f32 %v1560_v9, %v1368_v42  ;;  %v1082_v20 = vand.u32 2147483647, %v7594_v45  ;;  %v587_v29 = vmul.f32 0.15915494, %v491_v7 }
 0x2d6   : > { %v2533_v28 = vsel %vm2341_vm10, %v2437_v23, %v2245_v27  ;;  %v1740_v57 = vadd.f32 0.008333333, %v1644_v8  ;;  %v1166_v25 = vsub.f32 3.1415927, %v1070_v30  ;;  %v599_v61 = vmul.f32 0.15915494, %v503_v19 }
 0x2d7   : > { %v2545_v54 = vsel %vm2353_vm11, %v2449_v41, %v2257_v63  ;;  %v1752_v34 = vadd.f32 0.008333333, %v1656_v39  ;;  %v1178_v46 = vsub.f32 3.1415927, %v1082_v20  ;;  %v683_v36 = vadd.f32 0.5, %v587_v29 }
 0x2d8   : > { %v2629_v58 = vpack.c.bf16 %v2545_v54, %v2533_v28  ;;  %v1836_v50 = vmul.f32 %v1740_v57, %v1356_v1  ;;  %v7601_v44 = vmin.f32 %v1070_v30, %v1166_v25  ;;  %v695_v15 = vadd.f32 0.5, %v599_v61 }
 0x2d9   : > { %v1848_v21 = vmul.f32 %v1752_v34, %v1368_v42  ;;  %v7603_v56 = vmin.f32 %v1082_v20, %v1178_v46  ;;  %v365_v31 = vmul.f32 %v7009_v0, %v6517_v37  ;;  %v779_v13 = vfloor.f32 %v683_v36 }
 0x2da   : > { %3078 = vmatpush1.bf16.msra.mxu1 %v2629_v58  ;;  %v1932_v40 = vadd.f32 -0.16666667, %v1836_v50  ;;  %v1358_v17 = vmul.f32 %v7601_v44, %v7601_v44  ;;  %v377_v33 = vmul.f32 %v7009_v0, %v6521_v62  ;;  %v791_v49 = vfloor.f32 %v695_v15 }
 0x2db   : > { %v1944_v47 = vadd.f32 -0.16666667, %v1848_v21  ;;  %v1370_v32 = vmul.f32 %v7603_v56, %v7603_v56  ;;  %v493_v48 = vadd.f32 %v6534_v52, %v365_v31  ;;  %v875_v10 = vmul.f32 6.2831855, %v779_v13 }
 0x2dc   : > { %v2028_v43 = vmul.f32 %v1932_v40, %v1356_v1  ;;  %v1454_v22 = vmul.f32 2.7557319e-06, %v1358_v17  ;;  %v505_v37 = vadd.f32 %v6539_v51, %v377_v33  ;;  %v887_v26 = vmul.f32 6.2831855, %v791_v49 }
 0x2dd   : > { %v2040_v5 = vmul.f32 %v1944_v47, %v1368_v42  ;;  %v1466_v2 = vmul.f32 2.7557319e-06, %v1370_v32  ;;  %v589_v6 = vmul.f32 0.15915494, %v493_v48  ;;  %v7615_v27 = vsub.f32 %v491_v7, %v875_v10 }
 0x2de   : > { %v2124_v4 = vadd.f32 1.0, %v2028_v43  ;;  %v1550_v35 = vadd.f32 -0.0001984127, %v1454_v22  ;;  %v601_v62 = vmul.f32 0.15915494, %v505_v37  ;;  %v7617_v63 = vsub.f32 %v503_v19, %v887_v26  ;;  %v5871_v22 = vld [vmem:[%s9965_s1 + $0x38] sm:$0xff] }
 0x2df   : > { %v2136_v0 = vadd.f32 1.0, %v2040_v5  ;;  %v1562_v14 = vadd.f32 -0.0001984127, %v1466_v2  ;;  %v685_v9 = vadd.f32 0.5, %v589_v6  ;;  %vm2316_vm12 = vcmp.lt.f32.partialorder %v7561_v55, 0.0 }
 0x2e0   : > { %v2220_v52 = vmul.f32 %v2124_v4, %v7573_v53  ;;  %v1646_v1 = vmul.f32 %v1550_v35, %v1358_v17  ;;  %v1067_v51 = vand.u32 2147483647, %v7615_v27  ;;  %vm2328_vm13 = vcmp.lt.f32.partialorder %v7564_v59, 0.0 }
 0x2e1   : > { %v2232_v42 = vmul.f32 %v2136_v0, %v7577_v38  ;;  %v1658_v23 = vmul.f32 %v1562_v14, %v1370_v32  ;;  %v1079_v7 = vand.u32 2147483647, %v7617_v63  ;;  %v697_v19 = vadd.f32 0.5, %v601_v62  ;;  %v5873_v14 = vld [vmem:[%s9965_s1 + $0x28] sm:$0xff] }
 0x2e2   : > { %v2412_v8 = vsub.f32 0.0, %v2220_v52  ;;  %v1742_v30 = vadd.f32 0.008333333, %v1646_v1  ;;  %v1163_v41 = vsub.f32 3.1415927, %v1067_v51  ;;  %v781_v53 = vfloor.f32 %v685_v9 }
 0x2e3   : > { %v2424_v39 = vsub.f32 0.0, %v2232_v42  ;;  %v1754_v20 = vadd.f32 0.008333333, %v1658_v23  ;;  %v1175_v28 = vsub.f32 3.1415927, %v1079_v7  ;;  %v793_v29 = vfloor.f32 %v697_v19 }
 0x2e4   : > { %v2508_v57 = vsel %vm2316_vm12, %v2412_v8, %v2220_v52  ;;  %v1838_v55 = vmul.f32 %v1742_v30, %v1358_v17  ;;  %v7625_v25 = vmin.f32 %v1067_v51, %v1163_v41  ;;  %v877_v59 = vmul.f32 6.2831855, %v781_v53  ;;  %v5874_v51 = vld [vmem:[%s9965_s1 + $0x18] sm:$0xff] }
 0x2e5   : > { %v2520_v54 = vsel %vm2328_vm13, %v2424_v39, %v2232_v42  ;;  %v1850_v38 = vmul.f32 %v1754_v20, %v1370_v32  ;;  %v7627_v34 = vmin.f32 %v1079_v7, %v1175_v28  ;;  %v889_v50 = vmul.f32 6.2831855, %v793_v29  ;;  %v5875_v39 = vld [vmem:[%s9965_s1 + $0x20] sm:$0xff] }
 0x2e6   : > { %v2616_v46 = vpack.c.bf16 %v2520_v54, %v2508_v57  ;;  %v1934_v61 = vadd.f32 -0.16666667, %v1838_v55  ;;  %v1355_v58 = vmul.f32 %v7625_v25, %v7625_v25  ;;  %v7633_v15 = vsub.f32 %v493_v48, %v877_v59  ;;  %v5877_v59 = vld [vmem:[%s9965_s1 + $0x10] sm:$0xff] }
 0x2e7   : > { %v1946_v36 = vadd.f32 -0.16666667, %v1850_v38  ;;  %v1367_v21 = vmul.f32 %v7627_v34, %v7627_v34  ;;  %v7635_v13 = vsub.f32 %v505_v37, %v889_v50  ;;  %v5977_v33 = vmov 2  }
 0x2e8   : > { %3006 = vmatprep.subr.bf16.mxu0 %v2616_v46  ;;  %v2030_v31 = vmul.f32 %v1934_v61, %v1358_v17  ;;  %v1451_v40 = vmul.f32 2.7557319e-06, %v1355_v58  ;;  %5868 = vset.pattern.permute.xlu1 %v5977_v33  ;;  %v1069_v43 = vand.u32 2147483647, %v7633_v15  ;;  %v5872_v17 = vld [vmem:[%s9965_s1 + $0x30] sm:$0xff]  ;;  %vm2318_vm14 = vcmp.lt.f32.partialorder %v7590_v12, 0.0 }
 0x2e9   : > { %v2042_v47 = vmul.f32 %v1946_v36, %v1370_v32  ;;  %v1463_v49 = vmul.f32 2.7557319e-06, %v1367_v21  ;;  %2684 = vperm.xlu1 %5868, %v5871_v22   ;;  %5869 = vset.pattern.permute.xlu0 %v5977_v33  ;;  %v1081_v5 = vand.u32 2147483647, %v7635_v13  ;;  %vm2330_vm15 = vcmp.lt.f32.partialorder %v7594_v45, 0.0  ;;  %v5876_v12 = vld [vmem:[%s9965_s1 + $0x8] sm:$0xff] }
 0x2ea   : > { %v2126_v10 = vadd.f32 1.0, %v2030_v31  ;;  %v1547_v48 = vadd.f32 -0.0001984127, %v1451_v40  ;;  %2680 = vperm.xlu0 %5869, %v5872_v17   ;;  %v1165_v2 = vsub.f32 3.1415927, %v1069_v43  ;;  %vm2315_vm1 = vcmp.lt.f32.partialorder %v7615_v27, 0.0 }
 0x2eb   : > { %v2138_v37 = vadd.f32 1.0, %v2042_v47  ;;  %v1559_v32 = vadd.f32 -0.0001984127, %v1463_v49  ;;  %v1177_v4 = vsub.f32 3.1415927, %v1081_v5  ;;  %vm2327_vm2 = vcmp.lt.f32.partialorder %v7617_v63, 0.0 }
 0x2ec   : > { %v2222_v26 = vmul.f32 %v2126_v10, %v7601_v44  ;;  %v1643_v6 = vmul.f32 %v1547_v48, %v1355_v58  ;;  %v1261_v0 = vmin.f32 %v1069_v43, %v1165_v2  ;;  %vm2317_vm3 = vcmp.lt.f32.partialorder %v7633_v15, 0.0 }
 0x2ed   : > { %v2234_v35 = vmul.f32 %v2138_v37, %v7603_v56  ;;  %v1655_v62 = vmul.f32 %v1559_v32, %v1367_v21  ;;  %2676 = vperm.xlu1 %5868, %v5873_v14   ;;  %v1273_v1 = vmin.f32 %v1081_v5, %v1177_v4  ;;  %vm2329_vm4 = vcmp.lt.f32.partialorder %v7635_v13, 0.0 }
 0x2ee   : > { %v2414_v9 = vsub.f32 0.0, %v2222_v26  ;;  %v1739_v52 = vadd.f32 0.008333333, %v1643_v6  ;;  %2668 = vperm.xlu0 %5869, %v5874_v51   ;;  %v1357_v23 = vmul.f32 %v1261_v0, %v1261_v0 }
 0x2ef   : > { %v2426_v44 = vsub.f32 0.0, %v2234_v35  ;;  %v1751_v42 = vadd.f32 0.008333333, %v1655_v62  ;;  %v1369_v7 = vmul.f32 %v1273_v1, %v1273_v1 }
 0x2f0   : > { %v1835_v56 = vmul.f32 %v1739_v52, %v1355_v58  ;;  %v2510_v8 = vsel %vm2318_vm14, %v2414_v9, %v2222_v26  ;;  %v1453_v19 = vmul.f32 2.7557319e-06, %v1357_v23 }
 0x2f1   : > { %v2522_v30 = vsel %vm2330_vm15, %v2426_v44, %v2234_v35  ;;  %v1847_v41 = vmul.f32 %v1751_v42, %v1367_v21  ;;  %2672 = vperm.xlu1 %5868, %v5875_v39   ;;  %v1465_v53 = vmul.f32 2.7557319e-06, %v1369_v7 }
 0x2f2   : > { %v2618_v20 = vpack.c.bf16 %v2522_v30, %v2510_v8  ;;  %v1931_v28 = vadd.f32 -0.16666667, %v1835_v56  ;;  %2660 = vperm.xlu0 %5869, %v5876_v12   ;;  %v1549_v57 = vadd.f32 -0.0001984127, %v1453_v19 }
 0x2f3   : > { %v1943_v45 = vadd.f32 -0.16666667, %v1847_v41  ;;  %v1561_v29 = vadd.f32 -0.0001984127, %v1465_v53 }
 0x2f4   : > { %3079 = vmatprep.subr.bf16.mxu1 %v2618_v20  ;;  %v2027_v55 = vmul.f32 %v1931_v28, %v1355_v58  ;;  %v1645_v38 = vmul.f32 %v1549_v57, %v1357_v23  ;;  %v5878_v58 = vld [vmem:[%s9965_s1] sm:$0xff] }
 0x2f5   : > { %v2039_v54 = vmul.f32 %v1943_v45, %v1367_v21  ;;  %2664 = vperm.xlu1 %5868, %v5877_v59   ;;  %v1657_v61 = vmul.f32 %v1561_v29, %v1369_v7 }
 0x2f6   : > { %v2123_v46 = vadd.f32 1.0, %v2027_v55  ;;  %v1741_v36 = vadd.f32 0.008333333, %v1645_v38 }
 0x2f7   : > { %v2135_v50 = vadd.f32 1.0, %v2039_v54  ;;  %v1753_v40 = vadd.f32 0.008333333, %v1657_v61 }
 0x2f8   : > { %v2219_v31 = vmul.f32 %v2123_v46, %v7625_v25  ;;  %v1837_v47 = vmul.f32 %v1741_v36, %v1357_v23 }
 0x2f9   : > { %v2231_v33 = vmul.f32 %v2135_v50, %v7627_v34  ;;  %2656 = vperm.xlu1 %5868, %v5878_v58   ;;  %v1849_v49 = vmul.f32 %v1753_v40, %v1369_v7 }
 0x2fa   : > { %v2411_v21 = vsub.f32 0.0, %v2219_v31  ;;  %v1933_v22 = vadd.f32 -0.16666667, %v1837_v47 }
 0x2fb   : > { %v2423_v43 = vsub.f32 0.0, %v2231_v33  ;;  %v1945_v10 = vadd.f32 -0.16666667, %v1849_v49 }
 0x2fc   : > { %v2507_v48 = vsel %vm2315_vm1, %v2411_v21, %v2219_v31  ;;  %v2029_v5 = vmul.f32 %v1933_v22, %v1357_v23 }
 0x2fd   : > { %v2519_v25 = vsel %vm2327_vm2, %v2423_v43, %v2231_v33  ;;  %v2041_v34 = vmul.f32 %v1945_v10, %v1369_v7 }
 0x2fe   : > { %v2615_v17 = vpack.c.bf16 %v2519_v25, %v2507_v48  ;;  %v2125_v37 = vadd.f32 1.0, %v2029_v5 }
 0x2ff   : > { %v2137_v32 = vadd.f32 1.0, %v2041_v34 }
 0x300   : > { %3007 = vmatpush1.bf16.msra.mxu0 %v2615_v17  ;;  %v2221_v2 = vmul.f32 %v2125_v37, %v1261_v0 }
 0x301   : > { %v2233_v26 = vmul.f32 %v2137_v32, %v1273_v1 }
 0x302   : > { %v2413_v6 = vsub.f32 0.0, %v2221_v2 }
 0x303   : > { %5785 = vmatmul.mubr.msk.bf16.vlgmr.msra.gmra.mxu0 %vm2687_vm0, %v6692_v60  ;;  %v2425_v4 = vsub.f32 0.0, %v2233_v26 }
 0x304   : > { %3034 = vmatprep.mubr.bf16.mxu0 %v10351_v3  ;;  %v2509_v27 = vsel %vm2317_vm3, %v2413_v6, %v2221_v2 }
 0x305   : > { %v2521_v63 = vsel %vm2329_vm4, %v2425_v4, %v2233_v26 }
 0x306   : > { %v2617_v35 = vpack.c.bf16 %v2521_v63, %v2509_v27 }
 0x308   : > { %3080 = vmatpush1.bf16.msra.mxu1 %v2617_v35 }
 0x30b   : > { %5786 = vmatmul.mubr.msk.bf16.gmra.mxu0 %vm2687_vm0, %v6940_v24  ;;  %5789 = vmatmul.mubr.msk.bf16.vlgmr.msra.gmra.mxu1 %vm2687_vm0, %v6692_v60  ;;  %v2734_v60 = vpop.f32.mrf.mxu0 }
 0x30c   : > { %3044 = vmatprep.mubr.bf16.mxu0 %v10351_v3  ;;  %3107 = vmatprep.mubr.bf16.mxu1 %v10351_v3 }
 0x30d   : > { %v2736_v15 = vpop.f32.mrf.mxu0 }
 0x30f   : > { %v2738_v13 = vpop.f32.mrf.mxu0 }
 0x311   : > { %v2740_v62 = vpop.f32.mrf.mxu0 }
 0x313   : > { %5787 = vmatmul.mubr.msk.bf16.gmra.mxu0 %vm2687_vm0, %v7181_v16  ;;  %5790 = vmatmul.mubr.msk.bf16.gmra.mxu1 %vm2687_vm0, %v6940_v24  ;;  %v2807_v24 = vpop.f32.mrf.mxu1  ;;  %v7695_v0 = vpop.f32.mrf.mxu0 }
 0x314   : > { %3054 = vmatprep.mubr.bf16.mxu0 %v10351_v3  ;;  %3117 = vmatprep.mubr.bf16.mxu1 %v10351_v3 }
 0x315   : > { %v2809_v14 = vpop.f32.mrf.mxu1  ;;  %v7697_v9 = vpop.f32.mrf.mxu0 }
 0x317   : > { %v2811_v52 = vpop.f32.mrf.mxu1  ;;  %v7699_v1 = vpop.f32.mrf.mxu0 }
 0x319   : > { %v2813_v51 = vpop.f32.mrf.mxu1 }
 0x31b   : > { %5788 = vmatmul.mubr.msk.bf16.gmra.mxu0 %vm2687_vm0, %v7219_v18  ;;  %5791 = vmatmul.mubr.msk.bf16.gmra.mxu1 %vm2687_vm0, %v7181_v16  ;;  %v7701_v16 = vpop.f32.mrf.mxu0 }
 0x31c   : > { %3127 = vmatprep.mubr.bf16.mxu1 %v10351_v3  ;;  %v7703_v3 = vpop.f32.mrf.mxu1 }
 0x31d   : > { %v7705_v44 = vpop.f32.mrf.mxu0 }
 0x31f   : > { %v7709_v42 = vpop.f32.mrf.mxu0 }
 0x321   : > { %v7713_v56 = vpop.f32.mrf.mxu0 }
 0x323   : > { %5792 = vmatmul.mubr.msk.bf16.gmra.mxu1 %vm2687_vm0, %v7219_v18  ;;  %v7707_v18 = vpop.f32.mrf.mxu1  ;;  %v7717_v8 = vpop.f32.mrf.mxu0 }
 0x325   : > { %v7711_v23 = vpop.f32.mrf.mxu1  ;;  %v2764_v41 = vpop.f32.mrf.mxu0 }
 0x327   : > { %v7715_v7 = vpop.f32.mrf.mxu1  ;;  %v2766_v39 = vpop.f32.mrf.mxu0 }
 0x329   : > { %v7719_v30 = vpop.f32.mrf.mxu1  ;;  %v2768_v12 = vpop.f32.mrf.mxu0 }
 0x32b   : > { %v7721_v19 = vpop.f32.mrf.mxu1  ;;  %v2770_v29 = vpop.f32.mrf.mxu0 }
 0x32d   : > { %v7725_v28 = vpop.f32.mrf.mxu1  ;;  %v7741_v50 = vpop.f32.mrf.mxu0 }
 0x32f   : > { %v7731_v57 = vpop.f32.mrf.mxu1  ;;  %v7748_v21 = vpop.f32.mrf.mxu0 }
 0x331   : > { %v2837_v38 = vpop.f32.mrf.mxu1  ;;  %v7773_v6 = vpop.f32.mrf.mxu0 }
 0x332   : > { %10361 = vst [vmem:[#allocation18_spill] sm:$0xff] %v7773_v6 }
 0x333   : > { %v2839_v33 = vpop.f32.mrf.mxu1 }
 0x335   : > { %v2841_v22 = vpop.f32.mrf.mxu1 }
 0x364   : > { %v7723_v20 = vpop.permute.xlu1 %2684 }
 0x365   : > { %10353 = vst [vmem:[#allocation10_spill] sm:$0xff] %v7723_v20  ;;  %v7727_v53 = vpop.permute.xlu0 %2680  ;;  %v7771_v26 = vadd.f32 %v2768_v12, %v7723_v20  ;;  %v7779_v63 = vadd.f32 %v2841_v22, %v7723_v20  ;;  %v7782_v35 = vadd.f32 %v2770_v29, %v7723_v20 }
 0x366   : > { %10354 = vst [vmem:[#allocation11_spill] sm:$0xff] %v7727_v53  ;;  %v7776_v27 = vadd.f32 %v2764_v41, %v7727_v53  ;;  %v7790_v41 = vadd.f32 %v2766_v39, %v7727_v53  ;;  %v7794_v29 = vadd.f32 %v2839_v33, %v7727_v53 }
 0x367   : > { %10360 = vst [vmem:[#allocation17_spill] sm:$0xff] %v7771_v26  ;;  %10362 = vst [vmem:[#allocation19_spill] sm:$0xff] %v7779_v63  ;;  %v7805_v22 = vmul.f32 0.15915494, %v7779_v63  ;;  %v7808_v39 = vmul.f32 0.15915494, %v7782_v35 }
 0x368   : > { %v7729_v45 = vpop.permute.xlu1 %2676  ;;  %10363 = vst [vmem:[#allocation20_spill] sm:$0xff] %v7782_v35  ;;  %v7811_v33 = vmul.f32 0.15915494, %v7776_v27 }
 0x369   : > { %10355 = vst [vmem:[#allocation12_spill] sm:$0xff] %v7729_v45  ;;  %v7733_v55 = vpop.permute.xlu0 %2668  ;;  %10366 = vst [vmem:[#allocation23_spill] sm:$0xff] %v7808_v39 }
 0x36a   : > { %10356 = vst [vmem:[#allocation13_spill] sm:$0xff] %v7733_v55 }
 0x36c   : > { %v7735_v54 = vpop.permute.xlu1 %2672 }
 0x36d   : > { %10357 = vst [vmem:[#allocation14_spill] sm:$0xff] %v7735_v54  ;;  %v7737_v59 = vpop.permute.xlu0 %2660 }
 0x36e   : > { %10358 = vst [vmem:[#allocation15_spill] sm:$0xff] %v7737_v59  ;;  %v2739_v46 = vadd.f32 %v2738_v13, %v7737_v59  ;;  %v2812_v61 = vadd.f32 %v2811_v52, %v7737_v59  ;;  %v7746_v47 = vadd.f32 %v2740_v62, %v7737_v59  ;;  %v7768_v2 = vadd.f32 %v2813_v51, %v7737_v59 }
 0x370   : > { %v7743_v36 = vpop.permute.xlu1 %2664  ;;  %v3150_v31 = vmul.f32 0.15915494, %v2739_v46  ;;  %v3152_v40 = vmul.f32 0.15915494, %v2812_v61  ;;  %v3151_v5 = vmul.f32 0.15915494, %v7746_v47 }
 0x371   : > { %10359 = vst [vmem:[#allocation16_spill] sm:$0xff] %v7743_v36  ;;  %v3153_v12 = vmul.f32 0.15915494, %v7768_v2 }
 0x372   : > { %v3246_v58 = vadd.f32 0.5, %v3150_v31  ;;  %v3248_v43 = vadd.f32 0.5, %v3152_v40  ;;  %v3247_v62 = vadd.f32 0.5, %v3151_v5  ;;  %v7797_v31 = vmul.f32 0.15915494, %v7771_v26 }
 0x374   : > { %v7750_v49 = vpop.permute.xlu1 %2656  ;;  %v3342_v34 = vfloor.f32 %v3246_v58  ;;  %v3344_v4 = vfloor.f32 %v3248_v43 }
 0x375   : > { %v7753_v10 = vadd.f32 %v2734_v60, %v7750_v49  ;;  %v7756_v48 = vadd.f32 %v2807_v24, %v7750_v49  ;;  %v7759_v25 = vadd.f32 %v2736_v15, %v7750_v49  ;;  %v7763_v17 = vadd.f32 %v2809_v14, %v7750_v49  ;;  %v2843_v60 = vpop.f32.mrf.mxu1 }
 0x376   : > { %v7786_v24 = vadd.f32 %v2837_v38, %v7727_v53  ;;  %v3438_v51 = vmul.f32 6.2831855, %v3342_v34  ;;  %v7800_v40 = vadd.f32 %v2843_v60, %v7723_v20  ;;  %v7802_v38 = vpop.f32.mrf.mxu0  ;;  %v3440_v43 = vmul.f32 6.2831855, %v3344_v4 }
 0x377   : > { %v3138_v37 = vmul.f32 0.15915494, %v7753_v10  ;;  %v3140_v32 = vmul.f32 0.15915494, %v7756_v48  ;;  %v3139_v13 = vmul.f32 0.15915494, %v7759_v25  ;;  %v3343_v34 = vfloor.f32 %v3247_v62 }
 0x378   : > { %v3141_v52 = vmul.f32 0.15915494, %v7763_v17  ;;  %10364 = vst [vmem:[#allocation21_spill] sm:$0xff] %v7800_v40  ;;  %10365 = vst [vmem:[#allocation22_spill] sm:$0xff] %v7802_v38  ;;  %v7816_v11 = vsub.f32 %v2739_v46, %v3438_v51  ;;  %v7819_v4 = vmul.f32 0.15915494, %v7790_v41  ;;  %v7823_v20 = vadd.f32 %v7695_v0, %v7743_v36 }
 0x379   : > { %v3234_v15 = vadd.f32 0.5, %v3138_v37  ;;  %v3236_v14 = vadd.f32 0.5, %v3140_v32  ;;  %v3235_v5 = vadd.f32 0.5, %v3139_v13  ;;  %v7814_v37 = vmul.f32 0.15915494, %v7786_v24 }
 0x37a   : > { %v3237_v60 = vadd.f32 0.5, %v3141_v52  ;;  %10367 = vst [vmem:[#allocation24_spill] sm:$0xff] %v7816_v11  ;;  %v7827_v13 = vadd.f32 %v7713_v56, %v7729_v45  ;;  %v7831_v62 = vadd.f32 %v7725_v28, %v7729_v45  ;;  %v7835_v52 = vsub.f32 %v2812_v61, %v3440_v43 }
 0x37b   : > { %v3330_v58 = vfloor.f32 %v3234_v15  ;;  %v3332_v32 = vfloor.f32 %v3236_v14  ;;  %v3249_v15 = vadd.f32 0.5, %v3153_v12  ;;  %v7833_v14 = vpop.f32.mrf.mxu0  ;;  %v7839_v51 = vadd.f32 %v7703_v3, %v7743_v36 }
 0x37c   : > { %10368 = vst [vmem:[#allocation25_spill] sm:$0xff] %v7833_v14  ;;  %10369 = vst [vmem:[#allocation26_spill] sm:$0xff] %v7835_v52  ;;  %v7843_v0 = vadd.f32 %v7717_v8, %v7729_v45  ;;  %v3331_v12 = vfloor.f32 %v3235_v5  ;;  %v3439_v56 = vmul.f32 6.2831855, %v3343_v34  ;;  %v7847_v53 = vadd.f32 %v7697_v9, %v7743_v36 }
 0x37d   : > { %v3426_v46 = vmul.f32 6.2831855, %v3330_v58  ;;  %v7851_v28 = vadd.f32 %v7699_v1, %v7733_v55  ;;  %v3428_v61 = vmul.f32 6.2831855, %v3332_v32  ;;  %v3333_v58 = vfloor.f32 %v3237_v60  ;;  %v7866_v1 = vpop.f32.mrf.mxu0 }
 0x37e   : > { %v3630_v43 = vand.u32 2147483647, %v7816_v11  ;;  %v7856_v3 = vadd.f32 %v7711_v23, %v7733_v55  ;;  %v3345_v8 = vfloor.f32 %v3249_v15  ;;  %v3162_v5 = vmul.f32 0.15915494, %v7823_v20  ;;  %10370 = vst [vmem:[#allocation27_spill] sm:$0xff] %v7866_v1 }
 0x37f   : > { %v7861_v34 = vadd.f32 %v7701_v16, %v7733_v55  ;;  %v7864_v9 = vmul.f32 0.15915494, %v7827_v13  ;;  %v7869_v32 = vsub.f32 %v7753_v10, %v3426_v46  ;;  %v3632_v60 = vand.u32 2147483647, %v7835_v52 }
 0x380   : > { %v3164_v23 = vmul.f32 0.15915494, %v7839_v51  ;;  %v7874_v15 = vmul.f32 0.15915494, %v7831_v62  ;;  %v3427_v11 = vmul.f32 6.2831855, %v3331_v12  ;;  %v7877_v14 = vsub.f32 %v7746_v47, %v3439_v56  ;;  %v2894_v12 = vpop.f32.mrf.mxu0 }
 0x381   : > { %10371 = vst [vmem:[#allocation28_spill] sm:$0xff] %v7869_v32  ;;  %v3163_v16 = vmul.f32 0.15915494, %v7847_v53  ;;  %v7881_v38 = vmul.f32 0.15915494, %v7843_v0  ;;  %v7884_v1 = vsub.f32 %v7756_v48, %v3428_v61  ;;  %v3258_v6 = vadd.f32 0.5, %v3162_v5 }
 0x382   : > { %10372 = vst [vmem:[#allocation29_spill] sm:$0xff] %v7877_v14  ;;  %v3429_v10 = vmul.f32 6.2831855, %v3333_v58  ;;  %v3726_v46 = vsub.f32 3.1415927, %v3630_v43  ;;  %v7890_v47 = vadd.f32 %v7715_v7, %v7733_v55  ;;  %v3260_v40 = vadd.f32 0.5, %v3164_v23 }
 0x383   : > { %10373 = vst [vmem:[#allocation30_spill] sm:$0xff] %v7884_v1  ;;  %v3174_v52 = vmul.f32 0.15915494, %v7851_v28  ;;  %v3441_v35 = vmul.f32 6.2831855, %v3345_v8  ;;  %v7895_v48 = vadd.f32 %v7731_v57, %v7729_v45  ;;  %v7898_v61 = vsub.f32 %v7759_v25, %v3427_v11 }
 0x384   : > { %v3176_v59 = vmul.f32 0.15915494, %v7856_v3  ;;  %v3618_v56 = vand.u32 2147483647, %v7869_v32  ;;  %v3728_v63 = vsub.f32 3.1415927, %v3632_v60  ;;  %v7904_v26 = vsub.f32 %v7763_v17, %v3429_v10 }
 0x385   : > { %10374 = vst [vmem:[#allocation31_spill] sm:$0xff] %v7898_v61  ;;  %v3631_v58 = vand.u32 2147483647, %v7877_v14  ;;  %v3259_v8 = vadd.f32 0.5, %v3163_v16  ;;  %v3175_v5 = vmul.f32 0.15915494, %v7861_v34  ;;  %v7906_v32 = vmin.f32 %v3630_v43, %v3726_v46 }
 0x386   : > { %v3620_v7 = vand.u32 2147483647, %v7884_v1  ;;  %10375 = vst [vmem:[#allocation32_spill] sm:$0xff] %v7904_v26  ;;  %v7909_v23 = vadd.f32 %v2894_v12, %v7733_v55  ;;  %v7912_v57 = vsub.f32 %v7768_v2, %v3441_v35  ;;  %v3354_v11 = vfloor.f32 %v3258_v6 }
 0x387   : > { %10376 = vst [vmem:[#allocation33_spill] sm:$0xff] %v7906_v32  ;;  %v3177_v25 = vmul.f32 0.15915494, %v7890_v47  ;;  %v7917_v16 = vadd.f32 %v7705_v44, %v7735_v54  ;;  %v3714_v14 = vsub.f32 3.1415927, %v3618_v56  ;;  %v7919_v1 = vmin.f32 %v3632_v60, %v3728_v63 }
 0x388   : > { %10377 = vst [vmem:[#allocation34_spill] sm:$0xff] %v7909_v23  ;;  %10378 = vst [vmem:[#allocation35_spill] sm:$0xff] %v7912_v57  ;;  %v3356_v17 = vfloor.f32 %v3260_v40  ;;  %v7923_v43 = vadd.f32 %v7719_v30, %v7735_v54  ;;  %v3619_v10 = vand.u32 2147483647, %v7898_v61  ;;  %v3727_v46 = vsub.f32 3.1415927, %v3631_v58 }
 0x389   : > { %10379 = vst [vmem:[#allocation36_spill] sm:$0xff] %v7919_v1  ;;  %v3355_v2 = vfloor.f32 %v3259_v8  ;;  %v7928_v6 = vadd.f32 %v7709_v42, %v7735_v54  ;;  %v3716_v35 = vsub.f32 3.1415927, %v3620_v7  ;;  %v3621_v44 = vand.u32 2147483647, %v7904_v26 }
 0x38a   : > { %v7933_v63 = vmul.f32 %v7906_v32, %v7906_v32  ;;  %v7937_v40 = vadd.f32 %v7707_v18, %v7743_v36  ;;  %v3633_v30 = vand.u32 2147483647, %v7912_v57  ;;  %v3450_v60 = vmul.f32 6.2831855, %v3354_v11 }
 0x38b   : > { %v3270_v12 = vadd.f32 0.5, %v3174_v52  ;;  %v3272_v8 = vadd.f32 0.5, %v3176_v59  ;;  %v7940_v61 = vmin.f32 %v3618_v56, %v3714_v14  ;;  %v7944_v42 = vmul.f32 %v7919_v1, %v7919_v1 }
 0x38c   : > { %10380 = vst [vmem:[#allocation37_spill] sm:$0xff] %v7933_v63  ;;  %v3452_v26 = vmul.f32 6.2831855, %v3356_v17  ;;  %v3271_v45 = vadd.f32 0.5, %v3175_v5  ;;  %v3715_v55 = vsub.f32 3.1415927, %v3619_v10  ;;  %v7946_v32 = vmin.f32 %v3631_v58, %v3727_v46 }
 0x38d   : > { %10381 = vst [vmem:[#allocation38_spill] sm:$0xff] %v7940_v61  ;;  %10382 = vst [vmem:[#allocation39_spill] sm:$0xff] %v7944_v42  ;;  %v3451_v23 = vmul.f32 6.2831855, %v3355_v2  ;;  %v3273_v39 = vadd.f32 0.5, %v3177_v25  ;;  %v7948_v18 = vmin.f32 %v3620_v7, %v3716_v35  ;;  %v7953_v52 = vsub.f32 %v7823_v20, %v3450_v60 }
 0x38e   : > { %10383 = vst [vmem:[#allocation40_spill] sm:$0xff] %v7946_v32  ;;  %v3717_v36 = vsub.f32 3.1415927, %v3621_v44  ;;  %v4014_v11 = vmul.f32 2.7557319e-06, %v7933_v63  ;;  %v3366_v56 = vfloor.f32 %v3270_v12  ;;  %v7957_v5 = vadd.f32 %v7721_v19, %v7735_v54 }
 0x38f   : > { %10384 = vst [vmem:[#allocation41_spill] sm:$0xff] %v7948_v18  ;;  %v3165_v59 = vmul.f32 0.15915494, %v7937_v40  ;;  %v3729_v14 = vsub.f32 3.1415927, %v3633_v30  ;;  %10385 = vst [vmem:[#allocation42_spill] sm:$0xff] %v7953_v52  ;;  %v7961_v58 = vmul.f32 %v7940_v61, %v7940_v61  ;;  %v7965_v25 = vsub.f32 %v7839_v51, %v3452_v26 }
 0x390   : > { %v4016_v7 = vmul.f32 2.7557319e-06, %v7944_v42  ;;  %v3368_v17 = vfloor.f32 %v3272_v8  ;;  %v7967_v46 = vmin.f32 %v3619_v10, %v3715_v55  ;;  %v7971_v20 = vmul.f32 %v7946_v32, %v7946_v32 }
 0x391   : > { %10386 = vst [vmem:[#allocation43_spill] sm:$0xff] %v7961_v58  ;;  %10387 = vst [vmem:[#allocation44_spill] sm:$0xff] %v7965_v25  ;;  %v7974_v2 = vsub.f32 %v7847_v53, %v3451_v23  ;;  %v3367_v19 = vfloor.f32 %v3271_v45  ;;  %v7978_v35 = vmul.f32 %v7948_v18, %v7948_v18  ;;  %v7980_v60 = vmin.f32 %v3621_v44, %v3717_v36 }
 0x392   : > { %10388 = vst [vmem:[#allocation45_spill] sm:$0xff] %v7967_v46  ;;  %10389 = vst [vmem:[#allocation46_spill] sm:$0xff] %v7971_v20  ;;  %v7982_v12 = vadd.f32 -0.0001984127, %v4014_v11  ;;  %v3261_v26 = vadd.f32 0.5, %v3165_v59  ;;  %v7984_v51 = vmin.f32 %v3633_v30, %v3729_v14  ;;  %v3369_v18 = vfloor.f32 %v3273_v39 }
 0x393   : > { %10390 = vst [vmem:[#allocation47_spill] sm:$0xff] %v7974_v2  ;;  %10391 = vst [vmem:[#allocation48_spill] sm:$0xff] %v7978_v35  ;;  %v3642_v55 = vand.u32 2147483647, %v7953_v52  ;;  %v3462_v10 = vmul.f32 6.2831855, %v3366_v56  ;;  %v7994_v36 = vmul.f32 %v7967_v46, %v7967_v46  ;;  %v8000_v14 = vmul.f32 %v7980_v60, %v7980_v60 }
 0x394   : > { %10392 = vst [vmem:[#allocation49_spill] sm:$0xff] %v7980_v60  ;;  %10393 = vst [vmem:[#allocation50_spill] sm:$0xff] %v7982_v12  ;;  %v3186_v8 = vmul.f32 0.15915494, %v7917_v16  ;;  %v4002_v53 = vmul.f32 2.7557319e-06, %v7961_v58  ;;  %v3357_v56 = vfloor.f32 %v3261_v26  ;;  %v8005_v39 = vmul.f32 %v7984_v51, %v7984_v51 }
 0x395   : > { %10394 = vst [vmem:[#allocation51_spill] sm:$0xff] %v7984_v51  ;;  %v7989_v23 = vadd.f32 -0.0001984127, %v4016_v7  ;;  %v3644_v45 = vand.u32 2147483647, %v7965_v25  ;;  %10396 = vst [vmem:[#allocation53_spill] sm:$0xff] %v7994_v36  ;;  %v8008_v46 = vsub.f32 %v7851_v28, %v3462_v10 }
 0x396   : > { %v3643_v44 = vand.u32 2147483647, %v7974_v2  ;;  %v3464_v30 = vmul.f32 6.2831855, %v3368_v17  ;;  %v3282_v11 = vadd.f32 0.5, %v3186_v8  ;;  %10397 = vst [vmem:[#allocation54_spill] sm:$0xff] %v8000_v14  ;;  %v8012_v17 = vadd.f32 %v7741_v50, %v7750_v49  ;;  %v2953_v50 = vpop.f32.mrf.mxu1 }
 0x397   : > { %10395 = vst [vmem:[#allocation52_spill] sm:$0xff] %v7989_v23  ;;  %v4004_v59 = vmul.f32 2.7557319e-06, %v7978_v35  ;;  %v3188_v7 = vmul.f32 0.15915494, %v7923_v43  ;;  %10398 = vst [vmem:[#allocation55_spill] sm:$0xff] %v8005_v39 }
 0x398   : > { %v3738_v61 = vsub.f32 3.1415927, %v3642_v55  ;;  %10399 = vst [vmem:[#allocation56_spill] sm:$0xff] %v8008_v46  ;;  %v8014_v8 = vadd.f32 -0.0001984127, %v4002_v53  ;;  %v3378_v60 = vfloor.f32 %v3282_v11  ;;  %v8017_v58 = vsub.f32 %v7856_v3, %v3464_v30 }
 0x399   : > { %v3740_v35 = vsub.f32 3.1415927, %v3644_v45  ;;  %v3284_v1 = vadd.f32 0.5, %v3188_v7  ;;  %v3739_v26 = vsub.f32 3.1415927, %v3643_v44  ;;  %v3294_v14 = vadd.f32 0.5, %v7864_v9 }
 0x39a   : > { %10400 = vst [vmem:[#allocation57_spill] sm:$0xff] %v8014_v8  ;;  %10401 = vst [vmem:[#allocation58_spill] sm:$0xff] %v8017_v58  ;;  %v3463_v57 = vmul.f32 6.2831855, %v3367_v19  ;;  %v3453_v51 = vmul.f32 6.2831855, %v3357_v56  ;;  %v8022_v32 = vmin.f32 %v3642_v55, %v3738_v61  ;;  %v8035_v61 = vadd.f32 %v2953_v50, %v7750_v49 }
 0x39b   : > { %v3380_v36 = vfloor.f32 %v3284_v1  ;;  %v3187_v28 = vmul.f32 0.15915494, %v7928_v6  ;;  %v3189_v10 = vmul.f32 0.15915494, %v7957_v5  ;;  %v3654_v53 = vand.u32 2147483647, %v8008_v46 }
 0x39c   : > { %10402 = vst [vmem:[#allocation59_spill] sm:$0xff] %v8022_v32  ;;  %v3465_v11 = vmul.f32 6.2831855, %v3369_v18  ;;  %v3296_v7 = vadd.f32 0.5, %v7874_v15  ;;  %v8026_v8 = vadd.f32 -0.0001984127, %v4004_v59  ;;  %v8028_v3 = vmin.f32 %v3644_v45, %v3740_v35 }
 0x39d   : > { %v3474_v19 = vmul.f32 6.2831855, %v3378_v60  ;;  %v3390_v9 = vfloor.f32 %v3294_v14  ;;  %v3656_v1 = vand.u32 2147483647, %v8017_v58  ;;  %v8032_v30 = vsub.f32 %v7861_v34, %v3463_v57  ;;  %v10457_v58 = vld [vmem:[#allocation19_spill] sm:$0xff] }
 0x39e   : > { %10403 = vst [vmem:[#allocation60_spill] sm:$0xff] %v8026_v8  ;;  %10404 = vst [vmem:[#allocation61_spill] sm:$0xff] %v8028_v3  ;;  %v3476_v56 = vmul.f32 6.2831855, %v3380_v36  ;;  %v8037_v55 = vmin.f32 %v3643_v44, %v3739_v26  ;;  %v8040_v18 = vsub.f32 %v7937_v40, %v3453_v51  ;;  %v3283_v15 = vadd.f32 0.5, %v3187_v28 }
 0x39f   : > { %10405 = vst [vmem:[#allocation62_spill] sm:$0xff] %v8032_v30  ;;  %v3285_v59 = vadd.f32 0.5, %v3189_v10  ;;  %v8044_v35 = vmul.f32 %v8022_v32, %v8022_v32  ;;  %v3750_v60 = vsub.f32 3.1415927, %v3654_v53  ;;  %v8047_v45 = vsub.f32 %v7890_v47, %v3465_v11 }
 0x3a0   : > { %10406 = vst [vmem:[#allocation63_spill] sm:$0xff] %v8037_v55  ;;  %10407 = vst [vmem:[#allocation64_spill] sm:$0xff] %v8040_v18  ;;  %v3392_v34 = vfloor.f32 %v3296_v7  ;;  %v8051_v57 = vmul.f32 %v8028_v3, %v8028_v3  ;;  %v8054_v36 = vsub.f32 %v7917_v16, %v3474_v19  ;;  %v3486_v40 = vmul.f32 6.2831855, %v3390_v9 }
 0x3a1   : > { %10408 = vst [vmem:[#allocation65_spill] sm:$0xff] %v8044_v35  ;;  %10409 = vst [vmem:[#allocation66_spill] sm:$0xff] %v8047_v45  ;;  %v8058_v51 = vadd.f32 %v7748_v21, %v7750_v49  ;;  %v3752_v44 = vsub.f32 3.1415927, %v3656_v1  ;;  %v3655_v14 = vand.u32 2147483647, %v8032_v30  ;;  %v8062_v26 = vsub.f32 %v7923_v43, %v3476_v56 }
 0x3a2   : > { %10410 = vst [vmem:[#allocation67_spill] sm:$0xff] %v8051_v57  ;;  %10411 = vst [vmem:[#allocation68_spill] sm:$0xff] %v8054_v36  ;;  %v3295_v47 = vadd.f32 0.5, %v7881_v38  ;;  %v8067_v28 = vmul.f32 %v8037_v55, %v8037_v55  ;;  %v3645_v16 = vand.u32 2147483647, %v8040_v18  ;;  %v3379_v10 = vfloor.f32 %v3283_v15 }
 0x3a3   : > { %10412 = vst [vmem:[#allocation69_spill] sm:$0xff] %v8062_v26  ;;  %v3381_v50 = vfloor.f32 %v3285_v59  ;;  %v4026_v11 = vmul.f32 2.7557319e-06, %v8044_v35  ;;  %v8071_v21 = vmin.f32 %v3654_v53, %v3750_v60  ;;  %v3657_v7 = vand.u32 2147483647, %v8047_v45  ;;  %v10455_v45 = vld [vmem:[#allocation21_spill] sm:$0xff] }
 0x3a4   : > { %10413 = vst [vmem:[#allocation70_spill] sm:$0xff] %v8067_v28  ;;  %v3488_v19 = vmul.f32 6.2831855, %v3392_v34  ;;  %v4028_v43 = vmul.f32 2.7557319e-06, %v8051_v57  ;;  %v8077_v38 = vsub.f32 %v7827_v13, %v3486_v40  ;;  %v3306_v56 = vadd.f32 0.5, %v7811_v33 }
 0x3a5   : > { %10414 = vst [vmem:[#allocation71_spill] sm:$0xff] %v8071_v21  ;;  %v3666_v9 = vand.u32 2147483647, %v8054_v36  ;;  %v3751_v8 = vsub.f32 3.1415927, %v3655_v14  ;;  %v3391_v59 = vfloor.f32 %v3295_v47  ;;  %v8082_v60 = vmin.f32 %v3656_v1, %v3752_v44 }
 0x3a6   : > { %10415 = vst [vmem:[#allocation72_spill] sm:$0xff] %v8077_v38  ;;  %v3668_v15 = vand.u32 2147483647, %v8062_v26  ;;  %v3201_v23 = vmul.f32 0.15915494, %v7895_v48  ;;  %v8088_v63 = vmul.f32 %v8071_v21, %v8071_v21  ;;  %v8091_v33 = vsub.f32 %v7831_v62, %v3488_v19 }
 0x3a7   : > { %v3741_v53 = vsub.f32 3.1415927, %v3645_v16  ;;  %10416 = vst [vmem:[#allocation73_spill] sm:$0xff] %v8082_v60  ;;  %v3475_v42 = vmul.f32 6.2831855, %v3379_v10  ;;  %v3402_v2 = vfloor.f32 %v3306_v56  ;;  %v8101_v3 = vmin.f32 %v3655_v14, %v3751_v8 }
 0x3a8   : > { %v3477_v34 = vmul.f32 6.2831855, %v3381_v50  ;;  %v8084_v12 = vadd.f32 -0.0001984127, %v4026_v11  ;;  %10418 = vst [vmem:[#allocation75_spill] sm:$0xff] %v8088_v63  ;;  %10419 = vst [vmem:[#allocation76_spill] sm:$0xff] %v8091_v33  ;;  %v8099_v11 = vmul.f32 %v8082_v60, %v8082_v60 }
 0x3a9   : > { %v3753_v13 = vsub.f32 3.1415927, %v3657_v7  ;;  %v8093_v40 = vadd.f32 -0.0001984127, %v4028_v43  ;;  %v3762_v47 = vsub.f32 3.1415927, %v3666_v9  ;;  %v8104_v62 = vsub.f32 %v7928_v6, %v3475_v42 }
 0x3aa   : > { %10417 = vst [vmem:[#allocation74_spill] sm:$0xff] %v8084_v12  ;;  %v3678_v18 = vand.u32 2147483647, %v8077_v38  ;;  %v3764_v1 = vsub.f32 3.1415927, %v3668_v15  ;;  %v3297_v10 = vadd.f32 0.5, %v3201_v23  ;;  %v8107_v19 = vsub.f32 %v7957_v5, %v3477_v34 }
 0x3ab   : > { %10420 = vst [vmem:[#allocation77_spill] sm:$0xff] %v8093_v40  ;;  %v3487_v44 = vmul.f32 6.2831855, %v3391_v59  ;;  %v3308_v50 = vadd.f32 0.5, %v7814_v37  ;;  %10421 = vst [vmem:[#allocation78_spill] sm:$0xff] %v8099_v11  ;;  %v8109_v43 = vmin.f32 %v3645_v16, %v3741_v53  ;;  %v3307_v23 = vadd.f32 0.5, %v7819_v4 }
 0x3ac   : > { %10422 = vst [vmem:[#allocation79_spill] sm:$0xff] %v8101_v3  ;;  %10423 = vst [vmem:[#allocation80_spill] sm:$0xff] %v8104_v62  ;;  %v3680_v56 = vand.u32 2147483647, %v8091_v33  ;;  %v3498_v59 = vmul.f32 6.2831855, %v3402_v2  ;;  %v8114_v32 = vmin.f32 %v3666_v9, %v3762_v47  ;;  %v8116_v14 = vmin.f32 %v3657_v7, %v3753_v13 }
 0x3ad   : > { %10424 = vst [vmem:[#allocation81_spill] sm:$0xff] %v8107_v19  ;;  %10425 = vst [vmem:[#allocation82_spill] sm:$0xff] %v8109_v43  ;;  %v4038_v37 = vmul.f32 2.7557319e-06, %v8088_v63  ;;  %v3774_v55 = vsub.f32 3.1415927, %v3678_v18  ;;  %v3404_v8 = vfloor.f32 %v3308_v50  ;;  %v8118_v6 = vmin.f32 %v3668_v15, %v3764_v1 }
 0x3ae   : > { %10426 = vst [vmem:[#allocation83_spill] sm:$0xff] %v8114_v32  ;;  %10427 = vst [vmem:[#allocation84_spill] sm:$0xff] %v8116_v14  ;;  %v8121_v42 = vsub.f32 %v7843_v0, %v3487_v44  ;;  %v3393_v5 = vfloor.f32 %v3297_v10  ;;  %v4040_v16 = vmul.f32 2.7557319e-06, %v8099_v11  ;;  %v8126_v2 = vmul.f32 %v8101_v3, %v8101_v3 }
 0x3af   : > { %10428 = vst [vmem:[#allocation85_spill] sm:$0xff] %v8118_v6  ;;  %v3667_v4 = vand.u32 2147483647, %v8104_v62  ;;  %v3669_v9 = vand.u32 2147483647, %v8107_v19  ;;  %v8131_v7 = vsub.f32 %v7776_v27, %v3498_v59  ;;  %v3403_v15 = vfloor.f32 %v3307_v23 }
 0x3b0   : > { %10429 = vst [vmem:[#allocation86_spill] sm:$0xff] %v8121_v42  ;;  %10430 = vst [vmem:[#allocation87_spill] sm:$0xff] %v8126_v2  ;;  %v3776_v53 = vsub.f32 3.1415927, %v3680_v56  ;;  %v3318_v34 = vadd.f32 0.5, %v7797_v31  ;;  %v8136_v0 = vmul.f32 %v8114_v32, %v8114_v32  ;;  %v8138_v13 = vmin.f32 %v3678_v18, %v3774_v55 }
 0x3b1   : > { %10431 = vst [vmem:[#allocation88_spill] sm:$0xff] %v8131_v7  ;;  %v3500_v47 = vmul.f32 6.2831855, %v3404_v8  ;;  %v3213_v1 = vmul.f32 0.15915494, %v7794_v29  ;;  %v8145_v10 = vmul.f32 %v8118_v6, %v8118_v6  ;;  %v8150_v31 = vmul.f32 %v8109_v43, %v8109_v43 }
 0x3b2   : > { %10432 = vst [vmem:[#allocation89_spill] sm:$0xff] %v8136_v0  ;;  %10433 = vst [vmem:[#allocation90_spill] sm:$0xff] %v8138_v13  ;;  %v8141_v44 = vadd.f32 -0.0001984127, %v4038_v37  ;;  %v3679_v27 = vand.u32 2147483647, %v8121_v42  ;;  %v8153_v18 = vmin.f32 %v3680_v56, %v3776_v53  ;;  %v3414_v25 = vfloor.f32 %v3318_v34 }
 0x3b3   : > { %10435 = vst [vmem:[#allocation92_spill] sm:$0xff] %v8145_v10  ;;  %v3489_v50 = vmul.f32 6.2831855, %v3393_v5  ;;  %10436 = vst [vmem:[#allocation93_spill] sm:$0xff] %v8150_v31  ;;  %v3763_v59 = vsub.f32 3.1415927, %v3667_v4  ;;  %v8159_v52 = vmul.f32 %v8138_v13, %v8138_v13  ;;  %v8162_v5 = vsub.f32 %v7786_v24, %v3500_v47  ;;  %v2955_v31 = vpop.f32.mrf.mxu1 }
 0x3b4   : > { %10434 = vst [vmem:[#allocation91_spill] sm:$0xff] %v8141_v44  ;;  %v3765_v23 = vsub.f32 3.1415927, %v3669_v9  ;;  %v3320_v55 = vadd.f32 0.5, %v7805_v22  ;;  %10437 = vst [vmem:[#allocation94_spill] sm:$0xff] %v8153_v18  ;;  %v3309_v43 = vadd.f32 0.5, %v3213_v1  ;;  %v8166_v20 = vmul.f32 %v8116_v14, %v8116_v14 }
 0x3b5   : > { %v3690_v37 = vand.u32 2147483647, %v8131_v7  ;;  %v3499_v8 = vmul.f32 6.2831855, %v3403_v15  ;;  %v4050_v39 = vmul.f32 2.7557319e-06, %v8136_v0  ;;  %v8170_v53 = vsub.f32 %v7895_v48, %v3489_v50 }
 0x3b6   : > { %10438 = vst [vmem:[#allocation95_spill] sm:$0xff] %v8159_v52  ;;  %10439 = vst [vmem:[#allocation96_spill] sm:$0xff] %v8162_v5  ;;  %v4052_v22 = vmul.f32 2.7557319e-06, %v8145_v10  ;;  %v3775_v56 = vsub.f32 3.1415927, %v3679_v27  ;;  %v8174_v34 = vmin.f32 %v3667_v4, %v3763_v59  ;;  %v8176_v40 = vmin.f32 %v3669_v9, %v3765_v23 }
 0x3b7   : > { %10440 = vst [vmem:[#allocation97_spill] sm:$0xff] %v8166_v20  ;;  %10441 = vst [vmem:[#allocation98_spill] sm:$0xff] %v8170_v53  ;;  %v8172_v15 = vadd.f32 -0.0001984127, %v4040_v16  ;;  %v3416_v57 = vfloor.f32 %v3320_v55  ;;  %v8180_v24 = vmul.f32 %v8153_v18, %v8153_v18  ;;  %v3786_v47 = vsub.f32 3.1415927, %v3690_v37 }
 0x3b8   : > { %10443 = vst [vmem:[#allocation100_spill] sm:$0xff] %v8174_v34  ;;  %10444 = vst [vmem:[#allocation101_spill] sm:$0xff] %v8176_v40  ;;  %v8183_v1 = vsub.f32 %v7790_v41, %v3499_v8  ;;  %v3510_v12 = vmul.f32 6.2831855, %v3414_v25  ;;  %v8185_v35 = vadd.f32 -0.0001984127, %v4050_v39  ;;  %v3405_v4 = vfloor.f32 %v3309_v43 }
 0x3b9   : > { %10442 = vst [vmem:[#allocation99_spill] sm:$0xff] %v8172_v15  ;;  %10445 = vst [vmem:[#allocation102_spill] sm:$0xff] %v8180_v24  ;;  %v4062_v48 = vmul.f32 2.7557319e-06, %v8159_v52  ;;  %v3692_v16 = vand.u32 2147483647, %v8162_v5  ;;  %v8191_v9 = vmin.f32 %v3679_v27, %v3775_v56  ;;  %v8197_v41 = vmul.f32 %v8174_v34, %v8174_v34  ;;  %v2957_v15 = vpop.f32.mrf.mxu1 }
 0x3ba   : > { %10446 = vst [vmem:[#allocation103_spill] sm:$0xff] %v8183_v1  ;;  %10447 = vst [vmem:[#allocation104_spill] sm:$0xff] %v8185_v35  ;;  %v8189_v50 = vadd.f32 -0.0001984127, %v4052_v22  ;;  %v3681_v59 = vand.u32 2147483647, %v8170_v53  ;;  %v8202_v22 = vmin.f32 %v3690_v37, %v3786_v47 }
 0x3bb   : > { %10449 = vst [vmem:[#allocation106_spill] sm:$0xff] %v8191_v9  ;;  %v10450_v23 = vld [vmem:[#allocation23_spill] sm:$0xff]  ;;  %v3512_v25 = vmul.f32 6.2831855, %v3416_v57  ;;  %v3142_v39 = vmul.f32 0.15915494, %v8012_v17  ;;  %v8217_v30 = vmul.f32 %v8191_v9, %v8191_v9 }
 0x3bc   : > { %10448 = vst [vmem:[#allocation105_spill] sm:$0xff] %v8189_v50  ;;  %v3319_v55 = vadd.f32 0.5, %v10450_v23  ;;  %10451 = vst [vmem:[#allocation23_spill] sm:$0xff] %v8197_v41  ;;  %v3144_v8 = vmul.f32 0.15915494, %v8035_v61  ;;  %v10453_v56 = vld [vmem:[#allocation17_spill] sm:$0xff]  ;;  %v8210_v23 = vmul.f32 %v8176_v40, %v8176_v40  ;;  %v2959_v50 = vpop.f32.mrf.mxu1 }
 0x3bd   : > { %v4064_v43 = vmul.f32 2.7557319e-06, %v8180_v24  ;;  %10452 = vst [vmem:[#allocation107_spill] sm:$0xff] %v8202_v22  ;;  %v3691_v27 = vand.u32 2147483647, %v8183_v1  ;;  %v8206_v60 = vsub.f32 %v10453_v56, %v3510_v12  ;;  %v3238_v47 = vadd.f32 0.5, %v3142_v39 }
 0x3be   : > { %10454 = vst [vmem:[#allocation17_spill] sm:$0xff] %v8210_v23  ;;  %v3788_v28 = vsub.f32 3.1415927, %v3692_v16  ;;  %v3501_v57 = vmul.f32 6.2831855, %v3405_v4  ;;  %v3415_v37 = vfloor.f32 %v3319_v55  ;;  %v8220_v12 = vsub.f32 %v10457_v58, %v3512_v25  ;;  %v10461_v25 = vld [vmem:[#allocation15_spill] sm:$0xff] }
 0x3bf   : > { %v3225_v21 = vmul.f32 0.15915494, %v10455_v45  ;;  %v8213_v14 = vadd.f32 -0.0001984127, %v4062_v48  ;;  %v3777_v3 = vsub.f32 3.1415927, %v3681_v59  ;;  %v8227_v48 = vmul.f32 %v8202_v22, %v8202_v22 }
 0x3c0   : > { %v3240_v56 = vadd.f32 0.5, %v3144_v8  ;;  %v3143_v46 = vmul.f32 0.15915494, %v8058_v51  ;;  %v8223_v11 = vadd.f32 -0.0001984127, %v4064_v43  ;;  %v8230_v63 = vmin.f32 %v3692_v16, %v3788_v28  ;;  %v10462_v39 = vld [vmem:[#allocation18_spill] sm:$0xff] }
 0x3c1   : > { %10456 = vst [vmem:[#allocation21_spill] sm:$0xff] %v8213_v14  ;;  %v3787_v4 = vsub.f32 3.1415927, %v3691_v27  ;;  %v3702_v44 = vand.u32 2147483647, %v8206_v60  ;;  %v8233_v55 = vsub.f32 %v7794_v29, %v3501_v57  ;;  %v3321_v58 = vadd.f32 0.5, %v3225_v21 }
 0x3c2   : > { %10458 = vst [vmem:[#allocation19_spill] sm:$0xff] %v8223_v11  ;;  %10459 = vst [vmem:[#allocation108_spill] sm:$0xff] %v8230_v63  ;;  %v2885_v8 = vadd.f32 %v10462_v39, %v10461_v25  ;;  %v3511_v6 = vmul.f32 6.2831855, %v3415_v37  ;;  %v3334_v20 = vfloor.f32 %v3238_v47  ;;  %v8238_v43 = vadd.f32 %v2955_v31, %v7750_v49  ;;  %v10465_v39 = vld [vmem:[#allocation20_spill] sm:$0xff] }
 0x3c3   : > { %10460 = vst [vmem:[#allocation109_spill] sm:$0xff] %v8233_v55  ;;  %v2958_v32 = vadd.f32 %v2957_v15, %v10461_v25  ;;  %v3704_v40 = vand.u32 2147483647, %v8220_v12  ;;  %v3336_v34 = vfloor.f32 %v3240_v56  ;;  %v3239_v2 = vadd.f32 0.5, %v3143_v46 }
 0x3c4   : > { %v3154_v28 = vmul.f32 0.15915494, %v2885_v8  ;;  %v8242_v16 = vmin.f32 %v3681_v59, %v3777_v3  ;;  %v4074_v29 = vmul.f32 2.7557319e-06, %v8227_v48  ;;  %v3798_v21 = vsub.f32 3.1415927, %v3702_v44 }
 0x3c5   : > { %v3156_v57 = vmul.f32 0.15915494, %v2958_v32  ;;  %v8247_v37 = vmul.f32 %v8230_v63, %v8230_v63  ;;  %v8249_v47 = vmin.f32 %v3691_v27, %v3787_v4  ;;  %v3693_v31 = vand.u32 2147483647, %v8233_v55 }
 0x3c6   : > { %10463 = vst [vmem:[#allocation15_spill] sm:$0xff] %v8242_v16  ;;  %v3417_v15 = vfloor.f32 %v3321_v58  ;;  %v8253_v26 = vsub.f32 %v10465_v39, %v3511_v6  ;;  %v3430_v46 = vmul.f32 6.2831855, %v3334_v20  ;;  %v3145_v3 = vmul.f32 0.15915494, %v8238_v43  ;;  %v10467_v58 = vld [vmem:[#allocation22_spill] sm:$0xff] }
 0x3c7   : > { %10464 = vst [vmem:[#allocation18_spill] sm:$0xff] %v8249_v47  ;;  %v3250_v59 = vadd.f32 0.5, %v3154_v28  ;;  %v3800_v56 = vsub.f32 3.1415927, %v3704_v40  ;;  %v3432_v36 = vmul.f32 6.2831855, %v3336_v34  ;;  %v3335_v19 = vfloor.f32 %v3239_v2 }
 0x3c8   : > { %v3252_v62 = vadd.f32 0.5, %v3156_v57  ;;  %v8258_v10 = vmul.f32 %v8242_v16, %v8242_v16  ;;  %v8260_v27 = vmin.f32 %v3702_v44, %v3798_v21  ;;  %v8264_v6 = vadd.f32 %v10467_v58, %v10461_v25 }
 0x3c9   : > { %v3346_v4 = vfloor.f32 %v3250_v59  ;;  %v8266_v20 = vadd.f32 -0.0001984127, %v4074_v29  ;;  %v3789_v39 = vsub.f32 3.1415927, %v3693_v31  ;;  %v3513_v28 = vmul.f32 6.2831855, %v3417_v15  ;;  %v2963_v15 = vpop.f32.mrf.mxu1 }
 0x3ca   : > { %10466 = vst [vmem:[#allocation20_spill] sm:$0xff] %v8258_v10  ;;  %v3348_v35 = vfloor.f32 %v3252_v62  ;;  %v4076_v2 = vmul.f32 2.7557319e-06, %v8247_v37  ;;  %v3703_v34 = vand.u32 2147483647, %v8253_v26  ;;  %v8271_v57 = vsub.f32 %v8012_v17, %v3430_v46 }
 0x3cb   : > { %v3241_v0 = vadd.f32 0.5, %v3145_v3  ;;  %v8275_v44 = vmul.f32 %v8249_v47, %v8249_v47  ;;  %v8277_v21 = vmin.f32 %v3704_v40, %v3800_v56  ;;  %v8280_v29 = vsub.f32 %v8035_v61, %v3432_v36  ;;  %v10471_v61 = vld [vmem:[#allocation16_spill] sm:$0xff]  ;;  %v10472_v36 = vld [vmem:[#allocation25_spill] sm:$0xff] }
 0x3cc   : > { %10468 = vst [vmem:[#allocation22_spill] sm:$0xff] %v8271_v57  ;;  %v3431_v59 = vmul.f32 6.2831855, %v3335_v19  ;;  %v8284_v62 = vmul.f32 %v8260_v27, %v8260_v27  ;;  %v3442_v58 = vmul.f32 6.2831855, %v3346_v4  ;;  %v8288_v46 = vadd.f32 %v2959_v50, %v10461_v25 }
 0x3cd   : > { %10469 = vst [vmem:[#allocation110_spill] sm:$0xff] %v8280_v29  ;;  %v3155_v17 = vmul.f32 0.15915494, %v8264_v6  ;;  %v8290_v3 = vmin.f32 %v3693_v31, %v3789_v39  ;;  %v8293_v40 = vsub.f32 %v10455_v45, %v3513_v28  ;;  %v3444_v56 = vmul.f32 6.2831855, %v3348_v35  ;;  %v2965_v39 = vpop.f32.mrf.mxu1 }
 0x3ce   : > { %v8297_v19 = vadd.f32 %v10472_v36, %v10471_v61  ;;  %v8299_v18 = vadd.f32 -0.0001984127, %v4076_v2  ;;  %v3799_v13 = vsub.f32 3.1415927, %v3703_v34  ;;  %v3622_v4 = vand.u32 2147483647, %v8271_v57 }
 0x3cf   : > { %10470 = vst [vmem:[#allocation111_spill] sm:$0xff] %v8290_v3  ;;  %v3337_v53 = vfloor.f32 %v3241_v0  ;;  %v8304_v50 = vmul.f32 %v8277_v21, %v8277_v21  ;;  %v3624_v31 = vand.u32 2147483647, %v8280_v29  ;;  %v8308_v45 = vsub.f32 %v8058_v51, %v3431_v59  ;;  %v10476_v51 = vld [vmem:[#allocation27_spill] sm:$0xff] }
 0x3d0   : > { %v8311_v35 = vadd.f32 %v2963_v15, %v10471_v61  ;;  %v4086_v28 = vmul.f32 2.7557319e-06, %v8284_v62  ;;  %v8314_v2 = vsub.f32 %v2885_v8, %v3442_v58  ;;  %v3251_v36 = vadd.f32 0.5, %v3155_v17 }
 0x3d1   : > { %10473 = vst [vmem:[#allocation16_spill] sm:$0xff] %v8308_v45  ;;  %v3157_v0 = vmul.f32 0.15915494, %v8288_v46  ;;  %v3705_v57 = vand.u32 2147483647, %v8293_v40  ;;  %v8318_v16 = vsub.f32 %v2958_v32, %v3444_v56  ;;  %v8323_v59 = vadd.f32 %v10476_v51, %v10471_v61 }
 0x3d2   : > { %10474 = vst [vmem:[#allocation25_spill] sm:$0xff] %v8314_v2  ;;  %v3166_v29 = vmul.f32 0.15915494, %v8297_v19  ;;  %v3718_v15 = vsub.f32 3.1415927, %v3622_v4  ;;  %v8327_v8 = vadd.f32 %v2965_v39, %v10471_v61  ;;  %v8329_v58 = vmin.f32 %v3703_v34, %v3799_v13 }
 0x3d3   : > { %10475 = vst [vmem:[#allocation112_spill] sm:$0xff] %v8318_v16  ;;  %v3433_v23 = vmul.f32 6.2831855, %v3337_v53  ;;  %v3168_v41 = vmul.f32 0.15915494, %v8311_v35  ;;  %v3347_v38 = vfloor.f32 %v3251_v36  ;;  %v3253_v42 = vadd.f32 0.5, %v3157_v0 }
 0x3d4   : > { %v3720_v17 = vsub.f32 3.1415927, %v3624_v31  ;;  %v3623_v33 = vand.u32 2147483647, %v8308_v45  ;;  %v3262_v32 = vadd.f32 0.5, %v3166_v29  ;;  %v8335_v51 = vmul.f32 %v8290_v3, %v8290_v3 }
 0x3d5   : > { %v3634_v56 = vand.u32 2147483647, %v8314_v2  ;;  %v3264_v9 = vadd.f32 0.5, %v3168_v41  ;;  %v3636_v53 = vand.u32 2147483647, %v8318_v16  ;;  %v8341_v11 = vmin.f32 %v3622_v4, %v3718_v15 }
 0x3d6   : > { %v3167_v39 = vmul.f32 0.15915494, %v8323_v59  ;;  %v3169_v13 = vmul.f32 0.15915494, %v8327_v8  ;;  %v4088_v34 = vmul.f32 2.7557319e-06, %v8304_v50  ;;  %v3358_v29 = vfloor.f32 %v3262_v32 }
 0x3d7   : > { %10477 = vst [vmem:[#allocation27_spill] sm:$0xff] %v8341_v11  ;;  %v3360_v45 = vfloor.f32 %v3264_v9  ;;  %v8343_v2 = vadd.f32 -0.0001984127, %v4086_v28  ;;  %v3801_v36 = vsub.f32 3.1415927, %v3705_v57  ;;  %v8345_v41 = vmin.f32 %v3624_v31, %v3720_v17  ;;  %v2967_v9 = vpop.f32.mrf.mxu1 }
 0x3d8   : > { %v8348_v0 = vsub.f32 %v8238_v43, %v3433_v23  ;;  %v8352_v16 = vmul.f32 %v8329_v58, %v8329_v58  ;;  %v3730_v24 = vsub.f32 3.1415927, %v3634_v56  ;;  %v3443_v14 = vmul.f32 6.2831855, %v3347_v38  ;;  %v10481_v23 = vld [vmem:[#allocation34_spill] sm:$0xff] }
 0x3d9   : > { %10478 = vst [vmem:[#allocation113_spill] sm:$0xff] %v8345_v41  ;;  %v3349_v52 = vfloor.f32 %v3253_v42  ;;  %v3719_v55 = vsub.f32 3.1415927, %v3623_v33  ;;  %v3732_v4 = vsub.f32 3.1415927, %v3636_v53  ;;  %v3263_v15 = vadd.f32 0.5, %v3167_v39  ;;  %v2969_v47 = vpop.f32.mrf.mxu1 }
 0x3da   : > { %10479 = vst [vmem:[#allocation114_spill] sm:$0xff] %v8348_v0  ;;  %v3265_v32 = vadd.f32 0.5, %v3169_v13  ;;  %v8356_v28 = vmul.f32 %v8341_v11, %v8341_v11  ;;  %v3454_v31 = vmul.f32 6.2831855, %v3358_v29  ;;  %v3456_v17 = vmul.f32 6.2831855, %v3360_v45  ;;  %v2896_v45 = vpop.f32.mrf.mxu0 }
 0x3db   : > { %v3178_v43 = vmul.f32 0.15915494, %v10481_v23  ;;  %v8359_v3 = vadd.f32 -0.0001984127, %v4088_v34  ;;  %v8361_v1 = vmin.f32 %v3705_v57, %v3801_v36  ;;  %v8365_v38 = vmul.f32 %v8345_v41, %v8345_v41  ;;  %v10486_v57 = vld [vmem:[#allocation13_spill] sm:$0xff] }
 0x3dc   : > { %10480 = vst [vmem:[#allocation115_spill] sm:$0xff] %v8356_v28  ;;  %v3625_v42 = vand.u32 2147483647, %v8348_v0  ;;  %v8368_v39 = vmin.f32 %v3634_v56, %v3730_v24  ;;  %v8371_v13 = vsub.f32 %v8264_v6, %v3443_v14  ;;  %v3445_v11 = vmul.f32 6.2831855, %v3349_v52 }
 0x3dd   : > { %10482 = vst [vmem:[#allocation34_spill] sm:$0xff] %v8365_v38  ;;  %v3274_v29 = vadd.f32 0.5, %v3178_v43  ;;  %v8373_v63 = vmin.f32 %v3636_v53, %v3732_v4  ;;  %v3359_v34 = vfloor.f32 %v3263_v15  ;;  %v3361_v22 = vfloor.f32 %v3265_v32 }
 0x3de   : > { %10483 = vst [vmem:[#allocation116_spill] sm:$0xff] %v8368_v39  ;;  %10484 = vst [vmem:[#allocation117_spill] sm:$0xff] %v8371_v13  ;;  %v8376_v36 = vadd.f32 %v2967_v9, %v10486_v57  ;;  %v4006_v41 = vmul.f32 2.7557319e-06, %v8356_v28  ;;  %v8379_v5 = vmin.f32 %v3623_v33, %v3719_v55  ;;  %v8382_v24 = vsub.f32 %v8297_v19, %v3454_v31 }
 0x3df   : > { %10485 = vst [vmem:[#allocation118_spill] sm:$0xff] %v8373_v63  ;;  %v8385_v14 = vsub.f32 %v8311_v35, %v3456_v17  ;;  %v8389_v52 = vmul.f32 %v8361_v1, %v8361_v1  ;;  %v4008_v6 = vmul.f32 2.7557319e-06, %v8365_v38  ;;  %v3370_v56 = vfloor.f32 %v3274_v29  ;;  %v2900_v35 = vpop.f32.mrf.mxu0  ;;  %v2973_v17 = vpop.f32.mrf.mxu1 }
 0x3e0   : > { %10487 = vst [vmem:[#allocation13_spill] sm:$0xff] %v8379_v5  ;;  %10488 = vst [vmem:[#allocation119_spill] sm:$0xff] %v8382_v24  ;;  %v3180_v53 = vmul.f32 0.15915494, %v8376_v36  ;;  %v3721_v4 = vsub.f32 3.1415927, %v3625_v42  ;;  %v8395_v33 = vmul.f32 %v8368_v39, %v8368_v39  ;;  %v8399_v19 = vsub.f32 %v8288_v46, %v3445_v11 }
 0x3e1   : > { %10489 = vst [vmem:[#allocation120_spill] sm:$0xff] %v8385_v14  ;;  %v3635_v55 = vand.u32 2147483647, %v8371_v13  ;;  %v8403_v15 = vmul.f32 %v8373_v63, %v8373_v63  ;;  %v3455_v32 = vmul.f32 6.2831855, %v3359_v34  ;;  %v8406_v31 = vadd.f32 %v2896_v45, %v10486_v57 }
 0x3e2   : > { %10490 = vst [vmem:[#allocation121_spill] sm:$0xff] %v8395_v33  ;;  %10491 = vst [vmem:[#allocation122_spill] sm:$0xff] %v8399_v19  ;;  %v3457_v9 = vmul.f32 6.2831855, %v3361_v22  ;;  %v8408_v43 = vadd.f32 -0.0001984127, %v4006_v41  ;;  %v8412_v29 = vmul.f32 %v8379_v5, %v8379_v5  ;;  %v8419_v22 = vadd.f32 %v2969_v47, %v10486_v57  ;;  %v2902_v5 = vpop.f32.mrf.mxu0  ;;  %v2975_v47 = vpop.f32.mrf.mxu1 }
 0x3e3   : > { %10492 = vst [vmem:[#allocation123_spill] sm:$0xff] %v8403_v15  ;;  %v3646_v11 = vand.u32 2147483647, %v8382_v24  ;;  %v3648_v46 = vand.u32 2147483647, %v8385_v14  ;;  %v3276_v38 = vadd.f32 0.5, %v3180_v53  ;;  %v8421_v45 = vmin.f32 %v3625_v42, %v3721_v4 }
 0x3e4   : > { %10493 = vst [vmem:[#allocation124_spill] sm:$0xff] %v8408_v43  ;;  %10494 = vst [vmem:[#allocation125_spill] sm:$0xff] %v8412_v29  ;;  %v8416_v0 = vadd.f32 -0.0001984127, %v4008_v6  ;;  %v3466_v63 = vmul.f32 6.2831855, %v3370_v56  ;;  %v8427_v28 = vsub.f32 %v8323_v59, %v3455_v32  ;;  %v8430_v6 = vsub.f32 %v8327_v8, %v3457_v9 }
 0x3e5   : > { %10496 = vst [vmem:[#allocation127_spill] sm:$0xff] %v8421_v45  ;;  %v4018_v41 = vmul.f32 2.7557319e-06, %v8395_v33  ;;  %v3731_v34 = vsub.f32 3.1415927, %v3635_v55  ;;  %v2901_v4 = vadd.f32 %v2900_v35, %v7735_v54  ;;  %v3372_v13 = vfloor.f32 %v3276_v38 }
 0x3e6   : > { %10495 = vst [vmem:[#allocation126_spill] sm:$0xff] %v8416_v0  ;;  %v3637_v39 = vand.u32 2147483647, %v8399_v19  ;;  %v4020_v43 = vmul.f32 2.7557319e-06, %v8403_v15  ;;  %10497 = vst [vmem:[#allocation128_spill] sm:$0xff] %v8427_v28  ;;  %v2974_v0 = vadd.f32 %v2973_v17, %v7735_v54  ;;  %v8436_v19 = vsub.f32 %v10481_v23, %v3466_v63 }
 0x3e7   : > { %10498 = vst [vmem:[#allocation129_spill] sm:$0xff] %v8430_v6  ;;  %v3179_v56 = vmul.f32 0.15915494, %v8406_v31  ;;  %v3742_v53 = vsub.f32 3.1415927, %v3646_v11  ;;  %v8440_v59 = vadd.f32 %v2902_v5, %v7735_v54  ;;  %v8443_v15 = vadd.f32 %v2975_v47, %v7735_v54 }
 0x3e8   : > { %v3744_v42 = vsub.f32 3.1415927, %v3648_v46  ;;  %10499 = vst [vmem:[#allocation130_spill] sm:$0xff] %v8436_v19  ;;  %v3181_v29 = vmul.f32 0.15915494, %v8419_v22  ;;  %v8447_v35 = vmul.f32 %v8421_v45, %v8421_v45  ;;  %vm4951_vm5 = vcmp.lt.f32.partialorder %v8253_v26, 0.0 }
 0x3e9   : > { %v3733_v8 = vsub.f32 3.1415927, %v3637_v39  ;;  %v3190_v32 = vmul.f32 0.15915494, %v2901_v4  ;;  %v3192_v9 = vmul.f32 0.15915494, %v2974_v0  ;;  %v8451_v38 = vmin.f32 %v3646_v11, %v3742_v53 }
 0x3ea   : > { %10500 = vst [vmem:[#allocation131_spill] sm:$0xff] %v8447_v35  ;;  %v3647_v17 = vand.u32 2147483647, %v8427_v28  ;;  %v3649_v63 = vand.u32 2147483647, %v8430_v6  ;;  %v3275_v23 = vadd.f32 0.5, %v3179_v56  ;;  %v8454_v24 = vmin.f32 %v3648_v46, %v3744_v42 }
 0x3eb   : > { %10501 = vst [vmem:[#allocation132_spill] sm:$0xff] %v8451_v38  ;;  %v3286_v33 = vadd.f32 0.5, %v3190_v32  ;;  %v3288_v5 = vadd.f32 0.5, %v3192_v9  ;;  %v3191_v14 = vmul.f32 0.15915494, %v8440_v59  ;;  %v3277_v10 = vadd.f32 0.5, %v3181_v29  ;;  %v2904_v32 = vpop.f32.mrf.mxu0 }
 0x3ec   : > { %10502 = vst [vmem:[#allocation133_spill] sm:$0xff] %v8454_v24  ;;  %v3658_v47 = vand.u32 2147483647, %v8436_v19  ;;  %v3468_v54 = vmul.f32 6.2831855, %v3372_v13  ;;  %v8460_v6 = vmin.f32 %v3635_v55, %v3731_v34  ;;  %v8462_v11 = vmin.f32 %v3637_v39, %v3733_v8 }
 0x3ed   : > { %v8457_v7 = vadd.f32 -0.0001984127, %v4018_v41  ;;  %v3382_v45 = vfloor.f32 %v3286_v33  ;;  %v3384_v35 = vfloor.f32 %v3288_v5  ;;  %v3193_v28 = vmul.f32 0.15915494, %v8443_v15  ;;  %v2977_v41 = vpop.f32.mrf.mxu1 }
 0x3ee   : > { %10504 = vst [vmem:[#allocation135_spill] sm:$0xff] %v8460_v6  ;;  %10505 = vst [vmem:[#allocation136_spill] sm:$0xff] %v8462_v11  ;;  %v3371_v56 = vfloor.f32 %v3275_v23  ;;  %v3287_v53 = vadd.f32 0.5, %v3191_v14  ;;  %v8466_v46 = vmul.f32 %v8451_v38, %v8451_v38  ;;  %v3743_v42 = vsub.f32 3.1415927, %v3647_v17  ;;  %v10510_v23 = vld [vmem:[#allocation12_spill] sm:$0xff] }
 0x3ef   : > { %10503 = vst [vmem:[#allocation134_spill] sm:$0xff] %v8457_v7  ;;  %v3745_v13 = vsub.f32 3.1415927, %v3649_v63  ;;  %v3478_v29 = vmul.f32 6.2831855, %v3382_v45  ;;  %v8470_v33 = vmul.f32 %v8454_v24, %v8454_v24  ;;  %v8473_v55 = vsub.f32 %v8376_v36, %v3468_v54 }
 0x3f0   : > { %10506 = vst [vmem:[#allocation137_spill] sm:$0xff] %v8466_v46  ;;  %v3754_v9 = vsub.f32 3.1415927, %v3658_v47  ;;  %v3373_v39 = vfloor.f32 %v3277_v10  ;;  %v8475_v34 = vadd.f32 -0.0001984127, %v4020_v43  ;;  %v3289_v8 = vadd.f32 0.5, %v3193_v28  ;;  %v2906_v28 = vpop.f32.mrf.mxu0 }
 0x3f1   : > { %10507 = vst [vmem:[#allocation138_spill] sm:$0xff] %v8470_v33  ;;  %10508 = vst [vmem:[#allocation139_spill] sm:$0xff] %v8473_v55  ;;  %v3480_v14 = vmul.f32 6.2831855, %v3384_v35  ;;  %v2905_v5 = vadd.f32 %v2904_v32, %v10510_v23  ;;  %v8480_v38 = vmul.f32 %v8460_v6, %v8460_v6  ;;  %v8484_v45 = vmul.f32 %v8462_v11, %v8462_v11  ;;  %v2979_v35 = vpop.f32.mrf.mxu1 }
 0x3f2   : > { %10509 = vst [vmem:[#allocation140_spill] sm:$0xff] %v8475_v34  ;;  %v3467_v24 = vmul.f32 6.2831855, %v3371_v56  ;;  %v3383_v7 = vfloor.f32 %v3287_v53  ;;  %v4030_v54 = vmul.f32 2.7557319e-06, %v8466_v46  ;;  %v8487_v36 = vmin.f32 %v3647_v17, %v3743_v42 }
 0x3f3   : > { %10511 = vst [vmem:[#allocation12_spill] sm:$0xff] %v8480_v38  ;;  %10512 = vst [vmem:[#allocation141_spill] sm:$0xff] %v8484_v45  ;;  %v8489_v10 = vmin.f32 %v3649_v63, %v3745_v13  ;;  %v8491_v43 = vsub.f32 %v2901_v4, %v3478_v29  ;;  %v4032_v32 = vmul.f32 2.7557319e-06, %v8470_v33  ;;  %v8494_v6 = vmin.f32 %v3658_v47, %v3754_v9  ;;  %v10522_v33 = vld [vmem:[#allocation11_spill] sm:$0xff]  ;;  %v2983_v19 = vpop.f32.mrf.mxu1 }
 0x3f4   : > { %10513 = vst [vmem:[#allocation142_spill] sm:$0xff] %v8487_v36  ;;  %v3660_v34 = vand.u32 2147483647, %v8473_v55  ;;  %v3469_v11 = vmul.f32 6.2831855, %v3373_v39  ;;  %v8497_v45 = vsub.f32 %v2974_v0, %v3480_v14  ;;  %v3385_v56 = vfloor.f32 %v3289_v8  ;;  %v2910_v39 = vpop.f32.mrf.mxu0 }
 0x3f5   : > { %10514 = vst [vmem:[#allocation143_spill] sm:$0xff] %v8489_v10  ;;  %10515 = vst [vmem:[#allocation144_spill] sm:$0xff] %v8491_v43  ;;  %v3202_v53 = vmul.f32 0.15915494, %v2905_v5  ;;  %v2978_v17 = vadd.f32 %v2977_v41, %v10510_v23  ;;  %v8501_v63 = vsub.f32 %v8406_v31, %v3467_v24  ;;  %v3479_v4 = vmul.f32 6.2831855, %v3383_v7 }
 0x3f6   : > { %10516 = vst [vmem:[#allocation145_spill] sm:$0xff] %v8494_v6  ;;  %10517 = vst [vmem:[#allocation146_spill] sm:$0xff] %v8497_v45  ;;  %v8504_v42 = vadd.f32 %v2906_v28, %v10510_v23  ;;  %v8507_v13 = vadd.f32 %v2979_v35, %v10510_v23  ;;  %v8511_v47 = vmul.f32 %v8487_v36, %v8487_v36  ;;  %v3670_v0 = vand.u32 2147483647, %v8491_v43 }
 0x3f7   : > { %10518 = vst [vmem:[#allocation147_spill] sm:$0xff] %v8501_v63  ;;  %v3298_v29 = vadd.f32 0.5, %v3202_v53  ;;  %v3204_v9 = vmul.f32 0.15915494, %v2978_v17  ;;  %v8516_v24 = vmul.f32 %v8494_v6, %v8494_v6  ;;  %v3756_v7 = vsub.f32 3.1415927, %v3660_v34 }
 0x3f8   : > { %10519 = vst [vmem:[#allocation148_spill] sm:$0xff] %v8511_v47  ;;  %v8519_v31 = vsub.f32 %v8419_v22, %v3469_v11  ;;  %v3203_v41 = vmul.f32 0.15915494, %v8504_v42  ;;  %v3672_v14 = vand.u32 2147483647, %v8497_v45  ;;  %v8526_v46 = vadd.f32 %v2910_v39, %v10522_v33 }
 0x3f9   : > { %10520 = vst [vmem:[#allocation149_spill] sm:$0xff] %v8516_v24  ;;  %v3481_v8 = vmul.f32 6.2831855, %v3385_v56  ;;  %v3394_v28 = vfloor.f32 %v3298_v29  ;;  %v3300_v35 = vadd.f32 0.5, %v3204_v9  ;;  %v3659_v36 = vand.u32 2147483647, %v8501_v63 }
 0x3fa   : > { %10521 = vst [vmem:[#allocation150_spill] sm:$0xff] %v8519_v31  ;;  %v3299_v53 = vadd.f32 0.5, %v3203_v41  ;;  %v3205_v38 = vmul.f32 0.15915494, %v8507_v13  ;;  %v3766_v6 = vsub.f32 3.1415927, %v3670_v0  ;;  %v8529_v55 = vsub.f32 %v8440_v59, %v3479_v4  ;;  %v2912_v59 = vpop.f32.mrf.mxu0 }
 0x3fb   : > { %v3490_v22 = vmul.f32 6.2831855, %v3394_v28  ;;  %v3396_v11 = vfloor.f32 %v3300_v35  ;;  %v8531_v47 = vadd.f32 -0.0001984127, %v4030_v54  ;;  %v8533_v56 = vadd.f32 -0.0001984127, %v4032_v32 }
 0x3fc   : > { %10523 = vst [vmem:[#allocation11_spill] sm:$0xff] %v8529_v55  ;;  %v4042_v29 = vmul.f32 2.7557319e-06, %v8516_v24  ;;  %v8536_v9 = vmin.f32 %v3660_v34, %v3756_v7  ;;  %v3661_v41 = vand.u32 2147483647, %v8519_v31  ;;  %v8540_v39 = vsub.f32 %v8443_v15, %v3481_v8 }
 0x3fd   : > { %10524 = vst [vmem:[#allocation151_spill] sm:$0xff] %v8531_v47  ;;  %10525 = vst [vmem:[#allocation152_spill] sm:$0xff] %v8533_v56  ;;  %v3768_v63 = vsub.f32 3.1415927, %v3672_v14  ;;  %v3395_v45 = vfloor.f32 %v3299_v53  ;;  %v3492_v4 = vmul.f32 6.2831855, %v3396_v11  ;;  %v8544_v54 = vadd.f32 %v2983_v19, %v10522_v33  ;;  %v2985_v11 = vpop.f32.mrf.mxu1 }
 0x3fe   : > { %10526 = vst [vmem:[#allocation153_spill] sm:$0xff] %v8536_v9  ;;  %10527 = vst [vmem:[#allocation154_spill] sm:$0xff] %v8540_v39  ;;  %v3301_v28 = vadd.f32 0.5, %v3205_v38  ;;  %v3214_v35 = vmul.f32 0.15915494, %v8526_v46  ;;  %v8546_v56 = vmin.f32 %v3670_v0, %v3766_v6  ;;  %v8549_v7 = vsub.f32 %v2905_v5, %v3490_v22 }
 0x3ff   : > { %v3755_v32 = vsub.f32 3.1415927, %v3659_v36  ;;  %v3671_v34 = vand.u32 2147483647, %v8529_v55  ;;  %v8553_v15 = vmul.f32 %v8536_v9, %v8536_v9  ;;  %v3216_v53 = vmul.f32 0.15915494, %v8544_v54 }
 0x400   : > { %10528 = vst [vmem:[#allocation155_spill] sm:$0xff] %v8546_v56  ;;  %10529 = vst [vmem:[#allocation156_spill] sm:$0xff] %v8549_v7  ;;  %v3310_v8 = vadd.f32 0.5, %v3214_v35  ;;  %v8557_v38 = vadd.f32 %v2912_v59, %v10522_v33  ;;  %v8561_v19 = vmul.f32 %v8489_v10, %v8489_v10  ;;  %v3757_v6 = vsub.f32 3.1415927, %v3661_v41 }
 0x401   : > { %10530 = vst [vmem:[#allocation157_spill] sm:$0xff] %v8553_v15  ;;  %v3673_v0 = vand.u32 2147483647, %v8540_v39  ;;  %v3491_v5 = vmul.f32 6.2831855, %v3395_v45  ;;  %v8564_v22 = vmin.f32 %v3672_v14, %v3768_v63  ;;  %v8566_v31 = vsub.f32 %v2978_v17, %v3492_v4 }
 0x402   : > { %10531 = vst [vmem:[#allocation158_spill] sm:$0xff] %v8561_v19  ;;  %v3397_v9 = vfloor.f32 %v3301_v28  ;;  %v3406_v35 = vfloor.f32 %v3310_v8  ;;  %v8570_v47 = vmul.f32 %v8546_v56, %v8546_v56  ;;  %v3767_v59 = vsub.f32 3.1415927, %v3671_v34 }
 0x403   : > { %10532 = vst [vmem:[#allocation159_spill] sm:$0xff] %v8564_v22  ;;  %10533 = vst [vmem:[#allocation160_spill] sm:$0xff] %v8566_v31  ;;  %v3682_v24 = vand.u32 2147483647, %v8549_v7  ;;  %v8574_v10 = vadd.f32 %v2985_v11, %v10522_v33  ;;  %v4044_v19 = vmul.f32 2.7557319e-06, %v8553_v15  ;;  %v8577_v39 = vmin.f32 %v3659_v36, %v3755_v32  ;;  %v2914_v32 = vpop.f32.mrf.mxu0 }
 0x404   : > { %10534 = vst [vmem:[#allocation161_spill] sm:$0xff] %v8570_v47  ;;  %v3312_v45 = vadd.f32 0.5, %v3216_v53  ;;  %v3215_v17 = vmul.f32 0.15915494, %v8557_v38  ;;  %v8580_v63 = vmin.f32 %v3661_v41, %v3757_v6  ;;  %v3769_v14 = vsub.f32 3.1415927, %v3673_v0  ;;  %v2987_v53 = vpop.f32.mrf.mxu1 }
 0x405   : > { %10535 = vst [vmem:[#allocation162_spill] sm:$0xff] %v8577_v39  ;;  %v8583_v4 = vsub.f32 %v8504_v42, %v3491_v5  ;;  %v3502_v28 = vmul.f32 6.2831855, %v3406_v35  ;;  %v8585_v8 = vadd.f32 -0.0001984127, %v4042_v29  ;;  %v8589_v11 = vmul.f32 %v8564_v22, %v8564_v22 }
 0x406   : > { %10536 = vst [vmem:[#allocation163_spill] sm:$0xff] %v8580_v63  ;;  %v3684_v15 = vand.u32 2147483647, %v8566_v31  ;;  %v3493_v36 = vmul.f32 6.2831855, %v3397_v9  ;;  %v8593_v41 = vmin.f32 %v3671_v34, %v3767_v59  ;;  %v8600_v29 = vmul.f32 %v8577_v39, %v8577_v39  ;;  %v10547_v39 = vld [vmem:[#allocation10_spill] sm:$0xff]  ;;  %v2989_v43 = vpop.f32.mrf.mxu1 }
 0x407   : > { %10537 = vst [vmem:[#allocation164_spill] sm:$0xff] %v8583_v4  ;;  %10538 = vst [vmem:[#allocation165_spill] sm:$0xff] %v8585_v8  ;;  %v4054_v56 = vmul.f32 2.7557319e-06, %v8570_v47  ;;  %v3778_v6 = vsub.f32 3.1415927, %v3682_v24  ;;  %v3408_v35 = vfloor.f32 %v3312_v45  ;;  %v8604_v9 = vmul.f32 %v8580_v63, %v8580_v63 }
 0x408   : > { %10539 = vst [vmem:[#allocation166_spill] sm:$0xff] %v8589_v11  ;;  %10540 = vst [vmem:[#allocation167_spill] sm:$0xff] %v8593_v41  ;;  %v3217_v42 = vmul.f32 0.15915494, %v8574_v10  ;;  %v8596_v5 = vadd.f32 -0.0001984127, %v4044_v19  ;;  %v8606_v8 = vmin.f32 %v3673_v0, %v3769_v14  ;;  %v8610_v59 = vsub.f32 %v8526_v46, %v3502_v28 }
 0x409   : > { %10542 = vst [vmem:[#allocation169_spill] sm:$0xff] %v8600_v29  ;;  %v3311_v22 = vadd.f32 0.5, %v3215_v17  ;;  %10543 = vst [vmem:[#allocation170_spill] sm:$0xff] %v8604_v9  ;;  %v3683_v34 = vand.u32 2147483647, %v8583_v4  ;;  %v8614_v55 = vsub.f32 %v8507_v13, %v3493_v36  ;;  %v2915_v45 = vadd.f32 %v2914_v32, %v10547_v39  ;;  %v2916_v17 = vpop.f32.mrf.mxu0 }
 0x40a   : > { %10541 = vst [vmem:[#allocation168_spill] sm:$0xff] %v8596_v5  ;;  %10544 = vst [vmem:[#allocation171_spill] sm:$0xff] %v8606_v8  ;;  %v4056_v19 = vmul.f32 2.7557319e-06, %v8589_v11  ;;  %v3780_v5 = vsub.f32 3.1415927, %v3684_v15  ;;  %v8621_v0 = vmul.f32 %v8593_v41, %v8593_v41  ;;  %v8623_v14 = vmin.f32 %v3682_v24, %v3778_v6 }
 0x40b   : > { %10545 = vst [vmem:[#allocation172_spill] sm:$0xff] %v8610_v59  ;;  %10546 = vst [vmem:[#allocation173_spill] sm:$0xff] %v8614_v55  ;;  %v8617_v29 = vadd.f32 -0.0001984127, %v4054_v56  ;;  %v3313_v46 = vadd.f32 0.5, %v3217_v42  ;;  %v3407_v63 = vfloor.f32 %v3311_v22  ;;  %v2988_v11 = vadd.f32 %v2987_v53, %v10547_v39 }
 0x40c   : > { %10549 = vst [vmem:[#allocation174_spill] sm:$0xff] %v8621_v0  ;;  %10550 = vst [vmem:[#allocation175_spill] sm:$0xff] %v8623_v14  ;;  %v3504_v28 = vmul.f32 6.2831855, %v3408_v35  ;;  %v3226_v9 = vmul.f32 0.15915494, %v2915_v45  ;;  %v8628_v32 = vadd.f32 %v2916_v17, %v10547_v39  ;;  %v8631_v56 = vadd.f32 %v2989_v43, %v10547_v39 }
 0x40d   : > { %10548 = vst [vmem:[#allocation10_spill] sm:$0xff] %v8617_v29  ;;  %v3779_v13 = vsub.f32 3.1415927, %v3683_v34  ;;  %v3694_v36 = vand.u32 2147483647, %v8610_v59  ;;  %v8633_v29 = vmin.f32 %v3684_v15, %v3780_v5  ;;  %v8638_v22 = vmul.f32 %v8623_v14, %v8623_v14  ;;  %v3026_v5 = vpop.f32.mrf.mxu0  ;;  %v3099_v59 = vpop.f32.mrf.mxu1 }
 0x40e   : > { %v3685_v24 = vand.u32 2147483647, %v8614_v55  ;;  %v3322_v6 = vadd.f32 0.5, %v3226_v9  ;;  %v3228_v42 = vmul.f32 0.15915494, %v2988_v11  ;;  %v3409_v53 = vfloor.f32 %v3313_v46 }
 0x40f   : > { %10551 = vst [vmem:[#allocation176_spill] sm:$0xff] %v8633_v29  ;;  %10552 = vst [vmem:[#allocation177_spill] sm:$0xff] %v8638_v22  ;;  %v3227_v35 = vmul.f32 0.15915494, %v8628_v32  ;;  %v3229_v41 = vmul.f32 0.15915494, %v8631_v56  ;;  %v8643_v17 = vsub.f32 %v8544_v54, %v3504_v28  ;;  %v8647_v9 = vmin.f32 %v3683_v34, %v3779_v13 }
 0x410   : > { %v3503_v43 = vmul.f32 6.2831855, %v3407_v63  ;;  %v3418_v47 = vfloor.f32 %v3322_v6  ;;  %v3324_v15 = vadd.f32 0.5, %v3228_v42  ;;  %v8645_v4 = vadd.f32 -0.0001984127, %v4056_v19 }
 0x411   : > { %10553 = vst [vmem:[#allocation178_spill] sm:$0xff] %v8643_v17  ;;  %10555 = vst [vmem:[#allocation180_spill] sm:$0xff] %v8647_v9  ;;  %v3790_v55 = vsub.f32 3.1415927, %v3694_v36  ;;  %v3323_v31 = vadd.f32 0.5, %v3227_v35  ;;  %v8651_v46 = vmul.f32 %v8633_v29, %v8633_v29  ;;  %v3325_v0 = vadd.f32 0.5, %v3229_v41 }
 0x412   : > { %10554 = vst [vmem:[#allocation179_spill] sm:$0xff] %v8645_v4  ;;  %v3514_v14 = vmul.f32 6.2831855, %v3418_v47  ;;  %v3420_v7 = vfloor.f32 %v3324_v15  ;;  %v8655_v54 = vmul.f32 %v8606_v8, %v8606_v8  ;;  %v4066_v63 = vmul.f32 2.7557319e-06, %v8638_v22  ;;  %v3028_v47 = vpop.f32.mrf.mxu0 }
 0x413   : > { %10556 = vst [vmem:[#allocation181_spill] sm:$0xff] %v8651_v46  ;;  %v3781_v19 = vsub.f32 3.1415927, %v3685_v24  ;;  %v3505_v28 = vmul.f32 6.2831855, %v3409_v53  ;;  %v8660_v13 = vsub.f32 %v8557_v38, %v3503_v43  ;;  %v3027_v42 = vadd.f32 %v3026_v5, %v7750_v49  ;;  %v3101_v43 = vpop.f32.mrf.mxu1 }
 0x414   : > { %10557 = vst [vmem:[#allocation182_spill] sm:$0xff] %v8655_v54  ;;  %v3696_v34 = vand.u32 2147483647, %v8643_v17  ;;  %v3516_v6 = vmul.f32 6.2831855, %v3420_v7  ;;  %v8665_v41 = vmul.f32 %v8647_v9, %v8647_v9  ;;  %v8667_v35 = vmin.f32 %v3694_v36, %v3790_v55 }
 0x415   : > { %10558 = vst [vmem:[#allocation183_spill] sm:$0xff] %v8660_v13  ;;  %v3419_v15 = vfloor.f32 %v3323_v31  ;;  %v3100_v8 = vadd.f32 %v3099_v59, %v7750_v49  ;;  %v4068_v53 = vmul.f32 2.7557319e-06, %v8651_v46  ;;  %v8671_v29 = vsub.f32 %v2915_v45, %v3514_v14 }
 0x416   : > { %10559 = vst [vmem:[#allocation184_spill] sm:$0xff] %v8665_v41  ;;  %10560 = vst [vmem:[#allocation185_spill] sm:$0xff] %v8667_v35  ;;  %v3421_v4 = vfloor.f32 %v3325_v0  ;;  %v3146_v38 = vmul.f32 0.15915494, %v3027_v42  ;;  %v8674_v7 = vsub.f32 %v8574_v10, %v3505_v28  ;;  %v8676_v5 = vsub.f32 %v2988_v11, %v3516_v6 }
 0x417   : > { %10561 = vst [vmem:[#allocation186_spill] sm:$0xff] %v8671_v29  ;;  %v3148_v54 = vmul.f32 0.15915494, %v3100_v8  ;;  %v8679_v9 = vadd.f32 %v3028_v47, %v7750_v49  ;;  %v8681_v55 = vmin.f32 %v3685_v24, %v3781_v19  ;;  %v3792_v31 = vsub.f32 3.1415927, %v3696_v34 }
 0x418   : > { %10562 = vst [vmem:[#allocation187_spill] sm:$0xff] %v8674_v7  ;;  %10563 = vst [vmem:[#allocation188_spill] sm:$0xff] %v8676_v5  ;;  %v3695_v59 = vand.u32 2147483647, %v8660_v13  ;;  %v3242_v36 = vadd.f32 0.5, %v3146_v38  ;;  %v8686_v45 = vmul.f32 %v8667_v35, %v8667_v35  ;;  %v3102_v10 = vadd.f32 %v3101_v43, %v7750_v49  ;;  %v3103_v13 = vpop.f32.mrf.mxu1 }
 0x419   : > { %10564 = vst [vmem:[#allocation189_spill] sm:$0xff] %v8681_v55  ;;  %v3515_v0 = vmul.f32 6.2831855, %v3419_v15  ;;  %v3244_v14 = vadd.f32 0.5, %v3148_v54  ;;  %v3706_v11 = vand.u32 2147483647, %v8671_v29  ;;  %v8693_v22 = vmin.f32 %v3696_v34, %v3792_v31  ;;  %v3030_v54 = vpop.f32.mrf.mxu0 }
 0x41a   : > { %10565 = vst [vmem:[#allocation190_spill] sm:$0xff] %v8686_v45  ;;  %v3517_v28 = vmul.f32 6.2831855, %v3421_v4  ;;  %v3338_v6 = vfloor.f32 %v3242_v36  ;;  %v3147_v47 = vmul.f32 0.15915494, %v8679_v9  ;;  %vm4950_vm6 = vcmp.lt.f32.partialorder %v8206_v60, 0.0 }
 0x41b   : > { %v3697_v24 = vand.u32 2147483647, %v8674_v7  ;;  %v3708_v19 = vand.u32 2147483647, %v8676_v5  ;;  %v3340_v46 = vfloor.f32 %v3244_v14  ;;  %v3149_v38 = vmul.f32 0.15915494, %v3102_v10 }
 0x41c   : > { %10566 = vst [vmem:[#allocation191_spill] sm:$0xff] %v8693_v22  ;;  %v3791_v35 = vsub.f32 3.1415927, %v3695_v59  ;;  %v3434_v17 = vmul.f32 6.2831855, %v3338_v6  ;;  %v3243_v15 = vadd.f32 0.5, %v3147_v47  ;;  %v8697_v43 = vsub.f32 %v8628_v32, %v3515_v0 }
 0x41d   : > { %v4078_v49 = vmul.f32 2.7557319e-06, %v8686_v45  ;;  %v3436_v4 = vmul.f32 6.2831855, %v3340_v46  ;;  %v3245_v36 = vadd.f32 0.5, %v3149_v38  ;;  %v8702_v14 = vsub.f32 %v8631_v56, %v3517_v28 }
 0x41e   : > { %10567 = vst [vmem:[#allocation192_spill] sm:$0xff] %v8697_v43  ;;  %v8699_v41 = vadd.f32 -0.0001984127, %v4066_v63  ;;  %v3802_v7 = vsub.f32 3.1415927, %v3706_v11  ;;  %v8704_v34 = vsub.f32 %v3027_v42, %v3434_v17  ;;  %v8710_v6 = vmul.f32 %v8681_v55, %v8681_v55 }
 0x41f   : > { %10569 = vst [vmem:[#allocation194_spill] sm:$0xff] %v8702_v14  ;;  %v8706_v31 = vadd.f32 -0.0001984127, %v4068_v53  ;;  %v3804_v47 = vsub.f32 3.1415927, %v3708_v19  ;;  %v8712_v32 = vsub.f32 %v3100_v8, %v3436_v4  ;;  %v3339_v0 = vfloor.f32 %v3243_v15  ;;  %v3105_v53 = vpop.f32.mrf.mxu1 }
 0x420   : > { %10568 = vst [vmem:[#allocation193_spill] sm:$0xff] %v8699_v41  ;;  %10570 = vst [vmem:[#allocation195_spill] sm:$0xff] %v8704_v34  ;;  %v3793_v46 = vsub.f32 3.1415927, %v3697_v24  ;;  %v3341_v38 = vfloor.f32 %v3245_v36  ;;  %v3031_v63 = vadd.f32 %v3030_v54, %v10461_v25  ;;  %v3032_v41 = vpop.f32.mrf.mxu0  ;;  %v8715_v5 = vadd.f32 -0.0001984127, %v4078_v49 }
 0x421   : > { %10571 = vst [vmem:[#allocation196_spill] sm:$0xff] %v8706_v31  ;;  %10572 = vst [vmem:[#allocation197_spill] sm:$0xff] %v8710_v6  ;;  %v8719_v56 = vmul.f32 %v8693_v22, %v8693_v22  ;;  %v8721_v17 = vmin.f32 %v3695_v59, %v3791_v35  ;;  %v3707_v42 = vand.u32 2147483647, %v8697_v43  ;;  %v8724_v28 = vmin.f32 %v3706_v11, %v3802_v7 }
 0x422   : > { %10573 = vst [vmem:[#allocation198_spill] sm:$0xff] %v8712_v32  ;;  %10574 = vst [vmem:[#allocation199_spill] sm:$0xff] %v8715_v5  ;;  %v3709_v8 = vand.u32 2147483647, %v8702_v14  ;;  %v3626_v15 = vand.u32 2147483647, %v8704_v34  ;;  %v3104_v54 = vadd.f32 %v3103_v13, %v10461_v25  ;;  %v8729_v4 = vmin.f32 %v3708_v19, %v3804_v47 }
 0x423   : > { %10575 = vst [vmem:[#allocation200_spill] sm:$0xff] %v8719_v56  ;;  %10576 = vst [vmem:[#allocation201_spill] sm:$0xff] %v8721_v17  ;;  %v3628_v49 = vand.u32 2147483647, %v8712_v32  ;;  %v3158_v36 = vmul.f32 0.15915494, %v3031_v63  ;;  %v8733_v55 = vadd.f32 %v3032_v41, %v10461_v25  ;;  %v8736_v7 = vadd.f32 %v3105_v53, %v10461_v25 }
 0x424   : > { %10577 = vst [vmem:[#allocation202_spill] sm:$0xff] %v8724_v28  ;;  %10578 = vst [vmem:[#allocation203_spill] sm:$0xff] %v8729_v4  ;;  %v3435_v35 = vmul.f32 6.2831855, %v3339_v0  ;;  %v3437_v59 = vmul.f32 6.2831855, %v3341_v38  ;;  %v8738_v11 = vmin.f32 %v3697_v24, %v3793_v46  ;;  %v8744_v47 = vmul.f32 %v8724_v28, %v8724_v28  ;;  %v3036_v28 = vpop.f32.mrf.mxu0 }
 0x425   : > { %v3160_v31 = vmul.f32 0.15915494, %v3104_v54  ;;  %v3803_v22 = vsub.f32 3.1415927, %v3707_v42  ;;  %v3254_v34 = vadd.f32 0.5, %v3158_v36  ;;  %v8748_v0 = vmul.f32 %v8721_v17, %v8721_v17 }
 0x426   : > { %10579 = vst [vmem:[#allocation204_spill] sm:$0xff] %v8738_v11  ;;  %v3159_v13 = vmul.f32 0.15915494, %v8733_v55  ;;  %v4080_v19 = vmul.f32 2.7557319e-06, %v8719_v56  ;;  %v8752_v25 = vmul.f32 %v8729_v4, %v8729_v4  ;;  %v8755_v38 = vsub.f32 %v8679_v9, %v3435_v35 }
 0x427   : > { %v3722_v41 = vsub.f32 3.1415927, %v3626_v15  ;;  %v3256_v32 = vadd.f32 0.5, %v3160_v31  ;;  %10580 = vst [vmem:[#allocation205_spill] sm:$0xff] %v8748_v0  ;;  %v3724_v24 = vsub.f32 3.1415927, %v3628_v49  ;;  %v3350_v46 = vfloor.f32 %v3254_v34 }
 0x428   : > { %10581 = vst [vmem:[#allocation206_spill] sm:$0xff] %v8755_v38  ;;  %v8757_v53 = vsub.f32 %v3102_v10, %v3437_v59  ;;  %v3161_v6 = vmul.f32 0.15915494, %v8736_v7  ;;  %v8760_v14 = vmin.f32 %v3707_v42, %v3803_v22  ;;  %v3805_v31 = vsub.f32 3.1415927, %v3709_v8  ;;  %v3109_v10 = vpop.f32.mrf.mxu1 }
 0x429   : > { %v3352_v36 = vfloor.f32 %v3256_v32  ;;  %v3446_v56 = vmul.f32 6.2831855, %v3350_v46  ;;  %v3255_v17 = vadd.f32 0.5, %v3159_v13  ;;  %v8764_v4 = vmul.f32 %v8738_v11, %v8738_v11 }
 0x42a   : > { %10582 = vst [vmem:[#allocation207_spill] sm:$0xff] %v8757_v53  ;;  %10583 = vst [vmem:[#allocation208_spill] sm:$0xff] %v8760_v14  ;;  %v4090_v34 = vmul.f32 2.7557319e-06, %v8744_v47  ;;  %v8767_v5 = vmin.f32 %v3626_v15, %v3722_v41  ;;  %v8769_v35 = vadd.f32 -0.0001984127, %v4080_v19  ;;  %v8772_v22 = vmin.f32 %v3628_v49, %v3724_v24 }
 0x42b   : > { %10584 = vst [vmem:[#allocation209_spill] sm:$0xff] %v8764_v4  ;;  %v3448_v9 = vmul.f32 6.2831855, %v3352_v36  ;;  %v4092_v32 = vmul.f32 2.7557319e-06, %v8752_v25  ;;  %v8774_v42 = vsub.f32 %v3031_v63, %v3446_v56  ;;  %v3257_v46 = vadd.f32 0.5, %v3161_v6 }
 0x42c   : > { %10585 = vst [vmem:[#allocation210_spill] sm:$0xff] %v8767_v5  ;;  %10586 = vst [vmem:[#allocation211_spill] sm:$0xff] %v8769_v35  ;;  %v3627_v59 = vand.u32 2147483647, %v8755_v38  ;;  %v3629_v13 = vand.u32 2147483647, %v8757_v53  ;;  %v3037_v11 = vadd.f32 %v3036_v28, %v10471_v61  ;;  %v8781_v15 = vmul.f32 %v8760_v14, %v8760_v14 }
 0x42d   : > { %10587 = vst [vmem:[#allocation212_spill] sm:$0xff] %v8772_v22  ;;  %10588 = vst [vmem:[#allocation213_spill] sm:$0xff] %v8774_v42  ;;  %v8783_v41 = vmin.f32 %v3709_v8, %v3805_v31  ;;  %v3351_v19 = vfloor.f32 %v3255_v17  ;;  %v3110_v36 = vadd.f32 %v3109_v10, %v10471_v61  ;;  %v8786_v49 = vadd.f32 -0.0001984127, %v4090_v34 }
 0x42e   : > { %v8790_v63 = vmul.f32 %v8767_v5, %v8767_v5  ;;  %v8792_v56 = vsub.f32 %v3104_v54, %v3448_v9  ;;  %v3170_v6 = vmul.f32 0.15915494, %v3037_v11  ;;  %v8794_v24 = vadd.f32 -0.0001984127, %v4092_v32 }
 0x42f   : > { %10589 = vst [vmem:[#allocation214_spill] sm:$0xff] %v8783_v41  ;;  %v8798_v28 = vmul.f32 %v8772_v22, %v8772_v22  ;;  %v3638_v8 = vand.u32 2147483647, %v8774_v42  ;;  %v3172_v17 = vmul.f32 0.15915494, %v3110_v36  ;;  %v3353_v34 = vfloor.f32 %v3257_v46 }
 0x430   : > { %10590 = vst [vmem:[#allocation215_spill] sm:$0xff] %v8790_v63  ;;  %10591 = vst [vmem:[#allocation216_spill] sm:$0xff] %v8792_v56  ;;  %v3723_v31 = vsub.f32 3.1415927, %v3627_v59  ;;  %v3725_v10 = vsub.f32 3.1415927, %v3629_v13  ;;  %v8803_v38 = vmul.f32 %v8783_v41, %v8783_v41 }
 0x431   : > { %10592 = vst [vmem:[#allocation217_spill] sm:$0xff] %v8798_v28  ;;  %v3266_v53 = vadd.f32 0.5, %v3170_v6  ;;  %v3447_v54 = vmul.f32 6.2831855, %v3351_v19  ;;  %v3268_v9 = vadd.f32 0.5, %v3172_v17  ;;  %vm4952_vm7 = vcmp.lt.f32.partialorder %v8220_v12, 0.0 }
 0x432   : > { %v4087_v32 = vmul.f32 2.7557319e-06, %v8352_v16  ;;  %v4010_v5 = vmul.f32 2.7557319e-06, %v8790_v63  ;;  %v3640_v22 = vand.u32 2147483647, %v8792_v56  ;;  %v8810_v4 = vmin.f32 %v3627_v59, %v3723_v31 }
 0x433   : > { %v3362_v14 = vfloor.f32 %v3266_v53  ;;  %v4089_v42 = vmul.f32 2.7557319e-06, %v8389_v52  ;;  %v4012_v35 = vmul.f32 2.7557319e-06, %v8798_v28  ;;  %v3734_v45 = vsub.f32 3.1415927, %v3638_v8 }
 0x434   : > { %v3364_v46 = vfloor.f32 %v3268_v9  ;;  %v4183_v6 = vadd.f32 -0.0001984127, %v4087_v32  ;;  %10593 = vst [vmem:[#allocation218_spill] sm:$0xff] %v8810_v4  ;;  %v3449_v41 = vmul.f32 6.2831855, %v3353_v34  ;;  %v8812_v17 = vmin.f32 %v3629_v13, %v3725_v10 }
 0x435   : > { %v3458_v43 = vmul.f32 6.2831855, %v3362_v14  ;;  %v4185_v19 = vadd.f32 -0.0001984127, %v4089_v42  ;;  %v8815_v29 = vsub.f32 %v8733_v55, %v3447_v54  ;;  %v3736_v56 = vsub.f32 3.1415927, %v3640_v22 }
 0x436   : > { %10594 = vst [vmem:[#allocation219_spill] sm:$0xff] %v8812_v17  ;;  %v3460_v63 = vmul.f32 6.2831855, %v3364_v46  ;;  %v4279_v53 = vmul.f32 %v4183_v6, %v8352_v16  ;;  %v4278_v59 = vmul.f32 %v8343_v2, %v8284_v62  ;;  %v8823_v31 = vadd.f32 -0.0001984127, %v4010_v5 }
 0x437   : > { %10595 = vst [vmem:[#allocation220_spill] sm:$0xff] %v8815_v29  ;;  %v8818_v0 = vsub.f32 %v3037_v11, %v3458_v43  ;;  %v4281_v28 = vmul.f32 %v4185_v19, %v8389_v52  ;;  %v8825_v14 = vmin.f32 %v3638_v8, %v3734_v45  ;;  %v8829_v55 = vadd.f32 -0.0001984127, %v4012_v35 }
 0x438   : > { %10597 = vst [vmem:[#allocation222_spill] sm:$0xff] %v8823_v31  ;;  %v8827_v42 = vsub.f32 %v3110_v36, %v3460_v63  ;;  %v4375_v13 = vadd.f32 0.008333333, %v4279_v53  ;;  %v8833_v10 = vmul.f32 %v8810_v4, %v8810_v4  ;;  %v8836_v43 = vsub.f32 %v8736_v7, %v3449_v41  ;;  %v3038_v7 = vpop.f32.mrf.mxu0  ;;  %v3111_v53 = vpop.f32.mrf.mxu1  ;;  %v10646_v31 = vld [vmem:[#allocation98_spill] sm:$0xff] }
 0x439   : > { %10596 = vst [vmem:[#allocation221_spill] sm:$0xff] %v8818_v0  ;;  %10598 = vst [vmem:[#allocation223_spill] sm:$0xff] %v8825_v14  ;;  %v4280_v11 = vmul.f32 %v8359_v3, %v8304_v50  ;;  %v8842_v2 = vmul.f32 %v8812_v17, %v8812_v17  ;;  %v3639_v5 = vand.u32 2147483647, %v8815_v29  ;;  %v4377_v35 = vadd.f32 0.008333333, %v4281_v28 }
 0x43a   : > { %10599 = vst [vmem:[#allocation224_spill] sm:$0xff] %v8827_v42  ;;  %10600 = vst [vmem:[#allocation225_spill] sm:$0xff] %v8829_v55  ;;  %v4471_v45 = vmul.f32 %v4375_v13, %v8352_v16  ;;  %v8846_v36 = vmin.f32 %v3640_v22, %v3736_v56  ;;  %v3650_v63 = vand.u32 2147483647, %v8818_v0  ;;  %v4374_v8 = vadd.f32 0.008333333, %v4278_v59 }
 0x43b   : > { %10601 = vst [vmem:[#allocation226_spill] sm:$0xff] %v8833_v10  ;;  %10602 = vst [vmem:[#allocation227_spill] sm:$0xff] %v8836_v43  ;;  %v4376_v34 = vadd.f32 0.008333333, %v4280_v11  ;;  %v8851_v41 = vmul.f32 %v8825_v14, %v8825_v14  ;;  %v3652_v3 = vand.u32 2147483647, %v8827_v42  ;;  %v4473_v9 = vmul.f32 %v4377_v35, %v8389_v52 }
 0x43c   : > { %10603 = vst [vmem:[#allocation228_spill] sm:$0xff] %v8842_v2  ;;  %10604 = vst [vmem:[#allocation229_spill] sm:$0xff] %v8846_v36  ;;  %v4567_v54 = vadd.f32 -0.16666667, %v4471_v45  ;;  %v10257_v32 = vand.u32 2147483647, %v8836_v43  ;;  %v4470_v22 = vmul.f32 %v4374_v8, %v8284_v62  ;;  %v8861_v19 = vadd.f32 %v3038_v7, %v10471_v61 }
 0x43d   : > { %10605 = vst [vmem:[#allocation230_spill] sm:$0xff] %v8851_v41  ;;  %v4472_v56 = vmul.f32 %v4376_v34, %v8304_v50  ;;  %v3735_v28 = vsub.f32 3.1415927, %v3639_v5  ;;  %v4569_v6 = vadd.f32 -0.16666667, %v4473_v9  ;;  %v8865_v59 = vmul.f32 %v8846_v36, %v8846_v36 }
 0x43e   : > { %v4663_v46 = vmul.f32 %v4567_v54, %v8352_v16  ;;  %v3746_v13 = vsub.f32 3.1415927, %v3650_v63  ;;  %v4566_v11 = vadd.f32 -0.16666667, %v4470_v22  ;;  %v4022_v35 = vmul.f32 2.7557319e-06, %v8851_v41 }
 0x43f   : > { %10606 = vst [vmem:[#allocation231_spill] sm:$0xff] %v8865_v59  ;;  %v4568_v45 = vadd.f32 -0.16666667, %v4472_v56  ;;  %v3748_v8 = vsub.f32 3.1415927, %v3652_v3  ;;  %v4665_v34 = vmul.f32 %v4569_v6, %v8389_v52  ;;  %v8876_v22 = vadd.f32 %v3111_v53, %v10471_v61 }
 0x440   : > { %v4759_v16 = vadd.f32 1.0, %v4663_v46  ;;  %v3737_v7 = vsub.f32 3.1415927, %v10257_v32  ;;  %v4662_v54 = vmul.f32 %v4566_v11, %v8284_v62  ;;  %v8878_v56 = vmin.f32 %v3639_v5, %v3735_v28 }
 0x441   : > { %v4664_v9 = vmul.f32 %v4568_v45, %v8304_v50  ;;  %v4761_v4 = vadd.f32 1.0, %v4665_v34  ;;  %v3171_v29 = vmul.f32 0.15915494, %v8861_v19  ;;  %v4024_v46 = vmul.f32 2.7557319e-06, %v8865_v59  ;;  %v3113_v45 = vpop.f32.mrf.mxu1 }
 0x442   : > { %10607 = vst [vmem:[#allocation232_spill] sm:$0xff] %v8878_v56  ;;  %v4855_v17 = vmul.f32 %v4759_v16, %v8329_v58  ;;  %v8883_v52 = vmin.f32 %v3650_v63, %v3746_v13  ;;  %v4758_v6 = vadd.f32 1.0, %v4662_v54  ;;  %v8885_v36 = vadd.f32 -0.0001984127, %v4022_v35 }
 0x443   : > { %v4760_v32 = vadd.f32 1.0, %v4664_v9  ;;  %v8887_v62 = vmin.f32 %v3652_v3, %v3748_v8  ;;  %v4857_v61 = vmul.f32 %v4761_v4, %v8361_v1  ;;  %v3173_v28 = vmul.f32 0.15915494, %v8876_v22 }
 0x444   : > { %10608 = vst [vmem:[#allocation233_spill] sm:$0xff] %v8883_v52  ;;  %10609 = vst [vmem:[#allocation234_spill] sm:$0xff] %v8885_v36  ;;  %v5047_v50 = vsub.f32 0.0, %v4855_v17  ;;  %v4854_v5 = vmul.f32 %v4758_v6, %v8260_v27  ;;  %v4075_v53 = vmul.f32 2.7557319e-06, %v8275_v44  ;;  %vm4953_vm8 = vcmp.lt.f32.partialorder %v8293_v40, 0.0  ;;  %v3040_v40 = vpop.f32.mrf.mxu0 }
 0x445   : > { %10610 = vst [vmem:[#allocation235_spill] sm:$0xff] %v8887_v62  ;;  %v4856_v58 = vmul.f32 %v4760_v32, %v8277_v21  ;;  %v5049_v13 = vsub.f32 0.0, %v4857_v61  ;;  %v3267_v11 = vadd.f32 0.5, %v3171_v29  ;;  %v8899_v3 = vmul.f32 %v8883_v52, %v8883_v52 }
 0x446   : > { %v5143_v63 = vsel %vm4951_vm5, %v5047_v50, %v4855_v17  ;;  %v5046_v1 = vsub.f32 0.0, %v4854_v5  ;;  %v4171_v4 = vadd.f32 -0.0001984127, %v4075_v53  ;;  %v8901_v21 = vadd.f32 -0.0001984127, %v4024_v46 }
 0x447   : > { %10611 = vst [vmem:[#allocation236_spill] sm:$0xff] %v8899_v3  ;;  %5176 = vmatprep.subr.mxu0 %v5143_v63  ;;  %v5048_v27 = vsub.f32 0.0, %v4856_v58  ;;  %v8905_v32 = vmul.f32 %v8887_v62, %v8887_v62  ;;  %v5145_v26 = vsel %vm4953_vm8, %v5049_v13, %v4857_v61  ;;  %v4077_v17 = vmul.f32 2.7557319e-06, %v8335_v51 }
 0x448   : > { %10612 = vst [vmem:[#allocation237_spill] sm:$0xff] %v8901_v21  ;;  %5247 = vmatprep.subr.mxu1 %v5145_v26  ;;  %v5142_v29 = vsel %vm4950_vm6, %v5046_v1, %v4854_v5  ;;  %v3269_v8 = vadd.f32 0.5, %v3173_v28  ;;  %v4267_v16 = vmul.f32 %v4171_v4, %v8275_v44  ;;  %v3363_v34 = vfloor.f32 %v3267_v11 }
 0x449   : > { %10613 = vst [vmem:[#allocation238_spill] sm:$0xff] %v8905_v32  ;;  %v5144_v35 = vsel %vm4952_vm7, %v5048_v27, %v4856_v58  ;;  %5177 = vmatpush1.msra.mxu0 %v5142_v29  ;;  %v4173_v54 = vadd.f32 -0.0001984127, %v4077_v17  ;;  %v4266_v9 = vmul.f32 %v8266_v20, %v8227_v48  ;;  %v4268_v46 = vmul.f32 %v8299_v18, %v8247_v37 }
 0x44a   : > { %5248 = vmatpush1.msra.mxu1 %v5144_v35  ;;  %v4034_v6 = vmul.f32 2.7557319e-06, %v8899_v3  ;;  %v4363_v60 = vadd.f32 0.008333333, %v4267_v16  ;;  %v8919_v50 = vadd.f32 %v3040_v40, %v10486_v57  ;;  %v8922_v12 = vadd.f32 %v3113_v45, %v10486_v57 }
 0x44b   : > { %v4036_v61 = vmul.f32 2.7557319e-06, %v8905_v32  ;;  %v4269_v5 = vmul.f32 %v4173_v54, %v8335_v51  ;;  %v4362_v58 = vadd.f32 0.008333333, %v4266_v9  ;;  %v4364_v28 = vadd.f32 0.008333333, %v4268_v46 }
 0x44c   : > { %v3365_v53 = vfloor.f32 %v3269_v8  ;;  %v4459_v20 = vmul.f32 %v4363_v60, %v8275_v44  ;;  %v3182_v18 = vmul.f32 0.15915494, %v8919_v50  ;;  %v3184_v63 = vmul.f32 0.15915494, %v8922_v12 }
 0x44d   : > { %v3459_v13 = vmul.f32 6.2831855, %v3363_v34  ;;  %v4365_v11 = vadd.f32 0.008333333, %v4269_v5  ;;  %v4458_v1 = vmul.f32 %v4362_v58, %v8227_v48  ;;  %v4460_v27 = vmul.f32 %v4364_v28, %v8247_v37  ;;  %v10617_v34 = vld [vmem:[#allocation88_spill] sm:$0xff] }
 0x44e   : > { %v10614_v4 = vand.u32 2147483647, %v8836_v43  ;;  %v4555_v17 = vadd.f32 -0.16666667, %v4459_v20  ;;  %v3278_v40 = vadd.f32 0.5, %v3182_v18  ;;  %vm4938_vm9 = vcmp.lt.f32.partialorder %v10617_v34, 0.0 }
 0x44f   : > { %v4063_v45 = vmul.f32 2.7557319e-06, %v8217_v30  ;;  %v8936_v29 = vadd.f32 -0.0001984127, %v4034_v6  ;;  %v4461_v35 = vmul.f32 %v4365_v11, %v8335_v51  ;;  %v4554_v8 = vadd.f32 -0.16666667, %v4458_v1 }
 0x450   : > { %v8933_v26 = vmin.f32 %v10614_v4, %v3737_v7  ;;  %v4556_v16 = vadd.f32 -0.16666667, %v4460_v27  ;;  %v3461_v54 = vmul.f32 6.2831855, %v3365_v53  ;;  %v4651_v9 = vmul.f32 %v4555_v17, %v8275_v44  ;;  %v10618_v28 = vld [vmem:[#allocation20_spill] sm:$0xff]  ;;  %v10634_v34 = vld [vmem:[#allocation19_spill] sm:$0xff] }
 0x451   : > { %10616 = vst [vmem:[#allocation240_spill] sm:$0xff] %v8936_v29  ;;  %v3280_v46 = vadd.f32 0.5, %v3184_v63  ;;  %v4159_v60 = vadd.f32 -0.0001984127, %v4063_v45  ;;  %v4557_v5 = vadd.f32 -0.16666667, %v4461_v35  ;;  %v4650_v7 = vmul.f32 %v4554_v8, %v8227_v48 }
 0x452   : > { %10615 = vst [vmem:[#allocation239_spill] sm:$0xff] %v8933_v26  ;;  %v4652_v58 = vmul.f32 %v4556_v16, %v8247_v37  ;;  %v4065_v20 = vmul.f32 2.7557319e-06, %v10618_v28  ;;  %v8945_v6 = vsub.f32 %v8861_v19, %v3459_v13  ;;  %v4747_v18 = vadd.f32 1.0, %v4651_v9  ;;  %v10620_v27 = vld [vmem:[#allocation96_spill] sm:$0xff]  ;;  %v10622_v37 = vld [vmem:[#allocation18_spill] sm:$0xff] }
 0x453   : > { %v3374_v11 = vfloor.f32 %v3278_v40  ;;  %v4255_v1 = vmul.f32 %v4159_v60, %v8217_v30  ;;  %vm4940_vm10 = vcmp.lt.f32.partialorder %v10620_v27, 0.0  ;;  %v4653_v44 = vmul.f32 %v4557_v5, %v8335_v51  ;;  %v10623_v13 = vld [vmem:[#allocation107_spill] sm:$0xff]  ;;  %v10624_v40 = vld [vmem:[#allocation108_spill] sm:$0xff] }
 0x454   : > { %10619 = vst [vmem:[#allocation88_spill] sm:$0xff] %v8945_v6  ;;  %v4746_v53 = vadd.f32 1.0, %v4650_v7  ;;  %v4748_v63 = vadd.f32 1.0, %v4652_v58  ;;  %v4161_v4 = vadd.f32 -0.0001984127, %v4065_v20  ;;  %v8951_v48 = vsub.f32 %v8876_v22, %v3461_v54  ;;  %v10627_v7 = vld [vmem:[#allocation103_spill] sm:$0xff] }
 0x455   : > { %v4843_v17 = vmul.f32 %v4747_v18, %v10622_v37  ;;  %v3376_v45 = vfloor.f32 %v3280_v46  ;;  %v4351_v35 = vadd.f32 0.008333333, %v4255_v1  ;;  %v4749_v19 = vadd.f32 1.0, %v4653_v44  ;;  %v10628_v46 = vld [vmem:[#allocation111_spill] sm:$0xff] }
 0x456   : > { %10621 = vst [vmem:[#allocation20_spill] sm:$0xff] %v8951_v48  ;;  %v4842_v8 = vmul.f32 %v4746_v53, %v10623_v13  ;;  %v4844_v16 = vmul.f32 %v4748_v63, %v10624_v40  ;;  %v4257_v9 = vmul.f32 %v4161_v4, %v10618_v28  ;;  %v8959_v51 = vmul.f32 %v8878_v56, %v8878_v56  ;;  %v10629_v40 = vld [vmem:[#allocation109_spill] sm:$0xff]  ;;  %v10633_v63 = vld [vmem:[#allocation102_spill] sm:$0xff]  ;;  %v10645_v43 = vld [vmem:[#allocation15_spill] sm:$0xff] }
 0x457   : > { %v3651_v60 = vand.u32 2147483647, %v8945_v6  ;;  %v5035_v5 = vsub.f32 0.0, %v4843_v17  ;;  %v3470_v22 = vmul.f32 6.2831855, %v3374_v11  ;;  %vm4939_vm11 = vcmp.lt.f32.partialorder %v10627_v7, 0.0 }
 0x458   : > { %10625 = vst [vmem:[#allocation96_spill] sm:$0xff] %v8959_v51  ;;  %v8962_v54 = vadd.f32 -0.0001984127, %v4036_v61  ;;  %v4845_v58 = vmul.f32 %v4749_v19, %v10628_v46  ;;  %v5034_v20 = vsub.f32 0.0, %v4842_v8  ;;  %v5036_v1 = vsub.f32 0.0, %v4844_v16  ;;  %v3042_v61 = vpop.f32.mrf.mxu0  ;;  %v10631_v7 = vld [vmem:[#allocation95_spill] sm:$0xff] }
 0x459   : > { %v5131_v18 = vsel %vm4939_vm11, %v5035_v5, %v4843_v17  ;;  %v3472_v44 = vmul.f32 6.2831855, %v3376_v45  ;;  %v4447_v53 = vmul.f32 %v4351_v35, %v8217_v30  ;;  %v4353_v11 = vadd.f32 0.008333333, %v4257_v9  ;;  %v3115_v45 = vpop.f32.mrf.mxu1  ;;  %v10632_v46 = vld [vmem:[#allocation21_spill] sm:$0xff]  ;;  %v10707_v51 = vld [vmem:[#allocation42_spill] sm:$0xff] }
 0x45a   : > { %10626 = vst [vmem:[#allocation18_spill] sm:$0xff] %v8962_v54  ;;  %5178 = vmatprep.subr.mxu0 %v5131_v18  ;;  %v5037_v4 = vsub.f32 0.0, %v4845_v58  ;;  %v5130_v37 = vsel %vm4938_vm9, %v5034_v20, %v4842_v8  ;;  %v3747_v13 = vsub.f32 3.1415927, %v3651_v60  ;;  %vm4941_vm12 = vcmp.lt.f32.partialorder %v10629_v40, 0.0 }
 0x45b   : > { %5179 = vmatpush1.msra.mxu0 %v5130_v37  ;;  %v8972_v19 = vsub.f32 %v8919_v50, %v3470_v22  ;;  %v4543_v17 = vadd.f32 -0.16666667, %v4447_v53  ;;  %v4449_v35 = vmul.f32 %v4353_v11, %v10618_v28  ;;  %v4254_v18 = vmul.f32 %v10632_v46, %v10631_v7  ;;  %v10640_v46 = vld [vmem:[#allocation86_spill] sm:$0xff] }
 0x45c   : > { %v5133_v5 = vsel %vm4941_vm12, %v5037_v4, %v4845_v58  ;;  %v4256_v8 = vmul.f32 %v10634_v34, %v10633_v63  ;;  %v5132_v9 = vsel %vm4940_vm10, %v5036_v1, %v4844_v16  ;;  %v8982_v20 = vsub.f32 %v8922_v12, %v3472_v44 }
 0x45d   : > { %10630 = vst [vmem:[#allocation107_spill] sm:$0xff] %v8972_v19  ;;  %5249 = vmatprep.subr.mxu1 %v5133_v5  ;;  %v4639_v50 = vmul.f32 %v4543_v17, %v8217_v30  ;;  %v8986_v22 = vadd.f32 %v3042_v61, %v10486_v57  ;;  %v4545_v58 = vadd.f32 -0.16666667, %v4449_v35  ;;  %v4350_v53 = vadd.f32 0.008333333, %v4254_v18 }
 0x45e   : > { %10635 = vst [vmem:[#allocation108_spill] sm:$0xff] %v8982_v20  ;;  %5250 = vmatpush1.msra.mxu1 %v5132_v9  ;;  %v4352_v4 = vadd.f32 0.008333333, %v4256_v8  ;;  %v8989_v37 = vadd.f32 %v3115_v45, %v10486_v57  ;;  %v8993_v11 = vmul.f32 %v8933_v26, %v8933_v26  ;;  %v10637_v27 = vand.u32 2147483647, %v8951_v48  ;;  %v10639_v45 = vld [vmem:[#allocation106_spill] sm:$0xff] }
 0x45f   : > { %v3662_v30 = vand.u32 2147483647, %v8972_v19  ;;  %v4735_v16 = vadd.f32 1.0, %v4639_v50  ;;  %v4641_v1 = vmul.f32 %v4545_v58, %v10618_v28  ;;  %v4446_v44 = vmul.f32 %v4350_v53, %v10631_v7  ;;  %v10641_v28 = vld [vmem:[#allocation72_spill] sm:$0xff]  ;;  %v10643_v53 = vld [vmem:[#allocation23_spill] sm:$0xff] }
 0x460   : > { %10636 = vst [vmem:[#allocation103_spill] sm:$0xff] %v8993_v11  ;;  %v8997_v12 = vsub.f32 3.1415927, %v10637_v27  ;;  %v4448_v61 = vmul.f32 %v4352_v4, %v10633_v63  ;;  %v3183_v57 = vmul.f32 0.15915494, %v8986_v22  ;;  %v9004_v40 = vmin.f32 %v3651_v60, %v3747_v13  ;;  %v10642_v9 = vld [vmem:[#allocation76_spill] sm:$0xff] }
 0x461   : > { %v3664_v17 = vand.u32 2147483647, %v8982_v20  ;;  %v4831_v5 = vmul.f32 %v4735_v16, %v10639_v45  ;;  %v3185_v35 = vmul.f32 0.15915494, %v8989_v37  ;;  %vm4927_vm13 = vcmp.lt.f32.partialorder %v10640_v46, 0.0  ;;  %v10644_v13 = vld [vmem:[#allocation17_spill] sm:$0xff] }
 0x462   : > { %10638 = vst [vmem:[#allocation111_spill] sm:$0xff] %v9004_v40  ;;  %v4737_v18 = vadd.f32 1.0, %v4641_v1  ;;  %v4542_v34 = vadd.f32 -0.16666667, %v4446_v44  ;;  %v4544_v8 = vadd.f32 -0.16666667, %v4448_v61 }
 0x463   : > { %vm4926_vm14 = vcmp.lt.f32.partialorder %v10641_v28, 0.0  ;;  %vm4928_vm15 = vcmp.lt.f32.partialorder %v10642_v9, 0.0  ;;  %v5023_v50 = vsub.f32 0.0, %v4831_v5  ;;  %v3279_v58 = vadd.f32 0.5, %v3183_v57  ;;  %v10735_v20 = vld [vmem:[#allocation54_spill] sm:$0xff] }
 0x464   : > { %v4051_v60 = vmul.f32 2.7557319e-06, %v10643_v53  ;;  %v4053_v4 = vmul.f32 2.7557319e-06, %v10644_v13  ;;  %v3758_v27 = vsub.f32 3.1415927, %v3662_v30  ;;  %v4833_v16 = vmul.f32 %v4737_v18, %v10645_v43 }
 0x465   : > { %v4638_v45 = vmul.f32 %v4542_v34, %v10631_v7  ;;  %v4640_v46 = vmul.f32 %v4544_v8, %v10633_v63  ;;  %v5119_v1 = vsel %vm4927_vm13, %v5023_v50, %v4831_v5  ;;  %v3281_v44 = vadd.f32 0.5, %v3185_v35  ;;  %v10648_v63 = vld [vmem:[#allocation90_spill] sm:$0xff] }
 0x466   : > { %v4147_v61 = vadd.f32 -0.0001984127, %v4051_v60  ;;  %v4149_v26 = vadd.f32 -0.0001984127, %v4053_v4  ;;  %v3760_v56 = vsub.f32 3.1415927, %v3664_v17  ;;  %5180 = vmatprep.subr.mxu0 %v5119_v1  ;;  %v3375_v2 = vfloor.f32 %v3279_v58 }
 0x467   : > { %v5025_v55 = vsub.f32 0.0, %v4833_v16  ;;  %v4734_v14 = vadd.f32 1.0, %v4638_v45  ;;  %v4736_v57 = vadd.f32 1.0, %v4640_v46  ;;  %vm4929_vm1 = vcmp.lt.f32.partialorder %v10646_v31, 0.0  ;;  %v10649_v35 = vld [vmem:[#allocation94_spill] sm:$0xff]  ;;  %v10650_v4 = vld [vmem:[#allocation89_spill] sm:$0xff] }
 0x468   : > { %v4243_v10 = vmul.f32 %v4147_v61, %v10643_v53  ;;  %v4245_v43 = vmul.f32 %v4149_v26, %v10644_v13  ;;  %v9020_v18 = vmin.f32 %v3662_v30, %v3758_v27  ;;  %v3377_v8 = vfloor.f32 %v3281_v44  ;;  %v10651_v45 = vld [vmem:[#allocation104_spill] sm:$0xff]  ;;  %v10654_v26 = vld [vmem:[#allocation105_spill] sm:$0xff]  ;;  %v3119_v44 = vpop.f32.mrf.mxu1 }
 0x469   : > { %v5121_v7 = vsel %vm4929_vm1, %v5025_v55, %v4833_v16  ;;  %v4830_v5 = vmul.f32 %v4734_v14, %v10648_v63  ;;  %v4832_v34 = vmul.f32 %v4736_v57, %v10649_v35  ;;  %v4242_v46 = vmul.f32 %v10651_v45, %v10650_v4  ;;  %v10653_v61 = vld [vmem:[#allocation92_spill] sm:$0xff]  ;;  %v3046_v57 = vpop.f32.mrf.mxu0 }
 0x46a   : > { %10647 = vst [vmem:[#allocation109_spill] sm:$0xff] %v9020_v18  ;;  %5251 = vmatprep.subr.mxu1 %v5121_v7  ;;  %v4339_v50 = vadd.f32 0.008333333, %v4243_v10  ;;  %v4341_v60 = vadd.f32 0.008333333, %v4245_v43  ;;  %v9026_v31 = vmin.f32 %v3664_v17, %v3760_v56  ;;  %v4244_v30 = vmul.f32 %v10654_v26, %v10653_v61 }
 0x46b   : > { %v5022_v58 = vsub.f32 0.0, %v4830_v5  ;;  %v5024_v1 = vsub.f32 0.0, %v4832_v34  ;;  %v3471_v27 = vmul.f32 6.2831855, %v3375_v2  ;;  %v4338_v16 = vadd.f32 0.008333333, %v4242_v46 }
 0x46c   : > { %10652 = vst [vmem:[#allocation95_spill] sm:$0xff] %v9026_v31  ;;  %v4435_v55 = vmul.f32 %v4339_v50, %v10643_v53  ;;  %v4437_v14 = vmul.f32 %v4341_v60, %v10644_v13  ;;  %v9034_v10 = vmul.f32 %v9020_v18, %v9020_v18  ;;  %v4340_v43 = vadd.f32 0.008333333, %v4244_v30  ;;  %v10656_v50 = vld [vmem:[#allocation80_spill] sm:$0xff]  ;;  %v10657_v60 = vld [vmem:[#allocation81_spill] sm:$0xff]  ;;  %v10658_v46 = vld [vmem:[#allocation14_spill] sm:$0xff] }
 0x46d   : > { %v5118_v56 = vsel %vm4926_vm14, %v5022_v58, %v4830_v5  ;;  %v5120_v17 = vsel %vm4928_vm15, %v5024_v1, %v4832_v34  ;;  %v3473_v2 = vmul.f32 6.2831855, %v3377_v8  ;;  %v4434_v35 = vmul.f32 %v4338_v16, %v10650_v4  ;;  %v10660_v1 = vld [vmem:[#allocation68_spill] sm:$0xff]  ;;  %v10662_v16 = vld [vmem:[#allocation69_spill] sm:$0xff]  ;;  %v10711_v18 = vld [vmem:[#allocation59_spill] sm:$0xff] }
 0x46e   : > { %10655 = vst [vmem:[#allocation21_spill] sm:$0xff] %v9034_v10  ;;  %5181 = vmatpush1.msra.mxu0 %v5118_v56  ;;  %5252 = vmatpush1.msra.mxu1 %v5120_v17  ;;  %v4531_v7 = vadd.f32 -0.16666667, %v4435_v55  ;;  %v4533_v63 = vadd.f32 -0.16666667, %v4437_v14  ;;  %vm4915_vm2 = vcmp.lt.f32.partialorder %v10656_v50, 0.0  ;;  %v4436_v45 = vmul.f32 %v4340_v43, %v10653_v61 }
 0x46f   : > { %vm4917_vm3 = vcmp.lt.f32.partialorder %v10657_v60, 0.0  ;;  %v3047_v28 = vadd.f32 %v3046_v57, %v10658_v46  ;;  %v3120_v5 = vadd.f32 %v3119_v44, %v10658_v46  ;;  %v9047_v9 = vsub.f32 %v8986_v22, %v3471_v27  ;;  %v10664_v17 = vld [vmem:[#allocation87_spill] sm:$0xff] }
 0x470   : > { %v4627_v34 = vmul.f32 %v4531_v7, %v10643_v53  ;;  %v4629_v8 = vmul.f32 %v4533_v63, %v10644_v13  ;;  %v4530_v58 = vadd.f32 -0.16666667, %v4434_v35  ;;  %vm4914_vm4 = vcmp.lt.f32.partialorder %v10660_v1, 0.0  ;;  %v10665_v63 = vld [vmem:[#allocation100_spill] sm:$0xff]  ;;  %v10674_v60 = vld [vmem:[#allocation91_spill] sm:$0xff] }
 0x471   : > { %10659 = vst [vmem:[#allocation102_spill] sm:$0xff] %v9047_v9  ;;  %v9054_v26 = vmul.f32 %v9026_v31, %v9026_v31  ;;  %v4532_v30 = vadd.f32 -0.16666667, %v4436_v45  ;;  %v3194_v55 = vmul.f32 0.15915494, %v3047_v28  ;;  %vm4916_vm5 = vcmp.lt.f32.partialorder %v10662_v16, 0.0 }
 0x472   : > { %v3196_v14 = vmul.f32 0.15915494, %v3120_v5  ;;  %v9058_v57 = vsub.f32 %v8989_v37, %v3473_v2  ;;  %v4723_v22 = vadd.f32 1.0, %v4627_v34  ;;  %v4725_v27 = vadd.f32 1.0, %v4629_v8  ;;  %v10666_v45 = vld [vmem:[#allocation101_spill] sm:$0xff]  ;;  %v10709_v31 = vld [vmem:[#allocation44_spill] sm:$0xff] }
 0x473   : > { %10661 = vst [vmem:[#allocation19_spill] sm:$0xff] %v9054_v26  ;;  %v4626_v53 = vmul.f32 %v4530_v58, %v10650_v4  ;;  %v4628_v13 = vmul.f32 %v4532_v30, %v10653_v61  ;;  %v3290_v44 = vadd.f32 0.5, %v3194_v55  ;;  %v4039_v43 = vmul.f32 2.7557319e-06, %v10664_v17  ;;  %v10667_v4 = vld [vmem:[#allocation83_spill] sm:$0xff]  ;;  %v10668_v61 = vld [vmem:[#allocation97_spill] sm:$0xff] }
 0x474   : > { %10663 = vst [vmem:[#allocation106_spill] sm:$0xff] %v9058_v57  ;;  %v3292_v56 = vadd.f32 0.5, %v3196_v14  ;;  %v3663_v7 = vand.u32 2147483647, %v9047_v9  ;;  %v4819_v35 = vmul.f32 %v4723_v22, %v10665_v63  ;;  %v4821_v62 = vmul.f32 %v4725_v27, %v10666_v45  ;;  %v10669_v14 = vld [vmem:[#allocation85_spill] sm:$0xff] }
 0x475   : > { %v4722_v21 = vadd.f32 1.0, %v4626_v53  ;;  %v4724_v59 = vadd.f32 1.0, %v4628_v13  ;;  %v3386_v37 = vfloor.f32 %v3290_v44  ;;  %v4135_v34 = vadd.f32 -0.0001984127, %v4039_v43 }
 0x476   : > { %v3388_v2 = vfloor.f32 %v3292_v56  ;;  %v5011_v8 = vsub.f32 0.0, %v4819_v35  ;;  %v5013_v52 = vsub.f32 0.0, %v4821_v62  ;;  %v4041_v30 = vmul.f32 2.7557319e-06, %v10668_v61 }
 0x477   : > { %v4818_v58 = vmul.f32 %v4722_v21, %v10667_v4  ;;  %v3665_v55 = vand.u32 2147483647, %v9058_v57  ;;  %v4820_v36 = vmul.f32 %v4724_v59, %v10669_v14  ;;  %v3482_v41 = vmul.f32 6.2831855, %v3386_v37  ;;  %v3048_v37 = vpop.f32.mrf.mxu0  ;;  %v3121_v4 = vpop.f32.mrf.mxu1  ;;  %v10708_v57 = vld [vmem:[#allocation55_spill] sm:$0xff] }
 0x478   : > { %v4231_v22 = vmul.f32 %v4135_v34, %v10664_v17  ;;  %v5107_v27 = vsel %vm4915_vm2, %v5011_v8, %v4819_v35  ;;  %v5109_v53 = vsel %vm4917_vm3, %v5013_v52, %v4821_v62  ;;  %v4137_v44 = vadd.f32 -0.0001984127, %v4041_v30  ;;  %v10673_v62 = vld [vmem:[#allocation75_spill] sm:$0xff] }
 0x479   : > { %v5010_v13 = vsub.f32 0.0, %v4818_v58  ;;  %v10670_v21 = vand.u32 2147483647, %v8951_v48  ;;  %5182 = vmatprep.subr.mxu0 %v5107_v27  ;;  %5253 = vmatprep.subr.mxu1 %v5109_v53  ;;  %v5012_v43 = vsub.f32 0.0, %v4820_v36  ;;  %v3484_v59 = vmul.f32 6.2831855, %v3388_v2 }
 0x47a   : > { %v4327_v63 = vadd.f32 0.008333333, %v4231_v22  ;;  %v9082_v45 = vmul.f32 %v9004_v40, %v9004_v40  ;;  %v4233_v52 = vmul.f32 %v4137_v44, %v10668_v61  ;;  %v4230_v35 = vmul.f32 %v10674_v60, %v10673_v62  ;;  %v10677_v53 = vld [vmem:[#allocation78_spill] sm:$0xff] }
 0x47b   : > { %v9078_v56 = vmin.f32 %v10670_v21, %v8997_v12  ;;  %v5106_v50 = vsel %vm4914_vm4, %v5010_v13, %v4818_v58  ;;  %v4046_v12 = vmul.f32 2.7557319e-06, %v9034_v10  ;;  %v4048_v34 = vmul.f32 2.7557319e-06, %v9054_v26  ;;  %v10678_v13 = vld [vmem:[#allocation99_spill] sm:$0xff] }
 0x47c   : > { %10672 = vst [vmem:[#allocation72_spill] sm:$0xff] %v9082_v45  ;;  %5183 = vmatpush1.msra.mxu0 %v5106_v50  ;;  %v5108_v2 = vsel %vm4916_vm5, %v5012_v43, %v4820_v36  ;;  %v9093_v8 = vsub.f32 %v3047_v28, %v3482_v41  ;;  %v3759_v30 = vsub.f32 3.1415927, %v3663_v7  ;;  %v4423_v1 = vmul.f32 %v4327_v63, %v10664_v17  ;;  %v10744_v45 = vld [vmem:[#allocation60_spill] sm:$0xff] }
 0x47d   : > { %10671 = vst [vmem:[#allocation86_spill] sm:$0xff] %v9078_v56  ;;  %5254 = vmatpush1.msra.mxu1 %v5108_v2  ;;  %v4329_v58 = vadd.f32 0.008333333, %v4233_v52  ;;  %v4326_v14 = vadd.f32 0.008333333, %v4230_v35  ;;  %v9096_v27 = vsub.f32 %v3120_v5, %v3484_v59  ;;  %v4232_v44 = vmul.f32 %v10678_v13, %v10677_v53 }
 0x47e   : > { %10675 = vst [vmem:[#allocation76_spill] sm:$0xff] %v9093_v8  ;;  %v3761_v22 = vsub.f32 3.1415927, %v3665_v55  ;;  %v9101_v21 = vadd.f32 %v3048_v37, %v10658_v46  ;;  %v4519_v16 = vadd.f32 -0.16666667, %v4423_v1  ;;  %v9106_v28 = vadd.f32 %v3121_v4, %v10658_v46  ;;  %v10680_v37 = vld [vmem:[#allocation56_spill] sm:$0xff] }
 0x47f   : > { %10676 = vst [vmem:[#allocation23_spill] sm:$0xff] %v9096_v27  ;;  %v4425_v36 = vmul.f32 %v4329_v58, %v10668_v61  ;;  %v4422_v41 = vmul.f32 %v4326_v14, %v10673_v62  ;;  %v9110_v43 = vmul.f32 %v9078_v56, %v9078_v56  ;;  %v3674_v5 = vand.u32 2147483647, %v9093_v8 }
 0x480   : > { %v4328_v59 = vadd.f32 0.008333333, %v4232_v44  ;;  %v3195_v63 = vmul.f32 0.15915494, %v9101_v21  ;;  %v4615_v50 = vmul.f32 %v4519_v16, %v10664_v17  ;;  %v3197_v35 = vmul.f32 0.15915494, %v9106_v28 }
 0x481   : > { %10679 = vst [vmem:[#allocation17_spill] sm:$0xff] %v9110_v43  ;;  %v4521_v52 = vadd.f32 -0.16666667, %v4425_v36  ;;  %v4518_v60 = vadd.f32 -0.16666667, %v4422_v41  ;;  %vm4902_vm6 = vcmp.lt.f32.partialorder %v10680_v37, 0.0  ;;  %v9119_v46 = vmin.f32 %v3663_v7, %v3759_v30  ;;  %v3123_v37 = vpop.f32.mrf.mxu1 }
 0x482   : > { %v9117_v2 = vadd.f32 -0.0001984127, %v4046_v12  ;;  %v3676_v4 = vand.u32 2147483647, %v9096_v27  ;;  %v4424_v1 = vmul.f32 %v4328_v59, %v10677_v53  ;;  %v4711_v58 = vadd.f32 1.0, %v4615_v50  ;;  %v10685_v12 = vld [vmem:[#allocation58_spill] sm:$0xff] }
 0x483   : > { %10682 = vst [vmem:[#allocation98_spill] sm:$0xff] %v9119_v46  ;;  %v4617_v14 = vmul.f32 %v4521_v52, %v10668_v61  ;;  %v4614_v13 = vmul.f32 %v4518_v60, %v10673_v62  ;;  %v3291_v17 = vadd.f32 0.5, %v3195_v63  ;;  %v9125_v44 = vadd.f32 -0.0001984127, %v4048_v34  ;;  %v10686_v7 = vld [vmem:[#allocation79_spill] sm:$0xff]  ;;  %v10688_v62 = vld [vmem:[#allocation62_spill] sm:$0xff] }
 0x484   : > { %10681 = vst [vmem:[#allocation15_spill] sm:$0xff] %v9117_v2  ;;  %v9127_v16 = vmin.f32 %v3665_v55, %v3761_v22  ;;  %v3770_v36 = vsub.f32 3.1415927, %v3674_v5  ;;  %v4520_v41 = vadd.f32 -0.16666667, %v4424_v1  ;;  %vm4904_vm7 = vcmp.lt.f32.partialorder %v10685_v12, 0.0 }
 0x485   : > { %10683 = vst [vmem:[#allocation90_spill] sm:$0xff] %v9125_v44  ;;  %v4807_v30 = vmul.f32 %v4711_v58, %v10686_v7  ;;  %v4713_v48 = vadd.f32 1.0, %v4617_v14  ;;  %v4710_v56 = vadd.f32 1.0, %v4614_v13  ;;  %v3293_v40 = vadd.f32 0.5, %v3197_v35  ;;  %v10689_v22 = vld [vmem:[#allocation84_spill] sm:$0xff]  ;;  %v10690_v50 = vld [vmem:[#allocation71_spill] sm:$0xff] }
 0x486   : > { %10684 = vst [vmem:[#allocation94_spill] sm:$0xff] %v9127_v16  ;;  %v9133_v59 = vmul.f32 %v9119_v46, %v9119_v46  ;;  %v3772_v61 = vsub.f32 3.1415927, %v3676_v4  ;;  %vm4903_vm8 = vcmp.lt.f32.partialorder %v10688_v62, 0.0  ;;  %v4616_v34 = vmul.f32 %v4520_v41, %v10677_v53  ;;  %v10692_v58 = vld [vmem:[#allocation66_spill] sm:$0xff]  ;;  %v10695_v53 = vld [vmem:[#allocation73_spill] sm:$0xff] }
 0x487   : > { %v4999_v55 = vsub.f32 0.0, %v4807_v30  ;;  %v4809_v63 = vmul.f32 %v4713_v48, %v10689_v22  ;;  %v4806_v52 = vmul.f32 %v4710_v56, %v10690_v50  ;;  %v3387_v60 = vfloor.f32 %v3291_v17  ;;  %v10693_v14 = vld [vmem:[#allocation70_spill] sm:$0xff]  ;;  %v10696_v22 = vld [vmem:[#allocation93_spill] sm:$0xff]  ;;  %v3050_v17 = vpop.f32.mrf.mxu0 }
 0x488   : > { %10687 = vst [vmem:[#allocation89_spill] sm:$0xff] %v9133_v59  ;;  %v9139_v1 = vmin.f32 %v3674_v5, %v3770_v36  ;;  %vm4905_vm9 = vcmp.lt.f32.partialorder %v10692_v58, 0.0  ;;  %v4712_v35 = vadd.f32 1.0, %v4616_v34  ;;  %v4027_v13 = vmul.f32 2.7557319e-06, %v10693_v14  ;;  %v10699_v58 = vld [vmem:[#allocation65_spill] sm:$0xff] }
 0x489   : > { %v5095_v7 = vsel %vm4903_vm8, %v4999_v55, %v4807_v30  ;;  %v5001_v6 = vsub.f32 0.0, %v4809_v63  ;;  %v4998_v11 = vsub.f32 0.0, %v4806_v52  ;;  %v3389_v42 = vfloor.f32 %v3293_v40 }
 0x48a   : > { %10691 = vst [vmem:[#allocation104_spill] sm:$0xff] %v9139_v1  ;;  %v9143_v62 = vmin.f32 %v3676_v4, %v3772_v61  ;;  %5184 = vmatprep.subr.mxu0 %v5095_v7  ;;  %v4808_v41 = vmul.f32 %v4712_v35, %v10695_v53  ;;  %v4123_v48 = vadd.f32 -0.0001984127, %v4027_v13  ;;  %v4029_v56 = vmul.f32 2.7557319e-06, %v10696_v22  ;;  %v10700_v35 = vld [vmem:[#allocation74_spill] sm:$0xff] }
 0x48b   : > { %v9149_v5 = vmul.f32 %v9127_v16, %v9127_v16  ;;  %v5097_v36 = vsel %vm4905_vm9, %v5001_v6, %v4809_v63  ;;  %v5094_v30 = vsel %vm4902_vm6, %v4998_v11, %v4806_v52  ;;  %v3483_v34 = vmul.f32 6.2831855, %v3387_v60  ;;  %v10701_v7 = vld [vmem:[#allocation67_spill] sm:$0xff]  ;;  %v10702_v6 = vld [vmem:[#allocation77_spill] sm:$0xff] }
 0x48c   : > { %10694 = vst [vmem:[#allocation92_spill] sm:$0xff] %v9143_v62  ;;  %v9155_v40 = vmul.f32 %v9139_v1, %v9139_v1  ;;  %5255 = vmatprep.subr.mxu1 %v5097_v36  ;;  %5185 = vmatpush1.msra.mxu0 %v5094_v30  ;;  %v5000_v4 = vsub.f32 0.0, %v4808_v41  ;;  %v4219_v61 = vmul.f32 %v4123_v48, %v10693_v14  ;;  %v4125_v55 = vadd.f32 -0.0001984127, %v4029_v56 }
 0x48d   : > { %10697 = vst [vmem:[#allocation105_spill] sm:$0xff] %v9149_v5  ;;  %v3485_v50 = vmul.f32 6.2831855, %v3389_v42  ;;  %v4218_v13 = vmul.f32 %v10700_v35, %v10699_v58  ;;  %v4220_v63 = vmul.f32 %v10702_v6, %v10701_v7  ;;  %v3051_v11 = vadd.f32 %v3050_v17, %v10510_v23 }
 0x48e   : > { %10698 = vst [vmem:[#allocation80_spill] sm:$0xff] %v9155_v40  ;;  %v9165_v52 = vmul.f32 %v9143_v62, %v9143_v62  ;;  %v5096_v60 = vsel %vm4904_vm7, %v5000_v4, %v4808_v41  ;;  %v4315_v53 = vadd.f32 0.008333333, %v4219_v61  ;;  %v4221_v48 = vmul.f32 %v4125_v55, %v10696_v22  ;;  %v10752_v62 = vld [vmem:[#allocation49_spill] sm:$0xff] }
 0x48f   : > { %5256 = vmatpush1.msra.mxu1 %v5096_v60  ;;  %v9171_v42 = vsub.f32 %v9101_v21, %v3483_v34  ;;  %v4314_v56 = vadd.f32 0.008333333, %v4218_v13  ;;  %v4316_v36 = vadd.f32 0.008333333, %v4220_v63  ;;  %v3206_v30 = vmul.f32 0.15915494, %v3051_v11 }
 0x490   : > { %10703 = vst [vmem:[#allocation81_spill] sm:$0xff] %v9165_v52  ;;  %v4058_v17 = vmul.f32 2.7557319e-06, %v9155_v40  ;;  %v4411_v35 = vmul.f32 %v4315_v53, %v10693_v14  ;;  %v4317_v6 = vadd.f32 0.008333333, %v4221_v48  ;;  %v9176_v0 = vadd.f32 %v3123_v37, %v10510_v23  ;;  %v10706_v13 = vld [vmem:[#allocation46_spill] sm:$0xff] }
 0x491   : > { %10704 = vst [vmem:[#allocation14_spill] sm:$0xff] %v9171_v42  ;;  %v9179_v12 = vsub.f32 %v9106_v28, %v3485_v50  ;;  %v4410_v41 = vmul.f32 %v4314_v56, %v10699_v58  ;;  %v4412_v4 = vmul.f32 %v4316_v36, %v10701_v7  ;;  %v3302_v21 = vadd.f32 0.5, %v3206_v30 }
 0x492   : > { %v4507_v34 = vadd.f32 -0.16666667, %v4411_v35  ;;  %v4413_v61 = vmul.f32 %v4317_v6, %v10696_v22  ;;  %v3208_v55 = vmul.f32 0.15915494, %v9176_v0  ;;  %v4015_v63 = vmul.f32 2.7557319e-06, %v10706_v13 }
 0x493   : > { %10705 = vst [vmem:[#allocation68_spill] sm:$0xff] %v9179_v12  ;;  %v3675_v60 = vand.u32 2147483647, %v9171_v42  ;;  %v4506_v53 = vadd.f32 -0.16666667, %v4410_v41  ;;  %v3398_v48 = vfloor.f32 %v3302_v21  ;;  %vm4890_vm10 = vcmp.lt.f32.partialorder %v10707_v51, 0.0 }
 0x494   : > { %v4508_v37 = vadd.f32 -0.16666667, %v4412_v4  ;;  %v4603_v28 = vmul.f32 %v4507_v34, %v10693_v14  ;;  %v4509_v50 = vadd.f32 -0.16666667, %v4413_v61  ;;  %v3304_v56 = vadd.f32 0.5, %v3208_v55 }
 0x495   : > { %v4111_v36 = vadd.f32 -0.0001984127, %v4015_v63  ;;  %v3677_v30 = vand.u32 2147483647, %v9179_v12  ;;  %v4602_v35 = vmul.f32 %v4506_v53, %v10699_v58  ;;  %v4017_v16 = vmul.f32 2.7557319e-06, %v10708_v57 }
 0x496   : > { %v4604_v6 = vmul.f32 %v4508_v37, %v10701_v7  ;;  %vm4892_vm11 = vcmp.lt.f32.partialorder %v10709_v31, 0.0  ;;  %v4699_v41 = vadd.f32 1.0, %v4603_v28  ;;  %v4605_v4 = vmul.f32 %v4509_v50, %v10696_v22  ;;  %v10710_v63 = vld [vmem:[#allocation63_spill] sm:$0xff]  ;;  %v10712_v28 = vld [vmem:[#allocation61_spill] sm:$0xff] }
 0x497   : > { %v3494_v21 = vmul.f32 6.2831855, %v3398_v48  ;;  %v4207_v46 = vmul.f32 %v4111_v36, %v10706_v13  ;;  %v4060_v14 = vmul.f32 2.7557319e-06, %v9165_v52  ;;  %v4698_v34 = vadd.f32 1.0, %v4602_v35  ;;  %v10713_v48 = vld [vmem:[#allocation82_spill] sm:$0xff] }
 0x498   : > { %v4700_v61 = vadd.f32 1.0, %v4604_v6  ;;  %v4113_v55 = vadd.f32 -0.0001984127, %v4017_v16  ;;  %v4795_v54 = vmul.f32 %v4699_v41, %v10710_v63  ;;  %v4701_v58 = vadd.f32 1.0, %v4605_v4  ;;  %v10715_v6 = vld [vmem:[#allocation47_spill] sm:$0xff]  ;;  %v10770_v52 = vld [vmem:[#allocation188_spill] sm:$0xff] }
 0x499   : > { %v3400_v53 = vfloor.f32 %v3304_v56  ;;  %v4303_v7 = vadd.f32 0.008333333, %v4207_v46  ;;  %v3771_v37 = vsub.f32 3.1415927, %v3675_v60  ;;  %v3773_v32 = vsub.f32 3.1415927, %v3677_v30 }
 0x49a   : > { %v4794_v29 = vmul.f32 %v4698_v34, %v10711_v18  ;;  %v4796_v3 = vmul.f32 %v4700_v61, %v10712_v28  ;;  %v4987_v22 = vsub.f32 0.0, %v4795_v54  ;;  %v4797_v50 = vmul.f32 %v4701_v58, %v10713_v48  ;;  %v10718_v61 = vld [vmem:[#allocation64_spill] sm:$0xff]  ;;  %v3052_v58 = vpop.f32.mrf.mxu0 }
 0x49b   : > { %v9201_v36 = vsub.f32 %v3051_v11, %v3494_v21  ;;  %v4399_v35 = vmul.f32 %v4303_v7, %v10706_v13  ;;  %vm4891_vm12 = vcmp.lt.f32.partialorder %v10715_v6, 0.0  ;;  %v4209_v56 = vmul.f32 %v4113_v55, %v10708_v57  ;;  %v3125_v7 = vpop.f32.mrf.mxu1 }
 0x49c   : > { %v4986_v16 = vsub.f32 0.0, %v4794_v29  ;;  %v4988_v41 = vsub.f32 0.0, %v4796_v3  ;;  %v9206_v46 = vadd.f32 -0.0001984127, %v4058_v17  ;;  %v5083_v4 = vsel %vm4891_vm12, %v4987_v22, %v4795_v54  ;;  %v10723_v22 = vld [vmem:[#allocation52_spill] sm:$0xff] }
 0x49d   : > { %10714 = vst [vmem:[#allocation69_spill] sm:$0xff] %v9201_v36  ;;  %v4989_v63 = vsub.f32 0.0, %v4797_v50  ;;  %v3496_v18 = vmul.f32 6.2831855, %v3400_v53  ;;  %v9208_v34 = vmin.f32 %v3675_v60, %v3771_v37  ;;  %5186 = vmatprep.subr.mxu0 %v5083_v4  ;;  %vm4893_vm13 = vcmp.lt.f32.partialorder %v10718_v61, 0.0  ;;  %v10720_v53 = vld [vmem:[#allocation37_spill] sm:$0xff] }
 0x49e   : > { %10716 = vst [vmem:[#allocation87_spill] sm:$0xff] %v9206_v46  ;;  %v5082_v11 = vsel %vm4890_vm10, %v4986_v16, %v4794_v29  ;;  %v4495_v21 = vadd.f32 -0.16666667, %v4399_v35  ;;  %v9213_v28 = vmin.f32 %v3677_v30, %v3773_v32  ;;  %v3686_v17 = vand.u32 2147483647, %v9201_v36  ;;  %v10721_v37 = vld [vmem:[#allocation50_spill] sm:$0xff] }
 0x49f   : > { %10717 = vst [vmem:[#allocation100_spill] sm:$0xff] %v9208_v34  ;;  %v5085_v48 = vsel %vm4893_vm13, %v4989_v63, %v4797_v50  ;;  %5187 = vmatpush1.msra.mxu0 %v5082_v11  ;;  %v4305_v54 = vadd.f32 0.008333333, %v4209_v56  ;;  %v5084_v60 = vsel %vm4892_vm11, %v4988_v41, %v4796_v3  ;;  %v4206_v51 = vmul.f32 %v10721_v37, %v10720_v53  ;;  %v10722_v29 = vld [vmem:[#allocation39_spill] sm:$0xff]  ;;  %v10771_v46 = vld [vmem:[#allocation202_spill] sm:$0xff] }
 0x4a0   : > { %10719 = vst [vmem:[#allocation101_spill] sm:$0xff] %v9213_v28  ;;  %5257 = vmatprep.subr.mxu1 %v5085_v48  ;;  %v4591_v55 = vmul.f32 %v4495_v21, %v10706_v13  ;;  %v4208_v35 = vmul.f32 %v10723_v22, %v10722_v29  ;;  %v9224_v32 = vsub.f32 %v9176_v0, %v3496_v18  ;;  %v9231_v3 = vadd.f32 -0.0001984127, %v4060_v14  ;;  %v10728_v18 = vld [vmem:[#allocation40_spill] sm:$0xff]  ;;  %v10731_v22 = vld [vmem:[#allocation29_spill] sm:$0xff] }
 0x4a1   : > { %5258 = vmatpush1.msra.mxu1 %v5084_v60  ;;  %v4401_v30 = vmul.f32 %v4305_v54, %v10708_v57  ;;  %v3053_v50 = vadd.f32 %v3052_v58, %v10510_v23  ;;  %v9229_v6 = vadd.f32 %v3125_v7, %v10510_v23  ;;  %v9235_v31 = vmul.f32 %v9208_v34, %v9208_v34 }
 0x4a2   : > { %10724 = vst [vmem:[#allocation83_spill] sm:$0xff] %v9224_v32  ;;  %10725 = vst [vmem:[#allocation97_spill] sm:$0xff] %v9231_v3  ;;  %v4687_v13 = vadd.f32 1.0, %v4591_v55  ;;  %v4302_v16 = vadd.f32 0.008333333, %v4206_v51  ;;  %v9239_v41 = vmul.f32 %v9213_v28, %v9213_v28  ;;  %v10729_v55 = vld [vmem:[#allocation53_spill] sm:$0xff] }
 0x4a3   : > { %10726 = vst [vmem:[#allocation85_spill] sm:$0xff] %v9235_v31  ;;  %v4497_v0 = vadd.f32 -0.16666667, %v4401_v30  ;;  %v4304_v56 = vadd.f32 0.008333333, %v4208_v35  ;;  %v10730_v51 = vld [vmem:[#allocation24_spill] sm:$0xff] }
 0x4a4   : > { %10727 = vst [vmem:[#allocation75_spill] sm:$0xff] %v9239_v41  ;;  %v3207_v4 = vmul.f32 0.15915494, %v3053_v50  ;;  %v3782_v63 = vsub.f32 3.1415927, %v3686_v17  ;;  %v4783_v61 = vmul.f32 %v4687_v13, %v10728_v18  ;;  %v4398_v23 = vmul.f32 %v4302_v16, %v10720_v53  ;;  %v10732_v16 = vld [vmem:[#allocation26_spill] sm:$0xff] }
 0x4a5   : > { %v3209_v14 = vmul.f32 0.15915494, %v9229_v6  ;;  %v3688_v11 = vand.u32 2147483647, %v9224_v32  ;;  %v4593_v21 = vmul.f32 %v4497_v0, %v10708_v57  ;;  %v4400_v58 = vmul.f32 %v4304_v56, %v10722_v29  ;;  %v10751_v28 = vld [vmem:[#allocation38_spill] sm:$0xff]  ;;  %v10772_v32 = vld [vmem:[#allocation200_spill] sm:$0xff] }
 0x4a6   : > { %v3303_v7 = vadd.f32 0.5, %v3207_v4  ;;  %v4975_v48 = vsub.f32 0.0, %v4783_v61  ;;  %v4494_v54 = vadd.f32 -0.16666667, %v4398_v23  ;;  %v4003_v37 = vmul.f32 2.7557319e-06, %v10729_v55 }
 0x4a7   : > { %v3305_v60 = vadd.f32 0.5, %v3209_v14  ;;  %vm4878_vm14 = vcmp.lt.f32.partialorder %v10730_v51, 0.0  ;;  %vm4879_vm15 = vcmp.lt.f32.partialorder %v10731_v22, 0.0  ;;  %v4689_v35 = vadd.f32 1.0, %v4593_v21  ;;  %v10734_v23 = vld [vmem:[#allocation51_spill] sm:$0xff] }
 0x4a8   : > { %v4496_v30 = vadd.f32 -0.16666667, %v4400_v58  ;;  %v3399_v13 = vfloor.f32 %v3303_v7  ;;  %vm4880_vm1 = vcmp.lt.f32.partialorder %v10732_v16, 0.0  ;;  %v5071_v18 = vsel %vm4879_vm15, %v4975_v48, %v4783_v61  ;;  %v10736_v21 = vld [vmem:[#allocation35_spill] sm:$0xff] }
 0x4a9   : > { %v4590_v57 = vmul.f32 %v4494_v54, %v10720_v53  ;;  %v3401_v0 = vfloor.f32 %v3305_v60  ;;  %v4099_v56 = vadd.f32 -0.0001984127, %v4003_v37  ;;  %v9252_v4 = vmin.f32 %v3686_v17, %v3782_v63  ;;  %5188 = vmatprep.subr.mxu0 %v5071_v18  ;;  %v10737_v60 = vld [vmem:[#allocation33_spill] sm:$0xff]  ;;  %v10738_v18 = vld [vmem:[#allocation43_spill] sm:$0xff] }
 0x4aa   : > { %v4785_v14 = vmul.f32 %v4689_v35, %v10734_v23  ;;  %v4592_v9 = vmul.f32 %v4496_v30, %v10722_v29  ;;  %v4005_v43 = vmul.f32 2.7557319e-06, %v10735_v20  ;;  %v3784_v22 = vsub.f32 3.1415927, %v3688_v11  ;;  %v10739_v35 = vld [vmem:[#allocation57_spill] sm:$0xff]  ;;  %v10773_v41 = vld [vmem:[#allocation211_spill] sm:$0xff] }
 0x4ab   : > { %10733 = vst [vmem:[#allocation91_spill] sm:$0xff] %v9252_v4  ;;  %vm4881_vm2 = vcmp.lt.f32.partialorder %v10736_v21, 0.0  ;;  %v4686_v58 = vadd.f32 1.0, %v4590_v57  ;;  %v4195_v7 = vmul.f32 %v4099_v56, %v10729_v55  ;;  %v3495_v53 = vmul.f32 6.2831855, %v3399_v13  ;;  %v10740_v21 = vld [vmem:[#allocation36_spill] sm:$0xff] }
 0x4ac   : > { %v4977_v61 = vsub.f32 0.0, %v4785_v14  ;;  %v4688_v48 = vadd.f32 1.0, %v4592_v9  ;;  %v4101_v54 = vadd.f32 -0.0001984127, %v4005_v43  ;;  %v3497_v63 = vmul.f32 6.2831855, %v3401_v0  ;;  %v3056_v0 = vpop.f32.mrf.mxu0 }
 0x4ad   : > { %v4782_v17 = vmul.f32 %v4686_v58, %v10737_v60  ;;  %v4291_v37 = vadd.f32 0.008333333, %v4195_v7  ;;  %v4194_v23 = vmul.f32 %v10739_v35, %v10738_v18  ;;  %v9264_v29 = vmul.f32 %v9252_v4, %v9252_v4  ;;  %v10743_v35 = vld [vmem:[#allocation48_spill] sm:$0xff]  ;;  %v10775_v31 = vld [vmem:[#allocation203_spill] sm:$0xff] }
 0x4ae   : > { %v5073_v30 = vsel %vm4881_vm2, %v4977_v61, %v4785_v14  ;;  %v4784_v57 = vmul.f32 %v4688_v48, %v10740_v21  ;;  %v4197_v56 = vmul.f32 %v4101_v54, %v10735_v20  ;;  %v9268_v19 = vmin.f32 %v3688_v11, %v3784_v22  ;;  %v3129_v14 = vpop.f32.mrf.mxu1 }
 0x4af   : > { %5259 = vmatprep.subr.mxu1 %v5073_v30  ;;  %v4974_v9 = vsub.f32 0.0, %v4782_v17  ;;  %v4387_v43 = vmul.f32 %v4291_v37, %v10729_v55  ;;  %v4290_v13 = vadd.f32 0.008333333, %v4194_v23  ;;  %v9271_v7 = vsub.f32 %v3053_v50, %v3495_v53  ;;  %v10746_v50 = vld [vmem:[#allocation31_spill] sm:$0xff]  ;;  %v10747_v23 = vld [vmem:[#allocation28_spill] sm:$0xff] }
 0x4b0   : > { %10741 = vst [vmem:[#allocation78_spill] sm:$0xff] %v9268_v19  ;;  %v4976_v58 = vsub.f32 0.0, %v4784_v57  ;;  %v4293_v60 = vadd.f32 0.008333333, %v4197_v56  ;;  %v4196_v12 = vmul.f32 %v10744_v45, %v10743_v35  ;;  %v9278_v11 = vsub.f32 %v9229_v6, %v3497_v63  ;;  %v3058_v63 = vpop.f32.mrf.mxu0 }
 0x4b1   : > { %10742 = vst [vmem:[#allocation99_spill] sm:$0xff] %v9271_v7  ;;  %v5070_v61 = vsel %vm4878_vm14, %v4974_v9, %v4782_v17  ;;  %v4483_v22 = vadd.f32 -0.16666667, %v4387_v43  ;;  %v4386_v48 = vmul.f32 %v4290_v13, %v10738_v18  ;;  %vm4867_vm3 = vcmp.lt.f32.partialorder %v10746_v50, 0.0  ;;  %v10748_v43 = vld [vmem:[#allocation32_spill] sm:$0xff] }
 0x4b2   : > { %10745 = vst [vmem:[#allocation56_spill] sm:$0xff] %v9278_v11  ;;  %5189 = vmatpush1.msra.mxu0 %v5070_v61  ;;  %v5072_v54 = vsel %vm4880_vm1, %v4976_v58, %v4784_v57  ;;  %v4389_v53 = vmul.f32 %v4293_v60, %v10735_v20  ;;  %v4292_v37 = vadd.f32 0.008333333, %v4196_v12  ;;  %v9287_v45 = vmul.f32 %v9268_v19, %v9268_v19  ;;  %v3131_v57 = vpop.f32.mrf.mxu1 }
 0x4b3   : > { %5260 = vmatpush1.msra.mxu1 %v5072_v54  ;;  %v4579_v6 = vmul.f32 %v4483_v22, %v10729_v55  ;;  %v4482_v51 = vadd.f32 -0.16666667, %v4386_v48  ;;  %v3057_v17 = vadd.f32 %v3056_v0, %v10522_v33  ;;  %vm4866_vm4 = vcmp.lt.f32.partialorder %v10747_v23, 0.0  ;;  %v10749_v22 = vld [vmem:[#allocation30_spill] sm:$0xff]  ;;  %v10750_v48 = vld [vmem:[#allocation45_spill] sm:$0xff] }
 0x4b4   : > { %v4485_v30 = vadd.f32 -0.16666667, %v4389_v53  ;;  %v4388_v21 = vmul.f32 %v4292_v37, %v10743_v35  ;;  %v3130_v12 = vadd.f32 %v3129_v14, %v10522_v33  ;;  %vm4869_vm5 = vcmp.lt.f32.partialorder %v10748_v43, 0.0 }
 0x4b5   : > { %v4675_v9 = vadd.f32 1.0, %v4579_v6  ;;  %v4578_v55 = vmul.f32 %v4482_v51, %v10738_v18  ;;  %v3218_v13 = vmul.f32 0.15915494, %v3057_v17  ;;  %v3059_v61 = vadd.f32 %v3058_v63, %v10522_v33 }
 0x4b6   : > { %v4581_v0 = vmul.f32 %v4485_v30, %v10735_v20  ;;  %v4484_v58 = vadd.f32 -0.16666667, %v4388_v21  ;;  %v3220_v60 = vmul.f32 0.15915494, %v3130_v12  ;;  %vm4868_vm6 = vcmp.lt.f32.partialorder %v10749_v22, 0.0 }
 0x4b7   : > { %v4771_v54 = vmul.f32 %v4675_v9, %v10750_v48  ;;  %v4674_v14 = vadd.f32 1.0, %v4578_v55  ;;  %v3314_v53 = vadd.f32 0.5, %v3218_v13  ;;  %v3132_v37 = vadd.f32 %v3131_v57, %v10522_v33  ;;  %v3060_v9 = vpop.f32.mrf.mxu0 }
 0x4b8   : > { %v4677_v6 = vadd.f32 1.0, %v4581_v0  ;;  %v4580_v56 = vmul.f32 %v4484_v58, %v10743_v35  ;;  %v3316_v16 = vadd.f32 0.5, %v3220_v60  ;;  %v3219_v18 = vmul.f32 0.15915494, %v3059_v61  ;;  %v3133_v35 = vpop.f32.mrf.mxu1  ;;  %v10753_v58 = vld [vmem:[#allocation41_spill] sm:$0xff] }
 0x4b9   : > { %v4963_v51 = vsub.f32 0.0, %v4771_v54  ;;  %v4770_v20 = vmul.f32 %v4674_v14, %v10751_v28  ;;  %v3410_v30 = vfloor.f32 %v3314_v53  ;;  %v3221_v21 = vmul.f32 0.15915494, %v3132_v37 }
 0x4ba   : > { %v4773_v63 = vmul.f32 %v4677_v6, %v10752_v62  ;;  %v4676_v44 = vadd.f32 1.0, %v4580_v56  ;;  %v3412_v26 = vfloor.f32 %v3316_v16  ;;  %v3315_v34 = vadd.f32 0.5, %v3219_v18  ;;  %v3062_v18 = vpop.f32.mrf.mxu0 }
 0x4bb   : > { %v5059_v55 = vsel %vm4867_vm3, %v4963_v51, %v4771_v54  ;;  %v4962_v33 = vsub.f32 0.0, %v4770_v20  ;;  %v3506_v57 = vmul.f32 6.2831855, %v3410_v30  ;;  %v3317_v13 = vadd.f32 0.5, %v3221_v21  ;;  %v3135_v51 = vpop.f32.mrf.mxu1 }
 0x4bc   : > { %5190 = vmatprep.subr.mxu0 %v5059_v55  ;;  %v4965_v0 = vsub.f32 0.0, %v4773_v63  ;;  %v4772_v60 = vmul.f32 %v4676_v44, %v10753_v58  ;;  %v3508_v28 = vmul.f32 6.2831855, %v3412_v26  ;;  %v3411_v48 = vfloor.f32 %v3315_v34 }
 0x4bd   : > { %v5058_v62 = vsel %vm4866_vm4, %v4962_v33, %v4770_v20  ;;  %v9311_v56 = vsub.f32 %v3057_v17, %v3506_v57  ;;  %v3413_v16 = vfloor.f32 %v3317_v13  ;;  %v3061_v14 = vadd.f32 %v3060_v9, %v10547_v39 }
 0x4be   : > { %v5061_v50 = vsel %vm4869_vm5, %v4965_v0, %v4773_v63  ;;  %5191 = vmatpush1.msra.mxu0 %v5058_v62  ;;  %v4964_v54 = vsub.f32 0.0, %v4772_v60  ;;  %v9316_v53 = vsub.f32 %v3130_v12, %v3508_v28  ;;  %v3507_v6 = vmul.f32 6.2831855, %v3411_v48 }
 0x4bf   : > { %v10754_v44 = vand.u32 2147483647, %v9271_v7  ;;  %5261 = vmatprep.subr.mxu1 %v5061_v50  ;;  %v3698_v34 = vand.u32 2147483647, %v9311_v56  ;;  %v3509_v23 = vmul.f32 6.2831855, %v3413_v16  ;;  %v3134_v17 = vadd.f32 %v3133_v35, %v10547_v39 }
 0x4c0   : > { %v10755_v20 = vand.u32 2147483647, %v9278_v11  ;;  %v5060_v30 = vsel %vm4868_vm6, %v4964_v54, %v4772_v60  ;;  %v3700_v12 = vand.u32 2147483647, %v9316_v53  ;;  %v9327_v21 = vsub.f32 %v3059_v61, %v3507_v6  ;;  %v10765_v11 = vld [vmem:[#allocation186_spill] sm:$0xff] }
 0x4c1   : > { %v3783_v26 = vsub.f32 3.1415927, %v10754_v44  ;;  %5262 = vmatpush1.msra.mxu1 %v5060_v30  ;;  %v3794_v63 = vsub.f32 3.1415927, %v3698_v34  ;;  %v9329_v9 = vsub.f32 %v3132_v37, %v3509_v23  ;;  %v3230_v55 = vmul.f32 0.15915494, %v3061_v14 }
 0x4c2   : > { %v3785_v43 = vsub.f32 3.1415927, %v10755_v20  ;;  %v3232_v33 = vmul.f32 0.15915494, %v3134_v17  ;;  %v3796_v57 = vsub.f32 3.1415927, %v3700_v12  ;;  %v3063_v35 = vadd.f32 %v3062_v18, %v10547_v39 }
 0x4c3   : > { %10756 = vst [vmem:[#allocation58_spill] sm:$0xff] %v9329_v9  ;;  %v3699_v13 = vand.u32 2147483647, %v9327_v21  ;;  %v3136_v0 = vadd.f32 %v3135_v51, %v10547_v39  ;;  %v4070_v22 = vmul.f32 2.7557319e-06, %v9264_v29  ;;  %v9335_v58 = vmin.f32 %v3698_v34, %v3794_v63 }
 0x4c4   : > { %v3326_v60 = vadd.f32 0.5, %v3230_v55  ;;  %v3328_v61 = vadd.f32 0.5, %v3232_v33  ;;  %v4072_v28 = vmul.f32 2.7557319e-06, %v9287_v45  ;;  %v10757_v37 = vmov %v10754_v44 }
 0x4c5   : > { %v9340_v48 = vmin.f32 %v10757_v37, %v3783_v26  ;;  %v3231_v62 = vmul.f32 0.15915494, %v3063_v35  ;;  %v3233_v16 = vmul.f32 0.15915494, %v3136_v0  ;;  %v9342_v50 = vmin.f32 %v3700_v12, %v3796_v57 }
 0x4c6   : > { %v3701_v54 = vand.u32 2147483647, %v9329_v9  ;;  %v3422_v6 = vfloor.f32 %v3326_v60  ;;  %v3424_v39 = vfloor.f32 %v3328_v61  ;;  %v10760_v44 = vmov %v10755_v20 }
 0x4c7   : > { %10758 = vst [vmem:[#allocation79_spill] sm:$0xff] %v9340_v48  ;;  %10759 = vst [vmem:[#allocation62_spill] sm:$0xff] %v9342_v50  ;;  %v9347_v34 = vmin.f32 %v10760_v44, %v3785_v43  ;;  %v3795_v23 = vsub.f32 3.1415927, %v3699_v13  ;;  %v3327_v18 = vadd.f32 0.5, %v3231_v62  ;;  %v3329_v51 = vadd.f32 0.5, %v3233_v16 }
 0x4c8   : > { %v9349_v20 = vadd.f32 -0.0001984127, %v4070_v22  ;;  %v9353_v26 = vmul.f32 %v9335_v58, %v9335_v58  ;;  %v3518_v30 = vmul.f32 6.2831855, %v3422_v6  ;;  %v3520_v12 = vmul.f32 6.2831855, %v3424_v39 }
 0x4c9   : > { %10761 = vst [vmem:[#allocation84_spill] sm:$0xff] %v9347_v34  ;;  %v9355_v63 = vadd.f32 -0.0001984127, %v4072_v28  ;;  %v9359_v55 = vmul.f32 %v9340_v48, %v9340_v48  ;;  %v3423_v33 = vfloor.f32 %v3327_v18  ;;  %v3425_v43 = vfloor.f32 %v3329_v51  ;;  %v9378_v6 = vld [vmem:[%s9967_s3] sm:$0x1] }
 0x4ca   : > { %v9363_v57 = vmul.f32 %v9342_v50, %v9342_v50  ;;  %v3797_v22 = vsub.f32 3.1415927, %v3701_v54  ;;  %v9365_v60 = vsub.f32 %v3061_v14, %v3518_v30  ;;  %v9367_v61 = vsub.f32 %v3134_v17, %v3520_v12 }
 0x4cb   : > { %10762 = vst [vmem:[#allocation71_spill] sm:$0xff] %v9355_v63  ;;  %v9371_v37 = vmul.f32 %v9347_v34, %v9347_v34  ;;  %v9373_v28 = vmin.f32 %v3699_v13, %v3795_v23  ;;  %v3519_v62 = vmul.f32 6.2831855, %v3423_v33  ;;  %v3521_v16 = vmul.f32 6.2831855, %v3425_v43  ;;  %v10779_v63 = vld [vmem:[#allocation172_spill] sm:$0xff] }
 0x4cc   : > { %v4082_v39 = vmul.f32 2.7557319e-06, %v9353_v26  ;;  %v3710_v14 = vand.u32 2147483647, %v9365_v60  ;;  %v3712_v17 = vand.u32 2147483647, %v9367_v61  ;;  %v4282_v44 = vmul.f32 %v8786_v49, %v8744_v47 }
 0x4cd   : > { %v9385_v18 = vsub.f32 %v3063_v35, %v3519_v62  ;;  %v9387_v13 = vsub.f32 %v3136_v0, %v3521_v16  ;;  %v4091_v23 = vmul.f32 2.7557319e-06, %v8781_v15  ;;  %v4084_v51 = vmul.f32 2.7557319e-06, %v9363_v57 }
 0x4ce   : > { %v9391_v30 = vmin.f32 %v3701_v54, %v3797_v22  ;;  %v3806_v12 = vsub.f32 3.1415927, %v3710_v14  ;;  %v3808_v33 = vsub.f32 3.1415927, %v3712_v17  ;;  %v10311_v43 = vmov 0.0  }
 0x4cf   : > { %5224 = vmatprep.mubr.f32.mxu0 %v10311_v43  ;;  %5295 = vmatprep.mubr.f32.mxu1 %v10311_v43  ;;  %v3711_v1 = vand.u32 2147483647, %v9385_v18  ;;  %v3713_v49 = vand.u32 2147483647, %v9387_v13  ;;  %v4187_v35 = vadd.f32 -0.0001984127, %v4091_v23  ;;  %v4284_v0 = vmul.f32 %v8794_v24, %v8752_v25 }
 0x4d0   : > { %10763 = vst [vmem:[#allocation66_spill] sm:$0xff] %v9391_v30  ;;  %5793 = vmatmul.mubr.msk.f32.vlgmr.msra.gmra.mxu0 %vm2687_vm0, %v9378_v6  ;;  %5794 = vmatmul.mubr.msk.f32.vlgmr.msra.gmra.mxu1 %vm2687_vm0, %v9378_v6  ;;  %v9403_v54 = vmin.f32 %v3710_v14, %v3806_v12  ;;  %v9405_v22 = vmin.f32 %v3712_v17, %v3808_v33  ;;  %v4093_v62 = vmul.f32 2.7557319e-06, %v8803_v38  ;;  %v4378_v16 = vadd.f32 0.008333333, %v4282_v44 }
 0x4d1   : > { %5366 = vmatprep.mubr.f32.mxu0 %v10311_v43  ;;  %5437 = vmatprep.mubr.f32.mxu1 %v10311_v43  ;;  %v3807_v23 = vsub.f32 3.1415927, %v3711_v1  ;;  %v3809_v2 = vsub.f32 3.1415927, %v3713_v49  ;;  %v4283_v10 = vmul.f32 %v4187_v35, %v8781_v15  ;;  %v4380_v42 = vadd.f32 0.008333333, %v4284_v0 }
 0x4d2   : > { %v9413_v5 = vmul.f32 %v9403_v54, %v9403_v54  ;;  %v9417_v24 = vmul.f32 %v9405_v22, %v9405_v22  ;;  %v4189_v14 = vadd.f32 -0.0001984127, %v4093_v62  ;;  %v4474_v17 = vmul.f32 %v4378_v16, %v8744_v47 }
 0x4d3   : > { %v9422_v44 = vmul.f32 %v9373_v28, %v9373_v28  ;;  %v9424_v12 = vmin.f32 %v3711_v1, %v3807_v23  ;;  %v4379_v33 = vadd.f32 0.008333333, %v4283_v10  ;;  %v4476_v35 = vmul.f32 %v4380_v42, %v8752_v25 }
 0x4d4   : > { %v9427_v0 = vadd.f32 -0.0001984127, %v4082_v39  ;;  %v9429_v43 = vmin.f32 %v3713_v49, %v3809_v2  ;;  %v4285_v27 = vmul.f32 %v4189_v14, %v8803_v38  ;;  %v4570_v8 = vadd.f32 -0.16666667, %v4474_v17  ;;  %v10764_v14 = vld [vmem:[#allocation205_spill] sm:$0xff] }
 0x4d5   : > { %v9432_v59 = vadd.f32 -0.0001984127, %v4084_v51  ;;  %v9436_v62 = vmul.f32 %v9391_v30, %v9391_v30  ;;  %v4475_v16 = vmul.f32 %v4379_v33, %v8781_v15  ;;  %v4572_v1 = vadd.f32 -0.16666667, %v4476_v35  ;;  %v10766_v35 = vld [vmem:[#allocation192_spill] sm:$0xff] }
 0x4d6   : > { %v4094_v10 = vmul.f32 2.7557319e-06, %v9413_v5  ;;  %v4096_v42 = vmul.f32 2.7557319e-06, %v9417_v24  ;;  %v4381_v39 = vadd.f32 0.008333333, %v4285_v27  ;;  %v4666_v2 = vmul.f32 %v4570_v8, %v8744_v47 }
 0x4d7   : > { %v9444_v49 = vmul.f32 %v9424_v12, %v9424_v12  ;;  %v4571_v51 = vadd.f32 -0.16666667, %v4475_v16  ;;  %v4668_v23 = vmul.f32 %v4572_v1, %v8752_v25  ;;  %v4079_v17 = vmul.f32 2.7557319e-06, %v10764_v14  ;;  %v10767_v8 = vld [vmem:[#allocation209_spill] sm:$0xff]  ;;  %v10768_v25 = vld [vmem:[#allocation190_spill] sm:$0xff] }
 0x4d8   : > { %vm4954_vm7 = vcmp.lt.f32.partialorder %v10765_v11, 0.0  ;;  %v9451_v33 = vmul.f32 %v9429_v43, %v9429_v43  ;;  %vm4955_vm8 = vcmp.lt.f32.partialorder %v10766_v35, 0.0  ;;  %v4477_v27 = vmul.f32 %v4381_v39, %v8803_v38  ;;  %v10769_v1 = vld [vmem:[#allocation199_spill] sm:$0xff] }
 0x4d9   : > { %v4762_v47 = vadd.f32 1.0, %v4666_v2  ;;  %v4081_v34 = vmul.f32 2.7557319e-06, %v10767_v8  ;;  %v4667_v19 = vmul.f32 %v4571_v51, %v8781_v15  ;;  %v4764_v16 = vadd.f32 1.0, %v4668_v23  ;;  %v10774_v2 = vld [vmem:[#allocation194_spill] sm:$0xff] }
 0x4da   : > { %v4175_v48 = vadd.f32 -0.0001984127, %v4079_v17  ;;  %v4270_v3 = vmul.f32 %v10769_v1, %v10768_v25  ;;  %vm4956_vm9 = vcmp.lt.f32.partialorder %v10770_v52, 0.0  ;;  %v4573_v4 = vadd.f32 -0.16666667, %v4477_v27  ;;  %v10784_v52 = vld [vmem:[#allocation177_spill] sm:$0xff] }
 0x4db   : > { %v4858_v40 = vmul.f32 %v4762_v47, %v10771_v46  ;;  %v4177_v7 = vadd.f32 -0.0001984127, %v4081_v34  ;;  %v4272_v36 = vmul.f32 %v10773_v41, %v10772_v32  ;;  %v4763_v39 = vadd.f32 1.0, %v4667_v19  ;;  %v10776_v46 = vld [vmem:[#allocation208_spill] sm:$0xff] }
 0x4dc   : > { %vm4957_vm10 = vcmp.lt.f32.partialorder %v10774_v2, 0.0  ;;  %v4860_v9 = vmul.f32 %v4764_v16, %v10775_v31  ;;  %v4271_v15 = vmul.f32 %v4175_v48, %v10764_v14  ;;  %v4366_v51 = vadd.f32 0.008333333, %v4270_v3  ;;  %v10787_v2 = vld [vmem:[#allocation181_spill] sm:$0xff] }
 0x4dd   : > { %v9466_v23 = vadd.f32 -0.0001984127, %v4094_v10  ;;  %v4669_v17 = vmul.f32 %v4573_v4, %v8803_v38  ;;  %v4273_v27 = vmul.f32 %v4177_v7, %v10767_v8  ;;  %v4368_v1 = vadd.f32 0.008333333, %v4272_v36  ;;  %v10777_v4 = vld [vmem:[#allocation214_spill] sm:$0xff] }
 0x4de   : > { %v4859_v34 = vmul.f32 %v4763_v39, %v10776_v46  ;;  %v5050_v47 = vsub.f32 0.0, %v4858_v40  ;;  %v4367_v30 = vadd.f32 0.008333333, %v4271_v15  ;;  %v4462_v19 = vmul.f32 %v4366_v51, %v10768_v25  ;;  %v10778_v46 = vld [vmem:[#allocation184_spill] sm:$0xff] }
 0x4df   : > { %v9472_v41 = vadd.f32 -0.0001984127, %v4096_v42  ;;  %v4765_v50 = vadd.f32 1.0, %v4669_v17  ;;  %v4369_v31 = vadd.f32 0.008333333, %v4273_v27  ;;  %v4464_v48 = vmul.f32 %v4368_v1, %v10772_v32  ;;  %v10780_v1 = vld [vmem:[#allocation183_spill] sm:$0xff] }
 0x4e0   : > { %v5051_v3 = vsub.f32 0.0, %v4859_v34  ;;  %v5052_v10 = vsub.f32 0.0, %v4860_v9  ;;  %v4463_v16 = vmul.f32 %v4367_v30, %v10764_v14  ;;  %v4558_v38 = vadd.f32 -0.16666667, %v4462_v19 }
 0x4e1   : > { %v4861_v7 = vmul.f32 %v4765_v50, %v10777_v4  ;;  %v4465_v36 = vmul.f32 %v4369_v31, %v10767_v8  ;;  %v4560_v39 = vadd.f32 -0.16666667, %v4464_v48  ;;  %v4067_v15 = vmul.f32 2.7557319e-06, %v10778_v46  ;;  %v10781_v48 = vld [vmem:[#allocation178_spill] sm:$0xff]  ;;  %v10783_v4 = vld [vmem:[#allocation185_spill] sm:$0xff] }
 0x4e2   : > { %vm4942_vm11 = vcmp.lt.f32.partialorder %v10779_v63, 0.0  ;;  %v5147_v42 = vsel %vm4955_vm8, %v5051_v3, %v4859_v34  ;;  %v5146_v51 = vsel %vm4954_vm7, %v5050_v47, %v4858_v40  ;;  %v4559_v17 = vadd.f32 -0.16666667, %v4463_v16  ;;  %v10782_v34 = vld [vmem:[#allocation197_spill] sm:$0xff] }
 0x4e3   : > { %v4654_v27 = vmul.f32 %v4558_v38, %v10768_v25  ;;  %5318 = vmatprep.subr.mxu0 %v5147_v42  ;;  %v5053_v30 = vsub.f32 0.0, %v4861_v7  ;;  %vm4943_vm12 = vcmp.lt.f32.partialorder %v10780_v1, 0.0  ;;  %v4561_v50 = vadd.f32 -0.16666667, %v4465_v36 }
 0x4e4   : > { %v4656_v19 = vmul.f32 %v4560_v39, %v10772_v32  ;;  %v4163_v31 = vadd.f32 -0.0001984127, %v4067_v15  ;;  %vm4944_vm13 = vcmp.lt.f32.partialorder %v10781_v48, 0.0  ;;  %5319 = vmatpush1.msra.mxu0 %v5146_v51  ;;  %v5148_v35 = vsel %vm4956_vm9, %v5052_v10, %v4860_v9  ;;  %v10785_v9 = vld [vmem:[#allocation193_spill] sm:$0xff]  ;;  %v10786_v15 = vld [vmem:[#allocation191_spill] sm:$0xff] }
 0x4e5   : > { %v4655_v11 = vmul.f32 %v4559_v17, %v10764_v14  ;;  %v4750_v40 = vadd.f32 1.0, %v4654_v27  ;;  %v4069_v47 = vmul.f32 2.7557319e-06, %v10782_v34  ;;  %v5149_v25 = vsel %vm4957_vm10, %v5053_v30, %v4861_v7  ;;  %v10788_v7 = vld [vmem:[#allocation196_spill] sm:$0xff] }
 0x4e6   : > { %v4657_v3 = vmul.f32 %v4561_v50, %v10767_v8  ;;  %v4752_v16 = vadd.f32 1.0, %v4656_v19  ;;  %v4259_v32 = vmul.f32 %v4163_v31, %v10778_v46  ;;  %5389 = vmatprep.subr.mxu1 %v5149_v25  ;;  %v4258_v10 = vmul.f32 %v10785_v9, %v10784_v52  ;;  %v10789_v8 = vld [vmem:[#allocation201_spill] sm:$0xff]  ;;  %v10790_v31 = vld [vmem:[#allocation204_spill] sm:$0xff] }
 0x4e7   : > { %v4751_v38 = vadd.f32 1.0, %v4655_v11  ;;  %v4846_v36 = vmul.f32 %v4750_v40, %v10783_v4  ;;  %v4165_v39 = vadd.f32 -0.0001984127, %v4069_v47  ;;  %5390 = vmatpush1.msra.mxu1 %v5148_v35  ;;  %v4260_v17 = vmul.f32 %v10788_v7, %v10787_v2 }
 0x4e8   : > { %v4753_v14 = vadd.f32 1.0, %v4657_v3  ;;  %v4848_v42 = vmul.f32 %v4752_v16, %v10786_v15  ;;  %v4355_v51 = vadd.f32 0.008333333, %v4259_v32  ;;  %v4354_v19 = vadd.f32 0.008333333, %v4258_v10  ;;  %v10791_v3 = vld [vmem:[#allocation187_spill] sm:$0xff] }
 0x4e9   : > { %v4847_v27 = vmul.f32 %v4751_v38, %v10789_v8  ;;  %v5038_v30 = vsub.f32 0.0, %v4846_v36  ;;  %v4261_v50 = vmul.f32 %v4165_v39, %v10782_v34  ;;  %v4356_v25 = vadd.f32 0.008333333, %v4260_v17  ;;  %v10793_v17 = vld [vmem:[#allocation156_spill] sm:$0xff] }
 0x4ea   : > { %v4849_v11 = vmul.f32 %v4753_v14, %v10790_v31  ;;  %v5040_v40 = vsub.f32 0.0, %v4848_v42  ;;  %v4451_v47 = vmul.f32 %v4355_v51, %v10778_v46  ;;  %vm4945_vm14 = vcmp.lt.f32.partialorder %v10791_v3, 0.0  ;;  %v10792_v51 = vld [vmem:[#allocation174_spill] sm:$0xff] }
 0x4eb   : > { %v5039_v35 = vsub.f32 0.0, %v4847_v27  ;;  %v4357_v16 = vadd.f32 0.008333333, %v4261_v50  ;;  %v4450_v32 = vmul.f32 %v4354_v19, %v10784_v52  ;;  %v5134_v38 = vsel %vm4942_vm11, %v5038_v30, %v4846_v36  ;;  %v10794_v19 = vld [vmem:[#allocation182_spill] sm:$0xff] }
 0x4ec   : > { %v5041_v4 = vsub.f32 0.0, %v4849_v11  ;;  %v4547_v9 = vadd.f32 -0.16666667, %v4451_v47  ;;  %v4452_v39 = vmul.f32 %v4356_v25, %v10787_v2  ;;  %v4055_v7 = vmul.f32 2.7557319e-06, %v10792_v51  ;;  %v10795_v47 = vld [vmem:[#allocation160_spill] sm:$0xff] }
 0x4ed   : > { %v5135_v10 = vsel %vm4943_vm12, %v5039_v35, %v4847_v27  ;;  %v4453_v14 = vmul.f32 %v4357_v16, %v10782_v34  ;;  %v4546_v15 = vadd.f32 -0.16666667, %v4450_v32  ;;  %vm4930_vm15 = vcmp.lt.f32.partialorder %v10793_v17, 0.0  ;;  %v10796_v35 = vld [vmem:[#allocation164_spill] sm:$0xff] }
 0x4ee   : > { %5320 = vmatprep.subr.mxu0 %v5135_v10  ;;  %v5137_v8 = vsel %vm4945_vm14, %v5041_v4, %v4849_v11  ;;  %v5136_v50 = vsel %vm4944_vm13, %v5040_v40, %v4848_v42  ;;  %v4643_v63 = vmul.f32 %v4547_v9, %v10778_v46  ;;  %v4548_v36 = vadd.f32 -0.16666667, %v4452_v39  ;;  %v10797_v42 = vld [vmem:[#allocation161_spill] sm:$0xff]  ;;  %v10798_v11 = vld [vmem:[#allocation10_spill] sm:$0xff]  ;;  %v10799_v32 = vld [vmem:[#allocation180_spill] sm:$0xff] }
 0x4ef   : > { %5391 = vmatprep.subr.mxu1 %v5137_v8  ;;  %5321 = vmatpush1.msra.mxu0 %v5134_v38  ;;  %v4549_v30 = vadd.f32 -0.16666667, %v4453_v14  ;;  %v4642_v1 = vmul.f32 %v4546_v15, %v10784_v52  ;;  %v4151_v27 = vadd.f32 -0.0001984127, %v4055_v7  ;;  %v4057_v31 = vmul.f32 2.7557319e-06, %v10794_v19 }
 0x4f0   : > { %vm4932_vm1 = vcmp.lt.f32.partialorder %v10795_v47, 0.0  ;;  %5392 = vmatpush1.msra.mxu1 %v5136_v50  ;;  %v4739_v25 = vadd.f32 1.0, %v4643_v63  ;;  %vm4931_vm2 = vcmp.lt.f32.partialorder %v10796_v35, 0.0  ;;  %v4644_v48 = vmul.f32 %v4548_v36, %v10787_v2  ;;  %v10800_v39 = vld [vmem:[#allocation166_spill] sm:$0xff]  ;;  %v10801_v10 = vld [vmem:[#allocation179_spill] sm:$0xff]  ;;  %v10803_v36 = vld [vmem:[#allocation176_spill] sm:$0xff] }
 0x4f1   : > { %v4246_v46 = vmul.f32 %v10798_v11, %v10797_v42  ;;  %v4645_v40 = vmul.f32 %v4549_v30, %v10782_v34  ;;  %v4738_v3 = vadd.f32 1.0, %v4642_v1  ;;  %v4247_v16 = vmul.f32 %v4151_v27, %v10792_v51  ;;  %v10802_v7 = vld [vmem:[#allocation175_spill] sm:$0xff]  ;;  %v10804_v27 = vld [vmem:[#allocation189_spill] sm:$0xff] }
 0x4f2   : > { %v4153_v52 = vadd.f32 -0.0001984127, %v4057_v31  ;;  %v4835_v4 = vmul.f32 %v4739_v25, %v10799_v32  ;;  %v4740_v38 = vadd.f32 1.0, %v4644_v48  ;;  %v4248_v14 = vmul.f32 %v10801_v10, %v10800_v39  ;;  %v10805_v10 = vld [vmem:[#allocation173_spill] sm:$0xff] }
 0x4f3   : > { %v4342_v9 = vadd.f32 0.008333333, %v4246_v46  ;;  %v4741_v15 = vadd.f32 1.0, %v4645_v40  ;;  %v4834_v8 = vmul.f32 %v4738_v3, %v10802_v7  ;;  %v4343_v2 = vadd.f32 0.008333333, %v4247_v16  ;;  %v10806_v35 = vld [vmem:[#allocation169_spill] sm:$0xff] }
 0x4f4   : > { %v4249_v50 = vmul.f32 %v4153_v52, %v10794_v19  ;;  %v5027_v63 = vsub.f32 0.0, %v4835_v4  ;;  %v4836_v34 = vmul.f32 %v4740_v38, %v10803_v36  ;;  %v4344_v1 = vadd.f32 0.008333333, %v4248_v14  ;;  %v10807_v7 = vld [vmem:[#allocation144_spill] sm:$0xff]  ;;  %v10811_v47 = vld [vmem:[#allocation149_spill] sm:$0xff] }
 0x4f5   : > { %v4438_v30 = vmul.f32 %v4342_v9, %v10797_v42  ;;  %v4837_v31 = vmul.f32 %v4741_v15, %v10804_v27  ;;  %v5026_v25 = vsub.f32 0.0, %v4834_v8  ;;  %v4439_v48 = vmul.f32 %v4343_v2, %v10792_v51 }
 0x4f6   : > { %v4345_v11 = vadd.f32 0.008333333, %v4249_v50  ;;  %v5123_v46 = vsel %vm4931_vm2, %v5027_v63, %v4835_v4  ;;  %v5028_v40 = vsub.f32 0.0, %v4836_v34  ;;  %v4440_v16 = vmul.f32 %v4344_v1, %v10800_v39  ;;  %v10808_v63 = vld [vmem:[#allocation146_spill] sm:$0xff] }
 0x4f7   : > { %v4534_v3 = vadd.f32 -0.16666667, %v4438_v30  ;;  %5322 = vmatprep.subr.mxu0 %v5123_v46  ;;  %v5029_v52 = vsub.f32 0.0, %v4837_v31  ;;  %v5122_v32 = vsel %vm4930_vm15, %v5026_v25, %v4834_v8  ;;  %v4535_v38 = vadd.f32 -0.16666667, %v4439_v48  ;;  %v10810_v48 = vld [vmem:[#allocation11_spill] sm:$0xff] }
 0x4f8   : > { %v4441_v9 = vmul.f32 %v4345_v11, %v10794_v19  ;;  %vm4933_vm3 = vcmp.lt.f32.partialorder %v10805_v10, 0.0  ;;  %5323 = vmatpush1.msra.mxu0 %v5122_v32  ;;  %v4536_v15 = vadd.f32 -0.16666667, %v4440_v16  ;;  %v4043_v4 = vmul.f32 2.7557319e-06, %v10806_v35  ;;  %v10816_v10 = vld [vmem:[#allocation168_spill] sm:$0xff] }
 0x4f9   : > { %v4630_v14 = vmul.f32 %v4534_v3, %v10797_v42  ;;  %vm4918_vm4 = vcmp.lt.f32.partialorder %v10807_v7, 0.0  ;;  %v5125_v2 = vsel %vm4933_vm3, %v5029_v52, %v4837_v31  ;;  %v5124_v50 = vsel %vm4932_vm1, %v5028_v40, %v4836_v34  ;;  %v10809_v42 = vld [vmem:[#allocation170_spill] sm:$0xff]  ;;  %v10812_v34 = vld [vmem:[#allocation165_spill] sm:$0xff]  ;;  %v10814_v52 = vld [vmem:[#allocation167_spill] sm:$0xff] }
 0x4fa   : > { %v4631_v17 = vmul.f32 %v4535_v38, %v10792_v51  ;;  %v4537_v8 = vadd.f32 -0.16666667, %v4441_v9  ;;  %vm4920_vm5 = vcmp.lt.f32.partialorder %v10808_v63, 0.0  ;;  %5393 = vmatprep.subr.mxu1 %v5125_v2  ;;  %v4632_v30 = vmul.f32 %v4536_v15, %v10800_v39  ;;  %v10813_v51 = vld [vmem:[#allocation155_spill] sm:$0xff]  ;;  %v10815_v9 = vld [vmem:[#allocation157_spill] sm:$0xff] }
 0x4fb   : > { %v4726_v36 = vadd.f32 1.0, %v4630_v14  ;;  %v4139_v1 = vadd.f32 -0.0001984127, %v4043_v4  ;;  %v4045_v27 = vmul.f32 2.7557319e-06, %v10809_v42  ;;  %5394 = vmatpush1.msra.mxu1 %v5124_v50  ;;  %vm4919_vm6 = vcmp.lt.f32.partialorder %v10810_v48, 0.0 }
 0x4fc   : > { %v4727_v25 = vadd.f32 1.0, %v4631_v17  ;;  %v4633_v31 = vmul.f32 %v4537_v8, %v10794_v19  ;;  %v4234_v11 = vmul.f32 %v10812_v34, %v10811_v47  ;;  %v4728_v40 = vadd.f32 1.0, %v4632_v30  ;;  %v10817_v4 = vld [vmem:[#allocation159_spill] sm:$0xff] }
 0x4fd   : > { %v4822_v46 = vmul.f32 %v4726_v36, %v10813_v51  ;;  %v4235_v3 = vmul.f32 %v4139_v1, %v10806_v35  ;;  %v4141_v16 = vadd.f32 -0.0001984127, %v4045_v27  ;;  %v4236_v14 = vmul.f32 %v10816_v10, %v10815_v9  ;;  %v10818_v8 = vld [vmem:[#allocation171_spill] sm:$0xff]  ;;  %v10819_v27 = vld [vmem:[#allocation154_spill] sm:$0xff] }
 0x4fe   : > { %v4823_v39 = vmul.f32 %v4727_v25, %v10814_v52  ;;  %v4729_v32 = vadd.f32 1.0, %v4633_v31  ;;  %v4330_v38 = vadd.f32 0.008333333, %v4234_v11  ;;  %v4824_v2 = vmul.f32 %v4728_v40, %v10817_v4 }
 0x4ff   : > { %v5014_v15 = vsub.f32 0.0, %v4822_v46  ;;  %v4331_v19 = vadd.f32 0.008333333, %v4235_v3  ;;  %v4237_v50 = vmul.f32 %v4141_v16, %v10809_v42  ;;  %v4332_v1 = vadd.f32 0.008333333, %v4236_v14 }
 0x500   : > { %v5015_v17 = vsub.f32 0.0, %v4823_v39  ;;  %v4825_v36 = vmul.f32 %v4729_v32, %v10818_v8  ;;  %v4426_v30 = vmul.f32 %v4330_v38, %v10811_v47  ;;  %vm4921_vm7 = vcmp.lt.f32.partialorder %v10819_v27, 0.0  ;;  %v10820_v38 = vld [vmem:[#allocation148_spill] sm:$0xff]  ;;  %v10823_v8 = vld [vmem:[#allocation139_spill] sm:$0xff] }
 0x501   : > { %v5016_v25 = vsub.f32 0.0, %v4824_v2  ;;  %v4427_v31 = vmul.f32 %v4331_v19, %v10806_v35  ;;  %v4333_v34 = vadd.f32 0.008333333, %v4237_v50  ;;  %v4428_v3 = vmul.f32 %v4332_v1, %v10815_v9  ;;  %v10821_v19 = vld [vmem:[#allocation130_spill] sm:$0xff] }
 0x502   : > { %v5111_v11 = vsel %vm4919_vm6, %v5015_v17, %v4823_v39  ;;  %v5017_v51 = vsub.f32 0.0, %v4825_v36  ;;  %v4522_v40 = vadd.f32 -0.16666667, %v4426_v30  ;;  %v5110_v16 = vsel %vm4918_vm4, %v5014_v15, %v4822_v46  ;;  %v10822_v15 = vld [vmem:[#allocation158_spill] sm:$0xff] }
 0x503   : > { %5324 = vmatprep.subr.mxu0 %v5111_v11  ;;  %v4523_v52 = vadd.f32 -0.16666667, %v4427_v31  ;;  %v4429_v32 = vmul.f32 %v4333_v34, %v10809_v42  ;;  %v4031_v10 = vmul.f32 2.7557319e-06, %v10820_v38  ;;  %v5112_v4 = vsel %vm4920_vm5, %v5016_v25, %v4824_v2  ;;  %v10825_v2 = vld [vmem:[#allocation137_spill] sm:$0xff] }
 0x504   : > { %v5113_v14 = vsel %vm4921_vm7, %v5017_v51, %v4825_v36  ;;  %5325 = vmatpush1.msra.mxu0 %v5110_v16  ;;  %v4618_v48 = vmul.f32 %v4522_v40, %v10811_v47  ;;  %v4524_v39 = vadd.f32 -0.16666667, %v4428_v3  ;;  %vm4906_vm8 = vcmp.lt.f32.partialorder %v10821_v19, 0.0  ;;  %v10824_v36 = vld [vmem:[#allocation147_spill] sm:$0xff]  ;;  %v10827_v34 = vld [vmem:[#allocation145_spill] sm:$0xff]  ;;  %v10828_v3 = vld [vmem:[#allocation138_spill] sm:$0xff] }
 0x505   : > { %5395 = vmatprep.subr.mxu1 %v5113_v14  ;;  %v4619_v50 = vmul.f32 %v4523_v52, %v10806_v35  ;;  %v4525_v7 = vadd.f32 -0.16666667, %v4429_v32  ;;  %v4127_v46 = vadd.f32 -0.0001984127, %v4031_v10  ;;  %v4033_v17 = vmul.f32 2.7557319e-06, %v10822_v15 }
 0x506   : > { %vm4908_vm9 = vcmp.lt.f32.partialorder %v10823_v8, 0.0  ;;  %5396 = vmatpush1.msra.mxu1 %v5112_v4  ;;  %vm4907_vm10 = vcmp.lt.f32.partialorder %v10824_v36, 0.0  ;;  %v4714_v30 = vadd.f32 1.0, %v4618_v48  ;;  %v4620_v63 = vmul.f32 %v4524_v39, %v10815_v9  ;;  %v10826_v47 = vld [vmem:[#allocation151_spill] sm:$0xff]  ;;  %v10829_v16 = vld [vmem:[#allocation152_spill] sm:$0xff]  ;;  %v10830_v32 = vld [vmem:[#allocation162_spill] sm:$0xff] }
 0x507   : > { %v4222_v1 = vmul.f32 %v10826_v47, %v10825_v2  ;;  %v4715_v27 = vadd.f32 1.0, %v4619_v50  ;;  %v4621_v25 = vmul.f32 %v4525_v7, %v10809_v42  ;;  %v4223_v35 = vmul.f32 %v4127_v46, %v10820_v38  ;;  %v10831_v39 = vld [vmem:[#allocation153_spill] sm:$0xff] }
 0x508   : > { %v4129_v31 = vadd.f32 -0.0001984127, %v4033_v17  ;;  %v4810_v11 = vmul.f32 %v4714_v30, %v10827_v34  ;;  %v4716_v51 = vadd.f32 1.0, %v4620_v63  ;;  %v4224_v52 = vmul.f32 %v10829_v16, %v10828_v3  ;;  %v10832_v17 = vld [vmem:[#allocation163_spill] sm:$0xff]  ;;  %v10839_v8 = vld [vmem:[#allocation121_spill] sm:$0xff] }
 0x509   : > { %v4318_v40 = vadd.f32 0.008333333, %v4222_v1  ;;  %v4811_v10 = vmul.f32 %v4715_v27, %v10830_v32  ;;  %v4717_v14 = vadd.f32 1.0, %v4621_v25  ;;  %v4319_v9 = vadd.f32 0.008333333, %v4223_v35  ;;  %v10833_v1 = vld [vmem:[#allocation150_spill] sm:$0xff] }
 0x50a   : > { %v4225_v4 = vmul.f32 %v4129_v31, %v10822_v15  ;;  %v5002_v48 = vsub.f32 0.0, %v4810_v11  ;;  %v4812_v50 = vmul.f32 %v4716_v51, %v10831_v39  ;;  %v4320_v7 = vadd.f32 0.008333333, %v4224_v52 }
 0x50b   : > { %v4414_v42 = vmul.f32 %v4318_v40, %v10825_v2  ;;  %v5003_v46 = vsub.f32 0.0, %v4811_v10  ;;  %v4813_v30 = vmul.f32 %v4717_v14, %v10832_v17  ;;  %v4415_v63 = vmul.f32 %v4319_v9, %v10820_v38  ;;  %v10834_v14 = vld [vmem:[#allocation12_spill] sm:$0xff] }
 0x50c   : > { %v4321_v47 = vadd.f32 0.008333333, %v4225_v4  ;;  %vm4909_vm11 = vcmp.lt.f32.partialorder %v10833_v1, 0.0  ;;  %v5004_v34 = vsub.f32 0.0, %v4812_v50  ;;  %v4416_v25 = vmul.f32 %v4320_v7, %v10828_v3  ;;  %v10835_v4 = vld [vmem:[#allocation119_spill] sm:$0xff]  ;;  %v10836_v7 = vld [vmem:[#allocation120_spill] sm:$0xff] }
 0x50d   : > { %v4510_v27 = vadd.f32 -0.16666667, %v4414_v42  ;;  %v5099_v35 = vsel %vm4907_vm10, %v5003_v46, %v4811_v10  ;;  %v5005_v31 = vsub.f32 0.0, %v4813_v30  ;;  %v4511_v51 = vadd.f32 -0.16666667, %v4415_v63  ;;  %v10838_v63 = vld [vmem:[#allocation128_spill] sm:$0xff] }
 0x50e   : > { %v4417_v40 = vmul.f32 %v4321_v47, %v10822_v15  ;;  %5326 = vmatprep.subr.mxu0 %v5099_v35  ;;  %v5098_v16 = vsel %vm4906_vm8, %v5002_v48, %v4810_v11  ;;  %v4512_v32 = vadd.f32 -0.16666667, %v4416_v25  ;;  %v4019_v9 = vmul.f32 2.7557319e-06, %v10834_v14  ;;  %v10837_v48 = vld [vmem:[#allocation141_spill] sm:$0xff]  ;;  %v10842_v35 = vld [vmem:[#allocation142_spill] sm:$0xff] }
 0x50f   : > { %v4606_v52 = vmul.f32 %v4510_v27, %v10825_v2  ;;  %vm4894_vm12 = vcmp.lt.f32.partialorder %v10835_v4, 0.0  ;;  %v5101_v39 = vsel %vm4909_vm11, %v5005_v31, %v4813_v30  ;;  %5327 = vmatpush1.msra.mxu0 %v5098_v16  ;;  %v5100_v36 = vsel %vm4908_vm9, %v5004_v34, %v4812_v50  ;;  %v10840_v50 = vld [vmem:[#allocation134_spill] sm:$0xff]  ;;  %v10844_v16 = vld [vmem:[#allocation140_spill] sm:$0xff] }
 0x510   : > { %v4607_v10 = vmul.f32 %v4511_v51, %v10820_v38  ;;  %v4513_v42 = vadd.f32 -0.16666667, %v4417_v40  ;;  %vm4896_vm13 = vcmp.lt.f32.partialorder %v10836_v7, 0.0  ;;  %5397 = vmatprep.subr.mxu1 %v5101_v39  ;;  %v4608_v11 = vmul.f32 %v4512_v32, %v10828_v3  ;;  %v10841_v38 = vld [vmem:[#allocation132_spill] sm:$0xff]  ;;  %v10843_v40 = vld [vmem:[#allocation123_spill] sm:$0xff] }
 0x511   : > { %v4702_v19 = vadd.f32 1.0, %v4606_v52  ;;  %v4115_v2 = vadd.f32 -0.0001984127, %v4019_v9  ;;  %v4021_v46 = vmul.f32 2.7557319e-06, %v10837_v48  ;;  %5398 = vmatpush1.msra.mxu1 %v5100_v36  ;;  %vm4895_vm14 = vcmp.lt.f32.partialorder %v10838_v63, 0.0 }
 0x512   : > { %v4703_v17 = vadd.f32 1.0, %v4607_v10  ;;  %v4609_v30 = vmul.f32 %v4513_v42, %v10822_v15  ;;  %v4210_v47 = vmul.f32 %v10840_v50, %v10839_v8  ;;  %v4704_v34 = vadd.f32 1.0, %v4608_v11  ;;  %v10845_v9 = vld [vmem:[#allocation133_spill] sm:$0xff]  ;;  %v10846_v42 = vld [vmem:[#allocation143_spill] sm:$0xff] }
 0x513   : > { %v4798_v1 = vmul.f32 %v4702_v19, %v10841_v38  ;;  %v4211_v27 = vmul.f32 %v4115_v2, %v10834_v14  ;;  %v4117_v25 = vadd.f32 -0.0001984127, %v4021_v46  ;;  %v4212_v52 = vmul.f32 %v10844_v16, %v10843_v40  ;;  %v10847_v46 = vld [vmem:[#allocation129_spill] sm:$0xff] }
 0x514   : > { %v4799_v3 = vmul.f32 %v4703_v17, %v10842_v35  ;;  %v4705_v31 = vadd.f32 1.0, %v4609_v30  ;;  %v4306_v51 = vadd.f32 0.008333333, %v4210_v47  ;;  %v4800_v39 = vmul.f32 %v4704_v34, %v10845_v9 }
 0x515   : > { %v4990_v32 = vsub.f32 0.0, %v4798_v1  ;;  %v4307_v15 = vadd.f32 0.008333333, %v4211_v27  ;;  %v4213_v36 = vmul.f32 %v4117_v25, %v10837_v48  ;;  %v4308_v2 = vadd.f32 0.008333333, %v4212_v52 }
 0x516   : > { %v4991_v10 = vsub.f32 0.0, %v4799_v3  ;;  %v4801_v19 = vmul.f32 %v4705_v31, %v10846_v42  ;;  %v4402_v11 = vmul.f32 %v4306_v51, %v10839_v8  ;;  %vm4897_vm15 = vcmp.lt.f32.partialorder %v10847_v46, 0.0  ;;  %v10848_v51 = vld [vmem:[#allocation125_spill] sm:$0xff]  ;;  %v10851_v42 = vld [vmem:[#allocation112_spill] sm:$0xff] }
 0x517   : > { %v4992_v17 = vsub.f32 0.0, %v4800_v39  ;;  %v4403_v30 = vmul.f32 %v4307_v15, %v10834_v14  ;;  %v4309_v50 = vadd.f32 0.008333333, %v4213_v36  ;;  %v4404_v27 = vmul.f32 %v4308_v2, %v10843_v40  ;;  %v10849_v15 = vld [vmem:[#allocation25_spill] sm:$0xff] }
 0x518   : > { %v5087_v47 = vsel %vm4895_vm14, %v4991_v10, %v4799_v3  ;;  %v4993_v38 = vsub.f32 0.0, %v4801_v19  ;;  %v4498_v34 = vadd.f32 -0.16666667, %v4402_v11  ;;  %v5086_v25 = vsel %vm4894_vm12, %v4990_v32, %v4798_v1  ;;  %v10850_v32 = vld [vmem:[#allocation131_spill] sm:$0xff] }
 0x519   : > { %5328 = vmatprep.subr.mxu0 %v5087_v47  ;;  %v4499_v35 = vadd.f32 -0.16666667, %v4403_v30  ;;  %v4405_v31 = vmul.f32 %v4309_v50, %v10837_v48  ;;  %v4007_v16 = vmul.f32 2.7557319e-06, %v10848_v51  ;;  %v5088_v9 = vsel %vm4896_vm13, %v4992_v17, %v4800_v39  ;;  %v10853_v39 = vld [vmem:[#allocation115_spill] sm:$0xff]  ;;  %v10855_v50 = vld [vmem:[#allocation116_spill] sm:$0xff] }
 0x51a   : > { %v5089_v52 = vsel %vm4897_vm15, %v4993_v38, %v4801_v19  ;;  %5329 = vmatpush1.msra.mxu0 %v5086_v25  ;;  %v4594_v63 = vmul.f32 %v4498_v34, %v10839_v8  ;;  %v4500_v3 = vadd.f32 -0.16666667, %v4404_v27  ;;  %vm4882_vm1 = vcmp.lt.f32.partialorder %v10849_v15, 0.0  ;;  %v10852_v19 = vld [vmem:[#allocation117_spill] sm:$0xff]  ;;  %v10854_v8 = vld [vmem:[#allocation124_spill] sm:$0xff]  ;;  %v10856_v27 = vld [vmem:[#allocation34_spill] sm:$0xff] }
 0x51b   : > { %5399 = vmatprep.subr.mxu1 %v5089_v52  ;;  %v4595_v36 = vmul.f32 %v4499_v35, %v10834_v14  ;;  %v4501_v4 = vadd.f32 -0.16666667, %v4405_v31  ;;  %v4103_v1 = vadd.f32 -0.0001984127, %v4007_v16  ;;  %v4009_v10 = vmul.f32 2.7557319e-06, %v10850_v32 }
 0x51c   : > { %vm4884_vm2 = vcmp.lt.f32.partialorder %v10851_v42, 0.0  ;;  %5400 = vmatpush1.msra.mxu1 %v5088_v9  ;;  %vm4883_vm3 = vcmp.lt.f32.partialorder %v10852_v19, 0.0  ;;  %v4690_v11 = vadd.f32 1.0, %v4594_v63  ;;  %v4596_v7 = vmul.f32 %v4500_v3, %v10843_v40  ;;  %v10857_v25 = vld [vmem:[#allocation126_spill] sm:$0xff]  ;;  %v10858_v31 = vld [vmem:[#allocation135_spill] sm:$0xff] }
 0x51d   : > { %v4198_v2 = vmul.f32 %v10854_v8, %v10853_v39  ;;  %v4691_v46 = vadd.f32 1.0, %v4595_v36  ;;  %v4597_v17 = vmul.f32 %v4501_v4, %v10837_v48  ;;  %v4199_v14 = vmul.f32 %v4103_v1, %v10848_v51  ;;  %v10859_v3 = vld [vmem:[#allocation118_spill] sm:$0xff] }
 0x51e   : > { %v4105_v30 = vadd.f32 -0.0001984127, %v4009_v10  ;;  %v4786_v47 = vmul.f32 %v4690_v11, %v10855_v50  ;;  %v4692_v38 = vadd.f32 1.0, %v4596_v7  ;;  %v4200_v35 = vmul.f32 %v10857_v25, %v10856_v27  ;;  %v10860_v10 = vld [vmem:[#allocation136_spill] sm:$0xff] }
 0x51f   : > { %v4294_v34 = vadd.f32 0.008333333, %v4198_v2  ;;  %v4787_v16 = vmul.f32 %v4691_v46, %v10858_v31  ;;  %v4693_v52 = vadd.f32 1.0, %v4597_v17  ;;  %v4295_v40 = vadd.f32 0.008333333, %v4199_v14  ;;  %v10861_v2 = vld [vmem:[#allocation122_spill] sm:$0xff] }
 0x520   : > { %v4201_v9 = vmul.f32 %v4105_v30, %v10850_v32  ;;  %v4978_v63 = vsub.f32 0.0, %v4786_v47  ;;  %v4788_v36 = vmul.f32 %v4692_v38, %v10859_v3  ;;  %v4296_v4 = vadd.f32 0.008333333, %v4200_v35 }
 0x521   : > { %v4390_v48 = vmul.f32 %v4294_v34, %v10853_v39  ;;  %v4979_v1 = vsub.f32 0.0, %v4787_v16  ;;  %v4789_v11 = vmul.f32 %v4693_v52, %v10860_v10  ;;  %v4391_v7 = vmul.f32 %v4295_v40, %v10848_v51  ;;  %v10862_v40 = vld [vmem:[#allocation22_spill] sm:$0xff] }
 0x522   : > { %v4297_v8 = vadd.f32 0.008333333, %v4201_v9  ;;  %vm4885_vm4 = vcmp.lt.f32.partialorder %v10861_v2, 0.0  ;;  %v4980_v50 = vsub.f32 0.0, %v4788_v36  ;;  %v4392_v17 = vmul.f32 %v4296_v4, %v10856_v27  ;;  %v10866_v2 = vld [vmem:[#allocation13_spill] sm:$0xff] }
 0x523   : > { %v4486_v46 = vadd.f32 -0.16666667, %v4390_v48  ;;  %v5075_v14 = vsel %vm4883_vm3, %v4979_v1, %v4787_v16  ;;  %v4981_v30 = vsub.f32 0.0, %v4789_v11  ;;  %v4487_v38 = vadd.f32 -0.16666667, %v4391_v7  ;;  %v10863_v48 = vld [vmem:[#allocation110_spill] sm:$0xff] }
 0x524   : > { %v4393_v34 = vmul.f32 %v4297_v8, %v10850_v32  ;;  %5330 = vmatprep.subr.mxu0 %v5075_v14  ;;  %v5074_v25 = vsel %vm4882_vm1, %v4978_v63, %v4786_v47  ;;  %v4488_v31 = vadd.f32 -0.16666667, %v4392_v17  ;;  %v4095_v52 = vmul.f32 2.7557319e-06, %v9444_v49  ;;  %v10864_v1 = vld [vmem:[#allocation16_spill] sm:$0xff] }
 0x525   : > { %v4582_v35 = vmul.f32 %v4486_v46, %v10853_v39  ;;  %vm4870_vm5 = vcmp.lt.f32.partialorder %v10862_v40, 0.0  ;;  %v5077_v9 = vsel %vm4885_vm4, %v4981_v30, %v4789_v11  ;;  %5331 = vmatpush1.msra.mxu0 %v5074_v25  ;;  %v5076_v19 = vsel %vm4884_vm2, %v4980_v50, %v4788_v36  ;;  %v10867_v30 = vld [vmem:[#allocation113_spill] sm:$0xff]  ;;  %v10868_v25 = vld [vmem:[#allocation127_spill] sm:$0xff] }
 0x526   : > { %v4583_v16 = vmul.f32 %v4487_v38, %v10848_v51  ;;  %v4489_v3 = vadd.f32 -0.16666667, %v4393_v34  ;;  %vm4872_vm6 = vcmp.lt.f32.partialorder %v10863_v48, 0.0  ;;  %5401 = vmatprep.subr.mxu1 %v5077_v9  ;;  %v4584_v47 = vmul.f32 %v4488_v31, %v10856_v27  ;;  %v10865_v51 = vld [vmem:[#allocation27_spill] sm:$0xff]  ;;  %v10869_v9 = vld [vmem:[#allocation114_spill] sm:$0xff] }
 0x527   : > { %v4678_v15 = vadd.f32 1.0, %v4582_v35  ;;  %v4191_v39 = vadd.f32 -0.0001984127, %v4095_v52  ;;  %v4097_v63 = vmul.f32 2.7557319e-06, %v9451_v33  ;;  %5402 = vmatpush1.msra.mxu1 %v5076_v19  ;;  %vm4871_vm7 = vcmp.lt.f32.partialorder %v10864_v1, 0.0 }
 0x528   : > { %v4679_v4 = vadd.f32 1.0, %v4583_v16  ;;  %v4585_v10 = vmul.f32 %v4489_v3, %v10850_v32  ;;  %v4286_v42 = vmul.f32 %v9466_v23, %v9413_v5  ;;  %v4680_v11 = vadd.f32 1.0, %v4584_v47 }
 0x529   : > { %v4774_v36 = vmul.f32 %v4678_v15, %v10865_v51  ;;  %v4287_v7 = vmul.f32 %v4191_v39, %v9444_v49  ;;  %v4193_v8 = vadd.f32 -0.0001984127, %v4097_v63  ;;  %v4288_v17 = vmul.f32 %v9472_v41, %v9417_v24 }
 0x52a   : > { %v4775_v27 = vmul.f32 %v4679_v4, %v10866_v2  ;;  %v4681_v50 = vadd.f32 1.0, %v4585_v10  ;;  %v4382_v46 = vadd.f32 0.008333333, %v4286_v42  ;;  %v4776_v38 = vmul.f32 %v4680_v11, %v10867_v30 }
 0x52b   : > { %v4966_v14 = vsub.f32 0.0, %v4774_v36  ;;  %v4383_v32 = vadd.f32 0.008333333, %v4287_v7  ;;  %v4289_v34 = vmul.f32 %v4193_v8, %v9451_v33  ;;  %v4384_v52 = vadd.f32 0.008333333, %v4288_v17 }
 0x52c   : > { %v4967_v23 = vsub.f32 0.0, %v4775_v27  ;;  %v4777_v35 = vmul.f32 %v4681_v50, %v10868_v25  ;;  %v4478_v31 = vmul.f32 %v4382_v46, %v9413_v5  ;;  %vm4873_vm8 = vcmp.lt.f32.partialorder %v10869_v9, 0.0 }
 0x52d   : > { %v4968_v19 = vsub.f32 0.0, %v4776_v38  ;;  %v4479_v16 = vmul.f32 %v4383_v32, %v9444_v49  ;;  %v4385_v3 = vadd.f32 0.008333333, %v4289_v34  ;;  %v4480_v39 = vmul.f32 %v4384_v52, %v9417_v24 }
 0x52e   : > { %v5063_v41 = vsel %vm4871_vm7, %v4967_v23, %v4775_v27  ;;  %v4969_v15 = vsub.f32 0.0, %v4777_v35  ;;  %v4574_v47 = vadd.f32 -0.16666667, %v4478_v31  ;;  %v5062_v63 = vsel %vm4870_vm5, %v4966_v14, %v4774_v36 }
 0x52f   : > { %5332 = vmatprep.subr.mxu0 %v5063_v41  ;;  %v4575_v4 = vadd.f32 -0.16666667, %v4479_v16  ;;  %v4481_v10 = vmul.f32 %v4385_v3, %v9451_v33  ;;  %v4083_v42 = vmul.f32 2.7557319e-06, %v9422_v44  ;;  %v5064_v11 = vsel %vm4872_vm6, %v4968_v19, %v4776_v38 }
 0x530   : > { %v5065_v51 = vsel %vm4873_vm8, %v4969_v15, %v4777_v35  ;;  %5333 = vmatpush1.msra.mxu0 %v5062_v63  ;;  %v4670_v1 = vmul.f32 %v4574_v47, %v9413_v5  ;;  %v4576_v7 = vadd.f32 -0.16666667, %v4480_v39  ;;  %vm4958_vm9 = vcmp.lt.f32.partialorder %v9365_v60, 0.0 }
 0x531   : > { %5403 = vmatprep.subr.mxu1 %v5065_v51  ;;  %5795 = vmatmul.mubr.msk.f32.vlgmr.msra.gmra.mxu0 %vm2687_vm0, %v9378_v6  ;;  %v4671_v40 = vmul.f32 %v4575_v4, %v9444_v49  ;;  %v4577_v36 = vadd.f32 -0.16666667, %v4481_v10  ;;  %v4179_v8 = vadd.f32 -0.0001984127, %v4083_v42  ;;  %v4085_v2 = vmul.f32 2.7557319e-06, %v9436_v62 }
 0x532   : > { %vm4960_vm10 = vcmp.lt.f32.partialorder %v9367_v61, 0.0  ;;  %5404 = vmatpush1.msra.mxu1 %v5064_v11  ;;  %vm4959_vm11 = vcmp.lt.f32.partialorder %v9385_v18, 0.0  ;;  %v4766_v48 = vadd.f32 1.0, %v4670_v1  ;;  %v4672_v5 = vmul.f32 %v4576_v7, %v9417_v24 }
 0x533   : > { %v4274_v27 = vmul.f32 %v9427_v0, %v9353_v26  ;;  %v10870_v50 = vmov 0.0   ;;  %5796 = vmatmul.mubr.msk.f32.vlgmr.msra.gmra.mxu1 %vm2687_vm0, %v9378_v6  ;;  %v4767_v49 = vadd.f32 1.0, %v4671_v40  ;;  %v4673_v46 = vmul.f32 %v4577_v36, %v9451_v33 }
 0x534   : > { %5508 = vmatprep.mubr.f32.mxu0 %v10870_v50  ;;  %v4275_v17 = vmul.f32 %v4179_v8, %v9422_v44  ;;  %v4181_v14 = vadd.f32 -0.0001984127, %v4085_v2  ;;  %v4862_v30 = vmul.f32 %v4766_v48, %v9403_v54  ;;  %v4768_v38 = vadd.f32 1.0, %v4672_v5  ;;  %5579 = vmatprep.mubr.f32.mxu1 %v10870_v50  ;;  %v10871_v48 = vld [vmem:[#allocation71_spill] sm:$0xff]  ;;  %v10872_v50 = vld [vmem:[#allocation62_spill] sm:$0xff] }
 0x535   : > { %v4370_v32 = vadd.f32 0.008333333, %v4274_v27  ;;  %v4276_v24 = vmul.f32 %v9432_v59, %v9363_v57  ;;  %v4863_v0 = vmul.f32 %v4767_v49, %v9424_v12  ;;  %v4769_v34 = vadd.f32 1.0, %v4673_v46 }
 0x536   : > { %v4371_v23 = vadd.f32 0.008333333, %v4275_v17  ;;  %v4277_v6 = vmul.f32 %v4181_v14, %v9436_v62  ;;  %v5054_v25 = vsub.f32 0.0, %v4862_v30  ;;  %v4864_v33 = vmul.f32 %v4768_v38, %v9405_v22  ;;  %v10873_v17 = vld [vmem:[#allocation66_spill] sm:$0xff] }
 0x537   : > { %v4466_v35 = vmul.f32 %v4370_v32, %v9353_v26  ;;  %v4372_v31 = vadd.f32 0.008333333, %v4276_v24  ;;  %v5055_v54 = vsub.f32 0.0, %v4863_v0  ;;  %v4865_v52 = vmul.f32 %v4769_v34, %v9429_v43  ;;  %v10874_v38 = vld [vmem:[#allocation58_spill] sm:$0xff] }
 0x538   : > { %v4467_v9 = vmul.f32 %v4371_v23, %v9422_v44  ;;  %v4373_v59 = vadd.f32 0.008333333, %v4277_v6  ;;  %vm4961_vm12 = vcmp.lt.f32.partialorder %v9387_v13, 0.0  ;;  %v5056_v19 = vsub.f32 0.0, %v4864_v33 }
 0x539   : > { %v4562_v12 = vadd.f32 -0.16666667, %v4466_v35  ;;  %v4468_v16 = vmul.f32 %v4372_v31, %v9363_v57  ;;  %v5151_v3 = vsel %vm4959_vm11, %v5055_v54, %v4863_v0  ;;  %v5057_v41 = vsub.f32 0.0, %v4865_v52  ;;  %v10875_v31 = vld [vmem:[#allocation85_spill] sm:$0xff] }
 0x53a   : > { %v4563_v22 = vadd.f32 -0.16666667, %v4467_v9  ;;  %v4469_v15 = vmul.f32 %v4373_v59, %v9436_v62  ;;  %5460 = vmatprep.subr.mxu0 %v5151_v3  ;;  %v5150_v43 = vsel %vm4958_vm9, %v5054_v25, %v4862_v30  ;;  %v4071_v13 = vmul.f32 2.7557319e-06, %v9359_v55  ;;  %v10877_v3 = vld [vmem:[#allocation75_spill] sm:$0xff] }
 0x53b   : > { %v4658_v47 = vmul.f32 %v4562_v12, %v9353_v26  ;;  %v4564_v39 = vadd.f32 -0.16666667, %v4468_v16  ;;  %vm4946_vm13 = vcmp.lt.f32.partialorder %v9311_v56, 0.0  ;;  %v5153_v63 = vsel %vm4961_vm12, %v5057_v41, %v4865_v52  ;;  %5461 = vmatpush1.msra.mxu0 %v5150_v43 }
 0x53c   : > { %v5152_v18 = vsel %vm4960_vm10, %v5056_v19, %v4864_v33  ;;  %v4659_v4 = vmul.f32 %v4563_v22, %v9422_v44  ;;  %v4565_v10 = vadd.f32 -0.16666667, %v4469_v15  ;;  %vm4948_vm14 = vcmp.lt.f32.partialorder %v9316_v53, 0.0  ;;  %5531 = vmatprep.subr.mxu1 %v5153_v63  ;;  %v10876_v19 = vld [vmem:[#allocation69_spill] sm:$0xff]  ;;  %v10878_v22 = vld [vmem:[#allocation83_spill] sm:$0xff] }
 0x53d   : > { %v4754_v60 = vadd.f32 1.0, %v4658_v47  ;;  %v4660_v42 = vmul.f32 %v4564_v39, %v9363_v57  ;;  %v4167_v26 = vadd.f32 -0.0001984127, %v4071_v13  ;;  %v4073_v51 = vmul.f32 2.7557319e-06, %v9371_v37  ;;  %5532 = vmatpush1.msra.mxu1 %v5152_v18  ;;  %v10879_v15 = vld [vmem:[#allocation99_spill] sm:$0xff] }
 0x53e   : > { %v4755_v11 = vadd.f32 1.0, %v4659_v4  ;;  %vm4947_vm15 = vcmp.lt.f32.partialorder %v9327_v21, 0.0  ;;  %v4661_v1 = vmul.f32 %v4565_v10, %v9436_v62  ;;  %v4262_v61 = vmul.f32 %v9349_v20, %v9264_v29  ;;  %v10880_v47 = vld [vmem:[#allocation80_spill] sm:$0xff]  ;;  %v10882_v4 = vld [vmem:[#allocation91_spill] sm:$0xff] }
 0x53f   : > { %v4850_v44 = vmul.f32 %v4754_v60, %v9335_v58  ;;  %v4756_v7 = vadd.f32 1.0, %v4660_v42  ;;  %v4263_v40 = vmul.f32 %v4167_v26, %v9359_v55  ;;  %v4169_v36 = vadd.f32 -0.0001984127, %v4073_v51  ;;  %v10883_v26 = vld [vmem:[#allocation81_spill] sm:$0xff] }
 0x540   : > { %v4851_v57 = vmul.f32 %v4755_v11, %v9373_v28  ;;  %v4757_v8 = vadd.f32 1.0, %v4661_v1  ;;  %v4358_v2 = vadd.f32 0.008333333, %v4262_v61  ;;  %v4264_v5 = vmul.f32 %v10871_v48, %v9287_v45  ;;  %v10884_v51 = vld [vmem:[#allocation97_spill] sm:$0xff]  ;;  %v10885_v1 = vld [vmem:[#allocation79_spill] sm:$0xff]  ;;  %v10887_v48 = vld [vmem:[#allocation84_spill] sm:$0xff] }
 0x541   : > { %v5042_v27 = vsub.f32 0.0, %v4850_v44  ;;  %v4852_v49 = vmul.f32 %v4756_v7, %v10872_v50  ;;  %v4359_v62 = vadd.f32 0.008333333, %v4263_v40  ;;  %v4265_v46 = vmul.f32 %v4169_v36, %v9371_v37  ;;  %v10886_v36 = vld [vmem:[#allocation78_spill] sm:$0xff] }
 0x542   : > { %v5043_v20 = vsub.f32 0.0, %v4851_v57  ;;  %v4853_v58 = vmul.f32 %v4757_v8, %v10873_v17  ;;  %v4454_v14 = vmul.f32 %v4358_v2, %v9264_v29  ;;  %v4360_v30 = vadd.f32 0.008333333, %v4264_v5 }
 0x543   : > { %vm4949_vm1 = vcmp.lt.f32.partialorder %v10874_v38, 0.0  ;;  %v5044_v28 = vsub.f32 0.0, %v4852_v49  ;;  %v4455_v32 = vmul.f32 %v4359_v62, %v9359_v55  ;;  %v4361_v24 = vadd.f32 0.008333333, %v4265_v46 }
 0x544   : > { %v5139_v0 = vsel %vm4947_vm15, %v5043_v20, %v4851_v57  ;;  %v5045_v34 = vsub.f32 0.0, %v4853_v58  ;;  %v4550_v23 = vadd.f32 -0.16666667, %v4454_v14  ;;  %v4456_v6 = vmul.f32 %v4360_v30, %v9287_v45 }
 0x545   : > { %5462 = vmatprep.subr.mxu0 %v5139_v0  ;;  %v5138_v25 = vsel %vm4946_vm13, %v5042_v27, %v4850_v44  ;;  %v4551_v33 = vadd.f32 -0.16666667, %v4455_v32  ;;  %v4457_v35 = vmul.f32 %v4361_v24, %v9371_v37  ;;  %v4059_v54 = vmul.f32 2.7557319e-06, %v10875_v31  ;;  %v10889_v24 = vld [vmem:[#allocation89_spill] sm:$0xff] }
 0x546   : > { %v5141_v52 = vsel %vm4949_vm1, %v5045_v34, %v4853_v58  ;;  %5463 = vmatpush1.msra.mxu0 %v5138_v25  ;;  %v5140_v9 = vsel %vm4948_vm14, %v5044_v28, %v4852_v49  ;;  %v4646_v21 = vmul.f32 %v4550_v23, %v9264_v29  ;;  %v4552_v59 = vadd.f32 -0.16666667, %v4456_v6  ;;  %v10881_v29 = vld [vmem:[#allocation87_spill] sm:$0xff]  ;;  %v10888_v49 = vld [vmem:[#allocation56_spill] sm:$0xff] }
 0x547   : > { %vm4934_vm2 = vcmp.lt.f32.partialorder %v10876_v19, 0.0  ;;  %5533 = vmatprep.subr.mxu1 %v5141_v52  ;;  %v4647_v12 = vmul.f32 %v4551_v33, %v9359_v55  ;;  %v4553_v56 = vadd.f32 -0.16666667, %v4457_v35  ;;  %v4155_v16 = vadd.f32 -0.0001984127, %v4059_v54  ;;  %v10890_v34 = vld [vmem:[#allocation76_spill] sm:$0xff] }
 0x548   : > { %v4061_v41 = vmul.f32 2.7557319e-06, %v10877_v3  ;;  %vm4936_vm3 = vcmp.lt.f32.partialorder %v10878_v22, 0.0  ;;  %5534 = vmatpush1.msra.mxu1 %v5140_v9  ;;  %vm4935_vm4 = vcmp.lt.f32.partialorder %v10879_v15, 0.0  ;;  %v4742_v43 = vadd.f32 1.0, %v4646_v21  ;;  %v10891_v35 = vld [vmem:[#allocation23_spill] sm:$0xff] }
 0x549   : > { %v4648_v53 = vmul.f32 %v4552_v59, %v9287_v45  ;;  %v4250_v39 = vmul.f32 %v10881_v29, %v10880_v47  ;;  %v4743_v13 = vadd.f32 1.0, %v4647_v12  ;;  %v4649_v63 = vmul.f32 %v4553_v56, %v9371_v37  ;;  %v10892_v21 = vld [vmem:[#allocation105_spill] sm:$0xff]  ;;  %v10893_v12 = vld [vmem:[#allocation14_spill] sm:$0xff]  ;;  %v10897_v29 = vld [vmem:[#allocation100_spill] sm:$0xff] }
 0x54a   : > { %v4251_v55 = vmul.f32 %v4155_v16, %v10875_v31  ;;  %v4157_v18 = vadd.f32 -0.0001984127, %v4061_v41  ;;  %v4838_v10 = vmul.f32 %v4742_v43, %v10882_v4  ;;  %v4252_v11 = vmul.f32 %v10884_v51, %v10883_v26  ;;  %v10894_v16 = vld [vmem:[#allocation21_spill] sm:$0xff]  ;;  %v10895_v41 = vld [vmem:[#allocation15_spill] sm:$0xff] }
 0x54b   : > { %v4744_v60 = vadd.f32 1.0, %v4648_v53  ;;  %v4346_v42 = vadd.f32 0.008333333, %v4250_v39  ;;  %v4839_v61 = vmul.f32 %v4743_v13, %v10885_v1  ;;  %v4745_v44 = vadd.f32 1.0, %v4649_v63 }
 0x54c   : > { %v4347_v45 = vadd.f32 0.008333333, %v4251_v55  ;;  %v4253_v7 = vmul.f32 %v4157_v18, %v10877_v3  ;;  %v5030_v40 = vsub.f32 0.0, %v4838_v10  ;;  %v4348_v8 = vadd.f32 0.008333333, %v4252_v11  ;;  %v10898_v55 = vld [vmem:[#allocation19_spill] sm:$0xff] }
 0x54d   : > { %v4840_v57 = vmul.f32 %v4744_v60, %v10886_v36  ;;  %v4442_v37 = vmul.f32 %v4346_v42, %v10880_v47  ;;  %v5031_v2 = vsub.f32 0.0, %v4839_v61  ;;  %v4841_v5 = vmul.f32 %v4745_v44, %v10887_v48  ;;  %v10899_v18 = vld [vmem:[#allocation90_spill] sm:$0xff]  ;;  %v10900_v60 = vld [vmem:[#allocation92_spill] sm:$0xff]  ;;  %v10901_v11 = vld [vmem:[#allocation101_spill] sm:$0xff] }
 0x54e   : > { %v4443_v27 = vmul.f32 %v4347_v45, %v10875_v31  ;;  %v4349_v50 = vadd.f32 0.008333333, %v4253_v7  ;;  %vm4937_vm5 = vcmp.lt.f32.partialorder %v10888_v49, 0.0  ;;  %v4444_v20 = vmul.f32 %v4348_v8, %v10883_v26  ;;  %v10902_v45 = vld [vmem:[#allocation68_spill] sm:$0xff] }
 0x54f   : > { %v5032_v62 = vsub.f32 0.0, %v4840_v57  ;;  %v4538_v46 = vadd.f32 -0.16666667, %v4442_v37  ;;  %v5127_v17 = vsel %vm4935_vm4, %v5031_v2, %v4839_v61  ;;  %v5033_v58 = vsub.f32 0.0, %v4841_v5 }
 0x550   : > { %v4539_v14 = vadd.f32 -0.16666667, %v4443_v27  ;;  %v4445_v30 = vmul.f32 %v4349_v50, %v10877_v3  ;;  %5464 = vmatprep.subr.mxu0 %v5127_v17  ;;  %v5126_v38 = vsel %vm4934_vm2, %v5030_v40, %v4838_v10  ;;  %v4540_v32 = vadd.f32 -0.16666667, %v4444_v20  ;;  %v10903_v50 = vld [vmem:[#allocation72_spill] sm:$0xff] }
 0x551   : > { %v4634_v28 = vmul.f32 %v4538_v46, %v10880_v47  ;;  %v4047_v0 = vmul.f32 2.7557319e-06, %v10889_v24  ;;  %vm4922_vm6 = vcmp.lt.f32.partialorder %v10890_v34, 0.0  ;;  %v5129_v23 = vsel %vm4937_vm5, %v5033_v58, %v4841_v5  ;;  %5465 = vmatpush1.msra.mxu0 %v5126_v38  ;;  %v10904_v58 = vld [vmem:[#allocation107_spill] sm:$0xff]  ;;  %v10907_v34 = vld [vmem:[#allocation102_spill] sm:$0xff] }
 0x552   : > { %v5128_v6 = vsel %vm4936_vm3, %v5032_v62, %v4840_v57  ;;  %v4635_v25 = vmul.f32 %v4539_v14, %v10875_v31  ;;  %v4541_v33 = vadd.f32 -0.16666667, %v4445_v30  ;;  %vm4924_vm7 = vcmp.lt.f32.partialorder %v10891_v35, 0.0  ;;  %5535 = vmatprep.subr.mxu1 %v5129_v23  ;;  %v10896_v31 = vld [vmem:[#allocation104_spill] sm:$0xff] }
 0x553   : > { %v4730_v54 = vadd.f32 1.0, %v4634_v28  ;;  %v4636_v52 = vmul.f32 %v4540_v32, %v10883_v26  ;;  %v4143_v9 = vadd.f32 -0.0001984127, %v4047_v0  ;;  %v4049_v59 = vmul.f32 2.7557319e-06, %v10892_v21  ;;  %5536 = vmatpush1.msra.mxu1 %v5128_v6  ;;  %v10905_v28 = vld [vmem:[#allocation17_spill] sm:$0xff] }
 0x554   : > { %v4731_v19 = vadd.f32 1.0, %v4635_v25  ;;  %vm4923_vm8 = vcmp.lt.f32.partialorder %v10893_v12, 0.0  ;;  %v4637_v56 = vmul.f32 %v4541_v33, %v10877_v3  ;;  %v4238_v22 = vmul.f32 %v10895_v41, %v10894_v16  ;;  %v10906_v0 = vld [vmem:[#allocation108_spill] sm:$0xff]  ;;  %v10912_v41 = vld [vmem:[#allocation18_spill] sm:$0xff] }
 0x555   : > { %v4826_v15 = vmul.f32 %v4730_v54, %v10896_v31  ;;  %v4732_v43 = vadd.f32 1.0, %v4636_v52  ;;  %v4239_v53 = vmul.f32 %v4143_v9, %v10889_v24  ;;  %v4145_v47 = vadd.f32 -0.0001984127, %v4049_v59  ;;  %v10908_v25 = vld [vmem:[#allocation236_spill] sm:$0xff]  ;;  %v10910_v59 = vld [vmem:[#allocation109_spill] sm:$0xff]  ;;  %v10913_v31 = vld [vmem:[#allocation98_spill] sm:$0xff] }
 0x556   : > { %v4827_v39 = vmul.f32 %v4731_v19, %v10897_v29  ;;  %v4733_v13 = vadd.f32 1.0, %v4637_v56  ;;  %v4334_v63 = vadd.f32 0.008333333, %v4238_v22  ;;  %v4240_v4 = vmul.f32 %v10899_v18, %v10898_v55  ;;  %v10909_v33 = vld [vmem:[#allocation240_spill] sm:$0xff]  ;;  %v10915_v18 = vld [vmem:[#allocation94_spill] sm:$0xff] }
 0x557   : > { %v5018_v10 = vsub.f32 0.0, %v4826_v15  ;;  %v4828_v42 = vmul.f32 %v4732_v43, %v10900_v60  ;;  %v4335_v3 = vadd.f32 0.008333333, %v4239_v53  ;;  %v4241_v26 = vmul.f32 %v4145_v47, %v10892_v21 }
 0x558   : > { %v5019_v51 = vsub.f32 0.0, %v4827_v39  ;;  %v4829_v1 = vmul.f32 %v4733_v13, %v10901_v11  ;;  %v4430_v61 = vmul.f32 %v4334_v63, %v10894_v16  ;;  %v4336_v44 = vadd.f32 0.008333333, %v4240_v4 }
 0x559   : > { %vm4925_vm9 = vcmp.lt.f32.partialorder %v10902_v45, 0.0  ;;  %v5020_v7 = vsub.f32 0.0, %v4828_v42  ;;  %v4431_v40 = vmul.f32 %v4335_v3, %v10889_v24  ;;  %v4337_v36 = vadd.f32 0.008333333, %v4241_v26 }
 0x55a   : > { %v5115_v57 = vsel %vm4923_vm8, %v5019_v51, %v4827_v39  ;;  %v5021_v37 = vsub.f32 0.0, %v4829_v1  ;;  %v4526_v8 = vadd.f32 -0.16666667, %v4430_v61  ;;  %v4432_v2 = vmul.f32 %v4336_v44, %v10898_v55  ;;  %v10914_v39 = vld [vmem:[#allocation95_spill] sm:$0xff] }
 0x55b   : > { %5466 = vmatprep.subr.mxu0 %v5115_v57  ;;  %v5114_v48 = vsel %vm4922_vm6, %v5018_v10, %v4826_v15  ;;  %v4527_v5 = vadd.f32 -0.16666667, %v4431_v40  ;;  %v4433_v27 = vmul.f32 %v4337_v36, %v10892_v21  ;;  %v4035_v49 = vmul.f32 2.7557319e-06, %v10903_v50  ;;  %v10917_v36 = vld [vmem:[#allocation96_spill] sm:$0xff] }
 0x55c   : > { %v5117_v62 = vsel %vm4925_vm9, %v5021_v37, %v4829_v1  ;;  %5467 = vmatpush1.msra.mxu0 %v5114_v48  ;;  %v5116_v46 = vsel %vm4924_vm7, %v5020_v7, %v4828_v42  ;;  %v4622_v20 = vmul.f32 %v4526_v8, %v10894_v16  ;;  %v4528_v17 = vadd.f32 -0.16666667, %v4432_v2  ;;  %v10911_v16 = vld [vmem:[#allocation238_spill] sm:$0xff]  ;;  %v10918_v37 = vld [vmem:[#allocation221_spill] sm:$0xff] }
 0x55d   : > { %vm4910_vm10 = vcmp.lt.f32.partialorder %v10904_v58, 0.0  ;;  %5537 = vmatprep.subr.mxu1 %v5117_v62  ;;  %v4623_v14 = vmul.f32 %v4527_v5, %v10889_v24  ;;  %v4529_v30 = vadd.f32 -0.16666667, %v4433_v27  ;;  %v4131_v38 = vadd.f32 -0.0001984127, %v4035_v49  ;;  %v10916_v42 = vld [vmem:[#allocation106_spill] sm:$0xff] }
 0x55e   : > { %v4037_v32 = vmul.f32 2.7557319e-06, %v10905_v28  ;;  %vm4912_vm11 = vcmp.lt.f32.partialorder %v10906_v0, 0.0  ;;  %5538 = vmatpush1.msra.mxu1 %v5116_v46  ;;  %vm4911_vm12 = vcmp.lt.f32.partialorder %v10907_v34, 0.0  ;;  %v4718_v23 = vadd.f32 1.0, %v4622_v20  ;;  %v10919_v27 = vld [vmem:[#allocation224_spill] sm:$0xff] }
 0x55f   : > { %v4624_v6 = vmul.f32 %v4528_v17, %v10898_v55  ;;  %v4226_v35 = vmul.f32 %v10909_v33, %v10908_v25  ;;  %v4719_v54 = vadd.f32 1.0, %v4623_v14  ;;  %v4625_v52 = vmul.f32 %v4529_v30, %v10892_v21  ;;  %v10920_v20 = vld [vmem:[#allocation103_spill] sm:$0xff]  ;;  %v10921_v14 = vld [vmem:[#allocation88_spill] sm:$0xff] }
 0x560   : > { %v4227_v24 = vmul.f32 %v4131_v38, %v10903_v50  ;;  %v4133_v9 = vadd.f32 -0.0001984127, %v4037_v32  ;;  %v4814_v19 = vmul.f32 %v4718_v23, %v10910_v59  ;;  %v4228_v22 = vmul.f32 %v10912_v41, %v10911_v16  ;;  %v10922_v38 = vld [vmem:[#allocation230_spill] sm:$0xff]  ;;  %v10925_v33 = vld [vmem:[#allocation111_spill] sm:$0xff] }
 0x561   : > { %v4720_v12 = vadd.f32 1.0, %v4624_v6  ;;  %v4322_v56 = vadd.f32 0.008333333, %v4226_v35  ;;  %v4815_v15 = vmul.f32 %v4719_v54, %v10913_v31  ;;  %v4721_v43 = vadd.f32 1.0, %v4625_v52  ;;  %v10923_v32 = vld [vmem:[#allocation234_spill] sm:$0xff] }
 0x562   : > { %v4323_v53 = vadd.f32 0.008333333, %v4227_v24  ;;  %v4229_v47 = vmul.f32 %v4133_v9, %v10905_v28  ;;  %v5006_v29 = vsub.f32 0.0, %v4814_v19  ;;  %v4324_v63 = vadd.f32 0.008333333, %v4228_v22  ;;  %v10926_v24 = vld [vmem:[#allocation231_spill] sm:$0xff] }
 0x563   : > { %v4816_v13 = vmul.f32 %v4720_v12, %v10914_v39  ;;  %v4418_v21 = vmul.f32 %v4322_v56, %v10908_v25  ;;  %v5007_v55 = vsub.f32 0.0, %v4815_v15  ;;  %v4817_v4 = vmul.f32 %v4721_v43, %v10915_v18  ;;  %v10927_v9 = vld [vmem:[#allocation237_spill] sm:$0xff]  ;;  %v10928_v12 = vld [vmem:[#allocation235_spill] sm:$0xff]  ;;  %v10929_v22 = vld [vmem:[#allocation86_spill] sm:$0xff] }
 0x564   : > { %v4419_v10 = vmul.f32 %v4323_v53, %v10903_v50  ;;  %v4325_v60 = vadd.f32 0.008333333, %v4229_v47  ;;  %vm4913_vm13 = vcmp.lt.f32.partialorder %v10916_v42, 0.0  ;;  %v4420_v51 = vmul.f32 %v4324_v63, %v10911_v16  ;;  %v10930_v53 = vld [vmem:[#allocation20_spill] sm:$0xff] }
 0x565   : > { %v5008_v3 = vsub.f32 0.0, %v4816_v13  ;;  %v4514_v26 = vadd.f32 -0.16666667, %v4418_v21  ;;  %v5103_v11 = vsel %vm4911_vm12, %v5007_v55, %v4815_v15  ;;  %v5009_v1 = vsub.f32 0.0, %v4817_v4 }
 0x566   : > { %v4515_v61 = vadd.f32 -0.16666667, %v4419_v10  ;;  %v4421_v44 = vmul.f32 %v4325_v60, %v10905_v28  ;;  %5468 = vmatprep.subr.mxu0 %v5103_v11  ;;  %v5102_v45 = vsel %vm4910_vm10, %v5006_v29, %v4814_v19  ;;  %v4516_v40 = vadd.f32 -0.16666667, %v4420_v51  ;;  %v10931_v60 = vld [vmem:[#allocation226_spill] sm:$0xff] }
 0x567   : > { %v4610_v7 = vmul.f32 %v4514_v26, %v10908_v25  ;;  %v4023_v57 = vmul.f32 2.7557319e-06, %v10917_v36  ;;  %vm4898_vm14 = vcmp.lt.f32.partialorder %v10918_v37, 0.0  ;;  %v5105_v8 = vsel %vm4913_vm13, %v5009_v1, %v4817_v4  ;;  %5469 = vmatpush1.msra.mxu0 %v5102_v45  ;;  %v10932_v45 = vld [vmem:[#allocation228_spill] sm:$0xff] }
 0x568   : > { %v5104_v2 = vsel %vm4912_vm11, %v5008_v3, %v4816_v13  ;;  %v4611_v48 = vmul.f32 %v4515_v61, %v10903_v50  ;;  %v4517_v5 = vadd.f32 -0.16666667, %v4421_v44  ;;  %vm4900_vm15 = vcmp.lt.f32.partialorder %v10919_v27, 0.0  ;;  %5539 = vmatprep.subr.mxu1 %v5105_v8  ;;  %v10924_v50 = vld [vmem:[#allocation233_spill] sm:$0xff]  ;;  %v10934_v8 = vld [vmem:[#allocation215_spill] sm:$0xff] }
 0x569   : > { %v4706_v49 = vadd.f32 1.0, %v4610_v7  ;;  %v4612_v62 = vmul.f32 %v4516_v40, %v10911_v16  ;;  %v4119_v46 = vadd.f32 -0.0001984127, %v4023_v57  ;;  %v4025_v17 = vmul.f32 2.7557319e-06, %v10920_v20  ;;  %5540 = vmatpush1.msra.mxu1 %v5104_v2  ;;  %v10933_v40 = vld [vmem:[#allocation213_spill] sm:$0xff] }
 0x56a   : > { %v4707_v58 = vadd.f32 1.0, %v4611_v48  ;;  %vm4899_vm1 = vcmp.lt.f32.partialorder %v10921_v14, 0.0  ;;  %v4613_v30 = vmul.f32 %v4517_v5, %v10905_v28  ;;  %v4214_v0 = vmul.f32 %v10923_v32, %v10922_v38  ;;  %v10935_v2 = vld [vmem:[#allocation222_spill] sm:$0xff]  ;;  %v10937_v14 = vld [vmem:[#allocation217_spill] sm:$0xff]  ;;  %v10939_v32 = vld [vmem:[#allocation232_spill] sm:$0xff] }
 0x56b   : > { %v4802_v34 = vmul.f32 %v4706_v49, %v10924_v50  ;;  %v4708_v23 = vadd.f32 1.0, %v4612_v62  ;;  %v4215_v6 = vmul.f32 %v4119_v46, %v10917_v36  ;;  %v4121_v25 = vadd.f32 -0.0001984127, %v4025_v17 }
 0x56c   : > { %v4803_v35 = vmul.f32 %v4707_v58, %v10925_v33  ;;  %v4709_v54 = vadd.f32 1.0, %v4613_v30  ;;  %v4310_v52 = vadd.f32 0.008333333, %v4214_v0  ;;  %v4216_v59 = vmul.f32 %v10927_v9, %v10926_v24  ;;  %v10938_v30 = vld [vmem:[#allocation225_spill] sm:$0xff] }
 0x56d   : > { %v4994_v19 = vsub.f32 0.0, %v4802_v34  ;;  %v4804_v56 = vmul.f32 %v4708_v23, %v10928_v12  ;;  %v4311_v28 = vadd.f32 0.008333333, %v4215_v6  ;;  %v4217_v16 = vmul.f32 %v4121_v25, %v10920_v20  ;;  %v10940_v25 = vld [vmem:[#allocation229_spill] sm:$0xff] }
 0x56e   : > { %v4995_v41 = vsub.f32 0.0, %v4803_v35  ;;  %v4805_v31 = vmul.f32 %v4709_v54, %v10929_v22  ;;  %v4406_v15 = vmul.f32 %v4310_v52, %v10922_v38  ;;  %v4312_v43 = vadd.f32 0.008333333, %v4216_v59  ;;  %v10941_v52 = vld [vmem:[#allocation239_spill] sm:$0xff] }
 0x56f   : > { %vm4901_vm2 = vcmp.lt.f32.partialorder %v10930_v53, 0.0  ;;  %v4996_v47 = vsub.f32 0.0, %v4804_v56  ;;  %v4407_v29 = vmul.f32 %v4311_v28, %v10917_v36  ;;  %v4313_v39 = vadd.f32 0.008333333, %v4217_v16 }
 0x570   : > { %v5091_v13 = vsel %vm4899_vm1, %v4995_v41, %v4803_v35  ;;  %v4997_v21 = vsub.f32 0.0, %v4805_v31  ;;  %v4502_v63 = vadd.f32 -0.16666667, %v4406_v15  ;;  %v4408_v55 = vmul.f32 %v4312_v43, %v10926_v24  ;;  %v10943_v15 = vld [vmem:[#allocation227_spill] sm:$0xff] }
 0x571   : > { %5470 = vmatprep.subr.mxu0 %v5091_v13  ;;  %v5090_v18 = vsel %vm4898_vm14, %v4994_v19, %v4802_v34  ;;  %v4503_v4 = vadd.f32 -0.16666667, %v4407_v29  ;;  %v4409_v10 = vmul.f32 %v4313_v39, %v10920_v20  ;;  %v4011_v42 = vmul.f32 2.7557319e-06, %v10931_v60  ;;  %v10942_v19 = vld [vmem:[#allocation220_spill] sm:$0xff] }
 0x572   : > { %v5093_v3 = vsel %vm4901_vm2, %v4997_v21, %v4805_v31  ;;  %5471 = vmatpush1.msra.mxu0 %v5090_v18  ;;  %v5092_v26 = vsel %vm4900_vm15, %v4996_v47, %v4804_v56  ;;  %v4598_v51 = vmul.f32 %v4502_v63, %v10922_v38  ;;  %v4504_v11 = vadd.f32 -0.16666667, %v4408_v55  ;;  %v10944_v29 = vld [vmem:[#allocation216_spill] sm:$0xff] }
 0x573   : > { %5541 = vmatprep.subr.mxu1 %v5093_v3  ;;  %v4599_v1 = vmul.f32 %v4503_v4, %v10917_v36  ;;  %v4505_v61 = vadd.f32 -0.16666667, %v4409_v10  ;;  %v4107_v44 = vadd.f32 -0.0001984127, %v4011_v42  ;;  %v4013_v7 = vmul.f32 2.7557319e-06, %v10932_v45 }
 0x574   : > { %vm4886_vm3 = vcmp.lt.f32.partialorder %v10933_v40, 0.0  ;;  %5542 = vmatpush1.msra.mxu1 %v5092_v26  ;;  %v4694_v57 = vadd.f32 1.0, %v4598_v51  ;;  %v4600_v37 = vmul.f32 %v4504_v11, %v10926_v24  ;;  %v4202_v48 = vmul.f32 %v10935_v2, %v10934_v8  ;;  %v10936_v36 = vld [vmem:[#allocation223_spill] sm:$0xff]  ;;  %v10945_v42 = vld [vmem:[#allocation210_spill] sm:$0xff] }
 0x575   : > { %v4695_v5 = vadd.f32 1.0, %v4599_v1  ;;  %v4601_v27 = vmul.f32 %v4505_v61, %v10920_v20  ;;  %v4203_v49 = vmul.f32 %v4107_v44, %v10931_v60  ;;  %v4109_v62 = vadd.f32 -0.0001984127, %v4013_v7  ;;  %v10946_v51 = vld [vmem:[#allocation218_spill] sm:$0xff]  ;;  %v10947_v44 = vld [vmem:[#allocation212_spill] sm:$0xff]  ;;  %v10948_v40 = vld [vmem:[#allocation219_spill] sm:$0xff] }
 0x576   : > { %v4790_v46 = vmul.f32 %v4694_v57, %v10936_v36  ;;  %v4696_v17 = vadd.f32 1.0, %v4600_v37  ;;  %v4298_v58 = vadd.f32 0.008333333, %v4202_v48  ;;  %v4204_v38 = vmul.f32 %v10938_v30, %v10937_v14  ;;  %v10949_v37 = vld [vmem:[#allocation206_spill] sm:$0xff]  ;;  %v10950_v2 = vld [vmem:[#allocation195_spill] sm:$0xff] }
 0x577   : > { %v4791_v0 = vmul.f32 %v4695_v5, %v10939_v32  ;;  %v4697_v50 = vadd.f32 1.0, %v4601_v27  ;;  %v4299_v34 = vadd.f32 0.008333333, %v4203_v49  ;;  %v4205_v23 = vmul.f32 %v4109_v62, %v10932_v45  ;;  %v10952_v49 = vld [vmem:[#allocation198_spill] sm:$0xff] }
 0x578   : > { %v4982_v6 = vsub.f32 0.0, %v4790_v46  ;;  %v4792_v33 = vmul.f32 %v4696_v17, %v10940_v25  ;;  %v4394_v20 = vmul.f32 %v4298_v58, %v10934_v8  ;;  %v4300_v35 = vadd.f32 0.008333333, %v4204_v38 }
 0x579   : > { %v4983_v54 = vsub.f32 0.0, %v4791_v0  ;;  %v4793_v24 = vmul.f32 %v4697_v50, %v10941_v52  ;;  %v4395_v9 = vmul.f32 %v4299_v34, %v10931_v60  ;;  %v4301_v59 = vadd.f32 0.008333333, %v4205_v23 }
 0x57a   : > { %vm4887_vm4 = vcmp.lt.f32.partialorder %v10942_v19, 0.0  ;;  %v4984_v12 = vsub.f32 0.0, %v4792_v33  ;;  %v4490_v56 = vadd.f32 -0.16666667, %v4394_v20  ;;  %v4396_v28 = vmul.f32 %v4300_v35, %v10937_v14  ;;  %v10953_v20 = vld [vmem:[#allocation9_spill] sm:$0xff] }
 0x57b   : > { %v5079_v16 = vsel %vm4887_vm4, %v4983_v54, %v4791_v0  ;;  %v4985_v41 = vsub.f32 0.0, %v4793_v24  ;;  %v4491_v22 = vadd.f32 -0.16666667, %v4395_v9  ;;  %v4397_v31 = vmul.f32 %v4301_v59, %v10932_v45 }
 0x57c   : > { %5472 = vmatprep.subr.mxu0 %v5079_v16  ;;  %vm4889_vm5 = vcmp.lt.f32.partialorder %v10943_v15, 0.0  ;;  %v5078_v43 = vsel %vm4886_vm3, %v4982_v6, %v4790_v46  ;;  %v4586_v53 = vmul.f32 %v4490_v56, %v10934_v8  ;;  %v4492_v47 = vadd.f32 -0.16666667, %v4396_v28  ;;  %v5879_v46 = vld [vmem:[%s9967_s3] sm:$0x1] }
 0x57d   : > { %vm4888_vm6 = vcmp.lt.f32.partialorder %v10944_v29, 0.0  ;;  %v5081_v39 = vsel %vm4889_vm5, %v4985_v41, %v4793_v24  ;;  %5473 = vmatpush1.msra.mxu0 %v5078_v43  ;;  %v4587_v13 = vmul.f32 %v4491_v22, %v10931_v60  ;;  %v4493_v21 = vadd.f32 -0.16666667, %v4397_v31 }
 0x57e   : > { %5543 = vmatprep.subr.mxu1 %v5081_v39  ;;  %v5080_v63 = vsel %vm4888_vm6, %v4984_v12, %v4792_v33  ;;  %v4682_v55 = vadd.f32 1.0, %v4586_v53  ;;  %v4588_v18 = vmul.f32 %v4492_v47, %v10937_v14  ;;  %vm4875_vm7 = vcmp.lt.f32.partialorder %v10949_v37, 0.0 }
 0x57f   : > { %5544 = vmatpush1.msra.mxu1 %v5080_v63  ;;  %v4683_v4 = vadd.f32 1.0, %v4587_v13  ;;  %v4589_v10 = vmul.f32 %v4493_v21, %v10932_v45  ;;  %vm4874_vm8 = vcmp.lt.f32.partialorder %v10950_v2, 0.0  ;;  %v10951_v45 = vld [vmem:[#allocation207_spill] sm:$0xff]  ;;  %vm4876_vm10 = vcmp.lt.f32.partialorder %v10952_v49, 0.0 }
 0x580   : > { %v4778_v3 = vmul.f32 %v4682_v55, %v10945_v42  ;;  %v4684_v26 = vadd.f32 1.0, %v4588_v18  ;;  %vm4877_vm9 = vcmp.lt.f32.partialorder %v10951_v45, 0.0  ;;  %v5979_v14 = vmov 1966171168  }
 0x581   : > { %v4779_v11 = vmul.f32 %v4683_v4, %v10946_v51  ;;  %v4685_v1 = vadd.f32 1.0, %v4589_v10  ;;  %v5603_v30 = vunpack.c.l.s4 %v5979_v14  ;;  %v5156_v38 = vstv %s5155_s26 }
 0x582   : > { %v4970_v61 = vsub.f32 0.0, %v4778_v3  ;;  %v4780_v7 = vmul.f32 %v4684_v26, %v10947_v44  ;;  %v10954_v44 = vlaneseq }
 0x583   : > { %v4971_v60 = vsub.f32 0.0, %v4779_v11  ;;  %v4781_v57 = vmul.f32 %v4685_v1, %v10948_v40  ;;  %v5604_v0 = vunpack.c.0.s8 %v5603_v30 }
 0x584   : > { %v4972_v8 = vsub.f32 0.0, %v4780_v7  ;;  %v5066_v27 = vsel %vm4874_vm8, %v4970_v61, %v4778_v3 }
 0x585   : > { %v5067_v48 = vsel %vm4875_vm7, %v4971_v60, %v4779_v11  ;;  %v4973_v5 = vsub.f32 0.0, %v4781_v57  ;;  %v5607_v35 = vsub.s32 %v5604_v0, %v10953_v20 }
 0x586   : > { %5474 = vmatprep.subr.mxu0 %v5067_v48  ;;  %v5068_v36 = vsel %vm4876_vm10, %v4972_v8, %v4780_v7 }
 0x587   : > { %v5069_v62 = vsel %vm4877_vm9, %v4973_v5, %v4781_v57  ;;  %5475 = vmatpush1.msra.mxu0 %v5066_v27 }
 0x588   : > { %5545 = vmatprep.subr.mxu1 %v5069_v62  ;;  %5797 = vmatmul.mubr.msk.f32.vlgmr.msra.gmra.mxu0 %vm2687_vm0, %v5879_v46 }
 0x589   : > { %5546 = vmatpush1.msra.mxu1 %v5068_v36 }
 0x58a   : > { %5798 = vmatmul.mubr.msk.f32.vlgmr.msra.gmra.mxu1 %vm2687_vm0, %v5879_v46  ;;  %vm5676_vm0 = vcmp.lt.s32.totalorder %v10954_v44, 512 }
 0x590   : > { %v5226_v17 = vpop.f32.mrf.mxu0  ;;  %v5297_v58 = vpop.f32.mrf.mxu1 }
 0x591   : > { %v5227_v34 = vadd.f32 %v5226_v17, %v5156_v38  ;;  %v5298_v23 = vadd.f32 %v5297_v58, %v5156_v38 }
 0x592   : > { %v5228_v32 = vpop.f32.mrf.mxu0  ;;  %v5299_v50 = vpop.f32.mrf.mxu1 }
 0x593   : > { %v5229_v6 = vadd.f32 %v5228_v32, %v5156_v38  ;;  %v5300_v25 = vadd.f32 %v5299_v50, %v5156_v38 }
 0x595   : > { %v5598_v33 = vcombine.low %v5227_v34, %v5229_v6  ;;  %v5599_v54 = vcombine.low %v5298_v23, %v5300_v25 }
 0x597   : > { %v5608_v19 = vrot.slane %v5598_v33, %v5607_v35  ;;  %v5615_v12 = vrot.slane %v5599_v54, %v5607_v35 }
 0x599   : > { %v5630_v31 = vcombine.low %v5608_v19, %v5615_v12 }
 0x59b   : > { %v5638_v47 = vrot.slane %v5630_v31, %v5607_v35 }
 0x5f1   : > { %v5368_v52 = vpop.f32.mrf.mxu0 }
 0x5f2   : > { %v5369_v24 = vadd.f32 %v5368_v52, %v5156_v38 }
 0x5f3   : > { %v5439_v9 = vpop.f32.mrf.mxu1  ;;  %v5370_v59 = vpop.f32.mrf.mxu0 }
 0x5f4   : > { %v5440_v56 = vadd.f32 %v5439_v9, %v5156_v38  ;;  %v5371_v28 = vadd.f32 %v5370_v59, %v5156_v38 }
 0x5f5   : > { %v5441_v16 = vpop.f32.mrf.mxu1 }
 0x5f6   : > { %v5600_v41 = vcombine.low %v5369_v24, %v5371_v28  ;;  %v5442_v22 = vadd.f32 %v5441_v16, %v5156_v38 }
 0x5f8   : > { %v5622_v15 = vrot.slane %v5600_v41, %v5607_v35  ;;  %v5601_v43 = vcombine.low %v5440_v56, %v5442_v22 }
 0x5fa   : > { %v5629_v53 = vrot.slane %v5601_v43, %v5607_v35 }
 0x5fc   : > { %v5631_v29 = vcombine.low %v5622_v15, %v5629_v53 }
 0x5fe   : > { %v5645_v39 = vrot.slane %v5631_v29, %v5607_v35 }
 0x600   : > { %v5646_v13 = vcombine.low %v5638_v47, %v5645_v39 }
 0x602   : > { %5673 = vst [vmem:[%s241_s27] sm:$0xff] %v5646_v13 }
 0x648   : > { %v5510_v21 = vpop.f32.mrf.mxu0 }
 0x649   : > { %v5511_v18 = vadd.f32 %v5510_v21, %v5156_v38 }
 0x64a   : > { %v5581_v63 = vpop.f32.mrf.mxu1  ;;  %v5512_v55 = vpop.f32.mrf.mxu0 }
 0x64b   : > { %v5513_v4 = vadd.f32 %v5512_v55, %v5156_v38  ;;  %v5582_v42 = vadd.f32 %v5581_v63, %v5156_v38 }
 0x64c   : > { %v5583_v10 = vpop.f32.mrf.mxu1 }
 0x64d   : > { %v5647_v3 = vcombine.low %v5511_v18, %v5513_v4  ;;  %v5584_v26 = vadd.f32 %v5583_v10, %v5156_v38 }
 0x64f   : > { %v5655_v51 = vrot.slane %v5647_v3, %v5607_v35  ;;  %v5648_v11 = vcombine.low %v5582_v42, %v5584_v26 }
 0x651   : > { %v5662_v1 = vrot.slane %v5648_v11, %v5607_v35 }
 0x653   : > { %v5663_v61 = vcombine.low %v5655_v51, %v5662_v1 }
 0x655   : > { %v5670_v7 = vrot.slane %v5663_v61, %v5607_v35 }
 0x657   : > { %5678 = vst.msk [vmem:[%s241_s27 + $0x8] sm:$0xf] %vm5676_vm0, %v5670_v7 }
 0x658   : > { %5921 = shalt.err (!%p5918_p10)
}
 0x659   : > { %s5922_s16 = scalar_lea.hbm %s5692_s10, 192  ;;  %s5926_s19 = scalar_lea.hbm %s9969_s5, 384 }
 0x65a   : > { %p5923_p2 = scmp.ne.s32.totalorder %s5692_s10, %s5922_s16  ;;  %p5927_p7 = scmp.lt.s32.totalorder %s5692_s10, %s9969_s5 }
 0x65b   : > { %p5928_p5 = scmp.lt.s32.totalorder %s5926_s19, %s5922_s16 }
 0x65c   : > { %p5924_p4 = pnand %p5923_p2, %p10955_p12 }
 0x65d   : > { %p5929_p6 = por %p5928_p5, %p5927_p7 }
 0x65e   : > { %p5925_p9 = pneg %p5924_p4 }
 0x660   : > { %p5930_p11 = pnand %p5929_p6, %p5925_p9 }
 0x662   : > { %5933 = shalt.err (!%p5930_p11)
}
 0x663   : > { %5808 = dma.vmem_to_hbm [thread:$0]  (%p10955_p12), %s5695_s7, 192, %s5692_s10, %s5680_s17  }
 0x664 PF: > { %s5706_s26 = sand.u32 1, %s5960_s20   ;;  %p10956_p13 = scmp.ne.s32.totalorder %s10340_s6, 0 }
 0x665   : > { %p10957_p0 = scmp.ge.s32.totalorder %s5972_s23, 2  ;;  %s5707_s27 = scalar_lea.sflag [#allocation5], %s5706_s26 }
 0x667   : > { %p5815_p1 = pnand %p10957_p0, %p10956_p13 }
 0x669   : > { %p5816_p3 = pneg %p5815_p1 }
 0x66b   : > { %5955 = dma.done.wait (%p5816_p3), %s5707_s27, 192  }
 0x66c   : > { %5957 = vsyncadd (%p5816_p3), %s5707_s27, 4294967104  ;;  %p19_p8 = scmp.ge.s32.totalorder %s6039_s25, 4   ;;  %s10958_s20 = smov %s5964_s21 }
 0x66d   : > { %s10959_s21 = smov %s5968_s22  ;;  %s10960_s22 = smov %s6051_s28 }
 0x66e   : > { %s10961_s23 = smov %s6039_s25  ;;  %21 = sbr.rel (!%p19_p8) target bundleno = 7 (0x7), region = 85 }
 0x673   :  { %5712 = vsyncpa [#allocation4], 1 }
 0x674   :  { %5714 = vsyncpa [#allocation4 + $0x1], 1 }
 0x675   :  { %5715 = vsyncpa [#allocation5], 1 }
 0x676   :  { %5717 = vsyncpa [#allocation5 + $0x1], 1 }

</bundles_post_ra>
